<compile_context>
chip_gen: v5e
topology: v5e:2x2
jax: 0.10.0
libtpu: 0.0.40
codegen_flags: <defaults>
</compile_context>

<pallas_src>
import functools
import math

import numpy as np
import jax
import jax.numpy as jnp
from jax.experimental import pallas as pl
from jax.experimental.pallas import tpu as pltpu

_VMEM = pltpu.MemorySpace.VMEM

# fixed DDIM schedule (pure NumPy at trace time -> no host syncs)
_T_TRAIN = 20
_DDIM_STEPS = (15, 10, 5, 0)

# parameter orderings shared by the wrapper (packing) and the kernels (unpacking)
_SP_KEYS = ("w1", "b1", "w2", "b2", "wp", "bp")
_ENC_KEYS = ("wq", "wk", "wv", "bq", "bk", "bv", "wo", "bo",
             "g1", "be1", "w1", "b1", "w2", "b2", "g2", "be2")
_DEC_KEYS = ("swq", "swk", "swv", "sbq", "sbk", "sbv", "swo", "sbo",
             "g1", "be1",
             "cwq", "cwk", "cwv", "cbq", "cbk", "cbv", "cwo", "cbo",
             "g2", "be2", "w1", "b1", "w2", "b2", "g3", "be3")
_DIFF_KEYS = ("tw1", "tb1", "tw2", "tb2",
              "w1x", "w1t", "w1c", "b1", "w2", "b2", "w3", "b3")


# --------------------------------------------------------------------------
# pallas_call helper (whole-array VMEM blocks; all shapes here are tiny)
# --------------------------------------------------------------------------

def _pcall(kernel, out_shape, *args, **static):
    fn = functools.partial(kernel, **static) if static else kernel
    in_specs = [pl.BlockSpec(memory_space=_VMEM)] * len(args)
    out_specs = pl.BlockSpec(memory_space=_VMEM)
    return pl.pallas_call(fn, out_shape=out_shape,
                          in_specs=in_specs, out_specs=out_specs)(*args)


# --------------------------------------------------------------------------
# In-kernel building blocks (values, 2-D math; f32 everywhere except MXU operands)
# --------------------------------------------------------------------------

def _mm(x, w):
    """bf16-operand matmul with f32 accumulation."""
    return jnp.dot(x.astype(jnp.bfloat16), w.astype(jnp.bfloat16),
                   preferred_element_type=jnp.float32)


def _ln(x, g, b, eps=1e-5):
    mu = jnp.mean(x, axis=-1, keepdims=True)
    var = jnp.mean(jnp.square(x - mu), axis=-1, keepdims=True)
    return (x - mu) * jax.lax.rsqrt(var + eps) * g + b


def _softmax(s):
    m = jnp.max(s, axis=-1, keepdims=True)
    p = jnp.exp(s - m)
    return p * pl.reciprocal(jnp.sum(p, axis=-1, keepdims=True), approx=True)


def _attention(q2d, k2d, v2d, wo, bo, neg2d, B, Lq, Lk, nheads):
    """Multi-head attention on flattened slabs.
    q2d: (B*Lq, C) f32 (already scaled), k2d/v2d: (B*Lk, C) f32,
    neg2d: (B, Lk) additive key-padding bias or None.
    Per-(batch, head) score/softmax/PV loop; head outputs are lane-concatenated and the
    output projection is ONE full-C matmul on the (B*Lq, C) slab."""
    C = q2d.shape[1]
    Dh = C // nheads
    outs = []
    for b in range(B):
        qb = q2d[b * Lq:(b + 1) * Lq]
        kb = k2d[b * Lk:(b + 1) * Lk]
        vb = v2d[b * Lk:(b + 1) * Lk]
        bias = None if neg2d is None else neg2d[b:b + 1, :]
        heads = []
        for h in range(nheads):
            sl = slice(h * Dh, (h + 1) * Dh)
            s = jax.lax.dot_general(
                qb[:, sl].astype(jnp.bfloat16), kb[:, sl].astype(jnp.bfloat16),
                (((1,), (1,)), ((), ())), preferred_element_type=jnp.float32)  # (Lq, Lk) f32
            if bias is not None:
                s = s + bias
            p = _softmax(s)
            heads.append(jnp.dot(p.astype(jnp.bfloat16), vb[:, sl].astype(jnp.bfloat16),
                                 preferred_element_type=jnp.float32))           # (Lq, Dh)
        outs.append(jnp.concatenate(heads, axis=-1))                            # (Lq, C)
    attn = outs[0] if B == 1 else jnp.concatenate(outs, axis=0)                 # (B*Lq, C)
    return _mm(attn, wo) + bo


# --------------------------------------------------------------------------
# Kernel 1: fused sparse encoder + transformer encoder/decoder stack -> readout
# --------------------------------------------------------------------------

def _transformer_kernel(*refs, B, L, Q, nheads, num_enc, num_dec):
    # TODO(synk): MinkowskiEngine sparse 3D voxel convolutions (MinkResNet) have no clean
    # Pallas equivalent; approximated with a dense per-point MLP + linear positional embedding.
    it = iter(refs)
    cloud_ref, mask_ref = next(it), next(it)
    sp = {k: next(it) for k in _SP_KEYS}
    enc = {k: next(it) for k in _ENC_KEYS}
    dec = {k: next(it) for k in _DEC_KEYS}
    qemb_ref = next(it)
    out_ref = next(it)

    C = out_ref.shape[1]
    scale = 1.0 / math.sqrt(C // nheads)

    # ---- sparse 3D encoder (per-point MLP + positional linear) ----------------------
    cloud = cloud_ref[...]                                          # (B*L, pad_in) f32
    h = jnp.maximum(_mm(cloud, sp["w1"][...]) + sp["b1"][...], 0.0)
    src2d = _mm(h, sp["w2"][...]) + sp["b2"][...]                   # (B*L, C) f32
    # wp has zero rows for rgb/pad channels, so this equals xyz @ Wpos
    pos2d = _mm(cloud, sp["wp"][...]) + sp["bp"][...]               # (B*L, C) f32

    # additive key-padding bias built in-kernel from the (B, L) 0/1 mask (f32 math)
    neg2d = mask_ref[...] * jnp.float32(-1e9)                       # (B, L)

    # ---- transformer encoder stack (weights resident, static layer loop) ------------
    x2d = src2d
    for l in range(num_enc):
        qk_in = x2d + pos2d
        q2d = (_mm(qk_in, enc["wq"][l]) + enc["bq"][l]) * scale
        k2d = _mm(qk_in, enc["wk"][l]) + enc["bk"][l]
        v2d = _mm(x2d, enc["wv"][l]) + enc["bv"][l]
        sa = _attention(q2d, k2d, v2d, enc["wo"][l], enc["bo"][l], neg2d, B, L, L, nheads)
        x2d = _ln(x2d + sa, enc["g1"][l], enc["be1"][l])
        ff = jnp.maximum(_mm(x2d, enc["w1"][l]) + enc["b1"][l], 0.0)
        ff = _mm(ff, enc["w2"][l]) + enc["b2"][l]
        x2d = _ln(x2d + ff, enc["g2"][l], enc["be2"][l])
    mem2d = x2d                                                     # (B*L, C)
    memk2d = mem2d + pos2d                                          # cross-attn keys input

    # ---- transformer decoder stack (readout queries) --------------------------------
    qpos = qemb_ref[...]                                            # (Q, C), shared by batch
    qpos2d = qpos if B == 1 else jnp.concatenate([qpos] * B, axis=0)  # (B*Q, C)
    t2d = jnp.zeros((B * Q, C), jnp.float32)
    for l in range(num_dec):
        # self-attention among readout queries (no key-padding mask)
        q_in = t2d + qpos2d
        q2d = (_mm(q_in, dec["swq"][l]) + dec["sbq"][l]) * scale
        k2d = _mm(q_in, dec["swk"][l]) + dec["sbk"][l]
        v2d = _mm(t2d, dec["swv"][l]) + dec["sbv"][l]
        sa = _attention(q2d, k2d, v2d, dec["swo"][l], dec["sbo"][l], None, B, Q, Q, nheads)
        t2d = _ln(t2d + sa, dec["g1"][l], dec["be1"][l])
        # cross-attention into the encoded point cloud (masked padded points)
        q2d = (_mm(t2d + qpos2d, dec["cwq"][l]) + dec["cbq"][l]) * scale
        k2d = _mm(memk2d, dec["cwk"][l]) + dec["cbk"][l]
        v2d = _mm(mem2d, dec["cwv"][l]) + dec["cbv"][l]
        ca = _attention(q2d, k2d, v2d, dec["cwo"][l], dec["cbo"][l], neg2d, B, Q, L, nheads)
        t2d = _ln(t2d + ca, dec["g2"][l], dec["be2"][l])
        # FFN
        ff = jnp.maximum(_mm(t2d, dec["w1"][l]) + dec["b1"][l], 0.0)
        ff = _mm(ff, dec["w2"][l]) + dec["b2"][l]
        t2d = _ln(t2d + ff, dec["g3"][l], dec["be3"][l])

    # readout = query 0 of the last decoder layer for every batch element
    if Q == 1:
        readout = t2d
    else:
        readout = jnp.concatenate([t2d[b * Q:b * Q + 1] for b in range(B)], axis=0)
    out_ref[...] = readout.astype(out_ref.dtype)                    # single dense (B, C) store


# --------------------------------------------------------------------------
# Kernel 2: fused time-embedding MLP + all DDIM denoising steps
# --------------------------------------------------------------------------

def _diffusion_kernel(*refs, coeffs):
    # TODO(synk): real ConditionalUnet1D (FiLM Conv1d residual blocks) replaced by an MLP denoiser.
    it = iter(refs)
    x_ref, cond_ref, temb_ref = next(it), next(it), next(it)
    dp = {k: next(it) for k in _DIFF_KEYS}
    out_ref = next(it)

    x = x_ref[...]                                                  # (B, A) noise, f32
    cond = cond_ref[...]                                            # (B, C) readout, f32

    # time-embedding MLP for every DDIM step at once
    th = jnp.maximum(_mm(temb_ref[...], dp["tw1"][...]) + dp["tb1"][...], 0.0)
    temb = _mm(th, dp["tw2"][...]) + dp["tb2"][...]                 # (S, C)

    # loop-invariant parts of the first denoiser matmul, hoisted out of the DDIM loop
    temb_proj = _mm(temb, dp["w1t"][...])                           # (S, H2)
    cond_base = _mm(cond, dp["w1c"][...]) + dp["b1"][...]           # (B, H2)

    w1x = dp["w1x"][...]
    w2, b2 = dp["w2"][...], dp["b2"][...]
    w3, b3 = dp["w3"][...], dp["b3"][...]
    for i, (c1, c2) in enumerate(coeffs):
        h = jnp.maximum(_mm(x, w1x) + temb_proj[i:i + 1, :] + cond_base, 0.0)
        h = jnp.maximum(_mm(h, w2) + b2, 0.0)
        eps = _mm(h, w3) + b3
        # fused DDIM update x_{t-1} = c1*x + c2*eps (c1, c2 precomputed on host)
        x = c1 * x + c2 * eps
    out_ref[...] = x.astype(out_ref.dtype)


# --------------------------------------------------------------------------
# DDIM schedule & sinusoidal table (pure NumPy: trace-time constants, no host syncs)
# --------------------------------------------------------------------------

def _ddim_coeffs():
    betas = np.linspace(1e-4, 0.02, _T_TRAIN, dtype=np.float64)
    alpha_bar = np.cumprod(1.0 - betas)
    coeffs = []
    for i, t in enumerate(_DDIM_STEPS):
        ab_t = float(alpha_bar[t])
        ab_prev = float(alpha_bar[_DDIM_STEPS[i + 1]]) if i + 1 < len(_DDIM_STEPS) else 1.0
        # x0 = (x - sqrt(1-ab_t) eps)/sqrt(ab_t);  x_{t-1} = sqrt(ab_prev) x0 + sqrt(1-ab_prev) eps
        c1 = math.sqrt(ab_prev / ab_t)
        c2 = math.sqrt(1.0 - ab_prev) - math.sqrt(ab_prev) * math.sqrt((1.0 - ab_t) / ab_t)
        coeffs.append((float(c1), float(c2)))
    return tuple(coeffs)


def _sinusoidal_table(steps, dim):
    half = dim // 2
    freqs = np.exp(-math.log(10000.0) * np.arange(half, dtype=np.float64) / half)
    tab = np.stack([np.concatenate([np.sin(t * freqs), np.cos(t * freqs)]) for t in steps])
    return tab.astype(np.float32)                                   # (num_steps, dim)


# --------------------------------------------------------------------------
# Full forward (jitted): exactly two pallas_calls
# --------------------------------------------------------------------------

def rise_forward(params, cloud, src_padding_mask, key, *, nheads, num_action, action_dim):
    B, N, Din = cloud.shape
    C = params["readout_embed"].shape[1]
    Q = params["readout_embed"].shape[0]
    num_enc = params["encoder"]["wq"].shape[0]
    num_dec = params["decoder"]["swq"].shape[0]
    pad_in = params["sparse"]["w1"].shape[0]

    cloud2d = jnp.pad(cloud.reshape(B * N, Din), ((0, 0), (0, pad_in - Din)))
    maskf = src_padding_mask.astype(jnp.float32)                    # 1.0 = padded point

    args = [cloud2d, maskf]
    args += [params["sparse"][k] for k in _SP_KEYS]
    args += [params["encoder"][k] for k in _ENC_KEYS]
    args += [params["decoder"][k] for k in _DEC_KEYS]
    args += [params["readout_embed"]]
    readout = _pcall(_transformer_kernel,
                     jax.ShapeDtypeStruct((B, C), jnp.float32), *args,
                     B=B, L=N, Q=Q, nheads=nheads, num_enc=num_enc, num_dec=num_dec)

    A = num_action * action_dim
    noise = jax.random.normal(key, (B, A), jnp.float32)
    temb_raw = jnp.asarray(_sinusoidal_table(_DDIM_STEPS, C))       # (S, C) constant
    dargs = [noise, readout, temb_raw] + [params["diffusion"][k] for k in _DIFF_KEYS]
    action = _pcall(_diffusion_kernel,
                    jax.ShapeDtypeStruct((B, A), jnp.float32), *dargs,
                    coeffs=_ddim_coeffs())
    return action.reshape(B, num_action, action_dim)


# --------------------------------------------------------------------------
# Parameter init (deterministic, synthetic; matmul weights bf16, vectors f32)
# --------------------------------------------------------------------------

def init_params(key, input_dim, hidden, dff, num_enc, num_dec, num_action, action_dim):
    pad_in = 8 * ((input_dim + 7) // 8)

    def zeros(*shape):
        return jnp.zeros(shape, jnp.float32)

    def ones(*shape):
        return jnp.ones(shape, jnp.float32)

    def normal(k, shape):
        return (jax.random.normal(k, shape, jnp.float32) * 0.02).astype(jnp.bfloat16)

    keys = jax.random.split(key, 8)

    # sparse encoder
    ks = jax.random.split(keys[0], 3)
    w1 = (jnp.zeros((pad_in, hidden), jnp.float32)
          .at[:input_dim].set(jax.random.normal(ks[0], (input_dim, hidden), jnp.float32) * 0.02)
          .astype(jnp.bfloat16))
    wp = (jnp.zeros((pad_in, hidden), jnp.float32)
          .at[:3].set(jax.random.normal(ks[2], (3, hidden), jnp.float32) * 0.02)
          .astype(jnp.bfloat16))
    sparse = {"w1": w1, "b1": zeros(1, hidden),
              "w2": normal(ks[1], (hidden, hidden)), "b2": zeros(1, hidden),
              "wp": wp, "bp": zeros(1, hidden)}

    def enc_layer(kk):
        kl = jax.random.split(kk, 6)
        return {"wq": normal(kl[0], (hidden, hidden)), "wk": normal(kl[1], (hidden, hidden)),
                "wv": normal(kl[2], (hidden, hidden)),
                "bq": zeros(1, hidden), "bk": zeros(1, hidden), "bv": zeros(1, hidden),
                "wo": normal(kl[3], (hidden, hidden)), "bo": zeros(1, hidden),
                "g1": ones(1, hidden), "be1": zeros(1, hidden),
                "w1": normal(kl[4], (hidden, dff)), "b1": zeros(1, dff),
                "w2": normal(kl[5], (dff, hidden)), "b2": zeros(1, hidden),
                "g2": ones(1, hidden), "be2": zeros(1, hidden)}

    def dec_layer(kk):
        kl = jax.random.split(kk, 10)
        return {"swq": normal(kl[0], (hidden, hidden)), "swk": normal(kl[1], (hidden, hidden)),
                "swv": normal(kl[2], (hidden, hidden)),
                "sbq": zeros(1, hidden), "sbk": zeros(1, hidden), "sbv": zeros(1, hidden),
                "swo": normal(kl[3], (hidden, hidden)), "sbo": zeros(1, hidden),
                "g1": ones(1, hidden), "be1": zeros(1, hidden),
                "cwq": normal(kl[4], (hidden, hidden)), "cwk": normal(kl[5], (hidden, hidden)),
                "cwv": normal(kl[6], (hidden, hidden)),
                "cbq": zeros(1, hidden), "cbk": zeros(1, hidden), "cbv": zeros(1, hidden),
                "cwo": normal(kl[7], (hidden, hidden)), "cbo": zeros(1, hidden),
                "g2": ones(1, hidden), "be2": zeros(1, hidden),
                "w1": normal(kl[8], (hidden, dff)), "b1": zeros(1, dff),
                "w2": normal(kl[9], (dff, hidden)), "b2": zeros(1, hidden),
                "g3": ones(1, hidden), "be3": zeros(1, hidden)}

    def stack_layers(kk, n, make):
        kn = jax.random.split(kk, n)
        layers = [make(kn[i]) for i in range(n)]
        return {k: jnp.stack([lyr[k] for lyr in layers]) for k in layers[0]}

    enc = stack_layers(keys[1], num_enc, enc_layer)
    dec = stack_layers(keys[2], num_dec, dec_layer)

    A = num_action * action_dim
    H2 = 2 * hidden
    kd = jax.random.split(keys[3], 7)
    diff = {"tw1": normal(kd[0], (hidden, hidden)), "tb1": zeros(1, hidden),
            "tw2": normal(kd[1], (hidden, hidden)), "tb2": zeros(1, hidden),
            "w1x": normal(kd[2], (A, H2)), "w1t": normal(kd[3], (hidden, H2)),
            "w1c": normal(kd[4], (hidden, H2)), "b1": zeros(1, H2),
            "w2": normal(kd[5], (H2, H2)), "b2": zeros(1, H2),
            "w3": normal(kd[6], (H2, A)), "b3": zeros(1, A)}

    readout = jax.random.normal(keys[4], (1, hidden), jnp.float32) * 0.02
    return {"sparse": sparse, "encoder": enc, "decoder": dec,
            "diffusion": diff, "readout_embed": readout}


# --------------------------------------------------------------------------
# Main
# --------------------------------------------------------------------------

if __name__ == "__main__":
    # small shapes consistent with RISE(num_action, input_dim=6, obs_feature_dim=hidden_dim, ...)
    B, N = 2, 16                # batch, points per cloud
    input_dim = 6               # xyz + rgb
    hidden = 32                 # obs_feature_dim == hidden_dim
    nheads = 4
    num_encoder_layers = 2
    num_decoder_layers = 1
    dim_feedforward = 64
    num_action, action_dim = 4, 8

    root = jax.random.PRNGKey(0)
    k_cloud, k_noise, k_params = jax.random.split(root, 3)

    cloud = jax.random.normal(k_cloud, (B, N, input_dim), jnp.float32)
    # padding mask like the sparse encoder would emit (True = padded point)
    src_padding_mask = jnp.zeros((B, N), dtype=bool).at[1, N - 4:].set(True)

    params = init_params(k_params, input_dim, hidden, dim_feedforward,
                         num_encoder_layers, num_decoder_layers, num_action, action_dim)

    fwd = jax.jit(rise_forward, static_argnames=("nheads", "num_action", "action_dim"))
    action_pred = fwd(params, cloud, src_padding_mask, k_noise,
                      nheads=nheads, num_action=num_action, action_dim=action_dim)
    action_pred = jax.block_until_ready(action_pred)

    assert action_pred.shape == (B, num_action, action_dim)
    assert bool(jnp.all(jnp.isfinite(action_pred)))
    print("KERNEL_OK")
</pallas_src>

<mosaic_0001>
module attributes {stable_mosaic.version = 11 : i64} {
  func.func @_diffusion_kernel(%arg0: memref<2x32xf32, #tpu.memory_space<vmem>>, %arg1: memref<2x32xf32, #tpu.memory_space<vmem>>, %arg2: memref<4x32xf32, #tpu.memory_space<vmem>>, %arg3: memref<32x32xbf16, #tpu.memory_space<vmem>>, %arg4: memref<1x32xf32, #tpu.memory_space<vmem>>, %arg5: memref<32x32xbf16, #tpu.memory_space<vmem>>, %arg6: memref<1x32xf32, #tpu.memory_space<vmem>>, %arg7: memref<32x64xbf16, #tpu.memory_space<vmem>>, %arg8: memref<32x64xbf16, #tpu.memory_space<vmem>>, %arg9: memref<32x64xbf16, #tpu.memory_space<vmem>>, %arg10: memref<1x64xf32, #tpu.memory_space<vmem>>, %arg11: memref<64x64xbf16, #tpu.memory_space<vmem>>, %arg12: memref<1x64xf32, #tpu.memory_space<vmem>>, %arg13: memref<64x32xbf16, #tpu.memory_space<vmem>>, %arg14: memref<1x32xf32, #tpu.memory_space<vmem>>, %arg15: memref<2x32xf32, #tpu.memory_space<vmem>>) attributes {dimension_semantics = [], scalar_prefetch = 0 : i64, scratch_operands = 0 : i64, tpu.core_type = #tpu.core_type<tc>} {
    %c0 = arith.constant 0 : index
    %c0_0 = arith.constant 0 : index
    %0 = vector.load %arg0[%c0, %c0_0] : memref<2x32xf32, #tpu.memory_space<vmem>>, vector<2x32xf32>
    %c0_1 = arith.constant 0 : index
    %c0_2 = arith.constant 0 : index
    %1 = vector.load %arg1[%c0_1, %c0_2] : memref<2x32xf32, #tpu.memory_space<vmem>>, vector<2x32xf32>
    %c0_3 = arith.constant 0 : index
    %c0_4 = arith.constant 0 : index
    %2 = vector.load %arg2[%c0_3, %c0_4] : memref<4x32xf32, #tpu.memory_space<vmem>>, vector<4x32xf32>
    %c0_5 = arith.constant 0 : index
    %c0_6 = arith.constant 0 : index
    %3 = vector.load %arg3[%c0_5, %c0_6] : memref<32x32xbf16, #tpu.memory_space<vmem>>, vector<32x32xbf16>
    %4 = arith.truncf %2 : vector<4x32xf32> to vector<4x32xbf16>
    %cst = arith.constant dense<0.000000e+00> : vector<4x32xf32>
    %5 = tpu.matmul %4, %3, %cst {dimension_numbers = #tpu.dot_dimension_numbers<[1], [0], [0], [1], [0, 0, 1, 1], [], []>} : vector<4x32xbf16>, vector<32x32xbf16>, vector<4x32xf32> -> vector<4x32xf32>
    %c0_7 = arith.constant 0 : index
    %c0_8 = arith.constant 0 : index
    %6 = vector.load %arg4[%c0_7, %c0_8] : memref<1x32xf32, #tpu.memory_space<vmem>>, vector<1x32xf32>
    %7 = vector.broadcast %6 : vector<1x32xf32> to vector<4x32xf32>
    %8 = arith.addf %5, %7 : vector<4x32xf32>
    %cst_9 = arith.constant 0.000000e+00 : f32
    %9 = vector.broadcast %cst_9 : f32 to vector<4x32xf32>
    %10 = arith.maximumf %8, %9 : vector<4x32xf32>
    %c0_10 = arith.constant 0 : index
    %c0_11 = arith.constant 0 : index
    %11 = vector.load %arg5[%c0_10, %c0_11] : memref<32x32xbf16, #tpu.memory_space<vmem>>, vector<32x32xbf16>
    %12 = arith.truncf %10 : vector<4x32xf32> to vector<4x32xbf16>
    %cst_12 = arith.constant dense<0.000000e+00> : vector<4x32xf32>
    %13 = tpu.matmul %12, %11, %cst_12 {dimension_numbers = #tpu.dot_dimension_numbers<[1], [0], [0], [1], [0, 0, 1, 1], [], []>} : vector<4x32xbf16>, vector<32x32xbf16>, vector<4x32xf32> -> vector<4x32xf32>
    %c0_13 = arith.constant 0 : index
    %c0_14 = arith.constant 0 : index
    %14 = vector.load %arg6[%c0_13, %c0_14] : memref<1x32xf32, #tpu.memory_space<vmem>>, vector<1x32xf32>
    %15 = vector.broadcast %14 : vector<1x32xf32> to vector<4x32xf32>
    %16 = arith.addf %13, %15 : vector<4x32xf32>
    %c0_15 = arith.constant 0 : index
    %c0_16 = arith.constant 0 : index
    %17 = vector.load %arg8[%c0_15, %c0_16] : memref<32x64xbf16, #tpu.memory_space<vmem>>, vector<32x64xbf16>
    %18 = arith.truncf %16 : vector<4x32xf32> to vector<4x32xbf16>
    %cst_17 = arith.constant dense<0.000000e+00> : vector<4x64xf32>
    %19 = tpu.matmul %18, %17, %cst_17 {dimension_numbers = #tpu.dot_dimension_numbers<[1], [0], [0], [1], [0, 0, 1, 1], [], []>} : vector<4x32xbf16>, vector<32x64xbf16>, vector<4x64xf32> -> vector<4x64xf32>
    %c0_18 = arith.constant 0 : index
    %c0_19 = arith.constant 0 : index
    %20 = vector.load %arg9[%c0_18, %c0_19] : memref<32x64xbf16, #tpu.memory_space<vmem>>, vector<32x64xbf16>
    %21 = arith.truncf %1 : vector<2x32xf32> to vector<2x32xbf16>
    %cst_20 = arith.constant dense<0.000000e+00> : vector<2x64xf32>
    %22 = tpu.matmul %21, %20, %cst_20 {dimension_numbers = #tpu.dot_dimension_numbers<[1], [0], [0], [1], [0, 0, 1, 1], [], []>} : vector<2x32xbf16>, vector<32x64xbf16>, vector<2x64xf32> -> vector<2x64xf32>
    %c0_21 = arith.constant 0 : index
    %c0_22 = arith.constant 0 : index
    %23 = vector.load %arg10[%c0_21, %c0_22] : memref<1x64xf32, #tpu.memory_space<vmem>>, vector<1x64xf32>
    %24 = vector.broadcast %23 : vector<1x64xf32> to vector<2x64xf32>
    %25 = arith.addf %22, %24 : vector<2x64xf32>
    %c0_23 = arith.constant 0 : index
    %c0_24 = arith.constant 0 : index
    %26 = vector.load %arg7[%c0_23, %c0_24] : memref<32x64xbf16, #tpu.memory_space<vmem>>, vector<32x64xbf16>
    %c0_25 = arith.constant 0 : index
    %c0_26 = arith.constant 0 : index
    %27 = vector.load %arg11[%c0_25, %c0_26] : memref<64x64xbf16, #tpu.memory_space<vmem>>, vector<64x64xbf16>
    %c0_27 = arith.constant 0 : index
    %c0_28 = arith.constant 0 : index
    %28 = vector.load %arg12[%c0_27, %c0_28] : memref<1x64xf32, #tpu.memory_space<vmem>>, vector<1x64xf32>
    %c0_29 = arith.constant 0 : index
    %c0_30 = arith.constant 0 : index
    %29 = vector.load %arg13[%c0_29, %c0_30] : memref<64x32xbf16, #tpu.memory_space<vmem>>, vector<64x32xbf16>
    %c0_31 = arith.constant 0 : index
    %c0_32 = arith.constant 0 : index
    %30 = vector.load %arg14[%c0_31, %c0_32] : memref<1x32xf32, #tpu.memory_space<vmem>>, vector<1x32xf32>
    %31 = arith.truncf %0 : vector<2x32xf32> to vector<2x32xbf16>
    %cst_33 = arith.constant dense<0.000000e+00> : vector<2x64xf32>
    %32 = tpu.matmul %31, %26, %cst_33 {dimension_numbers = #tpu.dot_dimension_numbers<[1], [0], [0], [1], [0, 0, 1, 1], [], []>} : vector<2x32xbf16>, vector<32x64xbf16>, vector<2x64xf32> -> vector<2x64xf32>
    %33 = vector.extract_strided_slice %19 {offsets = [0, 0], sizes = [1, 64], strides = [1, 1]} : vector<4x64xf32> to vector<1x64xf32>
    %34 = vector.broadcast %33 : vector<1x64xf32> to vector<2x64xf32>
    %35 = arith.addf %32, %34 : vector<2x64xf32>
    %36 = arith.addf %35, %25 : vector<2x64xf32>
    %cst_34 = arith.constant 0.000000e+00 : f32
    %37 = vector.broadcast %cst_34 : f32 to vector<2x64xf32>
    %38 = arith.maximumf %36, %37 : vector<2x64xf32>
    %39 = arith.truncf %38 : vector<2x64xf32> to vector<2x64xbf16>
    %cst_35 = arith.constant dense<0.000000e+00> : vector<2x64xf32>
    %40 = tpu.matmul %39, %27, %cst_35 {dimension_numbers = #tpu.dot_dimension_numbers<[1], [0], [0], [1], [0, 0, 1, 1], [], []>} : vector<2x64xbf16>, vector<64x64xbf16>, vector<2x64xf32> -> vector<2x64xf32>
    %41 = vector.broadcast %28 : vector<1x64xf32> to vector<2x64xf32>
    %42 = arith.addf %40, %41 : vector<2x64xf32>
    %cst_36 = arith.constant 0.000000e+00 : f32
    %43 = vector.broadcast %cst_36 : f32 to vector<2x64xf32>
    %44 = arith.maximumf %42, %43 : vector<2x64xf32>
    %45 = arith.truncf %44 : vector<2x64xf32> to vector<2x64xbf16>
    %cst_37 = arith.constant dense<0.000000e+00> : vector<2x32xf32>
    %46 = tpu.matmul %45, %29, %cst_37 {dimension_numbers = #tpu.dot_dimension_numbers<[1], [0], [0], [1], [0, 0, 1, 1], [], []>} : vector<2x64xbf16>, vector<64x32xbf16>, vector<2x32xf32> -> vector<2x32xf32>
    %47 = vector.broadcast %30 : vector<1x32xf32> to vector<2x32xf32>
    %48 = arith.addf %46, %47 : vector<2x32xf32>
    %cst_38 = arith.constant 1.03513265 : f32
    %49 = vector.broadcast %cst_38 : f32 to vector<2x32xf32>
    %50 = arith.mulf %49, %0 : vector<2x32xf32>
    %cst_39 = arith.constant -0.119567484 : f32
    %51 = vector.broadcast %cst_39 : f32 to vector<2x32xf32>
    %52 = arith.mulf %51, %48 : vector<2x32xf32>
    %53 = arith.addf %50, %52 : vector<2x32xf32>
    %54 = arith.truncf %53 : vector<2x32xf32> to vector<2x32xbf16>
    %cst_40 = arith.constant dense<0.000000e+00> : vector<2x64xf32>
    %55 = tpu.matmul %54, %26, %cst_40 {dimension_numbers = #tpu.dot_dimension_numbers<[1], [0], [0], [1], [0, 0, 1, 1], [], []>} : vector<2x32xbf16>, vector<32x64xbf16>, vector<2x64xf32> -> vector<2x64xf32>
    %56 = vector.extract_strided_slice %19 {offsets = [1, 0], sizes = [1, 64], strides = [1, 1]} : vector<4x64xf32> to vector<1x64xf32>
    %57 = vector.broadcast %56 : vector<1x64xf32> to vector<2x64xf32>
    %58 = arith.addf %55, %57 : vector<2x64xf32>
    %59 = arith.addf %58, %25 : vector<2x64xf32>
    %cst_41 = arith.constant 0.000000e+00 : f32
    %60 = vector.broadcast %cst_41 : f32 to vector<2x64xf32>
    %61 = arith.maximumf %59, %60 : vector<2x64xf32>
    %62 = arith.truncf %61 : vector<2x64xf32> to vector<2x64xbf16>
    %cst_42 = arith.constant dense<0.000000e+00> : vector<2x64xf32>
    %63 = tpu.matmul %62, %27, %cst_42 {dimension_numbers = #tpu.dot_dimension_numbers<[1], [0], [0], [1], [0, 0, 1, 1], [], []>} : vector<2x64xbf16>, vector<64x64xbf16>, vector<2x64xf32> -> vector<2x64xf32>
    %64 = vector.broadcast %28 : vector<1x64xf32> to vector<2x64xf32>
    %65 = arith.addf %63, %64 : vector<2x64xf32>
    %cst_43 = arith.constant 0.000000e+00 : f32
    %66 = vector.broadcast %cst_43 : f32 to vector<2x64xf32>
    %67 = arith.maximumf %65, %66 : vector<2x64xf32>
    %68 = arith.truncf %67 : vector<2x64xf32> to vector<2x64xbf16>
    %cst_44 = arith.constant dense<0.000000e+00> : vector<2x32xf32>
    %69 = tpu.matmul %68, %29, %cst_44 {dimension_numbers = #tpu.dot_dimension_numbers<[1], [0], [0], [1], [0, 0, 1, 1], [], []>} : vector<2x64xbf16>, vector<64x32xbf16>, vector<2x32xf32> -> vector<2x32xf32>
    %70 = vector.broadcast %30 : vector<1x32xf32> to vector<2x32xf32>
    %71 = arith.addf %69, %70 : vector<2x32xf32>
    %cst_45 = arith.constant 1.02151883 : f32
    %72 = vector.broadcast %cst_45 : f32 to vector<2x32xf32>
    %73 = arith.mulf %72, %53 : vector<2x32xf32>
    %cst_46 = arith.constant -0.117039926 : f32
    %74 = vector.broadcast %cst_46 : f32 to vector<2x32xf32>
    %75 = arith.mulf %74, %71 : vector<2x32xf32>
    %76 = arith.addf %73, %75 : vector<2x32xf32>
    %77 = arith.truncf %76 : vector<2x32xf32> to vector<2x32xbf16>
    %cst_47 = arith.constant dense<0.000000e+00> : vector<2x64xf32>
    %78 = tpu.matmul %77, %26, %cst_47 {dimension_numbers = #tpu.dot_dimension_numbers<[1], [0], [0], [1], [0, 0, 1, 1], [], []>} : vector<2x32xbf16>, vector<32x64xbf16>, vector<2x64xf32> -> vector<2x64xf32>
    %79 = vector.extract_strided_slice %19 {offsets = [2, 0], sizes = [1, 64], strides = [1, 1]} : vector<4x64xf32> to vector<1x64xf32>
    %80 = vector.broadcast %79 : vector<1x64xf32> to vector<2x64xf32>
    %81 = arith.addf %78, %80 : vector<2x64xf32>
    %82 = arith.addf %81, %25 : vector<2x64xf32>
    %cst_48 = arith.constant 0.000000e+00 : f32
    %83 = vector.broadcast %cst_48 : f32 to vector<2x64xf32>
    %84 = arith.maximumf %82, %83 : vector<2x64xf32>
    %85 = arith.truncf %84 : vector<2x64xf32> to vector<2x64xbf16>
    %cst_49 = arith.constant dense<0.000000e+00> : vector<2x64xf32>
    %86 = tpu.matmul %85, %27, %cst_49 {dimension_numbers = #tpu.dot_dimension_numbers<[1], [0], [0], [1], [0, 0, 1, 1], [], []>} : vector<2x64xbf16>, vector<64x64xbf16>, vector<2x64xf32> -> vector<2x64xf32>
    %87 = vector.broadcast %28 : vector<1x64xf32> to vector<2x64xf32>
    %88 = arith.addf %86, %87 : vector<2x64xf32>
    %cst_50 = arith.constant 0.000000e+00 : f32
    %89 = vector.broadcast %cst_50 : f32 to vector<2x64xf32>
    %90 = arith.maximumf %88, %89 : vector<2x64xf32>
    %91 = arith.truncf %90 : vector<2x64xf32> to vector<2x64xbf16>
    %cst_51 = arith.constant dense<0.000000e+00> : vector<2x32xf32>
    %92 = tpu.matmul %91, %29, %cst_51 {dimension_numbers = #tpu.dot_dimension_numbers<[1], [0], [0], [1], [0, 0, 1, 1], [], []>} : vector<2x64xbf16>, vector<64x32xbf16>, vector<2x32xf32> -> vector<2x32xf32>
    %93 = vector.broadcast %30 : vector<1x32xf32> to vector<2x32xf32>
    %94 = arith.addf %92, %93 : vector<2x32xf32>
    %cst_52 = arith.constant 1.00815427 : f32
    %95 = vector.broadcast %cst_52 : f32 to vector<2x32xf32>
    %96 = arith.mulf %95, %76 : vector<2x32xf32>
    %cst_53 = arith.constant -1.183550e-01 : f32
    %97 = vector.broadcast %cst_53 : f32 to vector<2x32xf32>
    %98 = arith.mulf %97, %94 : vector<2x32xf32>
    %99 = arith.addf %96, %98 : vector<2x32xf32>
    %100 = arith.truncf %99 : vector<2x32xf32> to vector<2x32xbf16>
    %cst_54 = arith.constant dense<0.000000e+00> : vector<2x64xf32>
    %101 = tpu.matmul %100, %26, %cst_54 {dimension_numbers = #tpu.dot_dimension_numbers<[1], [0], [0], [1], [0, 0, 1, 1], [], []>} : vector<2x32xbf16>, vector<32x64xbf16>, vector<2x64xf32> -> vector<2x64xf32>
    %102 = vector.extract_strided_slice %19 {offsets = [3, 0], sizes = [1, 64], strides = [1, 1]} : vector<4x64xf32> to vector<1x64xf32>
    %103 = vector.broadcast %102 : vector<1x64xf32> to vector<2x64xf32>
    %104 = arith.addf %101, %103 : vector<2x64xf32>
    %105 = arith.addf %104, %25 : vector<2x64xf32>
    %cst_55 = arith.constant 0.000000e+00 : f32
    %106 = vector.broadcast %cst_55 : f32 to vector<2x64xf32>
    %107 = arith.maximumf %105, %106 : vector<2x64xf32>
    %108 = arith.truncf %107 : vector<2x64xf32> to vector<2x64xbf16>
    %cst_56 = arith.constant dense<0.000000e+00> : vector<2x64xf32>
    %109 = tpu.matmul %108, %27, %cst_56 {dimension_numbers = #tpu.dot_dimension_numbers<[1], [0], [0], [1], [0, 0, 1, 1], [], []>} : vector<2x64xbf16>, vector<64x64xbf16>, vector<2x64xf32> -> vector<2x64xf32>
    %110 = vector.broadcast %28 : vector<1x64xf32> to vector<2x64xf32>
    %111 = arith.addf %109, %110 : vector<2x64xf32>
    %cst_57 = arith.constant 0.000000e+00 : f32
    %112 = vector.broadcast %cst_57 : f32 to vector<2x64xf32>
    %113 = arith.maximumf %111, %112 : vector<2x64xf32>
    %114 = arith.truncf %113 : vector<2x64xf32> to vector<2x64xbf16>
    %cst_58 = arith.constant dense<0.000000e+00> : vector<2x32xf32>
    %115 = tpu.matmul %114, %29, %cst_58 {dimension_numbers = #tpu.dot_dimension_numbers<[1], [0], [0], [1], [0, 0, 1, 1], [], []>} : vector<2x64xbf16>, vector<64x32xbf16>, vector<2x32xf32> -> vector<2x32xf32>
    %116 = vector.broadcast %30 : vector<1x32xf32> to vector<2x32xf32>
    %117 = arith.addf %115, %116 : vector<2x32xf32>
    %cst_59 = arith.constant 1.000050e+00 : f32
    %118 = vector.broadcast %cst_59 : f32 to vector<2x32xf32>
    %119 = arith.mulf %118, %99 : vector<2x32xf32>
    %cst_60 = arith.constant -1.000050e-02 : f32
    %120 = vector.broadcast %cst_60 : f32 to vector<2x32xf32>
    %121 = arith.mulf %120, %117 : vector<2x32xf32>
    %122 = arith.addf %119, %121 : vector<2x32xf32>
    %c0_61 = arith.constant 0 : index
    %c0_62 = arith.constant 0 : index
    %123 = vector.load %arg15[%c0_61, %c0_62] : memref<2x32xf32, #tpu.memory_space<vmem>>, vector<2x32xf32>
    tpu.vector_store %arg15[%c0_61, %c0_62], %122 {strides = array<i32>} : memref<2x32xf32, #tpu.memory_space<vmem>>, vector<2x32xf32>,
    return
  }
}

module attributes {stable_mosaic.version = 11 : i64} {
  func.func @_transformer_kernel(%arg0: memref<32x8xf32, #tpu.memory_space<vmem>>, %arg1: memref<2x16xf32, #tpu.memory_space<vmem>>, %arg2: memref<8x32xbf16, #tpu.memory_space<vmem>>, %arg3: memref<1x32xf32, #tpu.memory_space<vmem>>, %arg4: memref<32x32xbf16, #tpu.memory_space<vmem>>, %arg5: memref<1x32xf32, #tpu.memory_space<vmem>>, %arg6: memref<8x32xbf16, #tpu.memory_space<vmem>>, %arg7: memref<1x32xf32, #tpu.memory_space<vmem>>, %arg8: memref<2x32x32xbf16, #tpu.memory_space<vmem>>, %arg9: memref<2x32x32xbf16, #tpu.memory_space<vmem>>, %arg10: memref<2x32x32xbf16, #tpu.memory_space<vmem>>, %arg11: memref<2x1x32xf32, #tpu.memory_space<vmem>>, %arg12: memref<2x1x32xf32, #tpu.memory_space<vmem>>, %arg13: memref<2x1x32xf32, #tpu.memory_space<vmem>>, %arg14: memref<2x32x32xbf16, #tpu.memory_space<vmem>>, %arg15: memref<2x1x32xf32, #tpu.memory_space<vmem>>, %arg16: memref<2x1x32xf32, #tpu.memory_space<vmem>>, %arg17: memref<2x1x32xf32, #tpu.memory_space<vmem>>, %arg18: memref<2x32x64xbf16, #tpu.memory_space<vmem>>, %arg19: memref<2x1x64xf32, #tpu.memory_space<vmem>>, %arg20: memref<2x64x32xbf16, #tpu.memory_space<vmem>>, %arg21: memref<2x1x32xf32, #tpu.memory_space<vmem>>, %arg22: memref<2x1x32xf32, #tpu.memory_space<vmem>>, %arg23: memref<2x1x32xf32, #tpu.memory_space<vmem>>, %arg24: memref<1x32x32xbf16, #tpu.memory_space<vmem>>, %arg25: memref<1x32x32xbf16, #tpu.memory_space<vmem>>, %arg26: memref<1x32x32xbf16, #tpu.memory_space<vmem>>, %arg27: memref<1x1x32xf32, #tpu.memory_space<vmem>>, %arg28: memref<1x1x32xf32, #tpu.memory_space<vmem>>, %arg29: memref<1x1x32xf32, #tpu.memory_space<vmem>>, %arg30: memref<1x32x32xbf16, #tpu.memory_space<vmem>>, %arg31: memref<1x1x32xf32, #tpu.memory_space<vmem>>, %arg32: memref<1x1x32xf32, #tpu.memory_space<vmem>>, %arg33: memref<1x1x32xf32, #tpu.memory_space<vmem>>, %arg34: memref<1x32x32xbf16, #tpu.memory_space<vmem>>, %arg35: memref<1x32x32xbf16, #tpu.memory_space<vmem>>, %arg36: memref<1x32x32xbf16, #tpu.memory_space<vmem>>, %arg37: memref<1x1x32xf32, #tpu.memory_space<vmem>>, %arg38: memref<1x1x32xf32, #tpu.memory_space<vmem>>, %arg39: memref<1x1x32xf32, #tpu.memory_space<vmem>>, %arg40: memref<1x32x32xbf16, #tpu.memory_space<vmem>>, %arg41: memref<1x1x32xf32, #tpu.memory_space<vmem>>, %arg42: memref<1x1x32xf32, #tpu.memory_space<vmem>>, %arg43: memref<1x1x32xf32, #tpu.memory_space<vmem>>, %arg44: memref<1x32x64xbf16, #tpu.memory_space<vmem>>, %arg45: memref<1x1x64xf32, #tpu.memory_space<vmem>>, %arg46: memref<1x64x32xbf16, #tpu.memory_space<vmem>>, %arg47: memref<1x1x32xf32, #tpu.memory_space<vmem>>, %arg48: memref<1x1x32xf32, #tpu.memory_space<vmem>>, %arg49: memref<1x1x32xf32, #tpu.memory_space<vmem>>, %arg50: memref<1x32xf32, #tpu.memory_space<vmem>>, %arg51: memref<2x32xf32, #tpu.memory_space<vmem>>) attributes {dimension_semantics = [], scalar_prefetch = 0 : i64, scratch_operands = 0 : i64, tpu.core_type = #tpu.core_type<tc>} {
    %c0 = arith.constant 0 : index
    %c0_0 = arith.constant 0 : index
    %0 = vector.load %arg0[%c0, %c0_0] : memref<32x8xf32, #tpu.memory_space<vmem>>, vector<32x8xf32>
    %c0_1 = arith.constant 0 : index
    %c0_2 = arith.constant 0 : index
    %1 = vector.load %arg2[%c0_1, %c0_2] : memref<8x32xbf16, #tpu.memory_space<vmem>>, vector<8x32xbf16>
    %2 = arith.truncf %0 : vector<32x8xf32> to vector<32x8xbf16>
    %cst = arith.constant dense<0.000000e+00> : vector<32x32xf32>
    %3 = tpu.matmul %2, %1, %cst {dimension_numbers = #tpu.dot_dimension_numbers<[1], [0], [0], [1], [0, 0, 1, 1], [], []>} : vector<32x8xbf16>, vector<8x32xbf16>, vector<32x32xf32> -> vector<32x32xf32>
    %c0_3 = arith.constant 0 : index
    %c0_4 = arith.constant 0 : index
    %4 = vector.load %arg3[%c0_3, %c0_4] : memref<1x32xf32, #tpu.memory_space<vmem>>, vector<1x32xf32>
    %5 = vector.broadcast %4 : vector<1x32xf32> to vector<32x32xf32>
    %6 = arith.addf %3, %5 : vector<32x32xf32>
    %cst_5 = arith.constant 0.000000e+00 : f32
    %7 = vector.broadcast %cst_5 : f32 to vector<32x32xf32>
    %8 = arith.maximumf %6, %7 : vector<32x32xf32>
    %c0_6 = arith.constant 0 : index
    %c0_7 = arith.constant 0 : index
    %9 = vector.load %arg4[%c0_6, %c0_7] : memref<32x32xbf16, #tpu.memory_space<vmem>>, vector<32x32xbf16>
    %10 = arith.truncf %8 : vector<32x32xf32> to vector<32x32xbf16>
    %cst_8 = arith.constant dense<0.000000e+00> : vector<32x32xf32>
    %11 = tpu.matmul %10, %9, %cst_8 {dimension_numbers = #tpu.dot_dimension_numbers<[1], [0], [0], [1], [0, 0, 1, 1], [], []>} : vector<32x32xbf16>, vector<32x32xbf16>, vector<32x32xf32> -> vector<32x32xf32>
    %c0_9 = arith.constant 0 : index
    %c0_10 = arith.constant 0 : index
    %12 = vector.load %arg5[%c0_9, %c0_10] : memref<1x32xf32, #tpu.memory_space<vmem>>, vector<1x32xf32>
    %13 = vector.broadcast %12 : vector<1x32xf32> to vector<32x32xf32>
    %14 = arith.addf %11, %13 : vector<32x32xf32>
    %c0_11 = arith.constant 0 : index
    %c0_12 = arith.constant 0 : index
    %15 = vector.load %arg6[%c0_11, %c0_12] : memref<8x32xbf16, #tpu.memory_space<vmem>>, vector<8x32xbf16>
    %16 = arith.truncf %0 : vector<32x8xf32> to vector<32x8xbf16>
    %cst_13 = arith.constant dense<0.000000e+00> : vector<32x32xf32>
    %17 = tpu.matmul %16, %15, %cst_13 {dimension_numbers = #tpu.dot_dimension_numbers<[1], [0], [0], [1], [0, 0, 1, 1], [], []>} : vector<32x8xbf16>, vector<8x32xbf16>, vector<32x32xf32> -> vector<32x32xf32>
    %c0_14 = arith.constant 0 : index
    %c0_15 = arith.constant 0 : index
    %18 = vector.load %arg7[%c0_14, %c0_15] : memref<1x32xf32, #tpu.memory_space<vmem>>, vector<1x32xf32>
    %19 = vector.broadcast %18 : vector<1x32xf32> to vector<32x32xf32>
    %20 = arith.addf %17, %19 : vector<32x32xf32>
    %c0_16 = arith.constant 0 : index
    %c0_17 = arith.constant 0 : index
    %21 = vector.load %arg1[%c0_16, %c0_17] : memref<2x16xf32, #tpu.memory_space<vmem>>, vector<2x16xf32>
    %cst_18 = arith.constant -1.000000e+09 : f32
    %22 = vector.broadcast %cst_18 : f32 to vector<2x16xf32>
    %23 = arith.mulf %21, %22 : vector<2x16xf32>
    %24 = arith.addf %14, %20 : vector<32x32xf32>
    %c0_19 = arith.constant 0 : index
    %c0_20 = arith.constant 0 : index
    %c0_21 = arith.constant 0 : index
    %25 = vector.load %arg8[%c0_19, %c0_20, %c0_21] : memref<2x32x32xbf16, #tpu.memory_space<vmem>>, vector<1x32x32xbf16>
    %26 = vector.shape_cast %25 : vector<1x32x32xbf16> to vector<32x32xbf16>
    %27 = arith.truncf %24 : vector<32x32xf32> to vector<32x32xbf16>
    %cst_22 = arith.constant dense<0.000000e+00> : vector<32x32xf32>
    %28 = tpu.matmul %27, %26, %cst_22 {dimension_numbers = #tpu.dot_dimension_numbers<[1], [0], [0], [1], [0, 0, 1, 1], [], []>} : vector<32x32xbf16>, vector<32x32xbf16>, vector<32x32xf32> -> vector<32x32xf32>
    %c0_23 = arith.constant 0 : index
    %c0_24 = arith.constant 0 : index
    %c0_25 = arith.constant 0 : index
    %29 = vector.load %arg11[%c0_23, %c0_24, %c0_25] : memref<2x1x32xf32, #tpu.memory_space<vmem>>, vector<1x1x32xf32>
    %30 = vector.shape_cast %29 : vector<1x1x32xf32> to vector<1x32xf32>
    %31 = vector.broadcast %30 : vector<1x32xf32> to vector<32x32xf32>
    %32 = arith.addf %28, %31 : vector<32x32xf32>
    %cst_26 = arith.constant 0.353553385 : f32
    %33 = vector.broadcast %cst_26 : f32 to vector<32x32xf32>
    %34 = arith.mulf %32, %33 : vector<32x32xf32>
    %c0_27 = arith.constant 0 : index
    %c0_28 = arith.constant 0 : index
    %c0_29 = arith.constant 0 : index
    %35 = vector.load %arg9[%c0_27, %c0_28, %c0_29] : memref<2x32x32xbf16, #tpu.memory_space<vmem>>, vector<1x32x32xbf16>
    %36 = vector.shape_cast %35 : vector<1x32x32xbf16> to vector<32x32xbf16>
    %37 = arith.truncf %24 : vector<32x32xf32> to vector<32x32xbf16>
    %cst_30 = arith.constant dense<0.000000e+00> : vector<32x32xf32>
    %38 = tpu.matmul %37, %36, %cst_30 {dimension_numbers = #tpu.dot_dimension_numbers<[1], [0], [0], [1], [0, 0, 1, 1], [], []>} : vector<32x32xbf16>, vector<32x32xbf16>, vector<32x32xf32> -> vector<32x32xf32>
    %c0_31 = arith.constant 0 : index
    %c0_32 = arith.constant 0 : index
    %c0_33 = arith.constant 0 : index
    %39 = vector.load %arg12[%c0_31, %c0_32, %c0_33] : memref<2x1x32xf32, #tpu.memory_space<vmem>>, vector<1x1x32xf32>
    %40 = vector.shape_cast %39 : vector<1x1x32xf32> to vector<1x32xf32>
    %41 = vector.broadcast %40 : vector<1x32xf32> to vector<32x32xf32>
    %42 = arith.addf %38, %41 : vector<32x32xf32>
    %c0_34 = arith.constant 0 : index
    %c0_35 = arith.constant 0 : index
    %c0_36 = arith.constant 0 : index
    %43 = vector.load %arg10[%c0_34, %c0_35, %c0_36] : memref<2x32x32xbf16, #tpu.memory_space<vmem>>, vector<1x32x32xbf16>
    %44 = vector.shape_cast %43 : vector<1x32x32xbf16> to vector<32x32xbf16>
    %45 = arith.truncf %14 : vector<32x32xf32> to vector<32x32xbf16>
    %cst_37 = arith.constant dense<0.000000e+00> : vector<32x32xf32>
    %46 = tpu.matmul %45, %44, %cst_37 {dimension_numbers = #tpu.dot_dimension_numbers<[1], [0], [0], [1], [0, 0, 1, 1], [], []>} : vector<32x32xbf16>, vector<32x32xbf16>, vector<32x32xf32> -> vector<32x32xf32>
    %c0_38 = arith.constant 0 : index
    %c0_39 = arith.constant 0 : index
    %c0_40 = arith.constant 0 : index
    %47 = vector.load %arg13[%c0_38, %c0_39, %c0_40] : memref<2x1x32xf32, #tpu.memory_space<vmem>>, vector<1x1x32xf32>
    %48 = vector.shape_cast %47 : vector<1x1x32xf32> to vector<1x32xf32>
    %49 = vector.broadcast %48 : vector<1x32xf32> to vector<32x32xf32>
    %50 = arith.addf %46, %49 : vector<32x32xf32>
    %c0_41 = arith.constant 0 : index
    %c0_42 = arith.constant 0 : index
    %c0_43 = arith.constant 0 : index
    %51 = vector.load %arg14[%c0_41, %c0_42, %c0_43] : memref<2x32x32xbf16, #tpu.memory_space<vmem>>, vector<1x32x32xbf16>
    %52 = vector.shape_cast %51 : vector<1x32x32xbf16> to vector<32x32xbf16>
    %c0_44 = arith.constant 0 : index
    %c0_45 = arith.constant 0 : index
    %c0_46 = arith.constant 0 : index
    %53 = vector.load %arg15[%c0_44, %c0_45, %c0_46] : memref<2x1x32xf32, #tpu.memory_space<vmem>>, vector<1x1x32xf32>
    %54 = vector.shape_cast %53 : vector<1x1x32xf32> to vector<1x32xf32>
    %55 = vector.extract_strided_slice %34 {offsets = [0, 0], sizes = [16, 32], strides = [1, 1]} : vector<32x32xf32> to vector<16x32xf32>
    %56 = vector.extract_strided_slice %42 {offsets = [0, 0], sizes = [16, 32], strides = [1, 1]} : vector<32x32xf32> to vector<16x32xf32>
    %57 = vector.extract_strided_slice %50 {offsets = [0, 0], sizes = [16, 32], strides = [1, 1]} : vector<32x32xf32> to vector<16x32xf32>
    %58 = vector.extract_strided_slice %23 {offsets = [0, 0], sizes = [1, 16], strides = [1, 1]} : vector<2x16xf32> to vector<1x16xf32>
    %59 = vector.extract_strided_slice %55 {offsets = [0, 0], sizes = [16, 8], strides = [1, 1]} : vector<16x32xf32> to vector<16x8xf32>
    %60 = arith.truncf %59 : vector<16x8xf32> to vector<16x8xbf16>
    %61 = vector.extract_strided_slice %56 {offsets = [0, 0], sizes = [16, 8], strides = [1, 1]} : vector<16x32xf32> to vector<16x8xf32>
    %62 = arith.truncf %61 : vector<16x8xf32> to vector<16x8xbf16>
    %cst_47 = arith.constant dense<0.000000e+00> : vector<16x16xf32>
    %63 = tpu.matmul %60, %62, %cst_47 {dimension_numbers = #tpu.dot_dimension_numbers<[1], [1], [0], [0], [0, 0, 1, 0], [], []>} : vector<16x8xbf16>, vector<16x8xbf16>, vector<16x16xf32> -> vector<16x16xf32>
    %64 = vector.broadcast %58 : vector<1x16xf32> to vector<16x16xf32>
    %65 = arith.addf %63, %64 : vector<16x16xf32>
    %cst_48 = arith.constant dense<0xFF800000> : vector<16xf32>
    %66 = vector.multi_reduction <maximumf>, %65, %cst_48 [1] : vector<16x16xf32> to vector<16xf32>
    %67 = vector.shape_cast %66 : vector<16xf32> to vector<16x1xf32>
    %68 = vector.broadcast %67 : vector<16x1xf32> to vector<16x16xf32>
    %69 = arith.subf %65, %68 : vector<16x16xf32>
    %70 = math.exp %69 : vector<16x16xf32>
    %cst_49 = arith.constant dense<0.000000e+00> : vector<16xf32>
    %71 = vector.multi_reduction <add>, %70, %cst_49 [1] : vector<16x16xf32> to vector<16xf32>
    %72 = vector.shape_cast %71 : vector<16xf32> to vector<16x1xf32>
    %73 = tpu.reciprocal %72 {approx = true} : vector<16x1xf32> -> vector<16x1xf32>
    %74 = vector.broadcast %73 : vector<16x1xf32> to vector<16x16xf32>
    %75 = arith.mulf %70, %74 : vector<16x16xf32>
    %76 = arith.truncf %75 : vector<16x16xf32> to vector<16x16xbf16>
    %77 = vector.extract_strided_slice %57 {offsets = [0, 0], sizes = [16, 8], strides = [1, 1]} : vector<16x32xf32> to vector<16x8xf32>
    %78 = arith.truncf %77 : vector<16x8xf32> to vector<16x8xbf16>
    %cst_50 = arith.constant dense<0.000000e+00> : vector<16x8xf32>
    %79 = tpu.matmul %76, %78, %cst_50 {dimension_numbers = #tpu.dot_dimension_numbers<[1], [0], [0], [1], [0, 0, 1, 1], [], []>} : vector<16x16xbf16>, vector<16x8xbf16>, vector<16x8xf32> -> vector<16x8xf32>
    %80 = vector.extract_strided_slice %55 {offsets = [0, 8], sizes = [16, 8], strides = [1, 1]} : vector<16x32xf32> to vector<16x8xf32>
    %81 = arith.truncf %80 : vector<16x8xf32> to vector<16x8xbf16>
    %82 = vector.extract_strided_slice %56 {offsets = [0, 8], sizes = [16, 8], strides = [1, 1]} : vector<16x32xf32> to vector<16x8xf32>
    %83 = arith.truncf %82 : vector<16x8xf32> to vector<16x8xbf16>
    %cst_51 = arith.constant dense<0.000000e+00> : vector<16x16xf32>
    %84 = tpu.matmul %81, %83, %cst_51 {dimension_numbers = #tpu.dot_dimension_numbers<[1], [1], [0], [0], [0, 0, 1, 0], [], []>} : vector<16x8xbf16>, vector<16x8xbf16>, vector<16x16xf32> -> vector<16x16xf32>
    %85 = vector.broadcast %58 : vector<1x16xf32> to vector<16x16xf32>
    %86 = arith.addf %84, %85 : vector<16x16xf32>
    %cst_52 = arith.constant dense<0xFF800000> : vector<16xf32>
    %87 = vector.multi_reduction <maximumf>, %86, %cst_52 [1] : vector<16x16xf32> to vector<16xf32>
    %88 = vector.shape_cast %87 : vector<16xf32> to vector<16x1xf32>
    %89 = vector.broadcast %88 : vector<16x1xf32> to vector<16x16xf32>
    %90 = arith.subf %86, %89 : vector<16x16xf32>
    %91 = math.exp %90 : vector<16x16xf32>
    %cst_53 = arith.constant dense<0.000000e+00> : vector<16xf32>
    %92 = vector.multi_reduction <add>, %91, %cst_53 [1] : vector<16x16xf32> to vector<16xf32>
    %93 = vector.shape_cast %92 : vector<16xf32> to vector<16x1xf32>
    %94 = tpu.reciprocal %93 {approx = true} : vector<16x1xf32> -> vector<16x1xf32>
    %95 = vector.broadcast %94 : vector<16x1xf32> to vector<16x16xf32>
    %96 = arith.mulf %91, %95 : vector<16x16xf32>
    %97 = arith.truncf %96 : vector<16x16xf32> to vector<16x16xbf16>
    %98 = vector.extract_strided_slice %57 {offsets = [0, 8], sizes = [16, 8], strides = [1, 1]} : vector<16x32xf32> to vector<16x8xf32>
    %99 = arith.truncf %98 : vector<16x8xf32> to vector<16x8xbf16>
    %cst_54 = arith.constant dense<0.000000e+00> : vector<16x8xf32>
    %100 = tpu.matmul %97, %99, %cst_54 {dimension_numbers = #tpu.dot_dimension_numbers<[1], [0], [0], [1], [0, 0, 1, 1], [], []>} : vector<16x16xbf16>, vector<16x8xbf16>, vector<16x8xf32> -> vector<16x8xf32>
    %101 = vector.extract_strided_slice %55 {offsets = [0, 16], sizes = [16, 8], strides = [1, 1]} : vector<16x32xf32> to vector<16x8xf32>
    %102 = arith.truncf %101 : vector<16x8xf32> to vector<16x8xbf16>
    %103 = vector.extract_strided_slice %56 {offsets = [0, 16], sizes = [16, 8], strides = [1, 1]} : vector<16x32xf32> to vector<16x8xf32>
    %104 = arith.truncf %103 : vector<16x8xf32> to vector<16x8xbf16>
    %cst_55 = arith.constant dense<0.000000e+00> : vector<16x16xf32>
    %105 = tpu.matmul %102, %104, %cst_55 {dimension_numbers = #tpu.dot_dimension_numbers<[1], [1], [0], [0], [0, 0, 1, 0], [], []>} : vector<16x8xbf16>, vector<16x8xbf16>, vector<16x16xf32> -> vector<16x16xf32>
    %106 = vector.broadcast %58 : vector<1x16xf32> to vector<16x16xf32>
    %107 = arith.addf %105, %106 : vector<16x16xf32>
    %cst_56 = arith.constant dense<0xFF800000> : vector<16xf32>
    %108 = vector.multi_reduction <maximumf>, %107, %cst_56 [1] : vector<16x16xf32> to vector<16xf32>
    %109 = vector.shape_cast %108 : vector<16xf32> to vector<16x1xf32>
    %110 = vector.broadcast %109 : vector<16x1xf32> to vector<16x16xf32>
    %111 = arith.subf %107, %110 : vector<16x16xf32>
    %112 = math.exp %111 : vector<16x16xf32>
    %cst_57 = arith.constant dense<0.000000e+00> : vector<16xf32>
    %113 = vector.multi_reduction <add>, %112, %cst_57 [1] : vector<16x16xf32> to vector<16xf32>
    %114 = vector.shape_cast %113 : vector<16xf32> to vector<16x1xf32>
    %115 = tpu.reciprocal %114 {approx = true} : vector<16x1xf32> -> vector<16x1xf32>
    %116 = vector.broadcast %115 : vector<16x1xf32> to vector<16x16xf32>
    %117 = arith.mulf %112, %116 : vector<16x16xf32>
    %118 = arith.truncf %117 : vector<16x16xf32> to vector<16x16xbf16>
    %119 = vector.extract_strided_slice %57 {offsets = [0, 16], sizes = [16, 8], strides = [1, 1]} : vector<16x32xf32> to vector<16x8xf32>
    %120 = arith.truncf %119 : vector<16x8xf32> to vector<16x8xbf16>
    %cst_58 = arith.constant dense<0.000000e+00> : vector<16x8xf32>
    %121 = tpu.matmul %118, %120, %cst_58 {dimension_numbers = #tpu.dot_dimension_numbers<[1], [0], [0], [1], [0, 0, 1, 1], [], []>} : vector<16x16xbf16>, vector<16x8xbf16>, vector<16x8xf32> -> vector<16x8xf32>
    %122 = vector.extract_strided_slice %55 {offsets = [0, 24], sizes = [16, 8], strides = [1, 1]} : vector<16x32xf32> to vector<16x8xf32>
    %123 = arith.truncf %122 : vector<16x8xf32> to vector<16x8xbf16>
    %124 = vector.extract_strided_slice %56 {offsets = [0, 24], sizes = [16, 8], strides = [1, 1]} : vector<16x32xf32> to vector<16x8xf32>
    %125 = arith.truncf %124 : vector<16x8xf32> to vector<16x8xbf16>
    %cst_59 = arith.constant dense<0.000000e+00> : vector<16x16xf32>
    %126 = tpu.matmul %123, %125, %cst_59 {dimension_numbers = #tpu.dot_dimension_numbers<[1], [1], [0], [0], [0, 0, 1, 0], [], []>} : vector<16x8xbf16>, vector<16x8xbf16>, vector<16x16xf32> -> vector<16x16xf32>
    %127 = vector.broadcast %58 : vector<1x16xf32> to vector<16x16xf32>
    %128 = arith.addf %126, %127 : vector<16x16xf32>
    %cst_60 = arith.constant dense<0xFF800000> : vector<16xf32>
    %129 = vector.multi_reduction <maximumf>, %128, %cst_60 [1] : vector<16x16xf32> to vector<16xf32>
    %130 = vector.shape_cast %129 : vector<16xf32> to vector<16x1xf32>
    %131 = vector.broadcast %130 : vector<16x1xf32> to vector<16x16xf32>
    %132 = arith.subf %128, %131 : vector<16x16xf32>
    %133 = math.exp %132 : vector<16x16xf32>
    %cst_61 = arith.constant dense<0.000000e+00> : vector<16xf32>
    %134 = vector.multi_reduction <add>, %133, %cst_61 [1] : vector<16x16xf32> to vector<16xf32>
    %135 = vector.shape_cast %134 : vector<16xf32> to vector<16x1xf32>
    %136 = tpu.reciprocal %135 {approx = true} : vector<16x1xf32> -> vector<16x1xf32>
    %137 = vector.broadcast %136 : vector<16x1xf32> to vector<16x16xf32>
    %138 = arith.mulf %133, %137 : vector<16x16xf32>
    %139 = arith.truncf %138 : vector<16x16xf32> to vector<16x16xbf16>
    %140 = vector.extract_strided_slice %57 {offsets = [0, 24], sizes = [16, 8], strides = [1, 1]} : vector<16x32xf32> to vector<16x8xf32>
    %141 = arith.truncf %140 : vector<16x8xf32> to vector<16x8xbf16>
    %cst_62 = arith.constant dense<0.000000e+00> : vector<16x8xf32>
    %142 = tpu.matmul %139, %141, %cst_62 {dimension_numbers = #tpu.dot_dimension_numbers<[1], [0], [0], [1], [0, 0, 1, 1], [], []>} : vector<16x16xbf16>, vector<16x8xbf16>, vector<16x8xf32> -> vector<16x8xf32>
    %143 = tpu.concatenate %79, %100, %121, %142 in 1 : vector<16x8xf32>, vector<16x8xf32>, vector<16x8xf32>, vector<16x8xf32> -> vector<16x32xf32>
    %144 = vector.extract_strided_slice %34 {offsets = [16, 0], sizes = [16, 32], strides = [1, 1]} : vector<32x32xf32> to vector<16x32xf32>
    %145 = vector.extract_strided_slice %42 {offsets = [16, 0], sizes = [16, 32], strides = [1, 1]} : vector<32x32xf32> to vector<16x32xf32>
    %146 = vector.extract_strided_slice %50 {offsets = [16, 0], sizes = [16, 32], strides = [1, 1]} : vector<32x32xf32> to vector<16x32xf32>
    %147 = vector.extract_strided_slice %23 {offsets = [1, 0], sizes = [1, 16], strides = [1, 1]} : vector<2x16xf32> to vector<1x16xf32>
    %148 = vector.extract_strided_slice %144 {offsets = [0, 0], sizes = [16, 8], strides = [1, 1]} : vector<16x32xf32> to vector<16x8xf32>
    %149 = arith.truncf %148 : vector<16x8xf32> to vector<16x8xbf16>
    %150 = vector.extract_strided_slice %145 {offsets = [0, 0], sizes = [16, 8], strides = [1, 1]} : vector<16x32xf32> to vector<16x8xf32>
    %151 = arith.truncf %150 : vector<16x8xf32> to vector<16x8xbf16>
    %cst_63 = arith.constant dense<0.000000e+00> : vector<16x16xf32>
    %152 = tpu.matmul %149, %151, %cst_63 {dimension_numbers = #tpu.dot_dimension_numbers<[1], [1], [0], [0], [0, 0, 1, 0], [], []>} : vector<16x8xbf16>, vector<16x8xbf16>, vector<16x16xf32> -> vector<16x16xf32>
    %153 = vector.broadcast %147 : vector<1x16xf32> to vector<16x16xf32>
    %154 = arith.addf %152, %153 : vector<16x16xf32>
    %cst_64 = arith.constant dense<0xFF800000> : vector<16xf32>
    %155 = vector.multi_reduction <maximumf>, %154, %cst_64 [1] : vector<16x16xf32> to vector<16xf32>
    %156 = vector.shape_cast %155 : vector<16xf32> to vector<16x1xf32>
    %157 = vector.broadcast %156 : vector<16x1xf32> to vector<16x16xf32>
    %158 = arith.subf %154, %157 : vector<16x16xf32>
    %159 = math.exp %158 : vector<16x16xf32>
    %cst_65 = arith.constant dense<0.000000e+00> : vector<16xf32>
    %160 = vector.multi_reduction <add>, %159, %cst_65 [1] : vector<16x16xf32> to vector<16xf32>
    %161 = vector.shape_cast %160 : vector<16xf32> to vector<16x1xf32>
    %162 = tpu.reciprocal %161 {approx = true} : vector<16x1xf32> -> vector<16x1xf32>
    %163 = vector.broadcast %162 : vector<16x1xf32> to vector<16x16xf32>
    %164 = arith.mulf %159, %163 : vector<16x16xf32>
    %165 = arith.truncf %164 : vector<16x16xf32> to vector<16x16xbf16>
    %166 = vector.extract_strided_slice %146 {offsets = [0, 0], sizes = [16, 8], strides = [1, 1]} : vector<16x32xf32> to vector<16x8xf32>
    %167 = arith.truncf %166 : vector<16x8xf32> to vector<16x8xbf16>
    %cst_66 = arith.constant dense<0.000000e+00> : vector<16x8xf32>
    %168 = tpu.matmul %165, %167, %cst_66 {dimension_numbers = #tpu.dot_dimension_numbers<[1], [0], [0], [1], [0, 0, 1, 1], [], []>} : vector<16x16xbf16>, vector<16x8xbf16>, vector<16x8xf32> -> vector<16x8xf32>
    %169 = vector.extract_strided_slice %144 {offsets = [0, 8], sizes = [16, 8], strides = [1, 1]} : vector<16x32xf32> to vector<16x8xf32>
    %170 = arith.truncf %169 : vector<16x8xf32> to vector<16x8xbf16>
    %171 = vector.extract_strided_slice %145 {offsets = [0, 8], sizes = [16, 8], strides = [1, 1]} : vector<16x32xf32> to vector<16x8xf32>
    %172 = arith.truncf %171 : vector<16x8xf32> to vector<16x8xbf16>
    %cst_67 = arith.constant dense<0.000000e+00> : vector<16x16xf32>
    %173 = tpu.matmul %170, %172, %cst_67 {dimension_numbers = #tpu.dot_dimension_numbers<[1], [1], [0], [0], [0, 0, 1, 0], [], []>} : vector<16x8xbf16>, vector<16x8xbf16>, vector<16x16xf32> -> vector<16x16xf32>
    %174 = vector.broadcast %147 : vector<1x16xf32> to vector<16x16xf32>
    %175 = arith.addf %173, %174 : vector<16x16xf32>
    %cst_68 = arith.constant dense<0xFF800000> : vector<16xf32>
    %176 = vector.multi_reduction <maximumf>, %175, %cst_68 [1] : vector<16x16xf32> to vector<16xf32>
    %177 = vector.shape_cast %176 : vector<16xf32> to vector<16x1xf32>
    %178 = vector.broadcast %177 : vector<16x1xf32> to vector<16x16xf32>
    %179 = arith.subf %175, %178 : vector<16x16xf32>
    %180 = math.exp %179 : vector<16x16xf32>
    %cst_69 = arith.constant dense<0.000000e+00> : vector<16xf32>
    %181 = vector.multi_reduction <add>, %180, %cst_69 [1] : vector<16x16xf32> to vector<16xf32>
    %182 = vector.shape_cast %181 : vector<16xf32> to vector<16x1xf32>
    %183 = tpu.reciprocal %182 {approx = true} : vector<16x1xf32> -> vector<16x1xf32>
    %184 = vector.broadcast %183 : vector<16x1xf32> to vector<16x16xf32>
    %185 = arith.mulf %180, %184 : vector<16x16xf32>
    %186 = arith.truncf %185 : vector<16x16xf32> to vector<16x16xbf16>
    %187 = vector.extract_strided_slice %146 {offsets = [0, 8], sizes = [16, 8], strides = [1, 1]} : vector<16x32xf32> to vector<16x8xf32>
    %188 = arith.truncf %187 : vector<16x8xf32> to vector<16x8xbf16>
    %cst_70 = arith.constant dense<0.000000e+00> : vector<16x8xf32>
    %189 = tpu.matmul %186, %188, %cst_70 {dimension_numbers = #tpu.dot_dimension_numbers<[1], [0], [0], [1], [0, 0, 1, 1], [], []>} : vector<16x16xbf16>, vector<16x8xbf16>, vector<16x8xf32> -> vector<16x8xf32>
    %190 = vector.extract_strided_slice %144 {offsets = [0, 16], sizes = [16, 8], strides = [1, 1]} : vector<16x32xf32> to vector<16x8xf32>
    %191 = arith.truncf %190 : vector<16x8xf32> to vector<16x8xbf16>
    %192 = vector.extract_strided_slice %145 {offsets = [0, 16], sizes = [16, 8], strides = [1, 1]} : vector<16x32xf32> to vector<16x8xf32>
    %193 = arith.truncf %192 : vector<16x8xf32> to vector<16x8xbf16>
    %cst_71 = arith.constant dense<0.000000e+00> : vector<16x16xf32>
    %194 = tpu.matmul %191, %193, %cst_71 {dimension_numbers = #tpu.dot_dimension_numbers<[1], [1], [0], [0], [0, 0, 1, 0], [], []>} : vector<16x8xbf16>, vector<16x8xbf16>, vector<16x16xf32> -> vector<16x16xf32>
    %195 = vector.broadcast %147 : vector<1x16xf32> to vector<16x16xf32>
    %196 = arith.addf %194, %195 : vector<16x16xf32>
    %cst_72 = arith.constant dense<0xFF800000> : vector<16xf32>
    %197 = vector.multi_reduction <maximumf>, %196, %cst_72 [1] : vector<16x16xf32> to vector<16xf32>
    %198 = vector.shape_cast %197 : vector<16xf32> to vector<16x1xf32>
    %199 = vector.broadcast %198 : vector<16x1xf32> to vector<16x16xf32>
    %200 = arith.subf %196, %199 : vector<16x16xf32>
    %201 = math.exp %200 : vector<16x16xf32>
    %cst_73 = arith.constant dense<0.000000e+00> : vector<16xf32>
    %202 = vector.multi_reduction <add>, %201, %cst_73 [1] : vector<16x16xf32> to vector<16xf32>
    %203 = vector.shape_cast %202 : vector<16xf32> to vector<16x1xf32>
    %204 = tpu.reciprocal %203 {approx = true} : vector<16x1xf32> -> vector<16x1xf32>
    %205 = vector.broadcast %204 : vector<16x1xf32> to vector<16x16xf32>
    %206 = arith.mulf %201, %205 : vector<16x16xf32>
    %207 = arith.truncf %206 : vector<16x16xf32> to vector<16x16xbf16>
    %208 = vector.extract_strided_slice %146 {offsets = [0, 16], sizes = [16, 8], strides = [1, 1]} : vector<16x32xf32> to vector<16x8xf32>
    %209 = arith.truncf %208 : vector<16x8xf32> to vector<16x8xbf16>
    %cst_74 = arith.constant dense<0.000000e+00> : vector<16x8xf32>
    %210 = tpu.matmul %207, %209, %cst_74 {dimension_numbers = #tpu.dot_dimension_numbers<[1], [0], [0], [1], [0, 0, 1, 1], [], []>} : vector<16x16xbf16>, vector<16x8xbf16>, vector<16x8xf32> -> vector<16x8xf32>
    %211 = vector.extract_strided_slice %144 {offsets = [0, 24], sizes = [16, 8], strides = [1, 1]} : vector<16x32xf32> to vector<16x8xf32>
    %212 = arith.truncf %211 : vector<16x8xf32> to vector<16x8xbf16>
    %213 = vector.extract_strided_slice %145 {offsets = [0, 24], sizes = [16, 8], strides = [1, 1]} : vector<16x32xf32> to vector<16x8xf32>
    %214 = arith.truncf %213 : vector<16x8xf32> to vector<16x8xbf16>
    %cst_75 = arith.constant dense<0.000000e+00> : vector<16x16xf32>
    %215 = tpu.matmul %212, %214, %cst_75 {dimension_numbers = #tpu.dot_dimension_numbers<[1], [1], [0], [0], [0, 0, 1, 0], [], []>} : vector<16x8xbf16>, vector<16x8xbf16>, vector<16x16xf32> -> vector<16x16xf32>
    %216 = vector.broadcast %147 : vector<1x16xf32> to vector<16x16xf32>
    %217 = arith.addf %215, %216 : vector<16x16xf32>
    %cst_76 = arith.constant dense<0xFF800000> : vector<16xf32>
    %218 = vector.multi_reduction <maximumf>, %217, %cst_76 [1] : vector<16x16xf32> to vector<16xf32>
    %219 = vector.shape_cast %218 : vector<16xf32> to vector<16x1xf32>
    %220 = vector.broadcast %219 : vector<16x1xf32> to vector<16x16xf32>
    %221 = arith.subf %217, %220 : vector<16x16xf32>
    %222 = math.exp %221 : vector<16x16xf32>
    %cst_77 = arith.constant dense<0.000000e+00> : vector<16xf32>
    %223 = vector.multi_reduction <add>, %222, %cst_77 [1] : vector<16x16xf32> to vector<16xf32>
    %224 = vector.shape_cast %223 : vector<16xf32> to vector<16x1xf32>
    %225 = tpu.reciprocal %224 {approx = true} : vector<16x1xf32> -> vector<16x1xf32>
    %226 = vector.broadcast %225 : vector<16x1xf32> to vector<16x16xf32>
    %227 = arith.mulf %222, %226 : vector<16x16xf32>
    %228 = arith.truncf %227 : vector<16x16xf32> to vector<16x16xbf16>
    %229 = vector.extract_strided_slice %146 {offsets = [0, 24], sizes = [16, 8], strides = [1, 1]} : vector<16x32xf32> to vector<16x8xf32>
    %230 = arith.truncf %229 : vector<16x8xf32> to vector<16x8xbf16>
    %cst_78 = arith.constant dense<0.000000e+00> : vector<16x8xf32>
    %231 = tpu.matmul %228, %230, %cst_78 {dimension_numbers = #tpu.dot_dimension_numbers<[1], [0], [0], [1], [0, 0, 1, 1], [], []>} : vector<16x16xbf16>, vector<16x8xbf16>, vector<16x8xf32> -> vector<16x8xf32>
    %232 = tpu.concatenate %168, %189, %210, %231 in 1 : vector<16x8xf32>, vector<16x8xf32>, vector<16x8xf32>, vector<16x8xf32> -> vector<16x32xf32>
    %233 = tpu.concatenate %143, %232 in 0 : vector<16x32xf32>, vector<16x32xf32> -> vector<32x32xf32>
    %234 = arith.truncf %233 : vector<32x32xf32> to vector<32x32xbf16>
    %cst_79 = arith.constant dense<0.000000e+00> : vector<32x32xf32>
    %235 = tpu.matmul %234, %52, %cst_79 {dimension_numbers = #tpu.dot_dimension_numbers<[1], [0], [0], [1], [0, 0, 1, 1], [], []>} : vector<32x32xbf16>, vector<32x32xbf16>, vector<32x32xf32> -> vector<32x32xf32>
    %236 = vector.broadcast %54 : vector<1x32xf32> to vector<32x32xf32>
    %237 = arith.addf %235, %236 : vector<32x32xf32>
    %238 = arith.addf %14, %237 : vector<32x32xf32>
    %c0_80 = arith.constant 0 : index
    %c0_81 = arith.constant 0 : index
    %c0_82 = arith.constant 0 : index
    %239 = vector.load %arg16[%c0_80, %c0_81, %c0_82] : memref<2x1x32xf32, #tpu.memory_space<vmem>>, vector<1x1x32xf32>
    %240 = vector.shape_cast %239 : vector<1x1x32xf32> to vector<1x32xf32>
    %c0_83 = arith.constant 0 : index
    %c0_84 = arith.constant 0 : index
    %c0_85 = arith.constant 0 : index
    %241 = vector.load %arg17[%c0_83, %c0_84, %c0_85] : memref<2x1x32xf32, #tpu.memory_space<vmem>>, vector<1x1x32xf32>
    %242 = vector.shape_cast %241 : vector<1x1x32xf32> to vector<1x32xf32>
    %cst_86 = arith.constant dense<0.000000e+00> : vector<32xf32>
    %243 = vector.multi_reduction <add>, %238, %cst_86 [1] : vector<32x32xf32> to vector<32xf32>
    %244 = vector.shape_cast %243 : vector<32xf32> to vector<32x1xf32>
    %cst_87 = arith.constant 3.200000e+01 : f32
    %245 = vector.broadcast %cst_87 : f32 to vector<32x1xf32>
    %246 = arith.divf %244, %245 : vector<32x1xf32>
    %247 = vector.broadcast %246 : vector<32x1xf32> to vector<32x32xf32>
    %248 = arith.subf %238, %247 : vector<32x32xf32>
    %249 = arith.mulf %248, %248 : vector<32x32xf32>
    %cst_88 = arith.constant dense<0.000000e+00> : vector<32xf32>
    %250 = vector.multi_reduction <add>, %249, %cst_88 [1] : vector<32x32xf32> to vector<32xf32>
    %251 = vector.shape_cast %250 : vector<32xf32> to vector<32x1xf32>
    %cst_89 = arith.constant 3.200000e+01 : f32
    %252 = vector.broadcast %cst_89 : f32 to vector<32x1xf32>
    %253 = arith.divf %251, %252 : vector<32x1xf32>
    %254 = vector.broadcast %246 : vector<32x1xf32> to vector<32x32xf32>
    %255 = arith.subf %238, %254 : vector<32x32xf32>
    %cst_90 = arith.constant 9.99999974E-6 : f32
    %256 = vector.broadcast %cst_90 : f32 to vector<32x1xf32>
    %257 = arith.addf %253, %256 : vector<32x1xf32>
    %258 = math.rsqrt %257 : vector<32x1xf32>
    %259 = vector.broadcast %258 : vector<32x1xf32> to vector<32x32xf32>
    %260 = arith.mulf %255, %259 : vector<32x32xf32>
    %261 = vector.broadcast %240 : vector<1x32xf32> to vector<32x32xf32>
    %262 = arith.mulf %260, %261 : vector<32x32xf32>
    %263 = vector.broadcast %242 : vector<1x32xf32> to vector<32x32xf32>
    %264 = arith.addf %262, %263 : vector<32x32xf32>
    %c0_91 = arith.constant 0 : index
    %c0_92 = arith.constant 0 : index
    %c0_93 = arith.constant 0 : index
    %265 = vector.load %arg18[%c0_91, %c0_92, %c0_93] : memref<2x32x64xbf16, #tpu.memory_space<vmem>>, vector<1x32x64xbf16>
    %266 = vector.shape_cast %265 : vector<1x32x64xbf16> to vector<32x64xbf16>
    %267 = arith.truncf %264 : vector<32x32xf32> to vector<32x32xbf16>
    %cst_94 = arith.constant dense<0.000000e+00> : vector<32x64xf32>
    %268 = tpu.matmul %267, %266, %cst_94 {dimension_numbers = #tpu.dot_dimension_numbers<[1], [0], [0], [1], [0, 0, 1, 1], [], []>} : vector<32x32xbf16>, vector<32x64xbf16>, vector<32x64xf32> -> vector<32x64xf32>
    %c0_95 = arith.constant 0 : index
    %c0_96 = arith.constant 0 : index
    %c0_97 = arith.constant 0 : index
    %269 = vector.load %arg19[%c0_95, %c0_96, %c0_97] : memref<2x1x64xf32, #tpu.memory_space<vmem>>, vector<1x1x64xf32>
    %270 = vector.shape_cast %269 : vector<1x1x64xf32> to vector<1x64xf32>
    %271 = vector.broadcast %270 : vector<1x64xf32> to vector<32x64xf32>
    %272 = arith.addf %268, %271 : vector<32x64xf32>
    %cst_98 = arith.constant 0.000000e+00 : f32
    %273 = vector.broadcast %cst_98 : f32 to vector<32x64xf32>
    %274 = arith.maximumf %272, %273 : vector<32x64xf32>
    %c0_99 = arith.constant 0 : index
    %c0_100 = arith.constant 0 : index
    %c0_101 = arith.constant 0 : index
    %275 = vector.load %arg20[%c0_99, %c0_100, %c0_101] : memref<2x64x32xbf16, #tpu.memory_space<vmem>>, vector<1x64x32xbf16>
    %276 = vector.shape_cast %275 : vector<1x64x32xbf16> to vector<64x32xbf16>
    %277 = arith.truncf %274 : vector<32x64xf32> to vector<32x64xbf16>
    %cst_102 = arith.constant dense<0.000000e+00> : vector<32x32xf32>
    %278 = tpu.matmul %277, %276, %cst_102 {dimension_numbers = #tpu.dot_dimension_numbers<[1], [0], [0], [1], [0, 0, 1, 1], [], []>} : vector<32x64xbf16>, vector<64x32xbf16>, vector<32x32xf32> -> vector<32x32xf32>
    %c0_103 = arith.constant 0 : index
    %c0_104 = arith.constant 0 : index
    %c0_105 = arith.constant 0 : index
    %279 = vector.load %arg21[%c0_103, %c0_104, %c0_105] : memref<2x1x32xf32, #tpu.memory_space<vmem>>, vector<1x1x32xf32>
    %280 = vector.shape_cast %279 : vector<1x1x32xf32> to vector<1x32xf32>
    %281 = vector.broadcast %280 : vector<1x32xf32> to vector<32x32xf32>
    %282 = arith.addf %278, %281 : vector<32x32xf32>
    %283 = arith.addf %264, %282 : vector<32x32xf32>
    %c0_106 = arith.constant 0 : index
    %c0_107 = arith.constant 0 : index
    %c0_108 = arith.constant 0 : index
    %284 = vector.load %arg22[%c0_106, %c0_107, %c0_108] : memref<2x1x32xf32, #tpu.memory_space<vmem>>, vector<1x1x32xf32>
    %285 = vector.shape_cast %284 : vector<1x1x32xf32> to vector<1x32xf32>
    %c0_109 = arith.constant 0 : index
    %c0_110 = arith.constant 0 : index
    %c0_111 = arith.constant 0 : index
    %286 = vector.load %arg23[%c0_109, %c0_110, %c0_111] : memref<2x1x32xf32, #tpu.memory_space<vmem>>, vector<1x1x32xf32>
    %287 = vector.shape_cast %286 : vector<1x1x32xf32> to vector<1x32xf32>
    %cst_112 = arith.constant dense<0.000000e+00> : vector<32xf32>
    %288 = vector.multi_reduction <add>, %283, %cst_112 [1] : vector<32x32xf32> to vector<32xf32>
    %289 = vector.shape_cast %288 : vector<32xf32> to vector<32x1xf32>
    %cst_113 = arith.constant 3.200000e+01 : f32
    %290 = vector.broadcast %cst_113 : f32 to vector<32x1xf32>
    %291 = arith.divf %289, %290 : vector<32x1xf32>
    %292 = vector.broadcast %291 : vector<32x1xf32> to vector<32x32xf32>
    %293 = arith.subf %283, %292 : vector<32x32xf32>
    %294 = arith.mulf %293, %293 : vector<32x32xf32>
    %cst_114 = arith.constant dense<0.000000e+00> : vector<32xf32>
    %295 = vector.multi_reduction <add>, %294, %cst_114 [1] : vector<32x32xf32> to vector<32xf32>
    %296 = vector.shape_cast %295 : vector<32xf32> to vector<32x1xf32>
    %cst_115 = arith.constant 3.200000e+01 : f32
    %297 = vector.broadcast %cst_115 : f32 to vector<32x1xf32>
    %298 = arith.divf %296, %297 : vector<32x1xf32>
    %299 = vector.broadcast %291 : vector<32x1xf32> to vector<32x32xf32>
    %300 = arith.subf %283, %299 : vector<32x32xf32>
    %cst_116 = arith.constant 9.99999974E-6 : f32
    %301 = vector.broadcast %cst_116 : f32 to vector<32x1xf32>
    %302 = arith.addf %298, %301 : vector<32x1xf32>
    %303 = math.rsqrt %302 : vector<32x1xf32>
    %304 = vector.broadcast %303 : vector<32x1xf32> to vector<32x32xf32>
    %305 = arith.mulf %300, %304 : vector<32x32xf32>
    %306 = vector.broadcast %285 : vector<1x32xf32> to vector<32x32xf32>
    %307 = arith.mulf %305, %306 : vector<32x32xf32>
    %308 = vector.broadcast %287 : vector<1x32xf32> to vector<32x32xf32>
    %309 = arith.addf %307, %308 : vector<32x32xf32>
    %310 = arith.addf %309, %20 : vector<32x32xf32>
    %c1 = arith.constant 1 : index
    %c0_117 = arith.constant 0 : index
    %c0_118 = arith.constant 0 : index
    %311 = vector.load %arg8[%c1, %c0_117, %c0_118] : memref<2x32x32xbf16, #tpu.memory_space<vmem>>, vector<1x32x32xbf16>
    %312 = vector.shape_cast %311 : vector<1x32x32xbf16> to vector<32x32xbf16>
    %313 = arith.truncf %310 : vector<32x32xf32> to vector<32x32xbf16>
    %cst_119 = arith.constant dense<0.000000e+00> : vector<32x32xf32>
    %314 = tpu.matmul %313, %312, %cst_119 {dimension_numbers = #tpu.dot_dimension_numbers<[1], [0], [0], [1], [0, 0, 1, 1], [], []>} : vector<32x32xbf16>, vector<32x32xbf16>, vector<32x32xf32> -> vector<32x32xf32>
    %c1_120 = arith.constant 1 : index
    %c0_121 = arith.constant 0 : index
    %c0_122 = arith.constant 0 : index
    %315 = vector.load %arg11[%c1_120, %c0_121, %c0_122] : memref<2x1x32xf32, #tpu.memory_space<vmem>>, vector<1x1x32xf32>
    %316 = vector.shape_cast %315 : vector<1x1x32xf32> to vector<1x32xf32>
    %317 = vector.broadcast %316 : vector<1x32xf32> to vector<32x32xf32>
    %318 = arith.addf %314, %317 : vector<32x32xf32>
    %cst_123 = arith.constant 0.353553385 : f32
    %319 = vector.broadcast %cst_123 : f32 to vector<32x32xf32>
    %320 = arith.mulf %318, %319 : vector<32x32xf32>
    %c1_124 = arith.constant 1 : index
    %c0_125 = arith.constant 0 : index
    %c0_126 = arith.constant 0 : index
    %321 = vector.load %arg9[%c1_124, %c0_125, %c0_126] : memref<2x32x32xbf16, #tpu.memory_space<vmem>>, vector<1x32x32xbf16>
    %322 = vector.shape_cast %321 : vector<1x32x32xbf16> to vector<32x32xbf16>
    %323 = arith.truncf %310 : vector<32x32xf32> to vector<32x32xbf16>
    %cst_127 = arith.constant dense<0.000000e+00> : vector<32x32xf32>
    %324 = tpu.matmul %323, %322, %cst_127 {dimension_numbers = #tpu.dot_dimension_numbers<[1], [0], [0], [1], [0, 0, 1, 1], [], []>} : vector<32x32xbf16>, vector<32x32xbf16>, vector<32x32xf32> -> vector<32x32xf32>
    %c1_128 = arith.constant 1 : index
    %c0_129 = arith.constant 0 : index
    %c0_130 = arith.constant 0 : index
    %325 = vector.load %arg12[%c1_128, %c0_129, %c0_130] : memref<2x1x32xf32, #tpu.memory_space<vmem>>, vector<1x1x32xf32>
    %326 = vector.shape_cast %325 : vector<1x1x32xf32> to vector<1x32xf32>
    %327 = vector.broadcast %326 : vector<1x32xf32> to vector<32x32xf32>
    %328 = arith.addf %324, %327 : vector<32x32xf32>
    %c1_131 = arith.constant 1 : index
    %c0_132 = arith.constant 0 : index
    %c0_133 = arith.constant 0 : index
    %329 = vector.load %arg10[%c1_131, %c0_132, %c0_133] : memref<2x32x32xbf16, #tpu.memory_space<vmem>>, vector<1x32x32xbf16>
    %330 = vector.shape_cast %329 : vector<1x32x32xbf16> to vector<32x32xbf16>
    %331 = arith.truncf %309 : vector<32x32xf32> to vector<32x32xbf16>
    %cst_134 = arith.constant dense<0.000000e+00> : vector<32x32xf32>
    %332 = tpu.matmul %331, %330, %cst_134 {dimension_numbers = #tpu.dot_dimension_numbers<[1], [0], [0], [1], [0, 0, 1, 1], [], []>} : vector<32x32xbf16>, vector<32x32xbf16>, vector<32x32xf32> -> vector<32x32xf32>
    %c1_135 = arith.constant 1 : index
    %c0_136 = arith.constant 0 : index
    %c0_137 = arith.constant 0 : index
    %333 = vector.load %arg13[%c1_135, %c0_136, %c0_137] : memref<2x1x32xf32, #tpu.memory_space<vmem>>, vector<1x1x32xf32>
    %334 = vector.shape_cast %333 : vector<1x1x32xf32> to vector<1x32xf32>
    %335 = vector.broadcast %334 : vector<1x32xf32> to vector<32x32xf32>
    %336 = arith.addf %332, %335 : vector<32x32xf32>
    %c1_138 = arith.constant 1 : index
    %c0_139 = arith.constant 0 : index
    %c0_140 = arith.constant 0 : index
    %337 = vector.load %arg14[%c1_138, %c0_139, %c0_140] : memref<2x32x32xbf16, #tpu.memory_space<vmem>>, vector<1x32x32xbf16>
    %338 = vector.shape_cast %337 : vector<1x32x32xbf16> to vector<32x32xbf16>
    %c1_141 = arith.constant 1 : index
    %c0_142 = arith.constant 0 : index
    %c0_143 = arith.constant 0 : index
    %339 = vector.load %arg15[%c1_141, %c0_142, %c0_143] : memref<2x1x32xf32, #tpu.memory_space<vmem>>, vector<1x1x32xf32>
    %340 = vector.shape_cast %339 : vector<1x1x32xf32> to vector<1x32xf32>
    %341 = vector.extract_strided_slice %320 {offsets = [0, 0], sizes = [16, 32], strides = [1, 1]} : vector<32x32xf32> to vector<16x32xf32>
    %342 = vector.extract_strided_slice %328 {offsets = [0, 0], sizes = [16, 32], strides = [1, 1]} : vector<32x32xf32> to vector<16x32xf32>
    %343 = vector.extract_strided_slice %336 {offsets = [0, 0], sizes = [16, 32], strides = [1, 1]} : vector<32x32xf32> to vector<16x32xf32>
    %344 = vector.extract_strided_slice %23 {offsets = [0, 0], sizes = [1, 16], strides = [1, 1]} : vector<2x16xf32> to vector<1x16xf32>
    %345 = vector.extract_strided_slice %341 {offsets = [0, 0], sizes = [16, 8], strides = [1, 1]} : vector<16x32xf32> to vector<16x8xf32>
    %346 = arith.truncf %345 : vector<16x8xf32> to vector<16x8xbf16>
    %347 = vector.extract_strided_slice %342 {offsets = [0, 0], sizes = [16, 8], strides = [1, 1]} : vector<16x32xf32> to vector<16x8xf32>
    %348 = arith.truncf %347 : vector<16x8xf32> to vector<16x8xbf16>
    %cst_144 = arith.constant dense<0.000000e+00> : vector<16x16xf32>
    %349 = tpu.matmul %346, %348, %cst_144 {dimension_numbers = #tpu.dot_dimension_numbers<[1], [1], [0], [0], [0, 0, 1, 0], [], []>} : vector<16x8xbf16>, vector<16x8xbf16>, vector<16x16xf32> -> vector<16x16xf32>
    %350 = vector.broadcast %344 : vector<1x16xf32> to vector<16x16xf32>
    %351 = arith.addf %349, %350 : vector<16x16xf32>
    %cst_145 = arith.constant dense<0xFF800000> : vector<16xf32>
    %352 = vector.multi_reduction <maximumf>, %351, %cst_145 [1] : vector<16x16xf32> to vector<16xf32>
    %353 = vector.shape_cast %352 : vector<16xf32> to vector<16x1xf32>
    %354 = vector.broadcast %353 : vector<16x1xf32> to vector<16x16xf32>
    %355 = arith.subf %351, %354 : vector<16x16xf32>
    %356 = math.exp %355 : vector<16x16xf32>
    %cst_146 = arith.constant dense<0.000000e+00> : vector<16xf32>
    %357 = vector.multi_reduction <add>, %356, %cst_146 [1] : vector<16x16xf32> to vector<16xf32>
    %358 = vector.shape_cast %357 : vector<16xf32> to vector<16x1xf32>
    %359 = tpu.reciprocal %358 {approx = true} : vector<16x1xf32> -> vector<16x1xf32>
    %360 = vector.broadcast %359 : vector<16x1xf32> to vector<16x16xf32>
    %361 = arith.mulf %356, %360 : vector<16x16xf32>
    %362 = arith.truncf %361 : vector<16x16xf32> to vector<16x16xbf16>
    %363 = vector.extract_strided_slice %343 {offsets = [0, 0], sizes = [16, 8], strides = [1, 1]} : vector<16x32xf32> to vector<16x8xf32>
    %364 = arith.truncf %363 : vector<16x8xf32> to vector<16x8xbf16>
    %cst_147 = arith.constant dense<0.000000e+00> : vector<16x8xf32>
    %365 = tpu.matmul %362, %364, %cst_147 {dimension_numbers = #tpu.dot_dimension_numbers<[1], [0], [0], [1], [0, 0, 1, 1], [], []>} : vector<16x16xbf16>, vector<16x8xbf16>, vector<16x8xf32> -> vector<16x8xf32>
    %366 = vector.extract_strided_slice %341 {offsets = [0, 8], sizes = [16, 8], strides = [1, 1]} : vector<16x32xf32> to vector<16x8xf32>
    %367 = arith.truncf %366 : vector<16x8xf32> to vector<16x8xbf16>
    %368 = vector.extract_strided_slice %342 {offsets = [0, 8], sizes = [16, 8], strides = [1, 1]} : vector<16x32xf32> to vector<16x8xf32>
    %369 = arith.truncf %368 : vector<16x8xf32> to vector<16x8xbf16>
    %cst_148 = arith.constant dense<0.000000e+00> : vector<16x16xf32>
    %370 = tpu.matmul %367, %369, %cst_148 {dimension_numbers = #tpu.dot_dimension_numbers<[1], [1], [0], [0], [0, 0, 1, 0], [], []>} : vector<16x8xbf16>, vector<16x8xbf16>, vector<16x16xf32> -> vector<16x16xf32>
    %371 = vector.broadcast %344 : vector<1x16xf32> to vector<16x16xf32>
    %372 = arith.addf %370, %371 : vector<16x16xf32>
    %cst_149 = arith.constant dense<0xFF800000> : vector<16xf32>
    %373 = vector.multi_reduction <maximumf>, %372, %cst_149 [1] : vector<16x16xf32> to vector<16xf32>
    %374 = vector.shape_cast %373 : vector<16xf32> to vector<16x1xf32>
    %375 = vector.broadcast %374 : vector<16x1xf32> to vector<16x16xf32>
    %376 = arith.subf %372, %375 : vector<16x16xf32>
    %377 = math.exp %376 : vector<16x16xf32>
    %cst_150 = arith.constant dense<0.000000e+00> : vector<16xf32>
    %378 = vector.multi_reduction <add>, %377, %cst_150 [1] : vector<16x16xf32> to vector<16xf32>
    %379 = vector.shape_cast %378 : vector<16xf32> to vector<16x1xf32>
    %380 = tpu.reciprocal %379 {approx = true} : vector<16x1xf32> -> vector<16x1xf32>
    %381 = vector.broadcast %380 : vector<16x1xf32> to vector<16x16xf32>
    %382 = arith.mulf %377, %381 : vector<16x16xf32>
    %383 = arith.truncf %382 : vector<16x16xf32> to vector<16x16xbf16>
    %384 = vector.extract_strided_slice %343 {offsets = [0, 8], sizes = [16, 8], strides = [1, 1]} : vector<16x32xf32> to vector<16x8xf32>
    %385 = arith.truncf %384 : vector<16x8xf32> to vector<16x8xbf16>
    %cst_151 = arith.constant dense<0.000000e+00> : vector<16x8xf32>
    %386 = tpu.matmul %383, %385, %cst_151 {dimension_numbers = #tpu.dot_dimension_numbers<[1], [0], [0], [1], [0, 0, 1, 1], [], []>} : vector<16x16xbf16>, vector<16x8xbf16>, vector<16x8xf32> -> vector<16x8xf32>
    %387 = vector.extract_strided_slice %341 {offsets = [0, 16], sizes = [16, 8], strides = [1, 1]} : vector<16x32xf32> to vector<16x8xf32>
    %388 = arith.truncf %387 : vector<16x8xf32> to vector<16x8xbf16>
    %389 = vector.extract_strided_slice %342 {offsets = [0, 16], sizes = [16, 8], strides = [1, 1]} : vector<16x32xf32> to vector<16x8xf32>
    %390 = arith.truncf %389 : vector<16x8xf32> to vector<16x8xbf16>
    %cst_152 = arith.constant dense<0.000000e+00> : vector<16x16xf32>
    %391 = tpu.matmul %388, %390, %cst_152 {dimension_numbers = #tpu.dot_dimension_numbers<[1], [1], [0], [0], [0, 0, 1, 0], [], []>} : vector<16x8xbf16>, vector<16x8xbf16>, vector<16x16xf32> -> vector<16x16xf32>
    %392 = vector.broadcast %344 : vector<1x16xf32> to vector<16x16xf32>
    %393 = arith.addf %391, %392 : vector<16x16xf32>
    %cst_153 = arith.constant dense<0xFF800000> : vector<16xf32>
    %394 = vector.multi_reduction <maximumf>, %393, %cst_153 [1] : vector<16x16xf32> to vector<16xf32>
    %395 = vector.shape_cast %394 : vector<16xf32> to vector<16x1xf32>
    %396 = vector.broadcast %395 : vector<16x1xf32> to vector<16x16xf32>
    %397 = arith.subf %393, %396 : vector<16x16xf32>
    %398 = math.exp %397 : vector<16x16xf32>
    %cst_154 = arith.constant dense<0.000000e+00> : vector<16xf32>
    %399 = vector.multi_reduction <add>, %398, %cst_154 [1] : vector<16x16xf32> to vector<16xf32>
    %400 = vector.shape_cast %399 : vector<16xf32> to vector<16x1xf32>
    %401 = tpu.reciprocal %400 {approx = true} : vector<16x1xf32> -> vector<16x1xf32>
    %402 = vector.broadcast %401 : vector<16x1xf32> to vector<16x16xf32>
    %403 = arith.mulf %398, %402 : vector<16x16xf32>
    %404 = arith.truncf %403 : vector<16x16xf32> to vector<16x16xbf16>
    %405 = vector.extract_strided_slice %343 {offsets = [0, 16], sizes = [16, 8], strides = [1, 1]} : vector<16x32xf32> to vector<16x8xf32>
    %406 = arith.truncf %405 : vector<16x8xf32> to vector<16x8xbf16>
    %cst_155 = arith.constant dense<0.000000e+00> : vector<16x8xf32>
    %407 = tpu.matmul %404, %406, %cst_155 {dimension_numbers = #tpu.dot_dimension_numbers<[1], [0], [0], [1], [0, 0, 1, 1], [], []>} : vector<16x16xbf16>, vector<16x8xbf16>, vector<16x8xf32> -> vector<16x8xf32>
    %408 = vector.extract_strided_slice %341 {offsets = [0, 24], sizes = [16, 8], strides = [1, 1]} : vector<16x32xf32> to vector<16x8xf32>
    %409 = arith.truncf %408 : vector<16x8xf32> to vector<16x8xbf16>
    %410 = vector.extract_strided_slice %342 {offsets = [0, 24], sizes = [16, 8], strides = [1, 1]} : vector<16x32xf32> to vector<16x8xf32>
    %411 = arith.truncf %410 : vector<16x8xf32> to vector<16x8xbf16>
    %cst_156 = arith.constant dense<0.000000e+00> : vector<16x16xf32>
    %412 = tpu.matmul %409, %411, %cst_156 {dimension_numbers = #tpu.dot_dimension_numbers<[1], [1], [0], [0], [0, 0, 1, 0], [], []>} : vector<16x8xbf16>, vector<16x8xbf16>, vector<16x16xf32> -> vector<16x16xf32>
    %413 = vector.broadcast %344 : vector<1x16xf32> to vector<16x16xf32>
    %414 = arith.addf %412, %413 : vector<16x16xf32>
    %cst_157 = arith.constant dense<0xFF800000> : vector<16xf32>
    %415 = vector.multi_reduction <maximumf>, %414, %cst_157 [1] : vector<16x16xf32> to vector<16xf32>
    %416 = vector.shape_cast %415 : vector<16xf32> to vector<16x1xf32>
    %417 = vector.broadcast %416 : vector<16x1xf32> to vector<16x16xf32>
    %418 = arith.subf %414, %417 : vector<16x16xf32>
    %419 = math.exp %418 : vector<16x16xf32>
    %cst_158 = arith.constant dense<0.000000e+00> : vector<16xf32>
    %420 = vector.multi_reduction <add>, %419, %cst_158 [1] : vector<16x16xf32> to vector<16xf32>
    %421 = vector.shape_cast %420 : vector<16xf32> to vector<16x1xf32>
    %422 = tpu.reciprocal %421 {approx = true} : vector<16x1xf32> -> vector<16x1xf32>
    %423 = vector.broadcast %422 : vector<16x1xf32> to vector<16x16xf32>
    %424 = arith.mulf %419, %423 : vector<16x16xf32>
    %425 = arith.truncf %424 : vector<16x16xf32> to vector<16x16xbf16>
    %426 = vector.extract_strided_slice %343 {offsets = [0, 24], sizes = [16, 8], strides = [1, 1]} : vector<16x32xf32> to vector<16x8xf32>
    %427 = arith.truncf %426 : vector<16x8xf32> to vector<16x8xbf16>
    %cst_159 = arith.constant dense<0.000000e+00> : vector<16x8xf32>
    %428 = tpu.matmul %425, %427, %cst_159 {dimension_numbers = #tpu.dot_dimension_numbers<[1], [0], [0], [1], [0, 0, 1, 1], [], []>} : vector<16x16xbf16>, vector<16x8xbf16>, vector<16x8xf32> -> vector<16x8xf32>
    %429 = tpu.concatenate %365, %386, %407, %428 in 1 : vector<16x8xf32>, vector<16x8xf32>, vector<16x8xf32>, vector<16x8xf32> -> vector<16x32xf32>
    %430 = vector.extract_strided_slice %320 {offsets = [16, 0], sizes = [16, 32], strides = [1, 1]} : vector<32x32xf32> to vector<16x32xf32>
    %431 = vector.extract_strided_slice %328 {offsets = [16, 0], sizes = [16, 32], strides = [1, 1]} : vector<32x32xf32> to vector<16x32xf32>
    %432 = vector.extract_strided_slice %336 {offsets = [16, 0], sizes = [16, 32], strides = [1, 1]} : vector<32x32xf32> to vector<16x32xf32>
    %433 = vector.extract_strided_slice %23 {offsets = [1, 0], sizes = [1, 16], strides = [1, 1]} : vector<2x16xf32> to vector<1x16xf32>
    %434 = vector.extract_strided_slice %430 {offsets = [0, 0], sizes = [16, 8], strides = [1, 1]} : vector<16x32xf32> to vector<16x8xf32>
    %435 = arith.truncf %434 : vector<16x8xf32> to vector<16x8xbf16>
    %436 = vector.extract_strided_slice %431 {offsets = [0, 0], sizes = [16, 8], strides = [1, 1]} : vector<16x32xf32> to vector<16x8xf32>
    %437 = arith.truncf %436 : vector<16x8xf32> to vector<16x8xbf16>
    %cst_160 = arith.constant dense<0.000000e+00> : vector<16x16xf32>
    %438 = tpu.matmul %435, %437, %cst_160 {dimension_numbers = #tpu.dot_dimension_numbers<[1], [1], [0], [0], [0, 0, 1, 0], [], []>} : vector<16x8xbf16>, vector<16x8xbf16>, vector<16x16xf32> -> vector<16x16xf32>
    %439 = vector.broadcast %433 : vector<1x16xf32> to vector<16x16xf32>
    %440 = arith.addf %438, %439 : vector<16x16xf32>
    %cst_161 = arith.constant dense<0xFF800000> : vector<16xf32>
    %441 = vector.multi_reduction <maximumf>, %440, %cst_161 [1] : vector<16x16xf32> to vector<16xf32>
    %442 = vector.shape_cast %441 : vector<16xf32> to vector<16x1xf32>
    %443 = vector.broadcast %442 : vector<16x1xf32> to vector<16x16xf32>
    %444 = arith.subf %440, %443 : vector<16x16xf32>
    %445 = math.exp %444 : vector<16x16xf32>
    %cst_162 = arith.constant dense<0.000000e+00> : vector<16xf32>
    %446 = vector.multi_reduction <add>, %445, %cst_162 [1] : vector<16x16xf32> to vector<16xf32>
    %447 = vector.shape_cast %446 : vector<16xf32> to vector<16x1xf32>
    %448 = tpu.reciprocal %447 {approx = true} : vector<16x1xf32> -> vector<16x1xf32>
    %449 = vector.broadcast %448 : vector<16x1xf32> to vector<16x16xf32>
    %450 = arith.mulf %445, %449 : vector<16x16xf32>
    %451 = arith.truncf %450 : vector<16x16xf32> to vector<16x16xbf16>
    %452 = vector.extract_strided_slice %432 {offsets = [0, 0], sizes = [16, 8], strides = [1, 1]} : vector<16x32xf32> to vector<16x8xf32>
    %453 = arith.truncf %452 : vector<16x8xf32> to vector<16x8xbf16>
    %cst_163 = arith.constant dense<0.000000e+00> : vector<16x8xf32>
    %454 = tpu.matmul %451, %453, %cst_163 {dimension_numbers = #tpu.dot_dimension_numbers<[1], [0], [0], [1], [0, 0, 1, 1], [], []>} : vector<16x16xbf16>, vector<16x8xbf16>, vector<16x8xf32> -> vector<16x8xf32>
    %455 = vector.extract_strided_slice %430 {offsets = [0, 8], sizes = [16, 8], strides = [1, 1]} : vector<16x32xf32> to vector<16x8xf32>
    %456 = arith.truncf %455 : vector<16x8xf32> to vector<16x8xbf16>
    %457 = vector.extract_strided_slice %431 {offsets = [0, 8], sizes = [16, 8], strides = [1, 1]} : vector<16x32xf32> to vector<16x8xf32>
    %458 = arith.truncf %457 : vector<16x8xf32> to vector<16x8xbf16>
    %cst_164 = arith.constant dense<0.000000e+00> : vector<16x16xf32>
    %459 = tpu.matmul %456, %458, %cst_164 {dimension_numbers = #tpu.dot_dimension_numbers<[1], [1], [0], [0], [0, 0, 1, 0], [], []>} : vector<16x8xbf16>, vector<16x8xbf16>, vector<16x16xf32> -> vector<16x16xf32>
    %460 = vector.broadcast %433 : vector<1x16xf32> to vector<16x16xf32>
    %461 = arith.addf %459, %460 : vector<16x16xf32>
    %cst_165 = arith.constant dense<0xFF800000> : vector<16xf32>
    %462 = vector.multi_reduction <maximumf>, %461, %cst_165 [1] : vector<16x16xf32> to vector<16xf32>
    %463 = vector.shape_cast %462 : vector<16xf32> to vector<16x1xf32>
    %464 = vector.broadcast %463 : vector<16x1xf32> to vector<16x16xf32>
    %465 = arith.subf %461, %464 : vector<16x16xf32>
    %466 = math.exp %465 : vector<16x16xf32>
    %cst_166 = arith.constant dense<0.000000e+00> : vector<16xf32>
    %467 = vector.multi_reduction <add>, %466, %cst_166 [1] : vector<16x16xf32> to vector<16xf32>
    %468 = vector.shape_cast %467 : vector<16xf32> to vector<16x1xf32>
    %469 = tpu.reciprocal %468 {approx = true} : vector<16x1xf32> -> vector<16x1xf32>
    %470 = vector.broadcast %469 : vector<16x1xf32> to vector<16x16xf32>
    %471 = arith.mulf %466, %470 : vector<16x16xf32>
    %472 = arith.truncf %471 : vector<16x16xf32> to vector<16x16xbf16>
    %473 = vector.extract_strided_slice %432 {offsets = [0, 8], sizes = [16, 8], strides = [1, 1]} : vector<16x32xf32> to vector<16x8xf32>
    %474 = arith.truncf %473 : vector<16x8xf32> to vector<16x8xbf16>
    %cst_167 = arith.constant dense<0.000000e+00> : vector<16x8xf32>
    %475 = tpu.matmul %472, %474, %cst_167 {dimension_numbers = #tpu.dot_dimension_numbers<[1], [0], [0], [1], [0, 0, 1, 1], [], []>} : vector<16x16xbf16>, vector<16x8xbf16>, vector<16x8xf32> -> vector<16x8xf32>
    %476 = vector.extract_strided_slice %430 {offsets = [0, 16], sizes = [16, 8], strides = [1, 1]} : vector<16x32xf32> to vector<16x8xf32>
    %477 = arith.truncf %476 : vector<16x8xf32> to vector<16x8xbf16>
    %478 = vector.extract_strided_slice %431 {offsets = [0, 16], sizes = [16, 8], strides = [1, 1]} : vector<16x32xf32> to vector<16x8xf32>
    %479 = arith.truncf %478 : vector<16x8xf32> to vector<16x8xbf16>
    %cst_168 = arith.constant dense<0.000000e+00> : vector<16x16xf32>
    %480 = tpu.matmul %477, %479, %cst_168 {dimension_numbers = #tpu.dot_dimension_numbers<[1], [1], [0], [0], [0, 0, 1, 0], [], []>} : vector<16x8xbf16>, vector<16x8xbf16>, vector<16x16xf32> -> vector<16x16xf32>
    %481 = vector.broadcast %433 : vector<1x16xf32> to vector<16x16xf32>
    %482 = arith.addf %480, %481 : vector<16x16xf32>
    %cst_169 = arith.constant dense<0xFF800000> : vector<16xf32>
    %483 = vector.multi_reduction <maximumf>, %482, %cst_169 [1] : vector<16x16xf32> to vector<16xf32>
    %484 = vector.shape_cast %483 : vector<16xf32> to vector<16x1xf32>
    %485 = vector.broadcast %484 : vector<16x1xf32> to vector<16x16xf32>
    %486 = arith.subf %482, %485 : vector<16x16xf32>
    %487 = math.exp %486 : vector<16x16xf32>
    %cst_170 = arith.constant dense<0.000000e+00> : vector<16xf32>
    %488 = vector.multi_reduction <add>, %487, %cst_170 [1] : vector<16x16xf32> to vector<16xf32>
    %489 = vector.shape_cast %488 : vector<16xf32> to vector<16x1xf32>
    %490 = tpu.reciprocal %489 {approx = true} : vector<16x1xf32> -> vector<16x1xf32>
    %491 = vector.broadcast %490 : vector<16x1xf32> to vector<16x16xf32>
    %492 = arith.mulf %487, %491 : vector<16x16xf32>
    %493 = arith.truncf %492 : vector<16x16xf32> to vector<16x16xbf16>
    %494 = vector.extract_strided_slice %432 {offsets = [0, 16], sizes = [16, 8], strides = [1, 1]} : vector<16x32xf32> to vector<16x8xf32>
    %495 = arith.truncf %494 : vector<16x8xf32> to vector<16x8xbf16>
    %cst_171 = arith.constant dense<0.000000e+00> : vector<16x8xf32>
    %496 = tpu.matmul %493, %495, %cst_171 {dimension_numbers = #tpu.dot_dimension_numbers<[1], [0], [0], [1], [0, 0, 1, 1], [], []>} : vector<16x16xbf16>, vector<16x8xbf16>, vector<16x8xf32> -> vector<16x8xf32>
    %497 = vector.extract_strided_slice %430 {offsets = [0, 24], sizes = [16, 8], strides = [1, 1]} : vector<16x32xf32> to vector<16x8xf32>
    %498 = arith.truncf %497 : vector<16x8xf32> to vector<16x8xbf16>
    %499 = vector.extract_strided_slice %431 {offsets = [0, 24], sizes = [16, 8], strides = [1, 1]} : vector<16x32xf32> to vector<16x8xf32>
    %500 = arith.truncf %499 : vector<16x8xf32> to vector<16x8xbf16>
    %cst_172 = arith.constant dense<0.000000e+00> : vector<16x16xf32>
    %501 = tpu.matmul %498, %500, %cst_172 {dimension_numbers = #tpu.dot_dimension_numbers<[1], [1], [0], [0], [0, 0, 1, 0], [], []>} : vector<16x8xbf16>, vector<16x8xbf16>, vector<16x16xf32> -> vector<16x16xf32>
    %502 = vector.broadcast %433 : vector<1x16xf32> to vector<16x16xf32>
    %503 = arith.addf %501, %502 : vector<16x16xf32>
    %cst_173 = arith.constant dense<0xFF800000> : vector<16xf32>
    %504 = vector.multi_reduction <maximumf>, %503, %cst_173 [1] : vector<16x16xf32> to vector<16xf32>
    %505 = vector.shape_cast %504 : vector<16xf32> to vector<16x1xf32>
    %506 = vector.broadcast %505 : vector<16x1xf32> to vector<16x16xf32>
    %507 = arith.subf %503, %506 : vector<16x16xf32>
    %508 = math.exp %507 : vector<16x16xf32>
    %cst_174 = arith.constant dense<0.000000e+00> : vector<16xf32>
    %509 = vector.multi_reduction <add>, %508, %cst_174 [1] : vector<16x16xf32> to vector<16xf32>
    %510 = vector.shape_cast %509 : vector<16xf32> to vector<16x1xf32>
    %511 = tpu.reciprocal %510 {approx = true} : vector<16x1xf32> -> vector<16x1xf32>
    %512 = vector.broadcast %511 : vector<16x1xf32> to vector<16x16xf32>
    %513 = arith.mulf %508, %512 : vector<16x16xf32>
    %514 = arith.truncf %513 : vector<16x16xf32> to vector<16x16xbf16>
    %515 = vector.extract_strided_slice %432 {offsets = [0, 24], sizes = [16, 8], strides = [1, 1]} : vector<16x32xf32> to vector<16x8xf32>
    %516 = arith.truncf %515 : vector<16x8xf32> to vector<16x8xbf16>
    %cst_175 = arith.constant dense<0.000000e+00> : vector<16x8xf32>
    %517 = tpu.matmul %514, %516, %cst_175 {dimension_numbers = #tpu.dot_dimension_numbers<[1], [0], [0], [1], [0, 0, 1, 1], [], []>} : vector<16x16xbf16>, vector<16x8xbf16>, vector<16x8xf32> -> vector<16x8xf32>
    %518 = tpu.concatenate %454, %475, %496, %517 in 1 : vector<16x8xf32>, vector<16x8xf32>, vector<16x8xf32>, vector<16x8xf32> -> vector<16x32xf32>
    %519 = tpu.concatenate %429, %518 in 0 : vector<16x32xf32>, vector<16x32xf32> -> vector<32x32xf32>
    %520 = arith.truncf %519 : vector<32x32xf32> to vector<32x32xbf16>
    %cst_176 = arith.constant dense<0.000000e+00> : vector<32x32xf32>
    %521 = tpu.matmul %520, %338, %cst_176 {dimension_numbers = #tpu.dot_dimension_numbers<[1], [0], [0], [1], [0, 0, 1, 1], [], []>} : vector<32x32xbf16>, vector<32x32xbf16>, vector<32x32xf32> -> vector<32x32xf32>
    %522 = vector.broadcast %340 : vector<1x32xf32> to vector<32x32xf32>
    %523 = arith.addf %521, %522 : vector<32x32xf32>
    %524 = arith.addf %309, %523 : vector<32x32xf32>
    %c1_177 = arith.constant 1 : index
    %c0_178 = arith.constant 0 : index
    %c0_179 = arith.constant 0 : index
    %525 = vector.load %arg16[%c1_177, %c0_178, %c0_179] : memref<2x1x32xf32, #tpu.memory_space<vmem>>, vector<1x1x32xf32>
    %526 = vector.shape_cast %525 : vector<1x1x32xf32> to vector<1x32xf32>
    %c1_180 = arith.constant 1 : index
    %c0_181 = arith.constant 0 : index
    %c0_182 = arith.constant 0 : index
    %527 = vector.load %arg17[%c1_180, %c0_181, %c0_182] : memref<2x1x32xf32, #tpu.memory_space<vmem>>, vector<1x1x32xf32>
    %528 = vector.shape_cast %527 : vector<1x1x32xf32> to vector<1x32xf32>
    %cst_183 = arith.constant dense<0.000000e+00> : vector<32xf32>
    %529 = vector.multi_reduction <add>, %524, %cst_183 [1] : vector<32x32xf32> to vector<32xf32>
    %530 = vector.shape_cast %529 : vector<32xf32> to vector<32x1xf32>
    %cst_184 = arith.constant 3.200000e+01 : f32
    %531 = vector.broadcast %cst_184 : f32 to vector<32x1xf32>
    %532 = arith.divf %530, %531 : vector<32x1xf32>
    %533 = vector.broadcast %532 : vector<32x1xf32> to vector<32x32xf32>
    %534 = arith.subf %524, %533 : vector<32x32xf32>
    %535 = arith.mulf %534, %534 : vector<32x32xf32>
    %cst_185 = arith.constant dense<0.000000e+00> : vector<32xf32>
    %536 = vector.multi_reduction <add>, %535, %cst_185 [1] : vector<32x32xf32> to vector<32xf32>
    %537 = vector.shape_cast %536 : vector<32xf32> to vector<32x1xf32>
    %cst_186 = arith.constant 3.200000e+01 : f32
    %538 = vector.broadcast %cst_186 : f32 to vector<32x1xf32>
    %539 = arith.divf %537, %538 : vector<32x1xf32>
    %540 = vector.broadcast %532 : vector<32x1xf32> to vector<32x32xf32>
    %541 = arith.subf %524, %540 : vector<32x32xf32>
    %cst_187 = arith.constant 9.99999974E-6 : f32
    %542 = vector.broadcast %cst_187 : f32 to vector<32x1xf32>
    %543 = arith.addf %539, %542 : vector<32x1xf32>
    %544 = math.rsqrt %543 : vector<32x1xf32>
    %545 = vector.broadcast %544 : vector<32x1xf32> to vector<32x32xf32>
    %546 = arith.mulf %541, %545 : vector<32x32xf32>
    %547 = vector.broadcast %526 : vector<1x32xf32> to vector<32x32xf32>
    %548 = arith.mulf %546, %547 : vector<32x32xf32>
    %549 = vector.broadcast %528 : vector<1x32xf32> to vector<32x32xf32>
    %550 = arith.addf %548, %549 : vector<32x32xf32>
    %c1_188 = arith.constant 1 : index
    %c0_189 = arith.constant 0 : index
    %c0_190 = arith.constant 0 : index
    %551 = vector.load %arg18[%c1_188, %c0_189, %c0_190] : memref<2x32x64xbf16, #tpu.memory_space<vmem>>, vector<1x32x64xbf16>
    %552 = vector.shape_cast %551 : vector<1x32x64xbf16> to vector<32x64xbf16>
    %553 = arith.truncf %550 : vector<32x32xf32> to vector<32x32xbf16>
    %cst_191 = arith.constant dense<0.000000e+00> : vector<32x64xf32>
    %554 = tpu.matmul %553, %552, %cst_191 {dimension_numbers = #tpu.dot_dimension_numbers<[1], [0], [0], [1], [0, 0, 1, 1], [], []>} : vector<32x32xbf16>, vector<32x64xbf16>, vector<32x64xf32> -> vector<32x64xf32>
    %c1_192 = arith.constant 1 : index
    %c0_193 = arith.constant 0 : index
    %c0_194 = arith.constant 0 : index
    %555 = vector.load %arg19[%c1_192, %c0_193, %c0_194] : memref<2x1x64xf32, #tpu.memory_space<vmem>>, vector<1x1x64xf32>
    %556 = vector.shape_cast %555 : vector<1x1x64xf32> to vector<1x64xf32>
    %557 = vector.broadcast %556 : vector<1x64xf32> to vector<32x64xf32>
    %558 = arith.addf %554, %557 : vector<32x64xf32>
    %cst_195 = arith.constant 0.000000e+00 : f32
    %559 = vector.broadcast %cst_195 : f32 to vector<32x64xf32>
    %560 = arith.maximumf %558, %559 : vector<32x64xf32>
    %c1_196 = arith.constant 1 : index
    %c0_197 = arith.constant 0 : index
    %c0_198 = arith.constant 0 : index
    %561 = vector.load %arg20[%c1_196, %c0_197, %c0_198] : memref<2x64x32xbf16, #tpu.memory_space<vmem>>, vector<1x64x32xbf16>
    %562 = vector.shape_cast %561 : vector<1x64x32xbf16> to vector<64x32xbf16>
    %563 = arith.truncf %560 : vector<32x64xf32> to vector<32x64xbf16>
    %cst_199 = arith.constant dense<0.000000e+00> : vector<32x32xf32>
    %564 = tpu.matmul %563, %562, %cst_199 {dimension_numbers = #tpu.dot_dimension_numbers<[1], [0], [0], [1], [0, 0, 1, 1], [], []>} : vector<32x64xbf16>, vector<64x32xbf16>, vector<32x32xf32> -> vector<32x32xf32>
    %c1_200 = arith.constant 1 : index
    %c0_201 = arith.constant 0 : index
    %c0_202 = arith.constant 0 : index
    %565 = vector.load %arg21[%c1_200, %c0_201, %c0_202] : memref<2x1x32xf32, #tpu.memory_space<vmem>>, vector<1x1x32xf32>
    %566 = vector.shape_cast %565 : vector<1x1x32xf32> to vector<1x32xf32>
    %567 = vector.broadcast %566 : vector<1x32xf32> to vector<32x32xf32>
    %568 = arith.addf %564, %567 : vector<32x32xf32>
    %569 = arith.addf %550, %568 : vector<32x32xf32>
    %c1_203 = arith.constant 1 : index
    %c0_204 = arith.constant 0 : index
    %c0_205 = arith.constant 0 : index
    %570 = vector.load %arg22[%c1_203, %c0_204, %c0_205] : memref<2x1x32xf32, #tpu.memory_space<vmem>>, vector<1x1x32xf32>
    %571 = vector.shape_cast %570 : vector<1x1x32xf32> to vector<1x32xf32>
    %c1_206 = arith.constant 1 : index
    %c0_207 = arith.constant 0 : index
    %c0_208 = arith.constant 0 : index
    %572 = vector.load %arg23[%c1_206, %c0_207, %c0_208] : memref<2x1x32xf32, #tpu.memory_space<vmem>>, vector<1x1x32xf32>
    %573 = vector.shape_cast %572 : vector<1x1x32xf32> to vector<1x32xf32>
    %cst_209 = arith.constant dense<0.000000e+00> : vector<32xf32>
    %574 = vector.multi_reduction <add>, %569, %cst_209 [1] : vector<32x32xf32> to vector<32xf32>
    %575 = vector.shape_cast %574 : vector<32xf32> to vector<32x1xf32>
    %cst_210 = arith.constant 3.200000e+01 : f32
    %576 = vector.broadcast %cst_210 : f32 to vector<32x1xf32>
    %577 = arith.divf %575, %576 : vector<32x1xf32>
    %578 = vector.broadcast %577 : vector<32x1xf32> to vector<32x32xf32>
    %579 = arith.subf %569, %578 : vector<32x32xf32>
    %580 = arith.mulf %579, %579 : vector<32x32xf32>
    %cst_211 = arith.constant dense<0.000000e+00> : vector<32xf32>
    %581 = vector.multi_reduction <add>, %580, %cst_211 [1] : vector<32x32xf32> to vector<32xf32>
    %582 = vector.shape_cast %581 : vector<32xf32> to vector<32x1xf32>
    %cst_212 = arith.constant 3.200000e+01 : f32
    %583 = vector.broadcast %cst_212 : f32 to vector<32x1xf32>
    %584 = arith.divf %582, %583 : vector<32x1xf32>
    %585 = vector.broadcast %577 : vector<32x1xf32> to vector<32x32xf32>
    %586 = arith.subf %569, %585 : vector<32x32xf32>
    %cst_213 = arith.constant 9.99999974E-6 : f32
    %587 = vector.broadcast %cst_213 : f32 to vector<32x1xf32>
    %588 = arith.addf %584, %587 : vector<32x1xf32>
    %589 = math.rsqrt %588 : vector<32x1xf32>
    %590 = vector.broadcast %589 : vector<32x1xf32> to vector<32x32xf32>
    %591 = arith.mulf %586, %590 : vector<32x32xf32>
    %592 = vector.broadcast %571 : vector<1x32xf32> to vector<32x32xf32>
    %593 = arith.mulf %591, %592 : vector<32x32xf32>
    %594 = vector.broadcast %573 : vector<1x32xf32> to vector<32x32xf32>
    %595 = arith.addf %593, %594 : vector<32x32xf32>
    %596 = arith.addf %595, %20 : vector<32x32xf32>
    %c0_214 = arith.constant 0 : index
    %c0_215 = arith.constant 0 : index
    %597 = vector.load %arg50[%c0_214, %c0_215] : memref<1x32xf32, #tpu.memory_space<vmem>>, vector<1x32xf32>
    %598 = tpu.concatenate %597, %597 in 0 : vector<1x32xf32>, vector<1x32xf32> -> vector<2x32xf32>
    %cst_216 = arith.constant 0.000000e+00 : f32
    %599 = vector.broadcast %cst_216 : f32 to vector<2x32xf32>
    %600 = arith.addf %599, %598 : vector<2x32xf32>
    %c0_217 = arith.constant 0 : index
    %c0_218 = arith.constant 0 : index
    %c0_219 = arith.constant 0 : index
    %601 = vector.load %arg24[%c0_217, %c0_218, %c0_219] : memref<1x32x32xbf16, #tpu.memory_space<vmem>>, vector<1x32x32xbf16>
    %602 = vector.shape_cast %601 : vector<1x32x32xbf16> to vector<32x32xbf16>
    %603 = arith.truncf %600 : vector<2x32xf32> to vector<2x32xbf16>
    %cst_220 = arith.constant dense<0.000000e+00> : vector<2x32xf32>
    %604 = tpu.matmul %603, %602, %cst_220 {dimension_numbers = #tpu.dot_dimension_numbers<[1], [0], [0], [1], [0, 0, 1, 1], [], []>} : vector<2x32xbf16>, vector<32x32xbf16>, vector<2x32xf32> -> vector<2x32xf32>
    %c0_221 = arith.constant 0 : index
    %c0_222 = arith.constant 0 : index
    %c0_223 = arith.constant 0 : index
    %605 = vector.load %arg27[%c0_221, %c0_222, %c0_223] : memref<1x1x32xf32, #tpu.memory_space<vmem>>, vector<1x1x32xf32>
    %606 = vector.shape_cast %605 : vector<1x1x32xf32> to vector<1x32xf32>
    %607 = vector.broadcast %606 : vector<1x32xf32> to vector<2x32xf32>
    %608 = arith.addf %604, %607 : vector<2x32xf32>
    %cst_224 = arith.constant 0.353553385 : f32
    %609 = vector.broadcast %cst_224 : f32 to vector<2x32xf32>
    %610 = arith.mulf %608, %609 : vector<2x32xf32>
    %c0_225 = arith.constant 0 : index
    %c0_226 = arith.constant 0 : index
    %c0_227 = arith.constant 0 : index
    %611 = vector.load %arg25[%c0_225, %c0_226, %c0_227] : memref<1x32x32xbf16, #tpu.memory_space<vmem>>, vector<1x32x32xbf16>
    %612 = vector.shape_cast %611 : vector<1x32x32xbf16> to vector<32x32xbf16>
    %613 = arith.truncf %600 : vector<2x32xf32> to vector<2x32xbf16>
    %cst_228 = arith.constant dense<0.000000e+00> : vector<2x32xf32>
    %614 = tpu.matmul %613, %612, %cst_228 {dimension_numbers = #tpu.dot_dimension_numbers<[1], [0], [0], [1], [0, 0, 1, 1], [], []>} : vector<2x32xbf16>, vector<32x32xbf16>, vector<2x32xf32> -> vector<2x32xf32>
    %c0_229 = arith.constant 0 : index
    %c0_230 = arith.constant 0 : index
    %c0_231 = arith.constant 0 : index
    %615 = vector.load %arg28[%c0_229, %c0_230, %c0_231] : memref<1x1x32xf32, #tpu.memory_space<vmem>>, vector<1x1x32xf32>
    %616 = vector.shape_cast %615 : vector<1x1x32xf32> to vector<1x32xf32>
    %617 = vector.broadcast %616 : vector<1x32xf32> to vector<2x32xf32>
    %618 = arith.addf %614, %617 : vector<2x32xf32>
    %c0_232 = arith.constant 0 : index
    %c0_233 = arith.constant 0 : index
    %c0_234 = arith.constant 0 : index
    %619 = vector.load %arg26[%c0_232, %c0_233, %c0_234] : memref<1x32x32xbf16, #tpu.memory_space<vmem>>, vector<1x32x32xbf16>
    %620 = vector.shape_cast %619 : vector<1x32x32xbf16> to vector<32x32xbf16>
    %621 = arith.truncf %599 : vector<2x32xf32> to vector<2x32xbf16>
    %cst_235 = arith.constant dense<0.000000e+00> : vector<2x32xf32>
    %622 = tpu.matmul %621, %620, %cst_235 {dimension_numbers = #tpu.dot_dimension_numbers<[1], [0], [0], [1], [0, 0, 1, 1], [], []>} : vector<2x32xbf16>, vector<32x32xbf16>, vector<2x32xf32> -> vector<2x32xf32>
    %c0_236 = arith.constant 0 : index
    %c0_237 = arith.constant 0 : index
    %c0_238 = arith.constant 0 : index
    %623 = vector.load %arg29[%c0_236, %c0_237, %c0_238] : memref<1x1x32xf32, #tpu.memory_space<vmem>>, vector<1x1x32xf32>
    %624 = vector.shape_cast %623 : vector<1x1x32xf32> to vector<1x32xf32>
    %625 = vector.broadcast %624 : vector<1x32xf32> to vector<2x32xf32>
    %626 = arith.addf %622, %625 : vector<2x32xf32>
    %c0_239 = arith.constant 0 : index
    %c0_240 = arith.constant 0 : index
    %c0_241 = arith.constant 0 : index
    %627 = vector.load %arg30[%c0_239, %c0_240, %c0_241] : memref<1x32x32xbf16, #tpu.memory_space<vmem>>, vector<1x32x32xbf16>
    %628 = vector.shape_cast %627 : vector<1x32x32xbf16> to vector<32x32xbf16>
    %c0_242 = arith.constant 0 : index
    %c0_243 = arith.constant 0 : index
    %c0_244 = arith.constant 0 : index
    %629 = vector.load %arg31[%c0_242, %c0_243, %c0_244] : memref<1x1x32xf32, #tpu.memory_space<vmem>>, vector<1x1x32xf32>
    %630 = vector.shape_cast %629 : vector<1x1x32xf32> to vector<1x32xf32>
    %631 = vector.extract_strided_slice %610 {offsets = [0, 0], sizes = [1, 32], strides = [1, 1]} : vector<2x32xf32> to vector<1x32xf32>
    %632 = vector.extract_strided_slice %618 {offsets = [0, 0], sizes = [1, 32], strides = [1, 1]} : vector<2x32xf32> to vector<1x32xf32>
    %633 = vector.extract_strided_slice %626 {offsets = [0, 0], sizes = [1, 32], strides = [1, 1]} : vector<2x32xf32> to vector<1x32xf32>
    %634 = vector.extract_strided_slice %631 {offsets = [0, 0], sizes = [1, 8], strides = [1, 1]} : vector<1x32xf32> to vector<1x8xf32>
    %635 = arith.truncf %634 : vector<1x8xf32> to vector<1x8xbf16>
    %636 = vector.extract_strided_slice %632 {offsets = [0, 0], sizes = [1, 8], strides = [1, 1]} : vector<1x32xf32> to vector<1x8xf32>
    %637 = arith.truncf %636 : vector<1x8xf32> to vector<1x8xbf16>
    %638 = arith.extf %635 : vector<1x8xbf16> to vector<1x8xf32>
    %639 = arith.extf %637 : vector<1x8xbf16> to vector<1x8xf32>
    %cst_245 = arith.constant dense<0.000000e+00> : vector<1xf32>
    %640 = arith.mulf %638, %639 : vector<1x8xf32>
    %641 = vector.multi_reduction <add>, %640, %cst_245 [1] : vector<1x8xf32> to vector<1xf32>
    %642 = vector.shape_cast %641 : vector<1xf32> to vector<1x1xf32>
    %cst_246 = arith.constant dense<0xFF800000> : vector<1xf32>
    %643 = vector.multi_reduction <maximumf>, %642, %cst_246 [1] : vector<1x1xf32> to vector<1xf32>
    %644 = vector.shape_cast %643 : vector<1xf32> to vector<1x1xf32>
    %645 = arith.subf %642, %644 : vector<1x1xf32>
    %646 = math.exp %645 : vector<1x1xf32>
    %cst_247 = arith.constant dense<0.000000e+00> : vector<1xf32>
    %647 = vector.multi_reduction <add>, %646, %cst_247 [1] : vector<1x1xf32> to vector<1xf32>
    %648 = vector.shape_cast %647 : vector<1xf32> to vector<1x1xf32>
    %649 = tpu.reciprocal %648 {approx = true} : vector<1x1xf32> -> vector<1x1xf32>
    %650 = arith.mulf %646, %649 : vector<1x1xf32>
    %651 = arith.truncf %650 : vector<1x1xf32> to vector<1x1xbf16>
    %652 = vector.extract_strided_slice %633 {offsets = [0, 0], sizes = [1, 8], strides = [1, 1]} : vector<1x32xf32> to vector<1x8xf32>
    %653 = arith.truncf %652 : vector<1x8xf32> to vector<1x8xbf16>
    %cst_248 = arith.constant dense<0.000000e+00> : vector<1x8xf32>
    %654 = tpu.matmul %651, %653, %cst_248 {dimension_numbers = #tpu.dot_dimension_numbers<[1], [0], [0], [1], [0, 0, 1, 1], [], []>} : vector<1x1xbf16>, vector<1x8xbf16>, vector<1x8xf32> -> vector<1x8xf32>
    %655 = vector.extract_strided_slice %631 {offsets = [0, 8], sizes = [1, 8], strides = [1, 1]} : vector<1x32xf32> to vector<1x8xf32>
    %656 = arith.truncf %655 : vector<1x8xf32> to vector<1x8xbf16>
    %657 = vector.extract_strided_slice %632 {offsets = [0, 8], sizes = [1, 8], strides = [1, 1]} : vector<1x32xf32> to vector<1x8xf32>
    %658 = arith.truncf %657 : vector<1x8xf32> to vector<1x8xbf16>
    %659 = arith.extf %656 : vector<1x8xbf16> to vector<1x8xf32>
    %660 = arith.extf %658 : vector<1x8xbf16> to vector<1x8xf32>
    %cst_249 = arith.constant dense<0.000000e+00> : vector<1xf32>
    %661 = arith.mulf %659, %660 : vector<1x8xf32>
    %662 = vector.multi_reduction <add>, %661, %cst_249 [1] : vector<1x8xf32> to vector<1xf32>
    %663 = vector.shape_cast %662 : vector<1xf32> to vector<1x1xf32>
    %cst_250 = arith.constant dense<0xFF800000> : vector<1xf32>
    %664 = vector.multi_reduction <maximumf>, %663, %cst_250 [1] : vector<1x1xf32> to vector<1xf32>
    %665 = vector.shape_cast %664 : vector<1xf32> to vector<1x1xf32>
    %666 = arith.subf %663, %665 : vector<1x1xf32>
    %667 = math.exp %666 : vector<1x1xf32>
    %cst_251 = arith.constant dense<0.000000e+00> : vector<1xf32>
    %668 = vector.multi_reduction <add>, %667, %cst_251 [1] : vector<1x1xf32> to vector<1xf32>
    %669 = vector.shape_cast %668 : vector<1xf32> to vector<1x1xf32>
    %670 = tpu.reciprocal %669 {approx = true} : vector<1x1xf32> -> vector<1x1xf32>
    %671 = arith.mulf %667, %670 : vector<1x1xf32>
    %672 = arith.truncf %671 : vector<1x1xf32> to vector<1x1xbf16>
    %673 = vector.extract_strided_slice %633 {offsets = [0, 8], sizes = [1, 8], strides = [1, 1]} : vector<1x32xf32> to vector<1x8xf32>
    %674 = arith.truncf %673 : vector<1x8xf32> to vector<1x8xbf16>
    %cst_252 = arith.constant dense<0.000000e+00> : vector<1x8xf32>
    %675 = tpu.matmul %672, %674, %cst_252 {dimension_numbers = #tpu.dot_dimension_numbers<[1], [0], [0], [1], [0, 0, 1, 1], [], []>} : vector<1x1xbf16>, vector<1x8xbf16>, vector<1x8xf32> -> vector<1x8xf32>
    %676 = vector.extract_strided_slice %631 {offsets = [0, 16], sizes = [1, 8], strides = [1, 1]} : vector<1x32xf32> to vector<1x8xf32>
    %677 = arith.truncf %676 : vector<1x8xf32> to vector<1x8xbf16>
    %678 = vector.extract_strided_slice %632 {offsets = [0, 16], sizes = [1, 8], strides = [1, 1]} : vector<1x32xf32> to vector<1x8xf32>
    %679 = arith.truncf %678 : vector<1x8xf32> to vector<1x8xbf16>
    %680 = arith.extf %677 : vector<1x8xbf16> to vector<1x8xf32>
    %681 = arith.extf %679 : vector<1x8xbf16> to vector<1x8xf32>
    %cst_253 = arith.constant dense<0.000000e+00> : vector<1xf32>
    %682 = arith.mulf %680, %681 : vector<1x8xf32>
    %683 = vector.multi_reduction <add>, %682, %cst_253 [1] : vector<1x8xf32> to vector<1xf32>
    %684 = vector.shape_cast %683 : vector<1xf32> to vector<1x1xf32>
    %cst_254 = arith.constant dense<0xFF800000> : vector<1xf32>
    %685 = vector.multi_reduction <maximumf>, %684, %cst_254 [1] : vector<1x1xf32> to vector<1xf32>
    %686 = vector.shape_cast %685 : vector<1xf32> to vector<1x1xf32>
    %687 = arith.subf %684, %686 : vector<1x1xf32>
    %688 = math.exp %687 : vector<1x1xf32>
    %cst_255 = arith.constant dense<0.000000e+00> : vector<1xf32>
    %689 = vector.multi_reduction <add>, %688, %cst_255 [1] : vector<1x1xf32> to vector<1xf32>
    %690 = vector.shape_cast %689 : vector<1xf32> to vector<1x1xf32>
    %691 = tpu.reciprocal %690 {approx = true} : vector<1x1xf32> -> vector<1x1xf32>
    %692 = arith.mulf %688, %691 : vector<1x1xf32>
    %693 = arith.truncf %692 : vector<1x1xf32> to vector<1x1xbf16>
    %694 = vector.extract_strided_slice %633 {offsets = [0, 16], sizes = [1, 8], strides = [1, 1]} : vector<1x32xf32> to vector<1x8xf32>
    %695 = arith.truncf %694 : vector<1x8xf32> to vector<1x8xbf16>
    %cst_256 = arith.constant dense<0.000000e+00> : vector<1x8xf32>
    %696 = tpu.matmul %693, %695, %cst_256 {dimension_numbers = #tpu.dot_dimension_numbers<[1], [0], [0], [1], [0, 0, 1, 1], [], []>} : vector<1x1xbf16>, vector<1x8xbf16>, vector<1x8xf32> -> vector<1x8xf32>
    %697 = vector.extract_strided_slice %631 {offsets = [0, 24], sizes = [1, 8], strides = [1, 1]} : vector<1x32xf32> to vector<1x8xf32>
    %698 = arith.truncf %697 : vector<1x8xf32> to vector<1x8xbf16>
    %699 = vector.extract_strided_slice %632 {offsets = [0, 24], sizes = [1, 8], strides = [1, 1]} : vector<1x32xf32> to vector<1x8xf32>
    %700 = arith.truncf %699 : vector<1x8xf32> to vector<1x8xbf16>
    %701 = arith.extf %698 : vector<1x8xbf16> to vector<1x8xf32>
    %702 = arith.extf %700 : vector<1x8xbf16> to vector<1x8xf32>
    %cst_257 = arith.constant dense<0.000000e+00> : vector<1xf32>
    %703 = arith.mulf %701, %702 : vector<1x8xf32>
    %704 = vector.multi_reduction <add>, %703, %cst_257 [1] : vector<1x8xf32> to vector<1xf32>
    %705 = vector.shape_cast %704 : vector<1xf32> to vector<1x1xf32>
    %cst_258 = arith.constant dense<0xFF800000> : vector<1xf32>
    %706 = vector.multi_reduction <maximumf>, %705, %cst_258 [1] : vector<1x1xf32> to vector<1xf32>
    %707 = vector.shape_cast %706 : vector<1xf32> to vector<1x1xf32>
    %708 = arith.subf %705, %707 : vector<1x1xf32>
    %709 = math.exp %708 : vector<1x1xf32>
    %cst_259 = arith.constant dense<0.000000e+00> : vector<1xf32>
    %710 = vector.multi_reduction <add>, %709, %cst_259 [1] : vector<1x1xf32> to vector<1xf32>
    %711 = vector.shape_cast %710 : vector<1xf32> to vector<1x1xf32>
    %712 = tpu.reciprocal %711 {approx = true} : vector<1x1xf32> -> vector<1x1xf32>
    %713 = arith.mulf %709, %712 : vector<1x1xf32>
    %714 = arith.truncf %713 : vector<1x1xf32> to vector<1x1xbf16>
    %715 = vector.extract_strided_slice %633 {offsets = [0, 24], sizes = [1, 8], strides = [1, 1]} : vector<1x32xf32> to vector<1x8xf32>
    %716 = arith.truncf %715 : vector<1x8xf32> to vector<1x8xbf16>
    %cst_260 = arith.constant dense<0.000000e+00> : vector<1x8xf32>
    %717 = tpu.matmul %714, %716, %cst_260 {dimension_numbers = #tpu.dot_dimension_numbers<[1], [0], [0], [1], [0, 0, 1, 1], [], []>} : vector<1x1xbf16>, vector<1x8xbf16>, vector<1x8xf32> -> vector<1x8xf32>
    %718 = tpu.concatenate %654, %675, %696, %717 in 1 : vector<1x8xf32>, vector<1x8xf32>, vector<1x8xf32>, vector<1x8xf32> -> vector<1x32xf32>
    %719 = vector.extract_strided_slice %610 {offsets = [1, 0], sizes = [1, 32], strides = [1, 1]} : vector<2x32xf32> to vector<1x32xf32>
    %720 = vector.extract_strided_slice %618 {offsets = [1, 0], sizes = [1, 32], strides = [1, 1]} : vector<2x32xf32> to vector<1x32xf32>
    %721 = vector.extract_strided_slice %626 {offsets = [1, 0], sizes = [1, 32], strides = [1, 1]} : vector<2x32xf32> to vector<1x32xf32>
    %722 = vector.extract_strided_slice %719 {offsets = [0, 0], sizes = [1, 8], strides = [1, 1]} : vector<1x32xf32> to vector<1x8xf32>
    %723 = arith.truncf %722 : vector<1x8xf32> to vector<1x8xbf16>
    %724 = vector.extract_strided_slice %720 {offsets = [0, 0], sizes = [1, 8], strides = [1, 1]} : vector<1x32xf32> to vector<1x8xf32>
    %725 = arith.truncf %724 : vector<1x8xf32> to vector<1x8xbf16>
    %726 = arith.extf %723 : vector<1x8xbf16> to vector<1x8xf32>
    %727 = arith.extf %725 : vector<1x8xbf16> to vector<1x8xf32>
    %cst_261 = arith.constant dense<0.000000e+00> : vector<1xf32>
    %728 = arith.mulf %726, %727 : vector<1x8xf32>
    %729 = vector.multi_reduction <add>, %728, %cst_261 [1] : vector<1x8xf32> to vector<1xf32>
    %730 = vector.shape_cast %729 : vector<1xf32> to vector<1x1xf32>
    %cst_262 = arith.constant dense<0xFF800000> : vector<1xf32>
    %731 = vector.multi_reduction <maximumf>, %730, %cst_262 [1] : vector<1x1xf32> to vector<1xf32>
    %732 = vector.shape_cast %731 : vector<1xf32> to vector<1x1xf32>
    %733 = arith.subf %730, %732 : vector<1x1xf32>
    %734 = math.exp %733 : vector<1x1xf32>
    %cst_263 = arith.constant dense<0.000000e+00> : vector<1xf32>
    %735 = vector.multi_reduction <add>, %734, %cst_263 [1] : vector<1x1xf32> to vector<1xf32>
    %736 = vector.shape_cast %735 : vector<1xf32> to vector<1x1xf32>
    %737 = tpu.reciprocal %736 {approx = true} : vector<1x1xf32> -> vector<1x1xf32>
    %738 = arith.mulf %734, %737 : vector<1x1xf32>
    %739 = arith.truncf %738 : vector<1x1xf32> to vector<1x1xbf16>
    %740 = vector.extract_strided_slice %721 {offsets = [0, 0], sizes = [1, 8], strides = [1, 1]} : vector<1x32xf32> to vector<1x8xf32>
    %741 = arith.truncf %740 : vector<1x8xf32> to vector<1x8xbf16>
    %cst_264 = arith.constant dense<0.000000e+00> : vector<1x8xf32>
    %742 = tpu.matmul %739, %741, %cst_264 {dimension_numbers = #tpu.dot_dimension_numbers<[1], [0], [0], [1], [0, 0, 1, 1], [], []>} : vector<1x1xbf16>, vector<1x8xbf16>, vector<1x8xf32> -> vector<1x8xf32>
    %743 = vector.extract_strided_slice %719 {offsets = [0, 8], sizes = [1, 8], strides = [1, 1]} : vector<1x32xf32> to vector<1x8xf32>
    %744 = arith.truncf %743 : vector<1x8xf32> to vector<1x8xbf16>
    %745 = vector.extract_strided_slice %720 {offsets = [0, 8], sizes = [1, 8], strides = [1, 1]} : vector<1x32xf32> to vector<1x8xf32>
    %746 = arith.truncf %745 : vector<1x8xf32> to vector<1x8xbf16>
    %747 = arith.extf %744 : vector<1x8xbf16> to vector<1x8xf32>
    %748 = arith.extf %746 : vector<1x8xbf16> to vector<1x8xf32>
    %cst_265 = arith.constant dense<0.000000e+00> : vector<1xf32>
    %749 = arith.mulf %747, %748 : vector<1x8xf32>
    %750 = vector.multi_reduction <add>, %749, %cst_265 [1] : vector<1x8xf32> to vector<1xf32>
    %751 = vector.shape_cast %750 : vector<1xf32> to vector<1x1xf32>
    %cst_266 = arith.constant dense<0xFF800000> : vector<1xf32>
    %752 = vector.multi_reduction <maximumf>, %751, %cst_266 [1] : vector<1x1xf32> to vector<1xf32>
    %753 = vector.shape_cast %752 : vector<1xf32> to vector<1x1xf32>
    %754 = arith.subf %751, %753 : vector<1x1xf32>
    %755 = math.exp %754 : vector<1x1xf32>
    %cst_267 = arith.constant dense<0.000000e+00> : vector<1xf32>
    %756 = vector.multi_reduction <add>, %755, %cst_267 [1] : vector<1x1xf32> to vector<1xf32>
    %757 = vector.shape_cast %756 : vector<1xf32> to vector<1x1xf32>
    %758 = tpu.reciprocal %757 {approx = true} : vector<1x1xf32> -> vector<1x1xf32>
    %759 = arith.mulf %755, %758 : vector<1x1xf32>
    %760 = arith.truncf %759 : vector<1x1xf32> to vector<1x1xbf16>
    %761 = vector.extract_strided_slice %721 {offsets = [0, 8], sizes = [1, 8], strides = [1, 1]} : vector<1x32xf32> to vector<1x8xf32>
    %762 = arith.truncf %761 : vector<1x8xf32> to vector<1x8xbf16>
    %cst_268 = arith.constant dense<0.000000e+00> : vector<1x8xf32>
    %763 = tpu.matmul %760, %762, %cst_268 {dimension_numbers = #tpu.dot_dimension_numbers<[1], [0], [0], [1], [0, 0, 1, 1], [], []>} : vector<1x1xbf16>, vector<1x8xbf16>, vector<1x8xf32> -> vector<1x8xf32>
    %764 = vector.extract_strided_slice %719 {offsets = [0, 16], sizes = [1, 8], strides = [1, 1]} : vector<1x32xf32> to vector<1x8xf32>
    %765 = arith.truncf %764 : vector<1x8xf32> to vector<1x8xbf16>
    %766 = vector.extract_strided_slice %720 {offsets = [0, 16], sizes = [1, 8], strides = [1, 1]} : vector<1x32xf32> to vector<1x8xf32>
    %767 = arith.truncf %766 : vector<1x8xf32> to vector<1x8xbf16>
    %768 = arith.extf %765 : vector<1x8xbf16> to vector<1x8xf32>
    %769 = arith.extf %767 : vector<1x8xbf16> to vector<1x8xf32>
    %cst_269 = arith.constant dense<0.000000e+00> : vector<1xf32>
    %770 = arith.mulf %768, %769 : vector<1x8xf32>
    %771 = vector.multi_reduction <add>, %770, %cst_269 [1] : vector<1x8xf32> to vector<1xf32>
    %772 = vector.shape_cast %771 : vector<1xf32> to vector<1x1xf32>
    %cst_270 = arith.constant dense<0xFF800000> : vector<1xf32>
    %773 = vector.multi_reduction <maximumf>, %772, %cst_270 [1] : vector<1x1xf32> to vector<1xf32>
    %774 = vector.shape_cast %773 : vector<1xf32> to vector<1x1xf32>
    %775 = arith.subf %772, %774 : vector<1x1xf32>
    %776 = math.exp %775 : vector<1x1xf32>
    %cst_271 = arith.constant dense<0.000000e+00> : vector<1xf32>
    %777 = vector.multi_reduction <add>, %776, %cst_271 [1] : vector<1x1xf32> to vector<1xf32>
    %778 = vector.shape_cast %777 : vector<1xf32> to vector<1x1xf32>
    %779 = tpu.reciprocal %778 {approx = true} : vector<1x1xf32> -> vector<1x1xf32>
    %780 = arith.mulf %776, %779 : vector<1x1xf32>
    %781 = arith.truncf %780 : vector<1x1xf32> to vector<1x1xbf16>
    %782 = vector.extract_strided_slice %721 {offsets = [0, 16], sizes = [1, 8], strides = [1, 1]} : vector<1x32xf32> to vector<1x8xf32>
    %783 = arith.truncf %782 : vector<1x8xf32> to vector<1x8xbf16>
    %cst_272 = arith.constant dense<0.000000e+00> : vector<1x8xf32>
    %784 = tpu.matmul %781, %783, %cst_272 {dimension_numbers = #tpu.dot_dimension_numbers<[1], [0], [0], [1], [0, 0, 1, 1], [], []>} : vector<1x1xbf16>, vector<1x8xbf16>, vector<1x8xf32> -> vector<1x8xf32>
    %785 = vector.extract_strided_slice %719 {offsets = [0, 24], sizes = [1, 8], strides = [1, 1]} : vector<1x32xf32> to vector<1x8xf32>
    %786 = arith.truncf %785 : vector<1x8xf32> to vector<1x8xbf16>
    %787 = vector.extract_strided_slice %720 {offsets = [0, 24], sizes = [1, 8], strides = [1, 1]} : vector<1x32xf32> to vector<1x8xf32>
    %788 = arith.truncf %787 : vector<1x8xf32> to vector<1x8xbf16>
    %789 = arith.extf %786 : vector<1x8xbf16> to vector<1x8xf32>
    %790 = arith.extf %788 : vector<1x8xbf16> to vector<1x8xf32>
    %cst_273 = arith.constant dense<0.000000e+00> : vector<1xf32>
    %791 = arith.mulf %789, %790 : vector<1x8xf32>
    %792 = vector.multi_reduction <add>, %791, %cst_273 [1] : vector<1x8xf32> to vector<1xf32>
    %793 = vector.shape_cast %792 : vector<1xf32> to vector<1x1xf32>
    %cst_274 = arith.constant dense<0xFF800000> : vector<1xf32>
    %794 = vector.multi_reduction <maximumf>, %793, %cst_274 [1] : vector<1x1xf32> to vector<1xf32>
    %795 = vector.shape_cast %794 : vector<1xf32> to vector<1x1xf32>
    %796 = arith.subf %793, %795 : vector<1x1xf32>
    %797 = math.exp %796 : vector<1x1xf32>
    %cst_275 = arith.constant dense<0.000000e+00> : vector<1xf32>
    %798 = vector.multi_reduction <add>, %797, %cst_275 [1] : vector<1x1xf32> to vector<1xf32>
    %799 = vector.shape_cast %798 : vector<1xf32> to vector<1x1xf32>
    %800 = tpu.reciprocal %799 {approx = true} : vector<1x1xf32> -> vector<1x1xf32>
    %801 = arith.mulf %797, %800 : vector<1x1xf32>
    %802 = arith.truncf %801 : vector<1x1xf32> to vector<1x1xbf16>
    %803 = vector.extract_strided_slice %721 {offsets = [0, 24], sizes = [1, 8], strides = [1, 1]} : vector<1x32xf32> to vector<1x8xf32>
    %804 = arith.truncf %803 : vector<1x8xf32> to vector<1x8xbf16>
    %cst_276 = arith.constant dense<0.000000e+00> : vector<1x8xf32>
    %805 = tpu.matmul %802, %804, %cst_276 {dimension_numbers = #tpu.dot_dimension_numbers<[1], [0], [0], [1], [0, 0, 1, 1], [], []>} : vector<1x1xbf16>, vector<1x8xbf16>, vector<1x8xf32> -> vector<1x8xf32>
    %806 = tpu.concatenate %742, %763, %784, %805 in 1 : vector<1x8xf32>, vector<1x8xf32>, vector<1x8xf32>, vector<1x8xf32> -> vector<1x32xf32>
    %807 = tpu.concatenate %718, %806 in 0 : vector<1x32xf32>, vector<1x32xf32> -> vector<2x32xf32>
    %808 = arith.truncf %807 : vector<2x32xf32> to vector<2x32xbf16>
    %cst_277 = arith.constant dense<0.000000e+00> : vector<2x32xf32>
    %809 = tpu.matmul %808, %628, %cst_277 {dimension_numbers = #tpu.dot_dimension_numbers<[1], [0], [0], [1], [0, 0, 1, 1], [], []>} : vector<2x32xbf16>, vector<32x32xbf16>, vector<2x32xf32> -> vector<2x32xf32>
    %810 = vector.broadcast %630 : vector<1x32xf32> to vector<2x32xf32>
    %811 = arith.addf %809, %810 : vector<2x32xf32>
    %812 = arith.addf %599, %811 : vector<2x32xf32>
    %c0_278 = arith.constant 0 : index
    %c0_279 = arith.constant 0 : index
    %c0_280 = arith.constant 0 : index
    %813 = vector.load %arg32[%c0_278, %c0_279, %c0_280] : memref<1x1x32xf32, #tpu.memory_space<vmem>>, vector<1x1x32xf32>
    %814 = vector.shape_cast %813 : vector<1x1x32xf32> to vector<1x32xf32>
    %c0_281 = arith.constant 0 : index
    %c0_282 = arith.constant 0 : index
    %c0_283 = arith.constant 0 : index
    %815 = vector.load %arg33[%c0_281, %c0_282, %c0_283] : memref<1x1x32xf32, #tpu.memory_space<vmem>>, vector<1x1x32xf32>
    %816 = vector.shape_cast %815 : vector<1x1x32xf32> to vector<1x32xf32>
    %cst_284 = arith.constant dense<0.000000e+00> : vector<2xf32>
    %817 = vector.multi_reduction <add>, %812, %cst_284 [1] : vector<2x32xf32> to vector<2xf32>
    %818 = vector.shape_cast %817 : vector<2xf32> to vector<2x1xf32>
    %cst_285 = arith.constant 3.200000e+01 : f32
    %819 = vector.broadcast %cst_285 : f32 to vector<2x1xf32>
    %820 = arith.divf %818, %819 : vector<2x1xf32>
    %821 = vector.broadcast %820 : vector<2x1xf32> to vector<2x32xf32>
    %822 = arith.subf %812, %821 : vector<2x32xf32>
    %823 = arith.mulf %822, %822 : vector<2x32xf32>
    %cst_286 = arith.constant dense<0.000000e+00> : vector<2xf32>
    %824 = vector.multi_reduction <add>, %823, %cst_286 [1] : vector<2x32xf32> to vector<2xf32>
    %825 = vector.shape_cast %824 : vector<2xf32> to vector<2x1xf32>
    %cst_287 = arith.constant 3.200000e+01 : f32
    %826 = vector.broadcast %cst_287 : f32 to vector<2x1xf32>
    %827 = arith.divf %825, %826 : vector<2x1xf32>
    %828 = vector.broadcast %820 : vector<2x1xf32> to vector<2x32xf32>
    %829 = arith.subf %812, %828 : vector<2x32xf32>
    %cst_288 = arith.constant 9.99999974E-6 : f32
    %830 = vector.broadcast %cst_288 : f32 to vector<2x1xf32>
    %831 = arith.addf %827, %830 : vector<2x1xf32>
    %832 = math.rsqrt %831 : vector<2x1xf32>
    %833 = vector.broadcast %832 : vector<2x1xf32> to vector<2x32xf32>
    %834 = arith.mulf %829, %833 : vector<2x32xf32>
    %835 = vector.broadcast %814 : vector<1x32xf32> to vector<2x32xf32>
    %836 = arith.mulf %834, %835 : vector<2x32xf32>
    %837 = vector.broadcast %816 : vector<1x32xf32> to vector<2x32xf32>
    %838 = arith.addf %836, %837 : vector<2x32xf32>
    %839 = arith.addf %838, %598 : vector<2x32xf32>
    %c0_289 = arith.constant 0 : index
    %c0_290 = arith.constant 0 : index
    %c0_291 = arith.constant 0 : index
    %840 = vector.load %arg34[%c0_289, %c0_290, %c0_291] : memref<1x32x32xbf16, #tpu.memory_space<vmem>>, vector<1x32x32xbf16>
    %841 = vector.shape_cast %840 : vector<1x32x32xbf16> to vector<32x32xbf16>
    %842 = arith.truncf %839 : vector<2x32xf32> to vector<2x32xbf16>
    %cst_292 = arith.constant dense<0.000000e+00> : vector<2x32xf32>
    %843 = tpu.matmul %842, %841, %cst_292 {dimension_numbers = #tpu.dot_dimension_numbers<[1], [0], [0], [1], [0, 0, 1, 1], [], []>} : vector<2x32xbf16>, vector<32x32xbf16>, vector<2x32xf32> -> vector<2x32xf32>
    %c0_293 = arith.constant 0 : index
    %c0_294 = arith.constant 0 : index
    %c0_295 = arith.constant 0 : index
    %844 = vector.load %arg37[%c0_293, %c0_294, %c0_295] : memref<1x1x32xf32, #tpu.memory_space<vmem>>, vector<1x1x32xf32>
    %845 = vector.shape_cast %844 : vector<1x1x32xf32> to vector<1x32xf32>
    %846 = vector.broadcast %845 : vector<1x32xf32> to vector<2x32xf32>
    %847 = arith.addf %843, %846 : vector<2x32xf32>
    %cst_296 = arith.constant 0.353553385 : f32
    %848 = vector.broadcast %cst_296 : f32 to vector<2x32xf32>
    %849 = arith.mulf %847, %848 : vector<2x32xf32>
    %c0_297 = arith.constant 0 : index
    %c0_298 = arith.constant 0 : index
    %c0_299 = arith.constant 0 : index
    %850 = vector.load %arg35[%c0_297, %c0_298, %c0_299] : memref<1x32x32xbf16, #tpu.memory_space<vmem>>, vector<1x32x32xbf16>
    %851 = vector.shape_cast %850 : vector<1x32x32xbf16> to vector<32x32xbf16>
    %852 = arith.truncf %596 : vector<32x32xf32> to vector<32x32xbf16>
    %cst_300 = arith.constant dense<0.000000e+00> : vector<32x32xf32>
    %853 = tpu.matmul %852, %851, %cst_300 {dimension_numbers = #tpu.dot_dimension_numbers<[1], [0], [0], [1], [0, 0, 1, 1], [], []>} : vector<32x32xbf16>, vector<32x32xbf16>, vector<32x32xf32> -> vector<32x32xf32>
    %c0_301 = arith.constant 0 : index
    %c0_302 = arith.constant 0 : index
    %c0_303 = arith.constant 0 : index
    %854 = vector.load %arg38[%c0_301, %c0_302, %c0_303] : memref<1x1x32xf32, #tpu.memory_space<vmem>>, vector<1x1x32xf32>
    %855 = vector.shape_cast %854 : vector<1x1x32xf32> to vector<1x32xf32>
    %856 = vector.broadcast %855 : vector<1x32xf32> to vector<32x32xf32>
    %857 = arith.addf %853, %856 : vector<32x32xf32>
    %c0_304 = arith.constant 0 : index
    %c0_305 = arith.constant 0 : index
    %c0_306 = arith.constant 0 : index
    %858 = vector.load %arg36[%c0_304, %c0_305, %c0_306] : memref<1x32x32xbf16, #tpu.memory_space<vmem>>, vector<1x32x32xbf16>
    %859 = vector.shape_cast %858 : vector<1x32x32xbf16> to vector<32x32xbf16>
    %860 = arith.truncf %595 : vector<32x32xf32> to vector<32x32xbf16>
    %cst_307 = arith.constant dense<0.000000e+00> : vector<32x32xf32>
    %861 = tpu.matmul %860, %859, %cst_307 {dimension_numbers = #tpu.dot_dimension_numbers<[1], [0], [0], [1], [0, 0, 1, 1], [], []>} : vector<32x32xbf16>, vector<32x32xbf16>, vector<32x32xf32> -> vector<32x32xf32>
    %c0_308 = arith.constant 0 : index
    %c0_309 = arith.constant 0 : index
    %c0_310 = arith.constant 0 : index
    %862 = vector.load %arg39[%c0_308, %c0_309, %c0_310] : memref<1x1x32xf32, #tpu.memory_space<vmem>>, vector<1x1x32xf32>
    %863 = vector.shape_cast %862 : vector<1x1x32xf32> to vector<1x32xf32>
    %864 = vector.broadcast %863 : vector<1x32xf32> to vector<32x32xf32>
    %865 = arith.addf %861, %864 : vector<32x32xf32>
    %c0_311 = arith.constant 0 : index
    %c0_312 = arith.constant 0 : index
    %c0_313 = arith.constant 0 : index
    %866 = vector.load %arg40[%c0_311, %c0_312, %c0_313] : memref<1x32x32xbf16, #tpu.memory_space<vmem>>, vector<1x32x32xbf16>
    %867 = vector.shape_cast %866 : vector<1x32x32xbf16> to vector<32x32xbf16>
    %c0_314 = arith.constant 0 : index
    %c0_315 = arith.constant 0 : index
    %c0_316 = arith.constant 0 : index
    %868 = vector.load %arg41[%c0_314, %c0_315, %c0_316] : memref<1x1x32xf32, #tpu.memory_space<vmem>>, vector<1x1x32xf32>
    %869 = vector.shape_cast %868 : vector<1x1x32xf32> to vector<1x32xf32>
    %870 = vector.extract_strided_slice %849 {offsets = [0, 0], sizes = [1, 32], strides = [1, 1]} : vector<2x32xf32> to vector<1x32xf32>
    %871 = vector.extract_strided_slice %857 {offsets = [0, 0], sizes = [16, 32], strides = [1, 1]} : vector<32x32xf32> to vector<16x32xf32>
    %872 = vector.extract_strided_slice %865 {offsets = [0, 0], sizes = [16, 32], strides = [1, 1]} : vector<32x32xf32> to vector<16x32xf32>
    %873 = vector.extract_strided_slice %23 {offsets = [0, 0], sizes = [1, 16], strides = [1, 1]} : vector<2x16xf32> to vector<1x16xf32>
    %874 = vector.extract_strided_slice %870 {offsets = [0, 0], sizes = [1, 8], strides = [1, 1]} : vector<1x32xf32> to vector<1x8xf32>
    %875 = arith.truncf %874 : vector<1x8xf32> to vector<1x8xbf16>
    %876 = vector.extract_strided_slice %871 {offsets = [0, 0], sizes = [16, 8], strides = [1, 1]} : vector<16x32xf32> to vector<16x8xf32>
    %877 = arith.truncf %876 : vector<16x8xf32> to vector<16x8xbf16>
    %cst_317 = arith.constant dense<0.000000e+00> : vector<1x16xf32>
    %878 = tpu.matmul %875, %877, %cst_317 {dimension_numbers = #tpu.dot_dimension_numbers<[1], [1], [0], [0], [0, 0, 1, 0], [], []>} : vector<1x8xbf16>, vector<16x8xbf16>, vector<1x16xf32> -> vector<1x16xf32>
    %879 = arith.addf %878, %873 : vector<1x16xf32>
    %cst_318 = arith.constant dense<0xFF800000> : vector<1xf32>
    %880 = vector.multi_reduction <maximumf>, %879, %cst_318 [1] : vector<1x16xf32> to vector<1xf32>
    %881 = vector.shape_cast %880 : vector<1xf32> to vector<1x1xf32>
    %882 = vector.broadcast %881 : vector<1x1xf32> to vector<1x16xf32>
    %883 = arith.subf %879, %882 : vector<1x16xf32>
    %884 = math.exp %883 : vector<1x16xf32>
    %cst_319 = arith.constant dense<0.000000e+00> : vector<1xf32>
    %885 = vector.multi_reduction <add>, %884, %cst_319 [1] : vector<1x16xf32> to vector<1xf32>
    %886 = vector.shape_cast %885 : vector<1xf32> to vector<1x1xf32>
    %887 = tpu.reciprocal %886 {approx = true} : vector<1x1xf32> -> vector<1x1xf32>
    %888 = vector.broadcast %887 : vector<1x1xf32> to vector<1x16xf32>
    %889 = arith.mulf %884, %888 : vector<1x16xf32>
    %890 = arith.truncf %889 : vector<1x16xf32> to vector<1x16xbf16>
    %891 = vector.extract_strided_slice %872 {offsets = [0, 0], sizes = [16, 8], strides = [1, 1]} : vector<16x32xf32> to vector<16x8xf32>
    %892 = arith.truncf %891 : vector<16x8xf32> to vector<16x8xbf16>
    %cst_320 = arith.constant dense<0.000000e+00> : vector<1x8xf32>
    %893 = tpu.matmul %890, %892, %cst_320 {dimension_numbers = #tpu.dot_dimension_numbers<[1], [0], [0], [1], [0, 0, 1, 1], [], []>} : vector<1x16xbf16>, vector<16x8xbf16>, vector<1x8xf32> -> vector<1x8xf32>
    %894 = vector.extract_strided_slice %870 {offsets = [0, 8], sizes = [1, 8], strides = [1, 1]} : vector<1x32xf32> to vector<1x8xf32>
    %895 = arith.truncf %894 : vector<1x8xf32> to vector<1x8xbf16>
    %896 = vector.extract_strided_slice %871 {offsets = [0, 8], sizes = [16, 8], strides = [1, 1]} : vector<16x32xf32> to vector<16x8xf32>
    %897 = arith.truncf %896 : vector<16x8xf32> to vector<16x8xbf16>
    %cst_321 = arith.constant dense<0.000000e+00> : vector<1x16xf32>
    %898 = tpu.matmul %895, %897, %cst_321 {dimension_numbers = #tpu.dot_dimension_numbers<[1], [1], [0], [0], [0, 0, 1, 0], [], []>} : vector<1x8xbf16>, vector<16x8xbf16>, vector<1x16xf32> -> vector<1x16xf32>
    %899 = arith.addf %898, %873 : vector<1x16xf32>
    %cst_322 = arith.constant dense<0xFF800000> : vector<1xf32>
    %900 = vector.multi_reduction <maximumf>, %899, %cst_322 [1] : vector<1x16xf32> to vector<1xf32>
    %901 = vector.shape_cast %900 : vector<1xf32> to vector<1x1xf32>
    %902 = vector.broadcast %901 : vector<1x1xf32> to vector<1x16xf32>
    %903 = arith.subf %899, %902 : vector<1x16xf32>
    %904 = math.exp %903 : vector<1x16xf32>
    %cst_323 = arith.constant dense<0.000000e+00> : vector<1xf32>
    %905 = vector.multi_reduction <add>, %904, %cst_323 [1] : vector<1x16xf32> to vector<1xf32>
    %906 = vector.shape_cast %905 : vector<1xf32> to vector<1x1xf32>
    %907 = tpu.reciprocal %906 {approx = true} : vector<1x1xf32> -> vector<1x1xf32>
    %908 = vector.broadcast %907 : vector<1x1xf32> to vector<1x16xf32>
    %909 = arith.mulf %904, %908 : vector<1x16xf32>
    %910 = arith.truncf %909 : vector<1x16xf32> to vector<1x16xbf16>
    %911 = vector.extract_strided_slice %872 {offsets = [0, 8], sizes = [16, 8], strides = [1, 1]} : vector<16x32xf32> to vector<16x8xf32>
    %912 = arith.truncf %911 : vector<16x8xf32> to vector<16x8xbf16>
    %cst_324 = arith.constant dense<0.000000e+00> : vector<1x8xf32>
    %913 = tpu.matmul %910, %912, %cst_324 {dimension_numbers = #tpu.dot_dimension_numbers<[1], [0], [0], [1], [0, 0, 1, 1], [], []>} : vector<1x16xbf16>, vector<16x8xbf16>, vector<1x8xf32> -> vector<1x8xf32>
    %914 = vector.extract_strided_slice %870 {offsets = [0, 16], sizes = [1, 8], strides = [1, 1]} : vector<1x32xf32> to vector<1x8xf32>
    %915 = arith.truncf %914 : vector<1x8xf32> to vector<1x8xbf16>
    %916 = vector.extract_strided_slice %871 {offsets = [0, 16], sizes = [16, 8], strides = [1, 1]} : vector<16x32xf32> to vector<16x8xf32>
    %917 = arith.truncf %916 : vector<16x8xf32> to vector<16x8xbf16>
    %cst_325 = arith.constant dense<0.000000e+00> : vector<1x16xf32>
    %918 = tpu.matmul %915, %917, %cst_325 {dimension_numbers = #tpu.dot_dimension_numbers<[1], [1], [0], [0], [0, 0, 1, 0], [], []>} : vector<1x8xbf16>, vector<16x8xbf16>, vector<1x16xf32> -> vector<1x16xf32>
    %919 = arith.addf %918, %873 : vector<1x16xf32>
    %cst_326 = arith.constant dense<0xFF800000> : vector<1xf32>
    %920 = vector.multi_reduction <maximumf>, %919, %cst_326 [1] : vector<1x16xf32> to vector<1xf32>
    %921 = vector.shape_cast %920 : vector<1xf32> to vector<1x1xf32>
    %922 = vector.broadcast %921 : vector<1x1xf32> to vector<1x16xf32>
    %923 = arith.subf %919, %922 : vector<1x16xf32>
    %924 = math.exp %923 : vector<1x16xf32>
    %cst_327 = arith.constant dense<0.000000e+00> : vector<1xf32>
    %925 = vector.multi_reduction <add>, %924, %cst_327 [1] : vector<1x16xf32> to vector<1xf32>
    %926 = vector.shape_cast %925 : vector<1xf32> to vector<1x1xf32>
    %927 = tpu.reciprocal %926 {approx = true} : vector<1x1xf32> -> vector<1x1xf32>
    %928 = vector.broadcast %927 : vector<1x1xf32> to vector<1x16xf32>
    %929 = arith.mulf %924, %928 : vector<1x16xf32>
    %930 = arith.truncf %929 : vector<1x16xf32> to vector<1x16xbf16>
    %931 = vector.extract_strided_slice %872 {offsets = [0, 16], sizes = [16, 8], strides = [1, 1]} : vector<16x32xf32> to vector<16x8xf32>
    %932 = arith.truncf %931 : vector<16x8xf32> to vector<16x8xbf16>
    %cst_328 = arith.constant dense<0.000000e+00> : vector<1x8xf32>
    %933 = tpu.matmul %930, %932, %cst_328 {dimension_numbers = #tpu.dot_dimension_numbers<[1], [0], [0], [1], [0, 0, 1, 1], [], []>} : vector<1x16xbf16>, vector<16x8xbf16>, vector<1x8xf32> -> vector<1x8xf32>
    %934 = vector.extract_strided_slice %870 {offsets = [0, 24], sizes = [1, 8], strides = [1, 1]} : vector<1x32xf32> to vector<1x8xf32>
    %935 = arith.truncf %934 : vector<1x8xf32> to vector<1x8xbf16>
    %936 = vector.extract_strided_slice %871 {offsets = [0, 24], sizes = [16, 8], strides = [1, 1]} : vector<16x32xf32> to vector<16x8xf32>
    %937 = arith.truncf %936 : vector<16x8xf32> to vector<16x8xbf16>
    %cst_329 = arith.constant dense<0.000000e+00> : vector<1x16xf32>
    %938 = tpu.matmul %935, %937, %cst_329 {dimension_numbers = #tpu.dot_dimension_numbers<[1], [1], [0], [0], [0, 0, 1, 0], [], []>} : vector<1x8xbf16>, vector<16x8xbf16>, vector<1x16xf32> -> vector<1x16xf32>
    %939 = arith.addf %938, %873 : vector<1x16xf32>
    %cst_330 = arith.constant dense<0xFF800000> : vector<1xf32>
    %940 = vector.multi_reduction <maximumf>, %939, %cst_330 [1] : vector<1x16xf32> to vector<1xf32>
    %941 = vector.shape_cast %940 : vector<1xf32> to vector<1x1xf32>
    %942 = vector.broadcast %941 : vector<1x1xf32> to vector<1x16xf32>
    %943 = arith.subf %939, %942 : vector<1x16xf32>
    %944 = math.exp %943 : vector<1x16xf32>
    %cst_331 = arith.constant dense<0.000000e+00> : vector<1xf32>
    %945 = vector.multi_reduction <add>, %944, %cst_331 [1] : vector<1x16xf32> to vector<1xf32>
    %946 = vector.shape_cast %945 : vector<1xf32> to vector<1x1xf32>
    %947 = tpu.reciprocal %946 {approx = true} : vector<1x1xf32> -> vector<1x1xf32>
    %948 = vector.broadcast %947 : vector<1x1xf32> to vector<1x16xf32>
    %949 = arith.mulf %944, %948 : vector<1x16xf32>
    %950 = arith.truncf %949 : vector<1x16xf32> to vector<1x16xbf16>
    %951 = vector.extract_strided_slice %872 {offsets = [0, 24], sizes = [16, 8], strides = [1, 1]} : vector<16x32xf32> to vector<16x8xf32>
    %952 = arith.truncf %951 : vector<16x8xf32> to vector<16x8xbf16>
    %cst_332 = arith.constant dense<0.000000e+00> : vector<1x8xf32>
    %953 = tpu.matmul %950, %952, %cst_332 {dimension_numbers = #tpu.dot_dimension_numbers<[1], [0], [0], [1], [0, 0, 1, 1], [], []>} : vector<1x16xbf16>, vector<16x8xbf16>, vector<1x8xf32> -> vector<1x8xf32>
    %954 = tpu.concatenate %893, %913, %933, %953 in 1 : vector<1x8xf32>, vector<1x8xf32>, vector<1x8xf32>, vector<1x8xf32> -> vector<1x32xf32>
    %955 = vector.extract_strided_slice %849 {offsets = [1, 0], sizes = [1, 32], strides = [1, 1]} : vector<2x32xf32> to vector<1x32xf32>
    %956 = vector.extract_strided_slice %857 {offsets = [16, 0], sizes = [16, 32], strides = [1, 1]} : vector<32x32xf32> to vector<16x32xf32>
    %957 = vector.extract_strided_slice %865 {offsets = [16, 0], sizes = [16, 32], strides = [1, 1]} : vector<32x32xf32> to vector<16x32xf32>
    %958 = vector.extract_strided_slice %23 {offsets = [1, 0], sizes = [1, 16], strides = [1, 1]} : vector<2x16xf32> to vector<1x16xf32>
    %959 = vector.extract_strided_slice %955 {offsets = [0, 0], sizes = [1, 8], strides = [1, 1]} : vector<1x32xf32> to vector<1x8xf32>
    %960 = arith.truncf %959 : vector<1x8xf32> to vector<1x8xbf16>
    %961 = vector.extract_strided_slice %956 {offsets = [0, 0], sizes = [16, 8], strides = [1, 1]} : vector<16x32xf32> to vector<16x8xf32>
    %962 = arith.truncf %961 : vector<16x8xf32> to vector<16x8xbf16>
    %cst_333 = arith.constant dense<0.000000e+00> : vector<1x16xf32>
    %963 = tpu.matmul %960, %962, %cst_333 {dimension_numbers = #tpu.dot_dimension_numbers<[1], [1], [0], [0], [0, 0, 1, 0], [], []>} : vector<1x8xbf16>, vector<16x8xbf16>, vector<1x16xf32> -> vector<1x16xf32>
    %964 = arith.addf %963, %958 : vector<1x16xf32>
    %cst_334 = arith.constant dense<0xFF800000> : vector<1xf32>
    %965 = vector.multi_reduction <maximumf>, %964, %cst_334 [1] : vector<1x16xf32> to vector<1xf32>
    %966 = vector.shape_cast %965 : vector<1xf32> to vector<1x1xf32>
    %967 = vector.broadcast %966 : vector<1x1xf32> to vector<1x16xf32>
    %968 = arith.subf %964, %967 : vector<1x16xf32>
    %969 = math.exp %968 : vector<1x16xf32>
    %cst_335 = arith.constant dense<0.000000e+00> : vector<1xf32>
    %970 = vector.multi_reduction <add>, %969, %cst_335 [1] : vector<1x16xf32> to vector<1xf32>
    %971 = vector.shape_cast %970 : vector<1xf32> to vector<1x1xf32>
    %972 = tpu.reciprocal %971 {approx = true} : vector<1x1xf32> -> vector<1x1xf32>
    %973 = vector.broadcast %972 : vector<1x1xf32> to vector<1x16xf32>
    %974 = arith.mulf %969, %973 : vector<1x16xf32>
    %975 = arith.truncf %974 : vector<1x16xf32> to vector<1x16xbf16>
    %976 = vector.extract_strided_slice %957 {offsets = [0, 0], sizes = [16, 8], strides = [1, 1]} : vector<16x32xf32> to vector<16x8xf32>
    %977 = arith.truncf %976 : vector<16x8xf32> to vector<16x8xbf16>
    %cst_336 = arith.constant dense<0.000000e+00> : vector<1x8xf32>
    %978 = tpu.matmul %975, %977, %cst_336 {dimension_numbers = #tpu.dot_dimension_numbers<[1], [0], [0], [1], [0, 0, 1, 1], [], []>} : vector<1x16xbf16>, vector<16x8xbf16>, vector<1x8xf32> -> vector<1x8xf32>
    %979 = vector.extract_strided_slice %955 {offsets = [0, 8], sizes = [1, 8], strides = [1, 1]} : vector<1x32xf32> to vector<1x8xf32>
    %980 = arith.truncf %979 : vector<1x8xf32> to vector<1x8xbf16>
    %981 = vector.extract_strided_slice %956 {offsets = [0, 8], sizes = [16, 8], strides = [1, 1]} : vector<16x32xf32> to vector<16x8xf32>
    %982 = arith.truncf %981 : vector<16x8xf32> to vector<16x8xbf16>
    %cst_337 = arith.constant dense<0.000000e+00> : vector<1x16xf32>
    %983 = tpu.matmul %980, %982, %cst_337 {dimension_numbers = #tpu.dot_dimension_numbers<[1], [1], [0], [0], [0, 0, 1, 0], [], []>} : vector<1x8xbf16>, vector<16x8xbf16>, vector<1x16xf32> -> vector<1x16xf32>
    %984 = arith.addf %983, %958 : vector<1x16xf32>
    %cst_338 = arith.constant dense<0xFF800000> : vector<1xf32>
    %985 = vector.multi_reduction <maximumf>, %984, %cst_338 [1] : vector<1x16xf32> to vector<1xf32>
    %986 = vector.shape_cast %985 : vector<1xf32> to vector<1x1xf32>
    %987 = vector.broadcast %986 : vector<1x1xf32> to vector<1x16xf32>
    %988 = arith.subf %984, %987 : vector<1x16xf32>
    %989 = math.exp %988 : vector<1x16xf32>
    %cst_339 = arith.constant dense<0.000000e+00> : vector<1xf32>
    %990 = vector.multi_reduction <add>, %989, %cst_339 [1] : vector<1x16xf32> to vector<1xf32>
    %991 = vector.shape_cast %990 : vector<1xf32> to vector<1x1xf32>
    %992 = tpu.reciprocal %991 {approx = true} : vector<1x1xf32> -> vector<1x1xf32>
    %993 = vector.broadcast %992 : vector<1x1xf32> to vector<1x16xf32>
    %994 = arith.mulf %989, %993 : vector<1x16xf32>
    %995 = arith.truncf %994 : vector<1x16xf32> to vector<1x16xbf16>
    %996 = vector.extract_strided_slice %957 {offsets = [0, 8], sizes = [16, 8], strides = [1, 1]} : vector<16x32xf32> to vector<16x8xf32>
    %997 = arith.truncf %996 : vector<16x8xf32> to vector<16x8xbf16>
    %cst_340 = arith.constant dense<0.000000e+00> : vector<1x8xf32>
    %998 = tpu.matmul %995, %997, %cst_340 {dimension_numbers = #tpu.dot_dimension_numbers<[1], [0], [0], [1], [0, 0, 1, 1], [], []>} : vector<1x16xbf16>, vector<16x8xbf16>, vector<1x8xf32> -> vector<1x8xf32>
    %999 = vector.extract_strided_slice %955 {offsets = [0, 16], sizes = [1, 8], strides = [1, 1]} : vector<1x32xf32> to vector<1x8xf32>
    %1000 = arith.truncf %999 : vector<1x8xf32> to vector<1x8xbf16>
    %1001 = vector.extract_strided_slice %956 {offsets = [0, 16], sizes = [16, 8], strides = [1, 1]} : vector<16x32xf32> to vector<16x8xf32>
    %1002 = arith.truncf %1001 : vector<16x8xf32> to vector<16x8xbf16>
    %cst_341 = arith.constant dense<0.000000e+00> : vector<1x16xf32>
    %1003 = tpu.matmul %1000, %1002, %cst_341 {dimension_numbers = #tpu.dot_dimension_numbers<[1], [1], [0], [0], [0, 0, 1, 0], [], []>} : vector<1x8xbf16>, vector<16x8xbf16>, vector<1x16xf32> -> vector<1x16xf32>
    %1004 = arith.addf %1003, %958 : vector<1x16xf32>
    %cst_342 = arith.constant dense<0xFF800000> : vector<1xf32>
    %1005 = vector.multi_reduction <maximumf>, %1004, %cst_342 [1] : vector<1x16xf32> to vector<1xf32>
    %1006 = vector.shape_cast %1005 : vector<1xf32> to vector<1x1xf32>
    %1007 = vector.broadcast %1006 : vector<1x1xf32> to vector<1x16xf32>
    %1008 = arith.subf %1004, %1007 : vector<1x16xf32>
    %1009 = math.exp %1008 : vector<1x16xf32>
    %cst_343 = arith.constant dense<0.000000e+00> : vector<1xf32>
    %1010 = vector.multi_reduction <add>, %1009, %cst_343 [1] : vector<1x16xf32> to vector<1xf32>
    %1011 = vector.shape_cast %1010 : vector<1xf32> to vector<1x1xf32>
    %1012 = tpu.reciprocal %1011 {approx = true} : vector<1x1xf32> -> vector<1x1xf32>
    %1013 = vector.broadcast %1012 : vector<1x1xf32> to vector<1x16xf32>
    %1014 = arith.mulf %1009, %1013 : vector<1x16xf32>
    %1015 = arith.truncf %1014 : vector<1x16xf32> to vector<1x16xbf16>
    %1016 = vector.extract_strided_slice %957 {offsets = [0, 16], sizes = [16, 8], strides = [1, 1]} : vector<16x32xf32> to vector<16x8xf32>
    %1017 = arith.truncf %1016 : vector<16x8xf32> to vector<16x8xbf16>
    %cst_344 = arith.constant dense<0.000000e+00> : vector<1x8xf32>
    %1018 = tpu.matmul %1015, %1017, %cst_344 {dimension_numbers = #tpu.dot_dimension_numbers<[1], [0], [0], [1], [0, 0, 1, 1], [], []>} : vector<1x16xbf16>, vector<16x8xbf16>, vector<1x8xf32> -> vector<1x8xf32>
    %1019 = vector.extract_strided_slice %955 {offsets = [0, 24], sizes = [1, 8], strides = [1, 1]} : vector<1x32xf32> to vector<1x8xf32>
    %1020 = arith.truncf %1019 : vector<1x8xf32> to vector<1x8xbf16>
    %1021 = vector.extract_strided_slice %956 {offsets = [0, 24], sizes = [16, 8], strides = [1, 1]} : vector<16x32xf32> to vector<16x8xf32>
    %1022 = arith.truncf %1021 : vector<16x8xf32> to vector<16x8xbf16>
    %cst_345 = arith.constant dense<0.000000e+00> : vector<1x16xf32>
    %1023 = tpu.matmul %1020, %1022, %cst_345 {dimension_numbers = #tpu.dot_dimension_numbers<[1], [1], [0], [0], [0, 0, 1, 0], [], []>} : vector<1x8xbf16>, vector<16x8xbf16>, vector<1x16xf32> -> vector<1x16xf32>
    %1024 = arith.addf %1023, %958 : vector<1x16xf32>
    %cst_346 = arith.constant dense<0xFF800000> : vector<1xf32>
    %1025 = vector.multi_reduction <maximumf>, %1024, %cst_346 [1] : vector<1x16xf32> to vector<1xf32>
    %1026 = vector.shape_cast %1025 : vector<1xf32> to vector<1x1xf32>
    %1027 = vector.broadcast %1026 : vector<1x1xf32> to vector<1x16xf32>
    %1028 = arith.subf %1024, %1027 : vector<1x16xf32>
    %1029 = math.exp %1028 : vector<1x16xf32>
    %cst_347 = arith.constant dense<0.000000e+00> : vector<1xf32>
    %1030 = vector.multi_reduction <add>, %1029, %cst_347 [1] : vector<1x16xf32> to vector<1xf32>
    %1031 = vector.shape_cast %1030 : vector<1xf32> to vector<1x1xf32>
    %1032 = tpu.reciprocal %1031 {approx = true} : vector<1x1xf32> -> vector<1x1xf32>
    %1033 = vector.broadcast %1032 : vector<1x1xf32> to vector<1x16xf32>
    %1034 = arith.mulf %1029, %1033 : vector<1x16xf32>
    %1035 = arith.truncf %1034 : vector<1x16xf32> to vector<1x16xbf16>
    %1036 = vector.extract_strided_slice %957 {offsets = [0, 24], sizes = [16, 8], strides = [1, 1]} : vector<16x32xf32> to vector<16x8xf32>
    %1037 = arith.truncf %1036 : vector<16x8xf32> to vector<16x8xbf16>
    %cst_348 = arith.constant dense<0.000000e+00> : vector<1x8xf32>
    %1038 = tpu.matmul %1035, %1037, %cst_348 {dimension_numbers = #tpu.dot_dimension_numbers<[1], [0], [0], [1], [0, 0, 1, 1], [], []>} : vector<1x16xbf16>, vector<16x8xbf16>, vector<1x8xf32> -> vector<1x8xf32>
    %1039 = tpu.concatenate %978, %998, %1018, %1038 in 1 : vector<1x8xf32>, vector<1x8xf32>, vector<1x8xf32>, vector<1x8xf32> -> vector<1x32xf32>
    %1040 = tpu.concatenate %954, %1039 in 0 : vector<1x32xf32>, vector<1x32xf32> -> vector<2x32xf32>
    %1041 = arith.truncf %1040 : vector<2x32xf32> to vector<2x32xbf16>
    %cst_349 = arith.constant dense<0.000000e+00> : vector<2x32xf32>
    %1042 = tpu.matmul %1041, %867, %cst_349 {dimension_numbers = #tpu.dot_dimension_numbers<[1], [0], [0], [1], [0, 0, 1, 1], [], []>} : vector<2x32xbf16>, vector<32x32xbf16>, vector<2x32xf32> -> vector<2x32xf32>
    %1043 = vector.broadcast %869 : vector<1x32xf32> to vector<2x32xf32>
    %1044 = arith.addf %1042, %1043 : vector<2x32xf32>
    %1045 = arith.addf %838, %1044 : vector<2x32xf32>
    %c0_350 = arith.constant 0 : index
    %c0_351 = arith.constant 0 : index
    %c0_352 = arith.constant 0 : index
    %1046 = vector.load %arg42[%c0_350, %c0_351, %c0_352] : memref<1x1x32xf32, #tpu.memory_space<vmem>>, vector<1x1x32xf32>
    %1047 = vector.shape_cast %1046 : vector<1x1x32xf32> to vector<1x32xf32>
    %c0_353 = arith.constant 0 : index
    %c0_354 = arith.constant 0 : index
    %c0_355 = arith.constant 0 : index
    %1048 = vector.load %arg43[%c0_353, %c0_354, %c0_355] : memref<1x1x32xf32, #tpu.memory_space<vmem>>, vector<1x1x32xf32>
    %1049 = vector.shape_cast %1048 : vector<1x1x32xf32> to vector<1x32xf32>
    %cst_356 = arith.constant dense<0.000000e+00> : vector<2xf32>
    %1050 = vector.multi_reduction <add>, %1045, %cst_356 [1] : vector<2x32xf32> to vector<2xf32>
    %1051 = vector.shape_cast %1050 : vector<2xf32> to vector<2x1xf32>
    %cst_357 = arith.constant 3.200000e+01 : f32
    %1052 = vector.broadcast %cst_357 : f32 to vector<2x1xf32>
    %1053 = arith.divf %1051, %1052 : vector<2x1xf32>
    %1054 = vector.broadcast %1053 : vector<2x1xf32> to vector<2x32xf32>
    %1055 = arith.subf %1045, %1054 : vector<2x32xf32>
    %1056 = arith.mulf %1055, %1055 : vector<2x32xf32>
    %cst_358 = arith.constant dense<0.000000e+00> : vector<2xf32>
    %1057 = vector.multi_reduction <add>, %1056, %cst_358 [1] : vector<2x32xf32> to vector<2xf32>
    %1058 = vector.shape_cast %1057 : vector<2xf32> to vector<2x1xf32>
    %cst_359 = arith.constant 3.200000e+01 : f32
    %1059 = vector.broadcast %cst_359 : f32 to vector<2x1xf32>
    %1060 = arith.divf %1058, %1059 : vector<2x1xf32>
    %1061 = vector.broadcast %1053 : vector<2x1xf32> to vector<2x32xf32>
    %1062 = arith.subf %1045, %1061 : vector<2x32xf32>
    %cst_360 = arith.constant 9.99999974E-6 : f32
    %1063 = vector.broadcast %cst_360 : f32 to vector<2x1xf32>
    %1064 = arith.addf %1060, %1063 : vector<2x1xf32>
    %1065 = math.rsqrt %1064 : vector<2x1xf32>
    %1066 = vector.broadcast %1065 : vector<2x1xf32> to vector<2x32xf32>
    %1067 = arith.mulf %1062, %1066 : vector<2x32xf32>
    %1068 = vector.broadcast %1047 : vector<1x32xf32> to vector<2x32xf32>
    %1069 = arith.mulf %1067, %1068 : vector<2x32xf32>
    %1070 = vector.broadcast %1049 : vector<1x32xf32> to vector<2x32xf32>
    %1071 = arith.addf %1069, %1070 : vector<2x32xf32>
    %c0_361 = arith.constant 0 : index
    %c0_362 = arith.constant 0 : index
    %c0_363 = arith.constant 0 : index
    %1072 = vector.load %arg44[%c0_361, %c0_362, %c0_363] : memref<1x32x64xbf16, #tpu.memory_space<vmem>>, vector<1x32x64xbf16>
    %1073 = vector.shape_cast %1072 : vector<1x32x64xbf16> to vector<32x64xbf16>
    %1074 = arith.truncf %1071 : vector<2x32xf32> to vector<2x32xbf16>
    %cst_364 = arith.constant dense<0.000000e+00> : vector<2x64xf32>
    %1075 = tpu.matmul %1074, %1073, %cst_364 {dimension_numbers = #tpu.dot_dimension_numbers<[1], [0], [0], [1], [0, 0, 1, 1], [], []>} : vector<2x32xbf16>, vector<32x64xbf16>, vector<2x64xf32> -> vector<2x64xf32>
    %c0_365 = arith.constant 0 : index
    %c0_366 = arith.constant 0 : index
    %c0_367 = arith.constant 0 : index
    %1076 = vector.load %arg45[%c0_365, %c0_366, %c0_367] : memref<1x1x64xf32, #tpu.memory_space<vmem>>, vector<1x1x64xf32>
    %1077 = vector.shape_cast %1076 : vector<1x1x64xf32> to vector<1x64xf32>
    %1078 = vector.broadcast %1077 : vector<1x64xf32> to vector<2x64xf32>
    %1079 = arith.addf %1075, %1078 : vector<2x64xf32>
    %cst_368 = arith.constant 0.000000e+00 : f32
    %1080 = vector.broadcast %cst_368 : f32 to vector<2x64xf32>
    %1081 = arith.maximumf %1079, %1080 : vector<2x64xf32>
    %c0_369 = arith.constant 0 : index
    %c0_370 = arith.constant 0 : index
    %c0_371 = arith.constant 0 : index
    %1082 = vector.load %arg46[%c0_369, %c0_370, %c0_371] : memref<1x64x32xbf16, #tpu.memory_space<vmem>>, vector<1x64x32xbf16>
    %1083 = vector.shape_cast %1082 : vector<1x64x32xbf16> to vector<64x32xbf16>
    %1084 = arith.truncf %1081 : vector<2x64xf32> to vector<2x64xbf16>
    %cst_372 = arith.constant dense<0.000000e+00> : vector<2x32xf32>
    %1085 = tpu.matmul %1084, %1083, %cst_372 {dimension_numbers = #tpu.dot_dimension_numbers<[1], [0], [0], [1], [0, 0, 1, 1], [], []>} : vector<2x64xbf16>, vector<64x32xbf16>, vector<2x32xf32> -> vector<2x32xf32>
    %c0_373 = arith.constant 0 : index
    %c0_374 = arith.constant 0 : index
    %c0_375 = arith.constant 0 : index
    %1086 = vector.load %arg47[%c0_373, %c0_374, %c0_375] : memref<1x1x32xf32, #tpu.memory_space<vmem>>, vector<1x1x32xf32>
    %1087 = vector.shape_cast %1086 : vector<1x1x32xf32> to vector<1x32xf32>
    %1088 = vector.broadcast %1087 : vector<1x32xf32> to vector<2x32xf32>
    %1089 = arith.addf %1085, %1088 : vector<2x32xf32>
    %1090 = arith.addf %1071, %1089 : vector<2x32xf32>
    %c0_376 = arith.constant 0 : index
    %c0_377 = arith.constant 0 : index
    %c0_378 = arith.constant 0 : index
    %1091 = vector.load %arg48[%c0_376, %c0_377, %c0_378] : memref<1x1x32xf32, #tpu.memory_space<vmem>>, vector<1x1x32xf32>
    %1092 = vector.shape_cast %1091 : vector<1x1x32xf32> to vector<1x32xf32>
    %c0_379 = arith.constant 0 : index
    %c0_380 = arith.constant 0 : index
    %c0_381 = arith.constant 0 : index
    %1093 = vector.load %arg49[%c0_379, %c0_380, %c0_381] : memref<1x1x32xf32, #tpu.memory_space<vmem>>, vector<1x1x32xf32>
    %1094 = vector.shape_cast %1093 : vector<1x1x32xf32> to vector<1x32xf32>
    %cst_382 = arith.constant dense<0.000000e+00> : vector<2xf32>
    %1095 = vector.multi_reduction <add>, %1090, %cst_382 [1] : vector<2x32xf32> to vector<2xf32>
    %1096 = vector.shape_cast %1095 : vector<2xf32> to vector<2x1xf32>
    %cst_383 = arith.constant 3.200000e+01 : f32
    %1097 = vector.broadcast %cst_383 : f32 to vector<2x1xf32>
    %1098 = arith.divf %1096, %1097 : vector<2x1xf32>
    %1099 = vector.broadcast %1098 : vector<2x1xf32> to vector<2x32xf32>
    %1100 = arith.subf %1090, %1099 : vector<2x32xf32>
    %1101 = arith.mulf %1100, %1100 : vector<2x32xf32>
    %cst_384 = arith.constant dense<0.000000e+00> : vector<2xf32>
    %1102 = vector.multi_reduction <add>, %1101, %cst_384 [1] : vector<2x32xf32> to vector<2xf32>
    %1103 = vector.shape_cast %1102 : vector<2xf32> to vector<2x1xf32>
    %cst_385 = arith.constant 3.200000e+01 : f32
    %1104 = vector.broadcast %cst_385 : f32 to vector<2x1xf32>
    %1105 = arith.divf %1103, %1104 : vector<2x1xf32>
    %1106 = vector.broadcast %1098 : vector<2x1xf32> to vector<2x32xf32>
    %1107 = arith.subf %1090, %1106 : vector<2x32xf32>
    %cst_386 = arith.constant 9.99999974E-6 : f32
    %1108 = vector.broadcast %cst_386 : f32 to vector<2x1xf32>
    %1109 = arith.addf %1105, %1108 : vector<2x1xf32>
    %1110 = math.rsqrt %1109 : vector<2x1xf32>
    %1111 = vector.broadcast %1110 : vector<2x1xf32> to vector<2x32xf32>
    %1112 = arith.mulf %1107, %1111 : vector<2x32xf32>
    %1113 = vector.broadcast %1092 : vector<1x32xf32> to vector<2x32xf32>
    %1114 = arith.mulf %1112, %1113 : vector<2x32xf32>
    %1115 = vector.broadcast %1094 : vector<1x32xf32> to vector<2x32xf32>
    %1116 = arith.addf %1114, %1115 : vector<2x32xf32>
    %c0_387 = arith.constant 0 : index
    %c0_388 = arith.constant 0 : index
    %1117 = vector.load %arg51[%c0_387, %c0_388] : memref<2x32xf32, #tpu.memory_space<vmem>>, vector<2x32xf32>
    tpu.vector_store %arg51[%c0_387, %c0_388], %1116 {strides = array<i32>} : memref<2x32xf32, #tpu.memory_space<vmem>>, vector<2x32xf32>,
    return
  }
}

</mosaic_0001>

<bundles_post_ra>
// kernel: rise_forward.3
= control target key start
LH: loop header
LB: loop body
LE: loop exit
PB: predicated region body
PF: predicated region fallthrough
CT: control target
= control target key end

     0   :  { %20 = vsyncpa [#allocation3], 0  ;;  %s1182_s0 = inlined_call_operand.vmem [shape: f32[2,32], index: 0, kind: input, shape index: {}]   ;;  %s1183_s1 = inlined_call_operand.vmem [shape: f32[2,32], index: 1, kind: input, shape index: {}]   ;;  %s1184_s2 = inlined_call_operand.vmem [shape: f32[4,32], index: 2, kind: input, shape index: {}]   ;;  %s1185_s3 = inlined_call_operand.vmem [shape: bf16[32,32], index: 3, kind: input, shape index: {}]   ;;  %s1186_s4 = inlined_call_operand.vmem [shape: f32[1,32], index: 4, kind: input, shape index: {}]   ;;  %s1187_s5 = inlined_call_operand.hbm [shape: bf16[32,32], index: 5, kind: input, shape index: {}]   ;;  %s1188_s6 = inlined_call_operand.hbm [shape: f32[1,32], index: 6, kind: input, shape index: {}]   ;;  %s1189_s7 = inlined_call_operand.hbm [shape: bf16[32,64], index: 7, kind: input, shape index: {}]   ;;  %s1190_s8 = inlined_call_operand.hbm [shape: bf16[32,64], index: 8, kind: input, shape index: {}]   ;;  %s1191_s9 = inlined_call_operand.hbm [shape: bf16[32,64], index: 9, kind: input, shape index: {}]   ;;  %s1192_s10 = inlined_call_operand.hbm [shape: f32[1,64], index: 10, kind: input, shape index: {}]   ;;  %s1193_s11 = inlined_call_operand.vmem [shape: bf16[64,64], index: 11, kind: input, shape index: {}]   ;;  %s1194_s12 = inlined_call_operand.hbm [shape: f32[1,64], index: 12, kind: input, shape index: {}]   ;;  %s1195_s13 = inlined_call_operand.vmem [shape: bf16[64,32], index: 13, kind: input, shape index: {}]   ;;  %s1196_s14 = inlined_call_operand.hbm [shape: f32[1,32], index: 14, kind: input, shape index: {}]   ;;  %s1197_s15 = inlined_call_operand.vmem [shape: f32[2,32], index: 15, kind: output, shape index: {}]  }
   0x1   :  { %21 = vsyncpa [#allocation5], 0 }
   0x2   :  { %22 = vsyncpa [#allocation8], 0 }
   0x3   :  { %23 = vsyncpa [#allocation11], 0  ;;  %s53_s20 = sshll.u32 %s1188_s6, 4  ;;  %s54_s20 = int_to_ptr.hbm [resolvable:$true] %s53_s20 }
   0x4   :  { %24 = vsyncpa [#allocation14], 0  ;;  %s972_s21 = smov [#allocation4]   ;;  %s76_s25 = sshll.u32 %s1190_s8, 4  ;;  %s77_s25 = int_to_ptr.hbm [resolvable:$true] %s76_s25 }
   0x5   :  { %s55_s22 = sshll.u32 %s972_s21, 4  ;;  %s973_s26 = smov [#allocation7]   ;;  %s56_s22 = int_to_ptr.vmem [resolvable:$true] %s55_s22 }
   0x6   :  { %58 = dma.hbm_to_vmem [thread:$0]  %s54_s20, 16, %s56_s22, [#allocation5]  }
   0x7   :  { %s78_s27 = sshll.u32 %s973_s26, 4  ;;  %s103_s30 = sshll.u32 %s1192_s10, 4  ;;  %s79_s27 = int_to_ptr.vmem [resolvable:$true] %s78_s27  ;;  %s104_s30 = int_to_ptr.hbm [resolvable:$true] %s103_s30 }
   0x8   :  { %s974_s6 = smov 64   ;;  %s975_s16 = smov 4  }
   0x9   :  { %84 = dma.hbm_to_vmem [thread:$0]  %s77_s25, 256, %s79_s27, [#allocation8], %s974_s6, %s974_s6, %s975_s16  }
   0xa   :  { %s39_s19 = sshll.u32 %s1187_s5, 4  ;;  %s976_s20 = smov [#allocation10]   ;;  %s40_s19 = int_to_ptr.hbm [resolvable:$true] %s39_s19 }
   0xb   :  { %s105_s21 = sshll.u32 %s976_s20, 4  ;;  %s977_s8 = smov [#allocation2]   ;;  %s106_s21 = int_to_ptr.vmem [resolvable:$true] %s105_s21 }
   0xc   :  { %108 = dma.hbm_to_vmem [thread:$0]  %s104_s30, 16, %s106_s21, [#allocation11]  }
   0xd   :  { %s41_s22 = sshll.u32 %s977_s8, 4  ;;  %s63_s10 = sshll.u32 %s1189_s7, 4  ;;  %s42_s22 = int_to_ptr.vmem [resolvable:$true] %s41_s22  ;;  %s64_s10 = int_to_ptr.hbm [resolvable:$true] %s63_s10 }
   0xe   :  { %47 = dma.hbm_to_vmem [thread:$0]  %s40_s19, 256, %s42_s22, [#allocation3], %s974_s6, %s974_s6, %s975_s16  }
   0xf   :  { %s89_s27 = sshll.u32 %s1191_s9, 4  ;;  %s978_s28 = smov [#allocation6]   ;;  %s90_s27 = int_to_ptr.hbm [resolvable:$true] %s89_s27 }
  0x10   :  { %s65_s5 = sshll.u32 %s978_s28, 4  ;;  %s979_s29 = smov [#allocation9]   ;;  %s66_s5 = int_to_ptr.vmem [resolvable:$true] %s65_s5 }
  0x11   :  { %71 = dma.hbm_to_vmem [thread:$0]  %s64_s10, 256, %s66_s5, [#allocation5], %s974_s6, %s974_s6, %s975_s16  }
  0x12   :  { %s91_s30 = sshll.u32 %s979_s29, 4  ;;  %s116_s20 = sshll.u32 %s1194_s12, 4  ;;  %s92_s30 = int_to_ptr.vmem [resolvable:$true] %s91_s30  ;;  %s117_s20 = int_to_ptr.hbm [resolvable:$true] %s116_s20 }
  0x13   :  { %97 = dma.hbm_to_vmem [thread:$0]  %s90_s27, 256, %s92_s30, [#allocation8], %s974_s6, %s974_s6, %s975_s16  }
  0x14   :  { %s129_s21 = sshll.u32 %s1196_s14, 4  ;;  %s980_s8 = smov [#allocation12]   ;;  %s130_s21 = int_to_ptr.hbm [resolvable:$true] %s129_s21 }
  0x15   :  { %s118_s9 = sshll.u32 %s980_s8, 4  ;;  %s981_s22 = smov [#allocation13]   ;;  %s119_s9 = int_to_ptr.vmem [resolvable:$true] %s118_s9 }
  0x16   :  { %121 = dma.hbm_to_vmem [thread:$0]  %s117_s20, 16, %s119_s9, [#allocation11]  }
  0x17   :  { %s131_s23 = sshll.u32 %s981_s22, 4  ;;  %s132_s23 = int_to_ptr.vmem [resolvable:$true] %s131_s23 }
  0x18   :  { %134 = dma.hbm_to_vmem [thread:$0]  %s130_s21, 16, %s132_s23, [#allocation14]  }
  0x19   :  { %962 = dma.done.wait [#allocation3], 256  }
  0x1a   :  { %963 = vsyncadd [#allocation3], 4294967040 }
  0x1b   :  { %964 = dma.done.wait [#allocation5], 272  }
  0x1c   :  { %965 = vsyncadd [#allocation5], 4294967024 }
  0x1d   :  { %966 = dma.done.wait [#allocation8], 512  }
  0x1e   :  { %967 = vsyncadd [#allocation8], 4294966784 }
  0x1f   :  { %968 = dma.done.wait [#allocation11], 32  }
  0x20   :  { %969 = vsyncadd [#allocation11], 4294967264 }
  0x21   :  { %970 = dma.done.wait [#allocation14], 16  }
  0x22   :  { %971 = vsyncadd [#allocation14], 4294967280  ;;  %v738_v0 = vld [vmem:[%s1185_s3 + $0x8] sm:$0xff]  ;;  %v737_v1 = vld [vmem:[%s1185_s3] sm:$0xff]  ;;  %vm192_vm0 = vcmask 261120   ;;  %vm399_vm1 = vcmask 523264  }
  0x23   :  { %v170_v2 = vld [vmem:[%s1184_s2] sm:$0xf]  ;;  %202 = vmatpush.bf16.msra.mxu0 %v738_v0  ;;  %v740_v4 = vld [vmem:[#allocation2 + $0x8] sm:$0xff]  ;;  %v743_v9 = vld [vmem:[#allocation9] sm:$0xff]  ;;  %vm638_vm2 = vcmask 254976  }
  0x24   :  { %v175_v3 = vpack.c.bf16 %v170_v2, %v170_v2  ;;  %240 = vmatpush.bf16.msra.mxu1 %v740_v4  ;;  %v739_v5 = vld [vmem:[#allocation2] sm:$0xff]  ;;  %v742_v8 = vld [vmem:[#allocation7 + $0x8] sm:$0xff]  ;;  %v745_v19 = vld [vmem:[#allocation6] sm:$0xff] }
  0x25   :  { %v744_v6 = vld [vmem:[#allocation9 + $0x8] sm:$0xff]  ;;  %273 = vmatpush.bf16.msra.mxu2 %v742_v8  ;;  %v741_v18 = vld [vmem:[#allocation7] sm:$0xff]  ;;  %v766_v24 = vld [vmem:[#allocation4] ss:$0 sm:$0xff] }
  0x26   :  { %v1096_v7 = vld [vmem:[#allocation6 + $0x8] sm:$0xff]  ;;  %310 = vmatpush.bf16.msra.mxu3 %v744_v6  ;;  %v749_v30 = vld [vmem:[%s1193_s11 + $0x10] sm:$0xff]  ;;  %v748_v33 = vld [vmem:[%s1193_s11 + $0x8] sm:$0xff] }
  0x27   :  { %203 = vmatpush.bf16.msra.mxu0 %v737_v1  ;;  %v169_v10 = vld [vmem:[%s1183_s1] sm:$0x3]  ;;  %v750_v29 = vld [vmem:[%s1193_s11 + $0x18] sm:$0xff]  ;;  %v753_v36 = vld [vmem:[%s1195_s13 + $0x10] sm:$0xff] }
  0x28   :  { %241 = vmatpush.bf16.msra.mxu1 %v739_v5  ;;  %v284_v11 = vpack.c.bf16 %v169_v10, %v169_v10  ;;  %v765_v12 = vld [vmem:[%s1186_s4] ss:$0 sm:$0xff]  ;;  %v754_v35 = vld [vmem:[%s1195_s13 + $0x18] sm:$0xff]  ;;  %v752_v37 = vld [vmem:[%s1195_s13 + $0x8] sm:$0xff] }
  0x29   :  { %274 = vmatpush.bf16.msra.mxu2 %v741_v18  ;;  %v1111_v20 = vld [vmem:[%s1182_s0] sm:$0x3]  ;;  %v767_v38 = vld [vmem:[#allocation10] ss:$0 sm:$0xff]  ;;  %v1150_v48 = vld [vmem:[#allocation12] ss:$0 sm:$0xff] }
  0x2a   :  { %657 = vmatmul.msk.bf16.vlgmr.msra.gmra.mxu0 %vm192_vm0, %v175_v3  ;;  %311 = vmatpush.bf16.msra.mxu3 %v743_v9  ;;  %v339_v21 = vpack.c.bf16 %v1111_v20, %v1111_v20  ;;  %v747_v34 = vld [vmem:[%s1193_s11] sm:$0xff]  ;;  %v461_v57 = vmul.f32 1.0351326, %v1111_v20 }
  0x2b   :  { %362 = vmatpush.bf16.msrb.mxu0 %v1096_v7  ;;  %v751_v47 = vld [vmem:[%s1195_s13] sm:$0xff] }
  0x2c   :  { %407 = vmatpush.bf16.msrb.mxu1 %v750_v29  ;;  %v1154_v54 = vld [vmem:[#allocation13] ss:$0 sm:$0xff] }
  0x2d   :  { %684 = vmatmul.msk.bf16.vlgmr.msra.gmra.mxu3 %vm192_vm0, %v284_v11  ;;  %452 = vmatpush.bf16.msrb.mxu2 %v754_v35 }
  0x2e   :  { %475 = vmatpush.bf16.msrb.mxu3 %v1096_v7 }
  0x2f   :  { %363 = vmatpush.bf16.msrb.mxu0 %v745_v19 }
  0x30   :  { %408 = vmatpush.bf16.msrb.mxu1 %v749_v30 }
  0x31   :  { %453 = vmatpush.bf16.msrb.mxu2 %v753_v36 }
  0x32   :  { %476 = vmatpush.bf16.msrb.mxu3 %v745_v19 }
  0x33   :  { %492 = vmatpush.bf16.msra.mxu0 %v750_v29 }
  0x34   :  { %409 = vmatpush.bf16.msrb.mxu1 %v748_v33 }
  0x35   :  { %454 = vmatpush.bf16.msrb.mxu2 %v752_v37 }
  0x36   :  { %550 = vmatpush.bf16.msra.mxu3 %v750_v29 }
  0x37   :  { %493 = vmatpush.bf16.msra.mxu0 %v749_v30 }
  0x38   :  { %410 = vmatpush.bf16.msrb.mxu1 %v747_v34 }
  0x39   :  { %455 = vmatpush.bf16.msrb.mxu2 %v751_v47 }
  0x3a   :  { %693 = vmatmul.msk.bf16.vlgmr.msrb.gmra.mxu0 %vm192_vm0, %v339_v21  ;;  %551 = vmatpush.bf16.msra.mxu3 %v749_v30 }
  0x3b   :  { %494 = vmatpush.bf16.msra.mxu0 %v748_v33 }
  0x3e   :  { %552 = vmatpush.bf16.msra.mxu3 %v748_v33 }
  0x3f   :  { %495 = vmatpush.bf16.msra.mxu0 %v747_v34 }
  0x42   :  { %553 = vmatpush.bf16.msra.mxu3 %v747_v34 }
  0x43   :  { %568 = vmatpush.bf16.msrb.mxu0 %v754_v35 }
  0x47   :  { %569 = vmatpush.bf16.msrb.mxu0 %v753_v36 }
  0x4b   :  { %570 = vmatpush.bf16.msrb.mxu0 %v752_v37 }
  0x4f   :  { %571 = vmatpush.bf16.msrb.mxu0 %v751_v47 }
  0xa7   :  { %v205_v13 = vpop.f32.mrf.mxu0 }
  0xa8   :  { %v206_v14 = vadd.f32 %v765_v12, %v205_v13 }
  0xaa   :  { %v209_v15 = vmax.f32 %v206_v14, 0.0 }
  0xac   :  { %v214_v16 = vpack.c.bf16 %v209_v15, %v209_v15 }
  0xae   :  { %666 = vmatmul.msk.bf16.vlgmr.msra.gmra.mxu1 %vm192_vm0, %v214_v16 }
  0xaf   :  { %v207_v17 = vpop.f32.mrf.mxu0  ;;  %510 = vmatpush.bf16.msra.mxu1 %v754_v35 }
  0xb0   :  { %v313_v22 = vpop.f32.mrf.mxu3 }
  0xb1   :  { %v1140_v40 = vadd.f32 %v767_v38, %v313_v22 }
  0xb3   :  { %511 = vmatpush.bf16.msra.mxu1 %v753_v36 }
  0xb7   :  { %v365_v31 = vpop.f32.mrf.mxu0  ;;  %512 = vmatpush.bf16.msra.mxu1 %v752_v37 }
  0xb8   :  { %v315_v23 = vpop.f32.mrf.mxu3 }
  0xbb   :  { %513 = vmatpush.bf16.msra.mxu1 %v751_v47 }
  0xbf   :  { %v367_v32 = vpop.f32.mrf.mxu0 }
 0x12b   :  { %v243_v25 = vpop.f32.mrf.mxu1 }
 0x12c   :  { %v244_v26 = vadd.f32 %v766_v24, %v243_v25 }
 0x12e   :  { %v251_v27 = vpack.c.bf16 %v244_v26, %v244_v26 }
 0x130   :  { %675 = vmatmul.msk.bf16.vlgmr.msra.gmra.mxu2 %vm192_vm0, %v251_v27 }
 0x131   :  { %533 = vmatpush.bf16.msra.mxu2 %v1096_v7 }
 0x133   :  { %v245_v28 = vpop.f32.mrf.mxu1 }
 0x135   :  { %534 = vmatpush.bf16.msra.mxu2 %v745_v19 }
 0x1b3   :  { %v1138_v39 = vpop.f32.mrf.mxu2 }
 0x1b4   :  { %v340_v41 = vperm.slane %v1138_v39, 0  ;;  %v465_v62 = vperm.slane %v1138_v39, 1  ;;  %v523_v17 = vperm.slane %v1138_v39, 2 }
 0x1b6   :  { %v366_v42 = vadd.f32 %v365_v31, %v340_v41 }
 0x1b8   :  { %v369_v43 = vadd.f32 %v366_v42, %v1140_v40 }
 0x1ba   :  { %v370_v44 = vmax.f32 %v369_v43, 0.0 }
 0x1bb   :  { %v278_v45 = vpop.f32.mrf.mxu2 }
 0x1bc   :  { %v371_v46 = vpack.c.bf16 %v370_v44, %v370_v44 }
 0x1be   :  { %710 = vmatmul.msk.bf16.vlgmr.msrb.gmra.mxu1 %vm399_vm1, %v371_v46 }
 0x1bf   :  { %591 = vmatpush.bf16.msrb.mxu1 %v1096_v7 }
 0x1c3   :  { %592 = vmatpush.bf16.msrb.mxu1 %v745_v19 }
 0x23b   :  { %v412_v49 = vpop.f32.mrf.mxu1 }
 0x23c   :  { %v413_v50 = vadd.f32 %v1150_v48, %v412_v49 }
 0x23e   :  { %v416_v51 = vmax.f32 %v413_v50, 0.0 }
 0x240   :  { %v417_v52 = vpack.c.bf16 %v416_v51, %v416_v51 }
 0x242   :  { %727 = vmatmul.msk.bf16.vlgmr.msrb.gmra.mxu2 %vm399_vm1, %v417_v52 }
 0x243   :  { %v414_v53 = vpop.f32.mrf.mxu1  ;;  %608 = vmatpush.bf16.msrb.mxu2 %v750_v29 }
 0x247   :  { %609 = vmatpush.bf16.msrb.mxu2 %v749_v30 }
 0x24b   :  { %610 = vmatpush.bf16.msrb.mxu2 %v748_v33 }
 0x24f   :  { %611 = vmatpush.bf16.msrb.mxu2 %v747_v34 }
 0x2c5   :  { %v457_v55 = vpop.f32.mrf.mxu2 }
 0x2c6   :  { %v458_v56 = vadd.f32 %v1154_v54, %v457_v55 }
 0x2c8   :  { %v462_v58 = vmul.f32 -0.11956748, %v458_v56 }
 0x2ca   :  { %v463_v59 = vadd.f32 %v462_v58, %v461_v57 }
 0x2cc   :  { %v464_v60 = vpack.c.bf16 %v463_v59, %v463_v59  ;;  %v519_v12 = vmul.f32 1.0215188, %v463_v59 }
 0x2cd   :  { %v459_v61 = vpop.f32.mrf.mxu2 }
 0x2ce   :  { %728 = vmatmul.msk.bf16.vlgmr.msrb.gmra.mxu3 %vm192_vm0, %v464_v60 }
 0x2cf   :  { %626 = vmatpush.bf16.msrb.mxu3 %v754_v35 }
 0x2d3   :  { %627 = vmatpush.bf16.msrb.mxu3 %v753_v36  ;;  %v581_v36 = vperm.slane %v1138_v39, 3 }
 0x2d7   :  { %628 = vmatpush.bf16.msrb.mxu3 %v752_v37 }
 0x2db   :  { %629 = vmatpush.bf16.msrb.mxu3 %v751_v47 }
 0x351   :  { %v478_v63 = vpop.f32.mrf.mxu3 }
 0x352   :  { %v479_v0 = vadd.f32 %v478_v63, %v465_v62 }
 0x354   :  { %v482_v1 = vadd.f32 %v479_v0, %v1140_v40 }
 0x356   :  { %v483_v2 = vmax.f32 %v482_v1, 0.0 }
 0x358   :  { %v484_v3 = vpack.c.bf16 %v483_v2, %v483_v2 }
 0x359   :  { %v480_v4 = vpop.f32.mrf.mxu3 }
 0x35a   :  { %729 = vmatmul.msk.bf16.vlgmr.msra.gmra.mxu0 %vm399_vm1, %v484_v3 }
 0x3d7   :  { %v497_v5 = vpop.f32.mrf.mxu0 }
 0x3d8   :  { %v498_v6 = vadd.f32 %v1150_v48, %v497_v5 }
 0x3da   :  { %v501_v7 = vmax.f32 %v498_v6, 0.0 }
 0x3dc   :  { %v502_v8 = vpack.c.bf16 %v501_v7, %v501_v7 }
 0x3de   :  { %730 = vmatmul.msk.bf16.vlgmr.msra.gmra.mxu1 %vm399_vm1, %v502_v8 }
 0x3df   :  { %v499_v9 = vpop.f32.mrf.mxu0 }
 0x45b   :  { %v515_v10 = vpop.f32.mrf.mxu1 }
 0x45c   :  { %v516_v11 = vadd.f32 %v1154_v54, %v515_v10 }
 0x45e   :  { %v520_v13 = vmul.f32 -0.11703993, %v516_v11 }
 0x460   :  { %v521_v14 = vadd.f32 %v520_v13, %v519_v12 }
 0x462   :  { %v522_v15 = vpack.c.bf16 %v521_v14, %v521_v14  ;;  %v577_v31 = vmul.f32 1.0081543, %v521_v14 }
 0x463   :  { %v517_v16 = vpop.f32.mrf.mxu1 }
 0x464   :  { %731 = vmatmul.msk.bf16.vlgmr.msra.gmra.mxu2 %vm192_vm0, %v522_v15 }
 0x4e7   :  { %v536_v18 = vpop.f32.mrf.mxu2 }
 0x4e8   :  { %v537_v19 = vadd.f32 %v536_v18, %v523_v17 }
 0x4ea   :  { %v540_v20 = vadd.f32 %v537_v19, %v1140_v40 }
 0x4ec   :  { %v541_v21 = vmax.f32 %v540_v20, 0.0 }
 0x4ee   :  { %v542_v22 = vpack.c.bf16 %v541_v21, %v541_v21 }
 0x4ef   :  { %v538_v23 = vpop.f32.mrf.mxu2 }
 0x4f0   :  { %732 = vmatmul.msk.bf16.vlgmr.msra.gmra.mxu3 %vm399_vm1, %v542_v22 }
 0x573   :  { %v555_v24 = vpop.f32.mrf.mxu3 }
 0x574   :  { %v556_v25 = vadd.f32 %v1150_v48, %v555_v24 }
 0x576   :  { %v559_v26 = vmax.f32 %v556_v25, 0.0 }
 0x578   :  { %v560_v27 = vpack.c.bf16 %v559_v26, %v559_v26 }
 0x57a   :  { %733 = vmatmul.msk.bf16.vlgmr.msrb.gmra.mxu0 %vm399_vm1, %v560_v27 }
 0x57b   :  { %v557_v28 = vpop.f32.mrf.mxu3 }
 0x5f7   :  { %v573_v29 = vpop.f32.mrf.mxu0 }
 0x5f8   :  { %v574_v30 = vadd.f32 %v1154_v54, %v573_v29 }
 0x5fa   :  { %v578_v32 = vmul.f32 -0.118355, %v574_v30 }
 0x5fc   :  { %v579_v33 = vadd.f32 %v578_v32, %v577_v31 }
 0x5fe   :  { %v580_v34 = vpack.c.bf16 %v579_v33, %v579_v33  ;;  %v635_v52 = vmul.f32 1.00005, %v579_v33 }
 0x5ff   :  { %v575_v35 = vpop.f32.mrf.mxu0 }
 0x600   :  { %734 = vmatmul.msk.bf16.vlgmr.msrb.gmra.mxu1 %vm192_vm0, %v580_v34 }
 0x67d   :  { %v594_v37 = vpop.f32.mrf.mxu1 }
 0x67e   :  { %v595_v38 = vadd.f32 %v594_v37, %v581_v36 }
 0x680   :  { %v598_v41 = vadd.f32 %v595_v38, %v1140_v40 }
 0x682   :  { %v599_v42 = vmax.f32 %v598_v41, 0.0 }
 0x684   :  { %v600_v43 = vpack.c.bf16 %v599_v42, %v599_v42 }
 0x685   :  { %v596_v44 = vpop.f32.mrf.mxu1 }
 0x686   :  { %735 = vmatmul.msk.bf16.vlgmr.msrb.gmra.mxu2 %vm399_vm1, %v600_v43 }
 0x709   :  { %v613_v45 = vpop.f32.mrf.mxu2 }
 0x70a   :  { %v614_v46 = vadd.f32 %v1150_v48, %v613_v45 }
 0x70c   :  { %v617_v47 = vmax.f32 %v614_v46, 0.0 }
 0x70e   :  { %v618_v49 = vpack.c.bf16 %v617_v47, %v617_v47 }
 0x710   :  { %736 = vmatmul.msk.bf16.vlgmr.msrb.gmra.mxu3 %vm399_vm1, %v618_v49 }
 0x711   :  { %v615_v50 = vpop.f32.mrf.mxu2 }
 0x793   :  { %v631_v51 = vpop.f32.mrf.mxu3 }
 0x794   :  { %v632_v39 = vadd.f32 %v1154_v54, %v631_v51 }
 0x796   :  { %v636_v53 = vmul.f32 -0.0100005, %v632_v39 }
 0x798   :  { %v637_v40 = vadd.f32 %v636_v53, %v635_v52 }
 0x79a   :  { %639 = vst.msk [vmem:[%s1197_s15] sm:$0x3] %vm638_vm2, %v637_v40 }
 0x79b   :  { %v633_v55 = vpop.f32.mrf.mxu3 }
 0x79c   :  { %644 = vsyncpa [#allocation3], 1 }
 0x79d   :  { %645 = vsyncpa [#allocation5], 1 }
 0x79e   :  { %646 = vsyncpa [#allocation8], 1 }
 0x79f   :  { %647 = vsyncpa [#allocation11], 1 }
 0x7a0   :  { %648 = vsyncpa [#allocation14], 1 }

// kernel: rise_forward.2
= control target key start
LH: loop header
LB: loop body
LE: loop exit
PB: predicated region body
PF: predicated region fallthrough
CT: control target
= control target key end

     0   :  { %s5699_s6 = smov 1   ;;  %s5700_s10 = smov 2   ;;  %s7223_s0 = inlined_call_operand.smem [shape: u32[52], index: -1, kind: input, shape index: {}] }
   0x1   :  { %s5792_s5 = sld [smem:[%s7223_s0]]   ;;  %s5701_s14 = smov 3  }
   0x2   :  { %s5797_s9 = sld [smem:[%s7223_s0 + %s5699_s6]]   ;;  %s5702_s18 = smov 4  }
   0x3   :  { %s5802_s13 = sld [smem:[%s7223_s0 + %s5700_s10]]   ;;  %s5703_s22 = smov 5  }
   0x4   :  { %s5807_s17 = sld [smem:[%s7223_s0 + %s5701_s14]]   ;;  %s5704_s26 = smov 6  }
   0x5   :  { %s5812_s21 = sld [smem:[%s7223_s0 + %s5702_s18]]   ;;  %s5705_s30 = smov 7  }
   0x6   :  { %s5817_s25 = sld [smem:[%s7223_s0 + %s5703_s22]]   ;;  %s5706_s4 = smov 8  }
   0x7   :  { %7246 = sst [smem:[#allocation49_spill]] %s5792_s5  ;;  %s5707_s10 = smov 9  }
   0x8   :  { %7247 = sst [smem:[#allocation50_spill]] %s5797_s9  ;;  %s5708_s15 = smov 10  }
   0x9   :  { %7248 = sst [smem:[#allocation51_spill]] %s5802_s13  ;;  %s5709_s20 = smov 11  }
   0xa   :  { %s5822_s29 = sld [smem:[%s7223_s0 + %s5704_s26]]   ;;  %s5710_s26 = smov 12  }
   0xb   :  { %7249 = sst [smem:[#allocation52_spill]] %s5812_s21  ;;  %s5711_s1 = smov 13  }
   0xc   :  { %s5827_s3 = sld [smem:[%s7223_s0 + %s5705_s30]]   ;;  %s5712_s7 = smov 14  }
   0xd   :  { %s5832_s8 = sld [smem:[%s7223_s0 + %s5706_s4]]   ;;  %s5714_s22 = smov 16  }
   0xe   :  { %s5837_s14 = sld [smem:[%s7223_s0 + %s5707_s10]]   ;;  %s5715_s28 = smov 17  }
   0xf   :  { %s5842_s19 = sld [smem:[%s7223_s0 + %s5708_s15]]   ;;  %s5713_s15 = smov 15  }
  0x10   :  { %7250 = sst [smem:[#allocation53_spill]] %s5822_s29 }
  0x11   :  { %s5847_s24 = sld [smem:[%s7223_s0 + %s5709_s20]]  }
  0x12   :  { %s5852_s30 = sld [smem:[%s7223_s0 + %s5710_s26]]  }
  0x13   :  { %7251 = sst [smem:[#allocation54_spill]] %s5832_s8 }
  0x14   :  { %7252 = sst [smem:[#allocation55_spill]] %s5837_s14 }
  0x15   :  { %7253 = sst [smem:[#allocation56_spill]] %s5842_s19 }
  0x16   :  { %s5857_s6 = sld [smem:[%s7223_s0 + %s5711_s1]]  }
  0x17   :  { %7254 = sst [smem:[#allocation57_spill]] %s5847_s24 }
  0x18   :  { %7255 = sst [smem:[#allocation58_spill]] %s5852_s30 }
  0x19   :  { %s5862_s12 = sld [smem:[%s7223_s0 + %s5712_s7]]   ;;  %s5716_s7 = smov 18  }
  0x1a   :  { %s5867_s20 = sld [smem:[%s7223_s0 + %s5713_s15]]   ;;  %s5717_s15 = smov 19  }
  0x1b   :  { %s5872_s27 = sld [smem:[%s7223_s0 + %s5714_s22]]   ;;  %s5718_s22 = smov 20  }
  0x1c   :  { %7256 = sst [smem:[#allocation59_spill]] %s5857_s6 }
  0x1d   :  { %s5877_s4 = sld [smem:[%s7223_s0 + %s5715_s28]]   ;;  %s5719_s28 = smov 21  }
  0x1e   :  { %s5887_s9 = sld [smem:[%s7223_s0 + %s5717_s15]]   ;;  %s5721_s15 = smov 23  }
  0x1f   :  { %7257 = sst [smem:[#allocation60_spill]] %s5862_s12 }
  0x20   :  { %s5882_s12 = sld [smem:[%s7223_s0 + %s5716_s7]]   ;;  %s5720_s7 = smov 22  }
  0x21   :  { %s5892_s24 = sld [smem:[%s7223_s0 + %s5718_s22]]   ;;  %s5722_s22 = smov 24  }
  0x22   :  { %s5897_s6 = sld [smem:[%s7223_s0 + %s5719_s28]]   ;;  %s5723_s28 = smov 25  }
  0x23   :  { %s5907_s30 = sld [smem:[%s7223_s0 + %s5721_s15]]   ;;  %s5725_s15 = smov 27  }
  0x24   :  { %s5917_s8 = sld [smem:[%s7223_s0 + %s5723_s28]]   ;;  %s5727_s28 = smov 29  }
  0x25   :  { %s5927_s19 = sld [smem:[%s7223_s0 + %s5725_s15]]   ;;  %s5729_s15 = smov 31  }
  0x26   :  { %7258 = sst [smem:[#allocation61_spill]] %s5882_s12 }
  0x27   :  { %7259 = sst [smem:[#allocation62_spill]] %s5892_s24 }
  0x28   :  { %s5902_s12 = sld [smem:[%s7223_s0 + %s5720_s7]]   ;;  %s5724_s7 = smov 26  }
  0x29   :  { %s5912_s24 = sld [smem:[%s7223_s0 + %s5722_s22]]   ;;  %s5726_s22 = smov 28  }
  0x2a   :  { %7262 = sst [smem:[#allocation65_spill]] %s5917_s8 }
  0x2b   :  { %s5922_s14 = sld [smem:[%s7223_s0 + %s5724_s7]]   ;;  %s5728_s7 = smov 30  }
  0x2c   :  { %7264 = sst [smem:[#allocation67_spill]] %s5927_s19 }
  0x2d   :  { %s5937_s8 = sld [smem:[%s7223_s0 + %s5727_s28]]   ;;  %s5731_s28 = smov 33  }
  0x2e   :  { %7260 = sst [smem:[#allocation63_spill]] %s5902_s12 }
  0x2f   :  { %7261 = sst [smem:[#allocation64_spill]] %s5912_s24 }
  0x30   :  { %s5932_s24 = sld [smem:[%s7223_s0 + %s5726_s22]]   ;;  %s5730_s22 = smov 32  }
  0x31   :  { %7263 = sst [smem:[#allocation66_spill]] %s5922_s14 }
  0x32   :  { %s5942_s14 = sld [smem:[%s7223_s0 + %s5728_s7]]   ;;  %s5732_s7 = smov 34  }
  0x33   :  { %7265 = sst [smem:[#allocation68_spill]] %s5937_s8 }
  0x34   :  { %s5947_s21 = sld [smem:[%s7223_s0 + %s5729_s15]]   ;;  %s5733_s15 = smov 35  }
  0x35   :  { %s5952_s29 = sld [smem:[%s7223_s0 + %s5730_s22]]   ;;  %s5734_s22 = smov 36  }
  0x36   :  { %s5957_s5 = sld [smem:[%s7223_s0 + %s5731_s28]]   ;;  %s5735_s28 = smov 37  }
  0x37   :  { %s5962_s13 = sld [smem:[%s7223_s0 + %s5732_s7]]   ;;  %s5736_s7 = smov 38  }
  0x38   :  { %s5982_s8 = sld [smem:[%s7223_s0 + %s5736_s7]]   ;;  %s5740_s7 = smov 42  }
  0x3a   :  { %7266 = sst [smem:[#allocation69_spill]] %s5947_s21 }
  0x3b   :  { %7267 = sst [smem:[#allocation70_spill]] %s5952_s29 }
  0x3c   :  { %7268 = sst [smem:[#allocation71_spill]] %s5957_s5 }
  0x3d   :  { %s5967_s21 = sld [smem:[%s7223_s0 + %s5733_s15]]   ;;  %s5737_s15 = smov 39  }
  0x3e   :  { %s5972_s29 = sld [smem:[%s7223_s0 + %s5734_s22]]   ;;  %s5738_s22 = smov 40  }
  0x3f   :  { %s5977_s5 = sld [smem:[%s7223_s0 + %s5735_s28]]   ;;  %s5739_s28 = smov 41  }
  0x40   :  { %7271 = sst [smem:[#allocation74_spill]] %s5982_s8 }
  0x41   :  { %s5992_s19 = sld [smem:[%s7223_s0 + %s5738_s22]]   ;;  %s5742_s22 = smov 44  }
  0x42   :  { %s6002_s8 = sld [smem:[%s7223_s0 + %s5740_s7]]   ;;  %s5744_s7 = smov 46  }
  0x43   :  { %7269 = sst [smem:[#allocation72_spill]] %s5967_s21 }
  0x44   :  { %s5987_s21 = sld [smem:[%s7223_s0 + %s5737_s15]]   ;;  %s5741_s15 = smov 43  }
  0x45   :  { %7270 = sst [smem:[#allocation73_spill]] %s5977_s5 }
  0x46   :  { %s5997_s5 = sld [smem:[%s7223_s0 + %s5739_s28]]   ;;  %s5743_s28 = smov 45  }
  0x47   :  { %7273 = sst [smem:[#allocation76_spill]] %s5992_s19 }
  0x48   :  { %s6012_s19 = sld [smem:[%s7223_s0 + %s5742_s22]]   ;;  %s5746_s22 = smov 48  }
  0x49   :  { %s6022_s12 = sld [smem:[%s7223_s0 + %s5744_s7]]   ;;  %s5748_s7 = smov 50  }
  0x4a   :  { %7272 = sst [smem:[#allocation75_spill]] %s5987_s21 }
  0x4b   :  { %s6007_s21 = sld [smem:[%s7223_s0 + %s5741_s15]]   ;;  %s5745_s15 = smov 47  }
  0x4c   :  { %7274 = sst [smem:[#allocation77_spill]] %s5997_s5 }
  0x4d   :  { %s6017_s5 = sld [smem:[%s7223_s0 + %s5743_s28]]   ;;  %s5747_s28 = smov 49  }
  0x4e   :  { %7276 = sst [smem:[#allocation79_spill]] %s6012_s19 }
  0x4f   :  { %7278 = sst [smem:[#allocation81_spill]] %s6022_s12 }
  0x50   :  { %s6032_s19 = sld [smem:[%s7223_s0 + %s5746_s22]]  }
  0x51   :  { %7275 = sst [smem:[#allocation78_spill]] %s6007_s21 }
  0x52   :  { %s6027_s21 = sld [smem:[%s7223_s0 + %s5745_s15]]   ;;  %s5749_s15 = smov 51  }
  0x53   :  { %7277 = sst [smem:[#allocation80_spill]] %s6017_s5 }
  0x54   :  { %s6037_s5 = sld [smem:[%s7223_s0 + %s5747_s28]]  }
  0x55   :  { %s6042_s12 = sld [smem:[%s7223_s0 + %s5748_s7]]  }
  0x58   :  { %7279 = sst [smem:[#allocation82_spill]] %s6027_s21 }
  0x59   :  { %s6047_s21 = sld [smem:[%s7223_s0 + %s5749_s15]]  }
  0x5a   :  { %108 = vsyncpa [#allocation3], 0 }
  0x5b   :  { %109 = vsyncpa [#allocation5], 0 }
  0x5c   :  { %110 = vsyncpa [#allocation8], 0 }
  0x5d   :  { %111 = vsyncpa [#allocation11], 0 }
  0x5e   :  { %112 = vsyncpa [#allocation14], 0 }
  0x5f   :  { %113 = vsyncpa [#allocation17], 0 }
  0x60   :  { %114 = vsyncpa [#allocation20], 0 }
  0x61   :  { %115 = vsyncpa [#allocation23], 0 }
  0x62   :  { %116 = vsyncpa [#allocation26], 0 }
  0x63   :  { %117 = vsyncpa [#allocation29], 0 }
  0x64   :  { %118 = vsyncpa [#allocation32], 0  ;;  %s144_s22 = sshll.u32 %s5817_s25, 4  ;;  %s145_s22 = int_to_ptr.hbm [resolvable:$true] %s144_s22 }
  0x65   :  { %119 = vsyncpa [#allocation35], 0  ;;  %s5750_s0 = smov [#allocation4]   ;;  %s181_s26 = sshll.u32 %s5867_s20, 4  ;;  %s182_s26 = int_to_ptr.hbm [resolvable:$true] %s181_s26 }
  0x66   :  { %s146_s23 = sshll.u32 %s5750_s0, 4  ;;  %s5123_s28 = sshra.s32 %s145_s22, 4  ;;  %s147_s23 = int_to_ptr.vmem [resolvable:$true] %s146_s23  ;;  %s5124_s28 = int_to_ptr.hbm [resolvable:$true] %s5123_s28 }
  0x67   :  { %s5125_s1 = scalar_lea.hbm %s5124_s28, 1  ;;  %s5127_s2 = scalar_lea.hbm %s5817_s25, 1 }
  0x68   :  { %p5126_p0 = scmp.ne.s32.totalorder %s5124_s28, %s5125_s1  ;;  %p5128_p1 = scmp.lt.s32.totalorder %s5124_s28, %s5817_s25 }
  0x69   :  { %p5129_p2 = scmp.lt.s32.totalorder %s5127_s2, %s5125_s1 }
  0x6b   :  { %p5130_p3 = por %p5129_p2, %p5128_p1 }
  0x6d   :  { %p5131_p4 = pnand %p5130_p3, %p5126_p0 }
  0x6f   :  { %5134 = shalt.err (!%p5131_p4)
}
  0x70   :  { %149 = dma.hbm_to_vmem [thread:$0]  %s145_s22, 16, %s147_s23, [#allocation5]  }
  0x71   :  { %s5751_s7 = smov [#allocation7]   ;;  %s5147_s11 = sshra.s32 %s182_s26, 4  ;;  %s5148_s11 = int_to_ptr.hbm [resolvable:$true] %s5147_s11 }
  0x72   :  { %s183_s10 = sshll.u32 %s5751_s7, 4  ;;  %s5149_s15 = scalar_lea.hbm %s5148_s11, 2  ;;  %s184_s10 = int_to_ptr.vmem [resolvable:$true] %s183_s10 }
  0x73   :  { %p5150_p5 = scmp.ne.s32.totalorder %s5148_s11, %s5149_s15  ;;  %s5151_s16 = scalar_lea.hbm %s5867_s20, 2 }
  0x74   :  { %p5152_p6 = scmp.lt.s32.totalorder %s5148_s11, %s5867_s20  ;;  %p5153_p7 = scmp.lt.s32.totalorder %s5151_s16, %s5149_s15 }
  0x76   :  { %p5154_p8 = por %p5153_p7, %p5152_p6 }
  0x78   :  { %p5155_p9 = pnand %p5154_p8, %p5150_p5 }
  0x7a   :  { %5158 = shalt.err (!%p5155_p9)
}
  0x7b   :  { %s5752_s25 = smov 16   ;;  %s5753_s18 = smov 1  }
  0x7c   :  { %189 = dma.hbm_to_vmem [thread:$0]  %s182_s26, 32, %s184_s10, [#allocation8], %s5752_s25, %s5752_s25, %s5753_s18  }
  0x7d   :  { %s207_s22 = sshll.u32 %s5877_s4, 4  ;;  %s5754_s0 = smov [#allocation10]   ;;  %s208_s22 = int_to_ptr.hbm [resolvable:$true] %s207_s22 }
  0x7e   :  { %s209_s23 = sshll.u32 %s5754_s0, 4  ;;  %s237_s20 = sshll.u32 %s5897_s6, 4  ;;  %s210_s23 = int_to_ptr.vmem [resolvable:$true] %s209_s23  ;;  %s238_s20 = int_to_ptr.hbm [resolvable:$true] %s237_s20 }
  0x7f   :  { %s5171_s28 = sshra.s32 %s208_s22, 4  ;;  %s5175_s2 = scalar_lea.hbm %s5877_s4, 2  ;;  %s5172_s28 = int_to_ptr.hbm [resolvable:$true] %s5171_s28 }
  0x80   :  { %s5173_s1 = scalar_lea.hbm %s5172_s28, 2  ;;  %p5176_p11 = scmp.lt.s32.totalorder %s5172_s28, %s5877_s4 }
  0x81   :  { %p5174_p10 = scmp.ne.s32.totalorder %s5172_s28, %s5173_s1  ;;  %p5177_p12 = scmp.lt.s32.totalorder %s5175_s2, %s5173_s1 }
  0x83   :  { %p5178_p13 = por %p5177_p12, %p5176_p11 }
  0x85   :  { %p5179_p0 = pnand %p5178_p13, %p5174_p10 }
  0x87   :  { %5182 = shalt.err (!%p5179_p0)
}
  0x88   :  { %215 = dma.hbm_to_vmem [thread:$0]  %s208_s22, 32, %s210_s23, [#allocation11], %s5752_s25, %s5752_s25, %s5753_s18  }
  0x89   :  { %s5755_s26 = smov [#allocation13]   ;;  %s263_s10 = sshll.u32 %s5907_s30, 4  ;;  %s6066_s10 = int_to_ptr.hbm [resolvable:$true] %s263_s10 }
  0x8a   :  { %s239_s7 = sshll.u32 %s5755_s26, 4  ;;  %s5195_s11 = sshra.s32 %s238_s20, 4  ;;  %s240_s7 = int_to_ptr.vmem [resolvable:$true] %s239_s7  ;;  %s5196_s11 = int_to_ptr.hbm [resolvable:$true] %s5195_s11 }
  0x8b   :  { %s5197_s4 = scalar_lea.hbm %s5196_s11, 2  ;;  %s5199_s15 = scalar_lea.hbm %s5897_s6, 2 }
  0x8c   :  { %p5198_p1 = scmp.ne.s32.totalorder %s5196_s11, %s5197_s4  ;;  %p5200_p2 = scmp.lt.s32.totalorder %s5196_s11, %s5897_s6 }
  0x8d   :  { %p5201_p3 = scmp.lt.s32.totalorder %s5199_s15, %s5197_s4 }
  0x8f   :  { %p5202_p4 = por %p5201_p3, %p5200_p2 }
  0x91   :  { %p5203_p5 = pnand %p5202_p4, %p5198_p1 }
  0x93   :  { %5206 = shalt.err (!%p5203_p5)
}
  0x94   :  { %245 = dma.hbm_to_vmem [thread:$0]  %s238_s20, 32, %s240_s7, [#allocation14], %s5752_s25, %s5752_s25, %s5753_s18  }
  0x95   :  { %s294_s16 = sshll.u32 %s5932_s24, 4  ;;  %s5756_s22 = smov [#allocation16]   ;;  %s295_s16 = int_to_ptr.hbm [resolvable:$true] %s294_s16 }
  0x96   :  { %s265_s0 = sshll.u32 %s5756_s22, 4  ;;  %s5219_s23 = sshra.s32 %s6066_s10, 4  ;;  %s266_s0 = int_to_ptr.vmem [resolvable:$true] %s265_s0  ;;  %s5220_s23 = int_to_ptr.hbm [resolvable:$true] %s5219_s23 }
  0x97   :  { %s5221_s6 = scalar_lea.hbm %s5220_s23, 2  ;;  %s5223_s28 = scalar_lea.hbm %s5907_s30, 2 }
  0x98   :  { %p5222_p6 = scmp.ne.s32.totalorder %s5220_s23, %s5221_s6  ;;  %p5224_p7 = scmp.lt.s32.totalorder %s5220_s23, %s5907_s30 }
  0x99   :  { %p5225_p8 = scmp.lt.s32.totalorder %s5223_s28, %s5221_s6 }
  0x9b   :  { %p5226_p9 = por %p5225_p8, %p5224_p7 }
  0x9d   :  { %p5227_p10 = pnand %p5226_p9, %p5222_p6 }
  0x9f   :  { %5230 = shalt.err (!%p5227_p10)
}
  0xa0   :  { %271 = dma.hbm_to_vmem [thread:$0]  %s6066_s10, 32, %s266_s0, [#allocation17], %s5752_s25, %s5752_s25, %s5753_s18  }
  0xa1   :  { %s5757_s20 = smov [#allocation19]   ;;  %s315_s2 = sshll.u32 %s5942_s14, 4  ;;  %s6082_s2 = int_to_ptr.hbm [resolvable:$true] %s315_s2 }
  0xa2   :  { %s296_s1 = sshll.u32 %s5757_s20, 4  ;;  %s5243_s26 = sshra.s32 %s295_s16, 4  ;;  %s297_s1 = int_to_ptr.vmem [resolvable:$true] %s296_s1  ;;  %s5244_s26 = int_to_ptr.hbm [resolvable:$true] %s5243_s26 }
  0xa3   :  { %s5245_s30 = scalar_lea.hbm %s5244_s26, 1  ;;  %s5247_s7 = scalar_lea.hbm %s5932_s24, 1 }
  0xa4   :  { %p5246_p11 = scmp.ne.s32.totalorder %s5244_s26, %s5245_s30  ;;  %p5248_p12 = scmp.lt.s32.totalorder %s5244_s26, %s5932_s24 }
  0xa5   :  { %p5249_p13 = scmp.lt.s32.totalorder %s5247_s7, %s5245_s30 }
  0xa7   :  { %p5250_p0 = por %p5249_p13, %p5248_p12 }
  0xa9   :  { %p5251_p1 = pnand %p5250_p0, %p5246_p11 }
  0xab   :  { %5254 = shalt.err (!%p5251_p1)
}
  0xac   :  { %299 = dma.hbm_to_vmem [thread:$0]  %s295_s16, 16, %s297_s1, [#allocation20]  }
  0xad   :  { %s5758_s10 = smov [#allocation22]   ;;  %s343_s4 = sshll.u32 %s5962_s13, 4  ;;  %s344_s4 = int_to_ptr.hbm [resolvable:$true] %s343_s4 }
  0xae   :  { %s317_s11 = sshll.u32 %s5758_s10, 4  ;;  %s5267_s15 = sshra.s32 %s6082_s2, 4  ;;  %s318_s11 = int_to_ptr.vmem [resolvable:$true] %s317_s11  ;;  %s5268_s15 = int_to_ptr.hbm [resolvable:$true] %s5267_s15 }
  0xaf   :  { %s5269_s22 = scalar_lea.hbm %s5268_s15, 16  ;;  %s5271_s0 = scalar_lea.hbm %s5942_s14, 16 }
  0xb0   :  { %p5270_p2 = scmp.ne.s32.totalorder %s5268_s15, %s5269_s22  ;;  %p5272_p3 = scmp.lt.s32.totalorder %s5268_s15, %s5942_s14 }
  0xb1   :  { %p5273_p4 = scmp.lt.s32.totalorder %s5271_s0, %s5269_s22 }
  0xb3   :  { %p5274_p5 = por %p5273_p4, %p5272_p3 }
  0xb5   :  { %p5275_p6 = pnand %p5274_p5, %p5270_p2 }
  0xb7   :  { %5278 = shalt.err (!%p5275_p6)
}
  0xb8   :  { %s5759_s24 = smov 64   ;;  %s5760_s16 = smov 4  }
  0xb9   :  { %323 = dma.hbm_to_vmem [thread:$0]  %s6082_s2, 256, %s318_s11, [#allocation23], %s5759_s24, %s5759_s24, %s5760_s16  }
  0xba   :  { %s5761_s23 = smov [#allocation25]   ;;  %s369_s28 = sshll.u32 %s5972_s29, 4  ;;  %s6095_s28 = int_to_ptr.hbm [resolvable:$true] %s369_s28 }
  0xbb   :  { %s345_s6 = sshll.u32 %s5761_s23, 4  ;;  %s5291_s14 = sshra.s32 %s344_s4, 4  ;;  %s346_s6 = int_to_ptr.vmem [resolvable:$true] %s345_s6  ;;  %s5292_s14 = int_to_ptr.hbm [resolvable:$true] %s5291_s14 }
  0xbc   :  { %s5293_s20 = scalar_lea.hbm %s5292_s14, 16  ;;  %s5295_s1 = scalar_lea.hbm %s5962_s13, 16 }
  0xbd   :  { %p5294_p7 = scmp.ne.s32.totalorder %s5292_s14, %s5293_s20  ;;  %p5296_p8 = scmp.lt.s32.totalorder %s5292_s14, %s5962_s13 }
  0xbe   :  { %p5297_p9 = scmp.lt.s32.totalorder %s5295_s1, %s5293_s20 }
  0xc0   :  { %p5298_p10 = por %p5297_p9, %p5296_p8 }
  0xc2   :  { %p5299_p11 = pnand %p5298_p10, %p5294_p7 }
  0xc4   :  { %5302 = shalt.err (!%p5299_p11)
}
  0xc5   :  { %351 = dma.hbm_to_vmem [thread:$0]  %s344_s4, 256, %s346_s6, [#allocation26], %s5759_s24, %s5759_s24, %s5760_s16  }
  0xc6   :  { %s404_s2 = sshll.u32 %s6002_s8, 4  ;;  %s5762_s26 = smov [#allocation28]   ;;  %s405_s2 = int_to_ptr.hbm [resolvable:$true] %s404_s2 }
  0xc7   :  { %s371_s30 = sshll.u32 %s5762_s26, 4  ;;  %s5315_s7 = sshra.s32 %s6095_s28, 4  ;;  %s372_s30 = int_to_ptr.vmem [resolvable:$true] %s371_s30  ;;  %s5316_s7 = int_to_ptr.hbm [resolvable:$true] %s5315_s7 }
  0xc8   :  { %s5317_s13 = scalar_lea.hbm %s5316_s7, 16  ;;  %s5319_s10 = scalar_lea.hbm %s5972_s29, 16 }
  0xc9   :  { %p5318_p12 = scmp.ne.s32.totalorder %s5316_s7, %s5317_s13  ;;  %p5320_p13 = scmp.lt.s32.totalorder %s5316_s7, %s5972_s29 }
  0xca   :  { %p5321_p0 = scmp.lt.s32.totalorder %s5319_s10, %s5317_s13 }
  0xcc   :  { %p5322_p1 = por %p5321_p0, %p5320_p13 }
  0xce   :  { %p5323_p2 = pnand %p5322_p1, %p5318_p12 }
  0xd0   :  { %5326 = shalt.err (!%p5323_p2)
}
  0xd1   :  { %377 = dma.hbm_to_vmem [thread:$0]  %s6095_s28, 256, %s372_s30, [#allocation29], %s5759_s24, %s5759_s24, %s5760_s16  }
  0xd2   :  { %s5763_s11 = smov [#allocation31]   ;;  %s436_s15 = sshll.u32 %s6032_s19, 4  ;;  %s437_s15 = int_to_ptr.hbm [resolvable:$true] %s436_s15 }
  0xd3   :  { %s406_s4 = sshll.u32 %s5763_s11, 4  ;;  %s5339_s22 = sshra.s32 %s405_s2, 4  ;;  %s407_s4 = int_to_ptr.vmem [resolvable:$true] %s406_s4  ;;  %s5340_s22 = int_to_ptr.hbm [resolvable:$true] %s5339_s22 }
  0xd4   :  { %s5341_s29 = scalar_lea.hbm %s5340_s22, 1  ;;  %s5343_s0 = scalar_lea.hbm %s6002_s8, 1 }
  0xd5   :  { %p5342_p3 = scmp.ne.s32.totalorder %s5340_s22, %s5341_s29  ;;  %p5344_p4 = scmp.lt.s32.totalorder %s5340_s22, %s6002_s8 }
  0xd6   :  { %p5345_p5 = scmp.lt.s32.totalorder %s5343_s0, %s5341_s29 }
  0xd8   :  { %p5346_p6 = por %p5345_p5, %p5344_p4 }
  0xda   :  { %p5347_p7 = pnand %p5346_p6, %p5342_p3 }
  0xdc   :  { %5350 = shalt.err (!%p5347_p7)
}
  0xdd   :  { %409 = dma.hbm_to_vmem [thread:$0]  %s405_s2, 16, %s407_s4, [#allocation32]  }
  0xde   :  { %s131_s23 = sshll.u32 %s5807_s17, 4  ;;  %s5764_s6 = smov [#allocation34]   ;;  %s132_s23 = int_to_ptr.hbm [resolvable:$true] %s131_s23 }
  0xdf   :  { %s438_s28 = sshll.u32 %s5764_s6, 4  ;;  %s5363_s14 = sshra.s32 %s437_s15, 4  ;;  %s439_s28 = int_to_ptr.vmem [resolvable:$true] %s438_s28  ;;  %s5364_s14 = int_to_ptr.hbm [resolvable:$true] %s5363_s14 }
  0xe0   :  { %s5365_s20 = scalar_lea.hbm %s5364_s14, 1  ;;  %s5367_s1 = scalar_lea.hbm %s6032_s19, 1 }
  0xe1   :  { %p5366_p8 = scmp.ne.s32.totalorder %s5364_s14, %s5365_s20  ;;  %p5368_p9 = scmp.lt.s32.totalorder %s5364_s14, %s6032_s19 }
  0xe2   :  { %p5369_p10 = scmp.lt.s32.totalorder %s5367_s1, %s5365_s20 }
  0xe4   :  { %p5370_p11 = por %p5369_p10, %p5368_p9 }
  0xe6   :  { %p5371_p12 = pnand %p5370_p11, %p5366_p8 }
  0xe8   :  { %5374 = shalt.err (!%p5371_p12)
}
  0xe9   :  { %441 = dma.hbm_to_vmem [thread:$0]  %s437_s15, 16, %s439_s28, [#allocation35]  }
  0xea   :  { %s5765_s8 = smov [#allocation2]   ;;  %s157_s26 = sshll.u32 %s5827_s3, 4  ;;  %s158_s26 = int_to_ptr.hbm [resolvable:$true] %s157_s26 }
  0xeb   :  { %s133_s2 = sshll.u32 %s5765_s8, 4  ;;  %s5387_s30 = sshra.s32 %s132_s23, 4  ;;  %s134_s2 = int_to_ptr.vmem [resolvable:$true] %s133_s2  ;;  %s5388_s30 = int_to_ptr.hbm [resolvable:$true] %s5387_s30 }
  0xec   :  { %s5389_s7 = scalar_lea.hbm %s5388_s30, 1  ;;  %s5391_s13 = scalar_lea.hbm %s5807_s17, 1 }
  0xed   :  { %p5390_p13 = scmp.ne.s32.totalorder %s5388_s30, %s5389_s7  ;;  %p5392_p0 = scmp.lt.s32.totalorder %s5388_s30, %s5807_s17 }
  0xee   :  { %p5393_p1 = scmp.lt.s32.totalorder %s5391_s13, %s5389_s7 }
  0xf0   :  { %p5394_p2 = por %p5393_p1, %p5392_p0 }
  0xf2   :  { %p5395_p3 = pnand %p5394_p2, %p5390_p13 }
  0xf4   :  { %5398 = shalt.err (!%p5395_p3)
}
  0xf5   :  { %136 = dma.hbm_to_vmem [thread:$0]  %s132_s23, 16, %s134_s2, [#allocation3]  }
  0xf6   :  { %s194_s19 = sshll.u32 %s5872_s27, 4  ;;  %s5766_s10 = smov [#allocation6]   ;;  %s6120_s19 = int_to_ptr.hbm [resolvable:$true] %s194_s19 }
  0xf7   :  { %s159_s11 = sshll.u32 %s5766_s10, 4  ;;  %s5411_s4 = sshra.s32 %s158_s26, 4  ;;  %s160_s11 = int_to_ptr.vmem [resolvable:$true] %s159_s11  ;;  %s5412_s4 = int_to_ptr.hbm [resolvable:$true] %s5411_s4 }
  0xf8   :  { %s5413_s15 = scalar_lea.hbm %s5412_s4, 1  ;;  %s5415_s22 = scalar_lea.hbm %s5827_s3, 1 }
  0xf9   :  { %p5414_p4 = scmp.ne.s32.totalorder %s5412_s4, %s5413_s15  ;;  %p5416_p5 = scmp.lt.s32.totalorder %s5412_s4, %s5827_s3 }
  0xfa   :  { %p5417_p6 = scmp.lt.s32.totalorder %s5415_s22, %s5413_s15 }
  0xfc   :  { %p5418_p7 = por %p5417_p6, %p5416_p5 }
  0xfe   :  { %p5419_p8 = pnand %p5418_p7, %p5414_p4 }
 0x100   :  { %5422 = shalt.err (!%p5419_p8)
}
 0x101   :  { %162 = dma.hbm_to_vmem [thread:$0]  %s158_s26, 16, %s160_s11, [#allocation5]  }
 0x102   :  { %s5767_s17 = smov [#allocation9]   ;;  %s222_s0 = sshll.u32 %s5887_s9, 4  ;;  %s6125_s0 = int_to_ptr.hbm [resolvable:$true] %s222_s0 }
 0x103   :  { %s196_s29 = sshll.u32 %s5767_s17, 4  ;;  %s5435_s23 = sshra.s32 %s6120_s19, 4  ;;  %s197_s29 = int_to_ptr.vmem [resolvable:$true] %s196_s29  ;;  %s5436_s23 = int_to_ptr.hbm [resolvable:$true] %s5435_s23 }
 0x104   :  { %s5437_s6 = scalar_lea.hbm %s5436_s23, 2  ;;  %s5439_s3 = scalar_lea.hbm %s5872_s27, 2 }
 0x105   :  { %p5438_p9 = scmp.ne.s32.totalorder %s5436_s23, %s5437_s6  ;;  %p5440_p10 = scmp.lt.s32.totalorder %s5436_s23, %s5872_s27 }
 0x106   :  { %p5441_p11 = scmp.lt.s32.totalorder %s5439_s3, %s5437_s6 }
 0x108   :  { %p5442_p12 = por %p5441_p11, %p5440_p10 }
 0x10a   :  { %p5443_p13 = pnand %p5442_p12, %p5438_p9 }
 0x10c   :  { %5446 = shalt.err (!%p5443_p13)
}
 0x10d   :  { %s7280_s28 = sld [smem:[#allocation63_spill]]  ;;  %s5768_s20 = smov [#allocation12]  }
 0x10e   :  { %202 = dma.hbm_to_vmem [thread:$0]  %s6120_s19, 32, %s197_s29, [#allocation8], %s5752_s25, %s5752_s25, %s5753_s18  }
 0x10f   :  { %s224_s1 = sshll.u32 %s5768_s20, 4  ;;  %s5459_s27 = sshra.s32 %s6125_s0, 4  ;;  %s225_s1 = int_to_ptr.vmem [resolvable:$true] %s224_s1  ;;  %s5460_s27 = int_to_ptr.hbm [resolvable:$true] %s5459_s27 }
 0x110   :  { %s5461_s8 = scalar_lea.hbm %s5460_s27, 2  ;;  %s5463_s2 = scalar_lea.hbm %s5887_s9, 2 }
 0x111   :  { %p5462_p0 = scmp.ne.s32.totalorder %s5460_s27, %s5461_s8  ;;  %p5464_p1 = scmp.lt.s32.totalorder %s5460_s27, %s5887_s9 }
 0x112   :  { %p5465_p2 = scmp.lt.s32.totalorder %s5463_s2, %s5461_s8 }
 0x113   :  { %s250_s14 = sshll.u32 %s7280_s28, 4  ;;  %s6135_s14 = int_to_ptr.hbm [resolvable:$true] %s250_s14 }
 0x114   :  { %p5466_p3 = por %p5465_p2, %p5464_p1 }
 0x116   :  { %p5467_p4 = pnand %p5466_p3, %p5462_p0 }
 0x118   :  { %5470 = shalt.err (!%p5467_p4)
}
 0x119   :  { %s7281_s26 = sld [smem:[#allocation67_spill]]  ;;  %s5769_s30 = smov [#allocation15]  }
 0x11a   :  { %230 = dma.hbm_to_vmem [thread:$0]  %s6125_s0, 32, %s225_s1, [#allocation11], %s5752_s25, %s5752_s25, %s5753_s18  }
 0x11b   :  { %s252_s7 = sshll.u32 %s5769_s30, 4  ;;  %s5483_s19 = sshra.s32 %s6135_s14, 4  ;;  %s253_s7 = int_to_ptr.vmem [resolvable:$true] %s252_s7  ;;  %s5484_s19 = int_to_ptr.hbm [resolvable:$true] %s5483_s19 }
 0x11c   :  { %s5485_s9 = scalar_lea.hbm %s5484_s19, 2  ;;  %s5487_s10 = scalar_lea.hbm %s7280_s28, 2 }
 0x11d   :  { %p5486_p5 = scmp.ne.s32.totalorder %s5484_s19, %s5485_s9  ;;  %p5488_p6 = scmp.lt.s32.totalorder %s5484_s19, %s7280_s28 }
 0x11e   :  { %p5489_p7 = scmp.lt.s32.totalorder %s5487_s10, %s5485_s9 }
 0x11f   :  { %s283_s13 = sshll.u32 %s7281_s26, 4  ;;  %s284_s13 = int_to_ptr.hbm [resolvable:$true] %s283_s13 }
 0x120   :  { %p5490_p8 = por %p5489_p7, %p5488_p6 }
 0x122   :  { %p5491_p9 = pnand %p5490_p8, %p5486_p5 }
 0x124   :  { %5494 = shalt.err (!%p5491_p9)
}
 0x125   :  { %s7282_s11 = sld [smem:[#allocation68_spill]]  ;;  %s5770_s15 = smov [#allocation18]  }
 0x126   :  { %258 = dma.hbm_to_vmem [thread:$0]  %s6135_s14, 32, %s253_s7, [#allocation14], %s5752_s25, %s5752_s25, %s5753_s18  }
 0x127   :  { %s285_s22 = sshll.u32 %s5770_s15, 4  ;;  %s5507_s17 = sshra.s32 %s284_s13, 4  ;;  %s286_s22 = int_to_ptr.vmem [resolvable:$true] %s285_s22  ;;  %s5508_s17 = int_to_ptr.hbm [resolvable:$true] %s5507_s17 }
 0x128   :  { %s5509_s29 = scalar_lea.hbm %s5508_s17, 1  ;;  %s5511_s0 = scalar_lea.hbm %s7281_s26, 1 }
 0x129   :  { %p5510_p10 = scmp.ne.s32.totalorder %s5508_s17, %s5509_s29  ;;  %p5512_p11 = scmp.lt.s32.totalorder %s5508_s17, %s7281_s26 }
 0x12a   :  { %p5513_p12 = scmp.lt.s32.totalorder %s5511_s0, %s5509_s29 }
 0x12b   :  { %s305_s4 = sshll.u32 %s7282_s11, 4  ;;  %s306_s4 = int_to_ptr.hbm [resolvable:$true] %s305_s4 }
 0x12c   :  { %p5514_p13 = por %p5513_p12, %p5512_p11 }
 0x12e   :  { %p5515_p0 = pnand %p5514_p13, %p5510_p10 }
 0x130   :  { %5518 = shalt.err (!%p5515_p0)
}
 0x131   :  { %288 = dma.hbm_to_vmem [thread:$0]  %s284_s13, 16, %s286_s22, [#allocation17]  }
 0x132   :  { %s7283_s23 = sld [smem:[#allocation69_spill]]  ;;  %s5771_s18 = smov [#allocation21]  }
 0x133   :  { %s307_s6 = sshll.u32 %s5771_s18, 4  ;;  %s5531_s28 = sshra.s32 %s306_s4, 4  ;;  %s308_s6 = int_to_ptr.vmem [resolvable:$true] %s307_s6  ;;  %s5532_s28 = int_to_ptr.hbm [resolvable:$true] %s5531_s28 }
 0x134   :  { %s5533_s14 = scalar_lea.hbm %s5532_s28, 1  ;;  %s5535_s20 = scalar_lea.hbm %s7282_s11, 1 }
 0x135   :  { %p5534_p1 = scmp.ne.s32.totalorder %s5532_s28, %s5533_s14  ;;  %p5536_p2 = scmp.lt.s32.totalorder %s5532_s28, %s7282_s11 }
 0x136   :  { %p5537_p3 = scmp.lt.s32.totalorder %s5535_s20, %s5533_s14 }
 0x138   :  { %s329_s3 = sshll.u32 %s7283_s23, 4  ;;  %p5538_p4 = por %p5537_p3, %p5536_p2  ;;  %s330_s3 = int_to_ptr.hbm [resolvable:$true] %s329_s3 }
 0x13a   :  { %p5539_p5 = pnand %p5538_p4, %p5534_p1 }
 0x13c   :  { %5542 = shalt.err (!%p5539_p5)
}
 0x13d   :  { %310 = dma.hbm_to_vmem [thread:$0]  %s306_s4, 16, %s308_s6, [#allocation20]  }
 0x13e   :  { %s7284_s1 = sld [smem:[#allocation72_spill]]  ;;  %s5772_s8 = smov [#allocation24]  }
 0x13f   :  { %s331_s2 = sshll.u32 %s5772_s8, 4  ;;  %s5555_s26 = sshra.s32 %s330_s3, 4  ;;  %s332_s2 = int_to_ptr.vmem [resolvable:$true] %s331_s2  ;;  %s5556_s26 = int_to_ptr.hbm [resolvable:$true] %s5555_s26 }
 0x140   :  { %s5557_s30 = scalar_lea.hbm %s5556_s26, 1  ;;  %s5559_s7 = scalar_lea.hbm %s7283_s23, 1 }
 0x141   :  { %p5558_p6 = scmp.ne.s32.totalorder %s5556_s26, %s5557_s30  ;;  %p5560_p7 = scmp.lt.s32.totalorder %s5556_s26, %s7283_s23 }
 0x142   :  { %p5561_p8 = scmp.lt.s32.totalorder %s5559_s7, %s5557_s30 }
 0x144   :  { %s356_s27 = sshll.u32 %s7284_s1, 4  ;;  %p5562_p9 = por %p5561_p8, %p5560_p7  ;;  %s6159_s27 = int_to_ptr.hbm [resolvable:$true] %s356_s27 }
 0x146   :  { %p5563_p10 = pnand %p5562_p9, %p5558_p6 }
 0x148   :  { %5566 = shalt.err (!%p5563_p10)
}
 0x149   :  { %334 = dma.hbm_to_vmem [thread:$0]  %s330_s3, 16, %s332_s2, [#allocation23]  }
 0x14a   :  { %s7285_s13 = sld [smem:[#allocation76_spill]]  ;;  %s5773_s19 = smov [#allocation27]  }
 0x14b   :  { %s358_s9 = sshll.u32 %s5773_s19, 4  ;;  %s5579_s11 = sshra.s32 %s6159_s27, 4  ;;  %s359_s9 = int_to_ptr.vmem [resolvable:$true] %s358_s9  ;;  %s5580_s11 = int_to_ptr.hbm [resolvable:$true] %s5579_s11 }
 0x14c   :  { %s5581_s4 = scalar_lea.hbm %s5580_s11, 16  ;;  %s5583_s15 = scalar_lea.hbm %s7284_s1, 16 }
 0x14d   :  { %p5582_p11 = scmp.ne.s32.totalorder %s5580_s11, %s5581_s4  ;;  %p5584_p12 = scmp.lt.s32.totalorder %s5580_s11, %s7284_s1 }
 0x14e   :  { %p5585_p13 = scmp.lt.s32.totalorder %s5583_s15, %s5581_s4 }
 0x150   :  { %s388_s10 = sshll.u32 %s7285_s13, 4  ;;  %p5586_p0 = por %p5585_p13, %p5584_p12  ;;  %s6164_s10 = int_to_ptr.hbm [resolvable:$true] %s388_s10 }
 0x152   :  { %p5587_p1 = pnand %p5586_p0, %p5582_p11 }
 0x154   :  { %5590 = shalt.err (!%p5587_p1)
}
 0x155   :  { %s7286_s22 = sld [smem:[#allocation79_spill]]  ;;  %s5774_s29 = smov [#allocation30]  }
 0x156   :  { %364 = dma.hbm_to_vmem [thread:$0]  %s6159_s27, 256, %s359_s9, [#allocation26], %s5759_s24, %s5759_s24, %s5760_s16  }
 0x157   :  { %s390_s0 = sshll.u32 %s5774_s29, 4  ;;  %s5603_s23 = sshra.s32 %s6164_s10, 4  ;;  %s391_s0 = int_to_ptr.vmem [resolvable:$true] %s390_s0  ;;  %s5604_s23 = int_to_ptr.hbm [resolvable:$true] %s5603_s23 }
 0x158   :  { %s5605_s18 = scalar_lea.hbm %s5604_s23, 16  ;;  %s5607_s6 = scalar_lea.hbm %s7285_s13, 16 }
 0x159   :  { %p5606_p2 = scmp.ne.s32.totalorder %s5604_s23, %s5605_s18  ;;  %p5608_p3 = scmp.lt.s32.totalorder %s5604_s23, %s7285_s13 }
 0x15a   :  { %p5609_p4 = scmp.lt.s32.totalorder %s5607_s6, %s5605_s18 }
 0x15b   :  { %s416_s17 = sshll.u32 %s7286_s22, 4  ;;  %s6174_s17 = int_to_ptr.hbm [resolvable:$true] %s416_s17 }
 0x15c   :  { %p5610_p5 = por %p5609_p4, %p5608_p3 }
 0x15e   :  { %p5611_p6 = pnand %p5610_p5, %p5606_p2 }
 0x160   :  { %5614 = shalt.err (!%p5611_p6)
}
 0x161   :  { %396 = dma.hbm_to_vmem [thread:$0]  %s6164_s10, 256, %s391_s0, [#allocation29], %s5759_s24, %s5759_s24, %s5760_s16  }
 0x162   :  { %s5775_s3 = smov [#allocation33]   ;;  %s449_s14 = sshll.u32 %s6042_s12, 4  ;;  %s450_s14 = int_to_ptr.hbm [resolvable:$true] %s449_s14 }
 0x163   :  { %s418_s28 = sshll.u32 %s5775_s3, 4  ;;  %s5627_s20 = sshra.s32 %s6174_s17, 4  ;;  %s419_s28 = int_to_ptr.vmem [resolvable:$true] %s418_s28  ;;  %s5628_s20 = int_to_ptr.hbm [resolvable:$true] %s5627_s20 }
 0x164   :  { %s5629_s1 = scalar_lea.hbm %s5628_s20, 16  ;;  %s5631_s27 = scalar_lea.hbm %s7286_s22, 16 }
 0x165   :  { %p5630_p7 = scmp.ne.s32.totalorder %s5628_s20, %s5629_s1  ;;  %p5632_p8 = scmp.lt.s32.totalorder %s5628_s20, %s7286_s22 }
 0x166   :  { %p5633_p9 = scmp.lt.s32.totalorder %s5631_s27, %s5629_s1 }
 0x168   :  { %p5634_p10 = por %p5633_p9, %p5632_p8 }
 0x16a   :  { %p5635_p11 = pnand %p5634_p10, %p5630_p7 }
 0x16c   :  { %5638 = shalt.err (!%p5635_p11)
}
 0x16d   :  { %424 = dma.hbm_to_vmem [thread:$0]  %s6174_s17, 256, %s419_s28, [#allocation32], %s5759_s24, %s5759_s24, %s5760_s16  }
 0x16e   :  { %s5776_s8 = smov [#allocation36]   ;;  %s5651_s26 = sshra.s32 %s450_s14, 4  ;;  %s5652_s26 = int_to_ptr.hbm [resolvable:$true] %s5651_s26 }
 0x16f   :  { %s451_s2 = sshll.u32 %s5776_s8, 4  ;;  %s5653_s30 = scalar_lea.hbm %s5652_s26, 1  ;;  %s452_s2 = int_to_ptr.vmem [resolvable:$true] %s451_s2 }
 0x170   :  { %p5654_p12 = scmp.ne.s32.totalorder %s5652_s26, %s5653_s30  ;;  %s5655_s7 = scalar_lea.hbm %s6042_s12, 1 }
 0x171   :  { %p5656_p13 = scmp.lt.s32.totalorder %s5652_s26, %s6042_s12  ;;  %p5657_p0 = scmp.lt.s32.totalorder %s5655_s7, %s5653_s30 }
 0x173   :  { %p5658_p1 = por %p5657_p0, %p5656_p13 }
 0x175   :  { %p5659_p2 = pnand %p5658_p1, %p5654_p12 }
 0x177   :  { %5662 = shalt.err (!%p5659_p2)
}
 0x178   :  { %454 = dma.hbm_to_vmem [thread:$0]  %s450_s14, 16, %s452_s2, [#allocation35]  }
 0x179   :  { %5675 = dma.done.wait [#allocation3], 16  }
 0x17a   :  { %5676 = vsyncadd [#allocation3], 4294967280 }
 0x17b   :  { %5677 = dma.done.wait [#allocation5], 32  }
 0x17c   :  { %5678 = vsyncadd [#allocation5], 4294967264 }
 0x17d   :  { %5679 = dma.done.wait [#allocation8], 64  }
 0x17e   :  { %5680 = vsyncadd [#allocation8], 4294967232 }
 0x17f   :  { %5681 = dma.done.wait [#allocation11], 64  }
 0x180   :  { %5682 = vsyncadd [#allocation11], 4294967232 }
 0x181   :  { %5683 = dma.done.wait [#allocation14], 64  }
 0x182   :  { %5684 = vsyncadd [#allocation14], 4294967232 }
 0x183   :  { %5685 = dma.done.wait [#allocation17], 48  }
 0x184   :  { %5686 = vsyncadd [#allocation17], 4294967248 }
 0x185   :  { %5687 = dma.done.wait [#allocation20], 32  }
 0x186   :  { %5688 = vsyncadd [#allocation20], 4294967264 }
 0x187   :  { %5689 = dma.done.wait [#allocation23], 272  }
 0x188   :  { %5690 = vsyncadd [#allocation23], 4294967024 }
 0x189   :  { %5691 = dma.done.wait [#allocation26], 512  }
 0x18a   :  { %5692 = vsyncadd [#allocation26], 4294966784 }
 0x18b   :  { %5693 = dma.done.wait [#allocation29], 512  }
 0x18c   :  { %5694 = vsyncadd [#allocation29], 4294966784 }
 0x18d   :  { %5695 = dma.done.wait [#allocation32], 272  }
 0x18e   :  { %5696 = vsyncadd [#allocation32], 4294967024 }
 0x18f   :  { %5697 = dma.done.wait [#allocation35], 32  }
 0x190   :  { %5698 = vsyncadd [#allocation35], 4294967264  ;;  %s7287_s12 = sld [smem:[#allocation51_spill]]  ;;  %vm566_vm0 = vcmask 1043456   ;;  %vm559_vm1 = vcmask 64512   ;;  %vm615_vm2 = vcmask 261120  }
 0x191   :  { %s7288_s24 = sld [smem:[#allocation49_spill]]  ;;  %v4851_v13 = vld [vmem:[#allocation2] ss:$0 sm:$0xff]  ;;  %v4852_v36 = vld [vmem:[#allocation6] ss:$0 sm:$0xff]  ;;  %s5777_s22 = smov 112  }
 0x192   :  { %s7289_s16 = sld [smem:[#allocation53_spill]]  ;;  %v4853_v37 = vld [vmem:[#allocation4] ss:$0 sm:$0xff]  ;;  %s5778_s17 = smov 120   ;;  %vm839_vm3 = vcmask 130048   ;;  %vm1113_vm4 = vcmask 195584  }
 0x193   :  { %s7290_s13 = sld [smem:[#allocation52_spill]]  ;;  %s5779_s29 = smov 104  }
 0x194   :  { %s7291_s19 = sld [smem:[#allocation56_spill]]  ;;  %s5780_s23 = smov 8  }
 0x195   :  { %s7292_s9 = sld [smem:[#allocation55_spill]]  ;;  %s5781_s6 = smov 24  }
 0x196   :  { %v552_v0 = vld [vmem:[%s7287_s12] sm:$0xf]  ;;  %s7293_s10 = sld [smem:[#allocation54_spill]] }
 0x197   :  { %v548_v1 = vld [vmem:[%s7288_s24] sm:$0xff]  ;;  %v549_v2 = vld [vmem:[%s7288_s24 + $0x8] sm:$0xff]  ;;  %v568_v3 = vsel %vm566_vm0, %v552_v0, 0  ;;  %v550_v7 = vld [vmem:[%s7288_s24 + $0x10] sm:$0xff]  ;;  %s7294_s11 = sld [smem:[#allocation58_spill]] }
 0x198   :  { %v553_v4 = vpack.c.bf16 %v549_v2, %v548_v1  ;;  %v641_v5 = vld [vmem:[%s7289_s16] sm:$0xf]  ;;  %577 = vmatpush.bf16.msra.mxu0 %v568_v3  ;;  %v551_v8 = vld [vmem:[%s7288_s24 + $0x18] sm:$0xff]  ;;  %s7295_s4 = sld [smem:[#allocation59_spill]] }
 0x199   :  { %v647_v6 = vsel %vm566_vm0, %v641_v5, 0  ;;  %v554_v9 = vpack.c.bf16 %v551_v8, %v550_v7  ;;  %v4625_v10 = vld [vmem:[%s7290_s13 + $0x8] sm:$0xff]  ;;  %v4624_v11 = vld [vmem:[%s7290_s13] sm:$0xff]  ;;  %s7296_s15 = sld [smem:[#allocation57_spill]] }
 0x19a   :  { %656 = vmatpush.bf16.msra.mxu2 %v647_v6  ;;  %628 = vmatpush.bf16.msra.mxu1 %v4625_v10  ;;  %v4631_v27 = vld [vmem:[%s7291_s19 + $0x8] sm:$0xff]  ;;  %v4630_v30 = vld [vmem:[%s7291_s19] sm:$0xff]  ;;  %s7297_s0 = sld [smem:[#allocation50_spill]] }
 0x19b   :  { %4288 = vmatmul.msk.bf16.vlgmr.msra.gmra.mxu0 %vm559_vm1, %v553_v4  ;;  %v4629_v28 = vld [vmem:[%s7292_s9 + $0x8] sm:$0xff]  ;;  %v4628_v32 = vld [vmem:[%s7292_s9] sm:$0xff]  ;;  %s7298_s18 = sld [smem:[#allocation60_spill]] }
 0x19c   :  { %751 = vmatpush.bf16.msrb.mxu0 %v4629_v28  ;;  %v4627_v29 = vld [vmem:[%s7293_s10 + $0x8] sm:$0xff]  ;;  %v4626_v31 = vld [vmem:[%s7293_s10] sm:$0xff]  ;;  %s7299_s3 = sld [smem:[#allocation61_spill]] }
 0x19d   :  { %4300 = vmatmul.msk.bf16.vlgmr.msra.gmra.mxu2 %vm559_vm1, %v553_v4  ;;  %708 = vmatpush.bf16.msra.mxu3 %v4627_v29  ;;  %v4854_v61 = vld [vmem:[%s7294_s11] ss:$0 sm:$0xff]  ;;  %s7300_s28 = sld [smem:[#allocation62_spill]] }
 0x19e   :  { %629 = vmatpush.bf16.msra.mxu1 %v4624_v11  ;;  %798 = vmatpush.bf16.msrb.mxu2 %v4631_v27  ;;  %v6249_v1 = vld [vmem:[%s7295_s4] ss:$0 sm:$0xff]  ;;  %s7301_s14 = sld [smem:[#allocation64_spill]] }
 0x19f   :  { %v4856_v2 = vld [vmem:[%s7296_s15] ss:$0 sm:$0xff]  ;;  %s7302_s20 = sld [smem:[#allocation65_spill]] }
 0x1a0   :  { %752 = vmatpush.bf16.msrb.mxu0 %v4628_v32  ;;  %s7303_s1 = sld [smem:[#allocation66_spill]] }
 0x1a1   :  { %709 = vmatpush.bf16.msra.mxu3 %v4626_v31  ;;  %s7304_s27 = sld [smem:[#allocation70_spill]] }
 0x1a2   :  { %799 = vmatpush.bf16.msrb.mxu2 %v4630_v30  ;;  %s7305_s8 = sld [smem:[#allocation71_spill]] }
 0x1a3   :  { %s7306_s2 = sld [smem:[#allocation75_spill]] }
 0x1a4   :  { %s7307_s26 = sld [smem:[#allocation74_spill]] }
 0x1a5   :  { %s7308_s30 = sld [smem:[#allocation73_spill]] }
 0x1a6   :  { %s7309_s7 = sld [smem:[#allocation77_spill]] }
 0x1a7   :  { %s7311_s12 = sld [smem:[#allocation78_spill]] }
 0x1a8   :  { %s7312_s24 = sld [smem:[#allocation80_spill]] }
 0x1a9   :  { %s7313_s16 = sld [smem:[#allocation82_spill]] }
 0x1ab   :  { %4289 = vmatmul.msk.bf16.gmra.mxu0 %vm559_vm1, %v554_v9 }
 0x1ad   :  { %4301 = vmatmul.msk.bf16.gmra.mxu2 %vm559_vm1, %v554_v9 }
 0x218   :  { %v579_v12 = vpop.f32.mrf.mxu0 }
 0x219   :  { %v580_v14 = vadd.f32 %v4851_v13, %v579_v12 }
 0x21b   :  { %v589_v17 = vmax.f32 %v580_v14, 0.0 }
 0x220   :  { %v581_v15 = vpop.f32.mrf.mxu0  ;;  %v658_v33 = vpop.f32.mrf.mxu2 }
 0x221   :  { %v582_v16 = vadd.f32 %v4851_v13, %v581_v15  ;;  %v6213_v38 = vadd.f32 %v4852_v36, %v658_v33 }
 0x223   :  { %v590_v18 = vmax.f32 %v582_v16, 0.0 }
 0x225   :  { %v597_v19 = vpack.c.bf16 %v590_v18, %v589_v17 }
 0x227   :  { %4298 = vmatmul.msk.bf16.vlgmr.msra.gmra.mxu1 %vm615_vm2, %v597_v19 }
 0x228   :  { %v584_v20 = vpop.f32.mrf.mxu0  ;;  %v660_v35 = vpop.f32.mrf.mxu2 }
 0x229   :  { %v585_v21 = vadd.f32 %v4851_v13, %v584_v20  ;;  %v6217_v41 = vadd.f32 %v4852_v36, %v660_v35 }
 0x22b   :  { %v591_v23 = vmax.f32 %v585_v21, 0.0 }
 0x230   :  { %v586_v22 = vpop.f32.mrf.mxu0  ;;  %v663_v43 = vpop.f32.mrf.mxu2 }
 0x231   :  { %v587_v24 = vadd.f32 %v4851_v13, %v586_v22  ;;  %v6232_v51 = vadd.f32 %v4852_v36, %v663_v43 }
 0x233   :  { %v592_v25 = vmax.f32 %v587_v24, 0.0 }
 0x235   :  { %v598_v26 = vpack.c.bf16 %v592_v25, %v591_v23 }
 0x237   :  { %4299 = vmatmul.msk.bf16.gmra.mxu1 %vm615_vm2, %v598_v26 }
 0x238   :  { %v665_v49 = vpop.f32.mrf.mxu2 }
 0x239   :  { %v6234_v52 = vadd.f32 %v4852_v36, %v665_v49 }
 0x2a4   :  { %v631_v34 = vpop.f32.mrf.mxu1 }
 0x2a5   :  { %v6215_v39 = vadd.f32 %v4853_v37, %v631_v34 }
 0x2a7   :  { %v670_v44 = vadd.f32 %v6213_v38, %v6215_v39 }
 0x2ac   :  { %v633_v40 = vpop.f32.mrf.mxu1 }
 0x2ad   :  { %v6219_v42 = vadd.f32 %v4853_v37, %v633_v40 }
 0x2af   :  { %v768_v45 = vpack.c.bf16 %v6219_v42, %v6215_v39  ;;  %v671_v46 = vadd.f32 %v6217_v41, %v6219_v42 }
 0x2b1   :  { %4330 = vmatmul.msk.bf16.vlgmr.msrb.gmra.mxu2 %vm615_vm2, %v768_v45  ;;  %v678_v47 = vpack.c.bf16 %v671_v46, %v670_v44  ;;  %v668_v44 = vld [vmem:[%s7297_s0] sm:$0x3] }
 0x2b2   :  { %v6281_v45 = vmul.f32 -1e+09, %v668_v44 }
 0x2b3   :  { %4310 = vmatmul.msk.bf16.vlgmr.msra.gmra.mxu3 %vm615_vm2, %v678_v47  ;;  %4320 = vmatmul.msk.bf16.vlgmr.msrb.gmra.mxu0 %vm615_vm2, %v678_v47 }
 0x2b4   :  { %v636_v48 = vpop.f32.mrf.mxu1  ;;  %v6284_v46 = vperm.slane %v6281_v45, 0 }
 0x2b5   :  { %v6230_v50 = vadd.f32 %v4853_v37, %v636_v48 }
 0x2b7   :  { %v672_v54 = vadd.f32 %v6232_v51, %v6230_v50 }
 0x2bc   :  { %v638_v53 = vpop.f32.mrf.mxu1 }
 0x2bd   :  { %v6238_v55 = vadd.f32 %v4853_v37, %v638_v53 }
 0x2bf   :  { %v673_v56 = vadd.f32 %v6234_v52, %v6238_v55  ;;  %v769_v57 = vpack.c.bf16 %v6238_v55, %v6230_v50 }
 0x2c1   :  { %v679_v58 = vpack.c.bf16 %v673_v56, %v672_v54  ;;  %4331 = vmatmul.msk.bf16.gmra.mxu2 %vm615_vm2, %v769_v57 }
 0x2c3   :  { %4311 = vmatmul.msk.bf16.gmra.mxu3 %vm615_vm2, %v679_v58  ;;  %4321 = vmatmul.msk.bf16.gmra.mxu0 %vm615_vm2, %v679_v58 }
 0x330   :  { %v754_v59 = vpop.f32.mrf.mxu0 }
 0x331   :  { %v755_v0 = vadd.f32 %v4854_v61, %v754_v59 }
 0x334   :  { %v801_v60 = vpop.f32.mrf.mxu2 }
 0x335   :  { %v802_v6 = vadd.f32 %v6249_v1, %v801_v60 }
 0x336   :  { %v711_v62 = vpop.f32.mrf.mxu3 }
 0x337   :  { %v712_v7 = vadd.f32 %v4856_v2, %v711_v62 }
 0x338   :  { %v756_v63 = vpop.f32.mrf.mxu0 }
 0x339   :  { %v757_v3 = vadd.f32 %v4854_v61, %v756_v63  ;;  %v721_v14 = vmul.f32 0.35355338, %v712_v7 }
 0x33b   :  { %v817_v4 = vpack.c.bf16 %v757_v3, %v755_v0 }
 0x33c   :  { %v803_v5 = vpop.f32.mrf.mxu2 }
 0x33d   :  { %v804_v8 = vadd.f32 %v6249_v1, %v803_v5  ;;  %953 = vrot.lane.b32.xlu1 %v817_v4, %s5777_s22  ;;  %885 = vrot.lane.b32.xlu0 %v817_v4, %s5778_s17  ;;  %v823_v9 = vsel %vm559_vm1, %v817_v4, 0 }
 0x33e   :  { %v713_v10 = vpop.f32.mrf.mxu3  ;;  %832 = vmatpush.bf16.xpose.msrb.mxu1 %v823_v9 }
 0x33f   :  { %v6257_v11 = vpack.c.bf16 %v804_v8, %v802_v6  ;;  %v714_v12 = vadd.f32 %v4856_v2, %v713_v10 }
 0x340   :  { %v759_v13 = vpop.f32.mrf.mxu0 }
 0x341   :  { %v722_v15 = vmul.f32 0.35355338, %v714_v12  ;;  %874 = vmatpush.bf16.msrb.mxu3 %v6257_v11  ;;  %v760_v18 = vadd.f32 %v4854_v61, %v759_v13 }
 0x343   :  { %v816_v16 = vpack.c.bf16 %v722_v15, %v721_v14 }
 0x345   :  { %1020 = vrot.lane.b32.xlu1 %v817_v4, %s5779_s29  ;;  %951 = vrot.lane.b32.xlu2 %v816_v16, %s5777_s22 }
 0x346   :  { %882 = vrot.lane.b32.xlu0 %v816_v16, %s5778_s17  ;;  %4332 = vmatmul.msk.bf16.vlgmr.msrb.gmra.mxu1 %vm559_vm1, %v816_v16  ;;  %v716_v17 = vpop.f32.mrf.mxu3 }
 0x347   :  { %v717_v21 = vadd.f32 %v4856_v2, %v716_v17 }
 0x348   :  { %v761_v19 = vpop.f32.mrf.mxu0 }
 0x349   :  { %v762_v20 = vadd.f32 %v4854_v61, %v761_v19  ;;  %v723_v24 = vmul.f32 0.35355338, %v717_v21  ;;  %v6318_v19 = vperm.slane %v6281_v45, 1 }
 0x34b   :  { %v1117_v22 = vpack.c.bf16 %v762_v20, %v760_v18 }
 0x34d   :  { %1018 = vrot.lane.b32.xlu2 %v816_v16, %s5779_s29  ;;  %v1123_v34 = vsel %vm559_vm1, %v1117_v22, 0 }
 0x34e   :  { %v718_v23 = vpop.f32.mrf.mxu3  ;;  %1184 = vrot.lane.b32.xlu0 %v1117_v22, %s5778_s17 }
 0x34f   :  { %v719_v25 = vadd.f32 %v4856_v2, %v718_v23 }
 0x351   :  { %v724_v26 = vmul.f32 0.35355338, %v719_v25 }
 0x353   :  { %v1116_v27 = vpack.c.bf16 %v724_v26, %v723_v24 }
 0x355   :  { %1181 = vrot.lane.b32.xlu1 %v1116_v27, %s5778_s17  ;;  %1252 = vrot.lane.b32.xlu2 %v1117_v22, %s5777_s22 }
 0x356   :  { %1319 = vrot.lane.b32.xlu0 %v1117_v22, %s5779_s29 }
 0x35d   :  { %1250 = vrot.lane.b32.xlu1 %v1116_v27, %s5777_s22  ;;  %1317 = vrot.lane.b32.xlu2 %v1116_v27, %s5779_s29 }
 0x365   :  { %931 = vrot.lane.b32.xlu1 %v6257_v11, %s5778_s17 }
 0x39f   :  { %v952_v28 = vpop.permute.xlu2 %951 }
 0x3a7   :  { %v1019_v29 = vpop.permute.xlu2 %1018 }
 0x3af   :  { %v954_v30 = vpop.permute.xlu1 %953  ;;  %v886_v31 = vpop.permute.xlu0 %885 }
 0x3b0   :  { %v959_v32 = vsel %vm559_vm1, %v954_v30, 0  ;;  %v891_v33 = vsel %vm559_vm1, %v886_v31, 0  ;;  %v1253_v35 = vpop.permute.xlu2 %1252 }
 0x3b1   :  { %900 = vmatpush.bf16.xpose.msra.mxu1 %v891_v33  ;;  %968 = vmatpush.bf16.xpose.msra.mxu0 %v959_v32  ;;  %v1258_v36 = vsel %vm559_vm1, %v1253_v35, 0 }
 0x3b7   :  { %v1021_v37 = vpop.permute.xlu1 %1020 }
 0x3b8   :  { %v1026_v40 = vsel %vm559_vm1, %v1021_v37, 0  ;;  %v883_v43 = vpop.permute.xlu0 %882  ;;  %4336 = vmatmul.msk.bf16.vlgmr.msra.gmra.mxu0 %vm559_vm1, %v952_v28  ;;  %v1318_v0 = vpop.permute.xlu2 %1317 }
 0x3b9   :  { %1132 = vmatpush.bf16.xpose.msrb.mxu0 %v1123_v34  ;;  %4334 = vmatmul.msk.bf16.vlgmr.msra.gmra.mxu1 %vm559_vm1, %v883_v43 }
 0x3ba   :  { %1035 = vmatpush.bf16.xpose.msrb.mxu1 %v1026_v40 }
 0x3c0   :  { %v1185_v47 = vpop.permute.xlu0 %1184 }
 0x3c1   :  { %1267 = vmatpush.bf16.xpose.msra.mxu0 %v1258_v36  ;;  %v1190_v48 = vsel %vm559_vm1, %v1185_v47, 0 }
 0x3c2   :  { %1199 = vmatpush.bf16.xpose.msra.mxu1 %v1190_v48 }
 0x3c3   :  { %v834_v49 = vpop.f32.mrf.mxu1 }
 0x3c4   :  { %v835_v53 = vadd.f32 %v834_v49, %v6284_v46 }
 0x3c6   :  { %v840_v54 = vsel %vm839_vm3, %v835_v53, -inf }
 0x3c7   :  { %841 = vmax.xlane.f32.xlu0 %v840_v54  ;;  %v1182_v56 = vpop.permute.xlu1 %1181 }
 0x3c8   :  { %4340 = vmatmul.msk.bf16.vlgmr.msrb.gmra.mxu0 %vm559_vm1, %v1116_v27  ;;  %v1320_v57 = vpop.permute.xlu0 %1319 }
 0x3c9   :  { %4338 = vmatmul.msk.bf16.vlgmr.msrb.gmra.mxu1 %vm559_vm1, %v1019_v29  ;;  %v1325_v58 = vsel %vm559_vm1, %v1320_v57, 0 }
 0x3ca   :  { %1334 = vmatpush.bf16.xpose.msrb.mxu1 %v1325_v58 }
 0x3cb   :  { %v836_v59 = vpop.f32.mrf.mxu1 }
 0x3cc   :  { %v837_v60 = vadd.f32 %v836_v59, %v6284_v46 }
 0x3ce   :  { %v843_v61 = vsel %vm839_vm3, %v837_v60, -inf }
 0x3cf   :  { %844 = vmax.xlane.f32.xlu1 %v843_v61  ;;  %v1251_v62 = vpop.permute.xlu1 %1250 }
 0x3d7   :  { %v932_v63 = vpop.permute.xlu1 %931 }
 0x3d8   :  { %944 = vmatpush.bf16.msra.mxu3 %v932_v63  ;;  %4344 = vmatmul.msk.bf16.vlgmr.msra.gmra.mxu0 %vm559_vm1, %v1251_v62 }
 0x3d9   :  { %4342 = vmatmul.msk.bf16.vlgmr.msra.gmra.mxu1 %vm559_vm1, %v1182_v56 }
 0x3e9   :  { %4346 = vmatmul.msk.bf16.vlgmr.msrb.gmra.mxu1 %vm559_vm1, %v1318_v0 }
 0x435   :  { %v970_v2 = vpop.f32.mrf.mxu0 }
 0x436   :  { %v902_v3 = vpop.f32.mrf.mxu1  ;;  %v6298_v4 = vadd.f32 %v970_v2, %v6284_v46 }
 0x437   :  { %v6301_v5 = vadd.f32 %v902_v3, %v6284_v46  ;;  %v806_v3 = vpop.f32.mrf.mxu2 }
 0x438   :  { %v975_v6 = vsel %vm839_vm3, %v6298_v4, -inf }
 0x439   :  { %v907_v7 = vsel %vm839_vm3, %v6301_v5, -inf  ;;  %976 = vmax.xlane.f32.xlu0 %v975_v6 }
 0x43a   :  { %908 = vmax.xlane.f32.xlu2 %v907_v7  ;;  %v842_v8 = vpop.xlane.xlu0 %841  ;;  %v807_v7 = vadd.f32 %v6249_v1, %v806_v3 }
 0x43b   :  { %v846_v9 = vsub.f32 %v835_v53, %v842_v8 }
 0x43d   :  { %v848_v10 = vmul.f32 1.442695, %v846_v9  ;;  %v972_v12 = vpop.f32.mrf.mxu0 }
 0x43e   :  { %v904_v13 = vpop.f32.mrf.mxu1  ;;  %v6308_v14 = vadd.f32 %v972_v12, %v6284_v46 }
 0x43f   :  { %v6311_v15 = vadd.f32 %v904_v13, %v6284_v46  ;;  %4891 = vpow2.f32 %v848_v10  ;;  %v808_v6 = vpop.f32.mrf.mxu2 }
 0x440   :  { %v978_v16 = vsel %vm839_vm3, %v6308_v14, -inf  ;;  %v809_v8 = vadd.f32 %v6249_v1, %v808_v6 }
 0x441   :  { %v910_v17 = vsel %vm839_vm3, %v6311_v15, -inf  ;;  %979 = vmax.xlane.f32.xlu1 %v978_v16 }
 0x442   :  { %911 = vmax.xlane.f32.xlu2 %v910_v17  ;;  %v845_v18 = vpop.xlane.xlu1 %844  ;;  %v6380_v9 = vpack.c.bf16 %v809_v8, %v807_v7 }
 0x443   :  { %v847_v20 = vsub.f32 %v837_v60, %v845_v18 }
 0x445   :  { %v850_v21 = vmul.f32 1.442695, %v847_v20  ;;  %v1134_v22 = vpop.f32.mrf.mxu0  ;;  %v6320_v23 = vpop.eup %4891 }
 0x446   :  { %v1037_v24 = vpop.f32.mrf.mxu1  ;;  %v6323_v25 = vadd.f32 %v1134_v22, %v6318_v19  ;;  %v852_v27 = vsel %vm839_vm3, %v6320_v23, 0.0 }
 0x447   :  { %4893 = vpow2.f32 %v850_v21  ;;  %v6332_v29 = vadd.f32 %v1037_v24, %v6284_v46 }
 0x448   :  { %v1139_v26 = vsel %vm839_vm3, %v6323_v25, -inf }
 0x449   :  { %1140 = vmax.xlane.f32.xlu1 %v1139_v26  ;;  %v1042_v33 = vsel %vm839_vm3, %v6332_v29, -inf }
 0x44a   :  { %853 = vadd.xlane.f32.xlu2 %v852_v27 }
 0x44d   :  { %v6329_v28 = vpop.eup %4893  ;;  %v1136_v30 = vpop.f32.mrf.mxu0 }
 0x44e   :  { %v1039_v31 = vpop.f32.mrf.mxu1  ;;  %v855_v32 = vsel %vm839_vm3, %v6329_v28, 0.0  ;;  %v6342_v35 = vadd.f32 %v1136_v30, %v6318_v19 }
 0x44f   :  { %856 = vadd.xlane.f32.xlu0 %v855_v32  ;;  %v6339_v34 = vadd.f32 %v1039_v31, %v6284_v46 }
 0x450   :  { %v1142_v48 = vsel %vm839_vm3, %v6342_v35, -inf }
 0x451   :  { %v1045_v43 = vsel %vm839_vm3, %v6339_v34, -inf }
 0x452   :  { %1043 = vmax.xlane.f32.xlu2 %v1042_v33 }
 0x455   :  { %v1269_v36 = vpop.f32.mrf.mxu0 }
 0x456   :  { %v1201_v37 = vpop.f32.mrf.mxu1  ;;  %v6345_v40 = vadd.f32 %v1269_v36, %v6318_v19 }
 0x457   :  { %1046 = vmax.xlane.f32.xlu0 %v1045_v43  ;;  %v6350_v44 = vadd.f32 %v1201_v37, %v6318_v19 }
 0x458   :  { %v1274_v47 = vsel %vm839_vm3, %v6345_v40, -inf }
 0x459   :  { %1275 = vmax.xlane.f32.xlu1 %v1274_v47  ;;  %v1206_v49 = vsel %vm839_vm3, %v6350_v44, -inf }
 0x45a   :  { %1143 = vmax.xlane.f32.xlu2 %v1142_v48 }
 0x45d   :  { %v1271_v53 = vpop.f32.mrf.mxu0 }
 0x45e   :  { %v1203_v54 = vpop.f32.mrf.mxu1  ;;  %v6359_v56 = vadd.f32 %v1271_v53, %v6318_v19 }
 0x45f   :  { %v6362_v57 = vadd.f32 %v1203_v54, %v6318_v19  ;;  %1207 = vmax.xlane.f32.xlu0 %v1206_v49 }
 0x460   :  { %v1277_v58 = vsel %vm839_vm3, %v6359_v56, -inf }
 0x461   :  { %v1209_v59 = vsel %vm839_vm3, %v6362_v57, -inf }
 0x462   :  { %1210 = vmax.xlane.f32.xlu1 %v1209_v59  ;;  %1278 = vmax.xlane.f32.xlu2 %v1277_v58 }
 0x466   :  { %v1336_v60 = vpop.f32.mrf.mxu1 }
 0x467   :  { %v6369_v61 = vadd.f32 %v1336_v60, %v6318_v19 }
 0x469   :  { %v1341_v62 = vsel %vm839_vm3, %v6369_v61, -inf }
 0x46a   :  { %1342 = vmax.xlane.f32.xlu0 %v1341_v62 }
 0x46e   :  { %v1338_v63 = vpop.f32.mrf.mxu1 }
 0x46f   :  { %v6374_v0 = vadd.f32 %v1338_v63, %v6318_v19 }
 0x471   :  { %v1344_v2 = vsel %vm839_vm3, %v6374_v0, -inf }
 0x472   :  { %1345 = vmax.xlane.f32.xlu1 %v1344_v2 }
 0x48b   :  { %1230 = vrot.lane.b32.xlu1 %v6380_v9, %s5778_s17 }
 0x4ac   :  { %v977_v12 = vpop.xlane.xlu0 %976 }
 0x4ad   :  { %v909_v10 = vpop.xlane.xlu2 %908  ;;  %v981_v17 = vsub.f32 %v6298_v4, %v977_v12 }
 0x4ae   :  { %v913_v13 = vsub.f32 %v6301_v5, %v909_v10 }
 0x4af   :  { %v983_v18 = vmul.f32 1.442695, %v981_v17 }
 0x4b0   :  { %v915_v16 = vmul.f32 1.442695, %v913_v13 }
 0x4b2   :  { %4895 = vpow2.f32 %v915_v16 }
 0x4b3   :  { %4897 = vpow2.f32 %v983_v18 }
 0x4b4   :  { %v980_v20 = vpop.xlane.xlu1 %979 }
 0x4b5   :  { %v912_v21 = vpop.xlane.xlu2 %911  ;;  %v982_v1 = vsub.f32 %v6308_v14, %v980_v20 }
 0x4b6   :  { %v914_v22 = vsub.f32 %v6311_v15, %v912_v21 }
 0x4b7   :  { %v985_v5 = vmul.f32 1.442695, %v982_v1 }
 0x4b8   :  { %v6388_v24 = vpop.eup %4895  ;;  %v917_v26 = vmul.f32 1.442695, %v914_v22 }
 0x4b9   :  { %v919_v27 = vsel %vm839_vm3, %v6388_v24, 0.0  ;;  %v6393_v32 = vpop.eup %4897 }
 0x4ba   :  { %4899 = vpow2.f32 %v917_v26  ;;  %920 = vadd.xlane.f32.xlu2 %v919_v27  ;;  %v987_v36 = vsel %vm839_vm3, %v6393_v32, 0.0 }
 0x4bb   :  { %4901 = vpow2.f32 %v985_v5 }
 0x4bc   :  { %v1141_v30 = vpop.xlane.xlu1 %1140 }
 0x4bd   :  { %v1145_v4 = vsub.f32 %v6323_v25, %v1141_v30  ;;  %v854_v31 = vpop.xlane.xlu2 %853 }
 0x4be   :  { %4903 = vrcp.f32 %v854_v31 }
 0x4bf   :  { %v1147_v15 = vmul.f32 1.442695, %v1145_v4 }
 0x4c0   :  { %v6395_v33 = vpop.eup %4899 }
 0x4c1   :  { %4905 = vpow2.f32 %v1147_v15  ;;  %v922_v14 = vsel %vm839_vm3, %v6395_v33, 0.0  ;;  %v6401_v25 = vpop.eup %4901 }
 0x4c2   :  { %923 = vadd.xlane.f32.xlu0 %v922_v14  ;;  %988 = vadd.xlane.f32.xlu2 %v987_v36  ;;  %v857_v37 = vpop.xlane.xlu0 %856  ;;  %v990_v59 = vsel %vm839_vm3, %v6401_v25, 0.0 }
 0x4c3   :  { %4907 = vrcp.f32 %v857_v37 }
 0x4c4   :  { %v4904_v47 = vpop.eup %4903 }
 0x4c5   :  { %v1044_v43 = vpop.xlane.xlu2 %1043  ;;  %v860_v60 = vmul.f32 %v4904_v47, %v6320_v23 }
 0x4c6   :  { %v1048_v48 = vsub.f32 %v6332_v29, %v1044_v43 }
 0x4c7   :  { %v6404_v49 = vpop.eup %4905 }
 0x4c8   :  { %v1050_v53 = vmul.f32 1.442695, %v1048_v48  ;;  %v1151_v54 = vsel %vm839_vm3, %v6404_v49, 0.0 }
 0x4c9   :  { %v4908_v58 = vpop.eup %4907  ;;  %1152 = vadd.xlane.f32.xlu1 %v1151_v54 }
 0x4ca   :  { %v861_v62 = vmul.f32 %v4908_v58, %v6329_v28  ;;  %4909 = vpow2.f32 %v1050_v53  ;;  %991 = vadd.xlane.f32.xlu0 %v990_v59  ;;  %v1047_v10 = vpop.xlane.xlu0 %1046 }
 0x4cb   :  { %v1049_v12 = vsub.f32 %v6339_v34, %v1047_v10 }
 0x4cc   :  { %v1276_v63 = vpop.xlane.xlu1 %1275  ;;  %v862_v2 = vpack.c.bf16 %v861_v62, %v860_v60 }
 0x4cd   :  { %v1052_v13 = vmul.f32 1.442695, %v1049_v12  ;;  %v1144_v16 = vpop.xlane.xlu2 %1143 }
 0x4ce   :  { %4333 = vmatmul.msk.bf16.vlgmr.msrb.gmra.mxu3 %vm839_vm3, %v862_v2 }
 0x4d0   :  { %v6413_v29 = vpop.eup %4909 }
 0x4d1   :  { %v1054_v3 = vsel %vm839_vm3, %v6413_v29, 0.0 }
 0x4d2   :  { %1055 = vadd.xlane.f32.xlu2 %v1054_v3  ;;  %v1208_v17 = vpop.xlane.xlu0 %1207 }
 0x4d3   :  { %v1212_v18 = vsub.f32 %v6350_v44, %v1208_v17 }
 0x4d5   :  { %v1211_v6 = vpop.xlane.xlu1 %1210  ;;  %v1214_v22 = vmul.f32 1.442695, %v1212_v18  ;;  %v1279_v1 = vpop.xlane.xlu2 %1278 }
 0x4d6   :  { %v1213_v7 = vsub.f32 %v6362_v57, %v1211_v6  ;;  %v1146_v57 = vsub.f32 %v6342_v35, %v1144_v16  ;;  %v1281_v26 = vsub.f32 %v6359_v56, %v1279_v1 }
 0x4d8   :  { %v1216_v8 = vmul.f32 1.442695, %v1213_v7  ;;  %v1149_v20 = vmul.f32 1.442695, %v1146_v57  ;;  %v1284_v44 = vmul.f32 1.442695, %v1281_v26 }
 0x4da   :  { %4911 = vpow2.f32 %v1216_v8 }
 0x4db   :  { %4913 = vpow2.f32 %v1052_v13 }
 0x4dc   :  { %4915 = vpow2.f32 %v1149_v20 }
 0x4dd   :  { %4917 = vpow2.f32 %v1214_v22  ;;  %v1343_v35 = vpop.xlane.xlu0 %1342 }
 0x4de   :  { %1065 = vrot.lane.b32.xlu0 %v6257_v11, %s5779_s29  ;;  %v1347_v30 = vsub.f32 %v6369_v61, %v1343_v35 }
 0x4e0   :  { %v6420_v23 = vpop.eup %4911  ;;  %v1349_v14 = vmul.f32 1.442695, %v1347_v30 }
 0x4e1   :  { %v1221_v28 = vsel %vm839_vm3, %v6420_v23, 0.0  ;;  %v6431_v21 = vpop.eup %4913 }
 0x4e2   :  { %1222 = vadd.xlane.f32.xlu1 %v1221_v28  ;;  %v1057_v34 = vsel %vm839_vm3, %v6431_v21, 0.0  ;;  %v6437_v5 = vpop.eup %4915 }
 0x4e3   :  { %v6440_v31 = vpop.eup %4917 }
 0x4e4   :  { %v1218_v56 = vsel %vm839_vm3, %v6440_v31, 0.0 }
 0x4e5   :  { %v1346_v4 = vpop.xlane.xlu1 %1345 }
 0x4e6   :  { %v1348_v15 = vsub.f32 %v6374_v0, %v1346_v4 }
 0x4e8   :  { %v1351_v37 = vmul.f32 1.442695, %v1348_v15 }
 0x4ea   :  { %998 = vrot.lane.b32.xlu2 %v6257_v11, %s5777_s22  ;;  %v1280_v11 = vsub.f32 %v6345_v40, %v1276_v63  ;;  %v1154_v40 = vsel %vm839_vm3, %v6437_v5, 0.0 }
 0x4ec   :  { %v1282_v27 = vmul.f32 1.442695, %v1280_v11 }
 0x4ee   :  { %4919 = vpow2.f32 %v1282_v27 }
 0x4ef   :  { %4921 = vpow2.f32 %v1284_v44 }
 0x4f0   :  { %4923 = vpow2.f32 %v1349_v14 }
 0x4f1   :  { %4925 = vpow2.f32 %v1351_v37 }
 0x4f4   :  { %v6447_v36 = vpop.eup %4919 }
 0x4f5   :  { %v6449_v61 = vpop.eup %4921  ;;  %v1286_v43 = vsel %vm839_vm3, %v6447_v36, 0.0 }
 0x4f6   :  { %v1289_v47 = vsel %vm839_vm3, %v6449_v61, 0.0  ;;  %v6455_v0 = vpop.eup %4923 }
 0x4f7   :  { %v6457_v48 = vpop.eup %4925  ;;  %v1353_v53 = vsel %vm839_vm3, %v6455_v0, 0.0 }
 0x4f8   :  { %v1356_v54 = vsel %vm839_vm3, %v6457_v48, 0.0 }
 0x4fb   :  { %1297 = vrot.lane.b32.xlu1 %v6380_v9, %s5777_s22 }
 0x508   :  { %1058 = vadd.xlane.f32.xlu0 %v1057_v34 }
 0x510   :  { %1155 = vadd.xlane.f32.xlu0 %v1154_v40 }
 0x513   :  { %1219 = vadd.xlane.f32.xlu2 %v1218_v56 }
 0x518   :  { %1287 = vadd.xlane.f32.xlu0 %v1286_v43 }
 0x51b   :  { %1290 = vadd.xlane.f32.xlu2 %v1289_v47 }
 0x520   :  { %1354 = vadd.xlane.f32.xlu0 %v1353_v53 }
 0x523   :  { %1357 = vadd.xlane.f32.xlu2 %v1356_v54 }
 0x52d   :  { %v921_v58 = vpop.xlane.xlu2 %920 }
 0x52e   :  { %4927 = vrcp.f32 %v921_v58 }
 0x534   :  { %1364 = vrot.lane.b32.xlu0 %v6380_v9, %s5779_s29  ;;  %v4928_v60 = vpop.eup %4927 }
 0x535   :  { %v924_v59 = vpop.xlane.xlu0 %923  ;;  %v989_v63 = vpop.xlane.xlu2 %988  ;;  %v927_v2 = vmul.f32 %v4928_v60, %v6388_v24 }
 0x536   :  { %4929 = vrcp.f32 %v924_v59 }
 0x53c   :  { %v4930_v62 = vpop.eup %4929 }
 0x53d   :  { %v928_v3 = vmul.f32 %v4930_v62, %v6395_v33  ;;  %v992_v6 = vpop.xlane.xlu0 %991  ;;  %v1231_v33 = vpop.permute.xlu1 %1230 }
 0x53e   :  { %4931 = vrcp.f32 %v992_v6 }
 0x53f   :  { %v929_v7 = vpack.c.bf16 %v928_v3, %v927_v2  ;;  %4933 = vrcp.f32 %v989_v63 }
 0x541   :  { %4335 = vmatmul.msk.bf16.vlgmr.msra.gmra.mxu3 %vm839_vm3, %v929_v7 }
 0x544   :  { %v4932_v28 = vpop.eup %4931 }
 0x545   :  { %v1056_v8 = vpop.xlane.xlu2 %1055  ;;  %v4934_v10 = vpop.eup %4933  ;;  %v996_v12 = vmul.f32 %v4932_v28, %v6401_v25 }
 0x546   :  { %v995_v13 = vmul.f32 %v4934_v10, %v6393_v32  ;;  %v1153_v17 = vpop.xlane.xlu1 %1152  ;;  %4935 = vrcp.f32 %v1056_v8 }
 0x548   :  { %v997_v57 = vpack.c.bf16 %v996_v12, %v995_v13 }
 0x54c   :  { %v4936_v25 = vpop.eup %4935 }
 0x54d   :  { %v999_v16 = vpop.permute.xlu2 %998  ;;  %v1062_v11 = vmul.f32 %v4936_v25, %v6413_v29 }
 0x54e   :  { %1011 = vmatpush.bf16.msra.mxu2 %v999_v16 }
 0x550   :  { %v1066_v24 = vpop.permute.xlu0 %1065 }
 0x551   :  { %4337 = vmatmul.msk.bf16.vlgmr.msra.gmra.mxu2 %vm839_vm3, %v997_v57  ;;  %1078 = vmatpush.bf16.msrb.mxu3 %v1066_v24 }
 0x552   :  { %1173 = vmatpush.bf16.msrb.mxu2 %v6380_v9 }
 0x555   :  { %1243 = vmatpush.bf16.msra.mxu3 %v1231_v33  ;;  %v1223_v18 = vpop.xlane.xlu1 %1222 }
 0x56d   :  { %v1298_v20 = vpop.permute.xlu1 %1297 }
 0x56e   :  { %1310 = vmatpush.bf16.msra.mxu2 %v1298_v20 }
 0x57b   :  { %v1059_v22 = vpop.xlane.xlu0 %1058 }
 0x57c   :  { %4937 = vrcp.f32 %v1059_v22  ;;  %v4633_v22 = vld [vmem:[%s7298_s18 + $0x8] sm:$0xff] }
 0x57d   :  { %4939 = vrcp.f32 %v1153_v17  ;;  %1443 = vmatpush.bf16.msrb.mxu0 %v4633_v22 }
 0x582   :  { %v4938_v32 = vpop.eup %4937 }
 0x583   :  { %v1063_v9 = vmul.f32 %v4938_v32, %v6431_v21  ;;  %v1156_v1 = vpop.xlane.xlu0 %1155  ;;  %v4940_v27 = vpop.eup %4939 }
 0x584   :  { %4941 = vrcp.f32 %v1156_v1  ;;  %v1159_v44 = vmul.f32 %v4940_v27, %v6404_v49 }
 0x585   :  { %v1064_v34 = vpack.c.bf16 %v1063_v9, %v1062_v11  ;;  %v4632_v11 = vld [vmem:[%s7298_s18] sm:$0xff] }
 0x586   :  { %v1220_v26 = vpop.xlane.xlu2 %1219  ;;  %1444 = vmatpush.bf16.msrb.mxu0 %v4632_v11 }
 0x587   :  { %4339 = vmatmul.msk.bf16.vlgmr.msrb.gmra.mxu3 %vm839_vm3, %v1064_v34  ;;  %4943 = vrcp.f32 %v1220_v26 }
 0x588   :  { %4945 = vrcp.f32 %v1223_v18 }
 0x58a   :  { %v4942_v35 = vpop.eup %4941 }
 0x58b   :  { %v1160_v30 = vmul.f32 %v4942_v35, %v6437_v5  ;;  %v1288_v29 = vpop.xlane.xlu0 %1287 }
 0x58d   :  { %v1161_v4 = vpack.c.bf16 %v1160_v30, %v1159_v44  ;;  %v4944_v40 = vpop.eup %4943 }
 0x58e   :  { %v1291_v15 = vpop.xlane.xlu2 %1290  ;;  %v4946_v21 = vpop.eup %4945  ;;  %v1226_v14 = vmul.f32 %v4944_v40, %v6440_v31 }
 0x58f   :  { %4341 = vmatmul.msk.bf16.vlgmr.msrb.gmra.mxu2 %vm839_vm3, %v1161_v4  ;;  %4947 = vrcp.f32 %v1291_v15  ;;  %v1227_v56 = vmul.f32 %v4946_v21, %v6420_v23 }
 0x590   :  { %4949 = vrcp.f32 %v1288_v29 }
 0x591   :  { %v1228_v37 = vpack.c.bf16 %v1227_v56, %v1226_v14 }
 0x593   :  { %v1355_v53 = vpop.xlane.xlu0 %1354 }
 0x595   :  { %v4948_v43 = vpop.eup %4947 }
 0x596   :  { %v4950_v49 = vpop.eup %4949  ;;  %v1358_v47 = vpop.xlane.xlu2 %1357  ;;  %v1295_v5 = vmul.f32 %v4948_v43, %v6449_v61 }
 0x597   :  { %4343 = vmatmul.msk.bf16.vlgmr.msra.gmra.mxu3 %vm839_vm3, %v1228_v37  ;;  %v1294_v54 = vmul.f32 %v4950_v49, %v6447_v36  ;;  %4951 = vrcp.f32 %v1358_v47  ;;  %v876_v61 = vpop.f32.mrf.mxu3 }
 0x598   :  { %4953 = vrcp.f32 %v1355_v53 }
 0x599   :  { %v1296_v58 = vpack.c.bf16 %v1295_v5, %v1294_v54 }
 0x59d   :  { %v4952_v31 = vpop.eup %4951 }
 0x59e   :  { %v4954_v59 = vpop.eup %4953  ;;  %v1362_v23 = vmul.f32 %v4952_v31, %v6457_v48 }
 0x59f   :  { %4345 = vmatmul.msk.bf16.vlgmr.msra.gmra.mxu2 %vm839_vm3, %v1296_v58  ;;  %v1361_v60 = vmul.f32 %v4954_v59, %v6455_v0  ;;  %v878_v2 = vpop.f32.mrf.mxu3 }
 0x5a1   :  { %v1363_v63 = vpack.c.bf16 %v1362_v23, %v1361_v60 }
 0x5a6   :  { %v1365_v62 = vpop.permute.xlu0 %1364 }
 0x5a7   :  { %1377 = vmatpush.bf16.msrb.mxu3 %v1365_v62 }
 0x5aa   :  { %4347 = vmatmul.msk.bf16.vlgmr.msrb.gmra.mxu3 %vm839_vm3, %v1363_v63 }
 0x5c4   :  { %v946_v3 = vpop.f32.mrf.mxu3 }
 0x5cc   :  { %v948_v36 = vpop.f32.mrf.mxu3 }
 0x5cd   :  { %v4761_v6 = vpack.i.bf16 %v948_v36, %v946_v3  ;;  %v4857_v36 = vld [vmem:[#allocation7] ss:$0 sm:$0xff] }
 0x5cf   :  { %4762 = vrot.lane.b32.xlu2 %v4761_v6, %s5780_s23 }
 0x5d4   :  { %v1013_v7 = vpop.f32.mrf.mxu2 }
 0x5dc   :  { %v1015_v8 = vpop.f32.mrf.mxu2 }
 0x5dd   :  { %v4766_v28 = vpack.i.bf16 %v1015_v8, %v1013_v7 }
 0x5df   :  { %4767 = vrot.lane.b32.xlu1 %v4766_v28, %s5752_s25 }
 0x60a   :  { %v1080_v48 = vpop.f32.mrf.mxu3 }
 0x612   :  { %v1082_v0 = vpop.f32.mrf.mxu3  ;;  %v1175_v10 = vpop.f32.mrf.mxu2 }
 0x613   :  { %v4771_v12 = vpack.i.bf16 %v1082_v0, %v1080_v48 }
 0x615   :  { %4772 = vrot.lane.b32.xlu1 %v4771_v12, %s5781_s6 }
 0x61a   :  { %v1177_v13 = vpop.f32.mrf.mxu2  ;;  %v1245_v16 = vpop.f32.mrf.mxu3 }
 0x622   :  { %v1247_v57 = vpop.f32.mrf.mxu3  ;;  %v1312_v24 = vpop.f32.mrf.mxu2 }
 0x623   :  { %v4776_v33 = vpack.i.bf16 %v1247_v57, %v1245_v16 }
 0x625   :  { %4777 = vrot.lane.b32.xlu0 %v4776_v33, %s5780_s23 }
 0x629   :  { %v4763_v1 = vpop.permute.xlu2 %4762 }
 0x62a   :  { %v1314_v17 = vpop.f32.mrf.mxu2  ;;  %v4765_v34 = vunpack.i.h.bf16 %v4763_v1  ;;  %v4764_v26 = vunpack.i.l.bf16 %v4763_v1 }
 0x62b   :  { %v4781_v18 = vpack.i.bf16 %v1314_v17, %v1312_v24 }
 0x62c   :  { %v1110_v30 = vsel %vm559_vm1, %v878_v2, %v4765_v34  ;;  %v1109_v4 = vsel %vm559_vm1, %v876_v61, %v4764_v26 }
 0x62d   :  { %4782 = vrot.lane.b32.xlu1 %v4781_v18, %s5752_s25  ;;  %v1379_v20 = vpop.f32.mrf.mxu3 }
 0x635   :  { %v1381_v25 = vpop.f32.mrf.mxu3 }
 0x636   :  { %v4786_v32 = vpack.i.bf16 %v1381_v25, %v1379_v20  ;;  %v5782_v20 = vmov 32.0  }
 0x637   :  { %4955 = vrcp.f32 %v5782_v20 }
 0x638   :  { %4787 = vrot.lane.b32.xlu2 %v4786_v32, %s5781_s6 }
 0x651   :  { %v4768_v9 = vpop.permute.xlu1 %4767 }
 0x652   :  { %v4770_v27 = vunpack.i.h.bf16 %v4768_v9  ;;  %v4769_v35 = vunpack.i.l.bf16 %v4768_v9 }
 0x654   :  { %v1112_v29 = vsel %vm839_vm3, %v1110_v30, %v4770_v27  ;;  %v1111_v21 = vsel %vm839_vm3, %v1109_v4, %v4769_v35 }
 0x687   :  { %v4773_v44 = vpop.permute.xlu1 %4772 }
 0x688   :  { %v4775_v40 = vunpack.i.h.bf16 %v4773_v44  ;;  %v4774_v15 = vunpack.i.l.bf16 %v4773_v44 }
 0x68a   :  { %v1115_v14 = vsel %vm1113_vm4, %v1112_v29, %v4775_v40  ;;  %v1114_v56 = vsel %vm1113_vm4, %v1111_v21, %v4774_v15 }
 0x68b   :  { %v1414_v37 = vpack.c.bf16 %v1115_v14, %v1114_v56 }
 0x68d   :  { %4356 = vmatmul.msk.bf16.vlgmr.msrb.gmra.mxu0 %vm615_vm2, %v1414_v37 }
 0x692   :  { %v4788_v5 = vpop.permute.xlu2 %4787 }
 0x693   :  { %v4790_v31 = vunpack.i.h.bf16 %v4788_v5  ;;  %v4789_v59 = vunpack.i.l.bf16 %v4788_v5  ;;  %v4635_v5 = vld [vmem:[%s7299_s3 + $0x8] sm:$0xff] }
 0x694   :  { %1605 = vmatpush.bf16.msrb.mxu2 %v4635_v5 }
 0x697   :  { %v4778_v43 = vpop.permute.xlu0 %4777 }
 0x698   :  { %v4780_v49 = vunpack.i.h.bf16 %v4778_v43  ;;  %v4779_v47 = vunpack.i.l.bf16 %v4778_v43 }
 0x69a   :  { %v1409_v23 = vsel %vm559_vm1, %v1177_v13, %v4780_v49  ;;  %v1408_v60 = vsel %vm559_vm1, %v1175_v10, %v4779_v47 }
 0x69f   :  { %v4783_v53 = vpop.permute.xlu1 %4782 }
 0x6a0   :  { %v4785_v54 = vunpack.i.h.bf16 %v4783_v53  ;;  %v4784_v58 = vunpack.i.l.bf16 %v4783_v53 }
 0x6a2   :  { %v1410_v62 = vsel %vm839_vm3, %v1408_v60, %v4784_v58  ;;  %v1411_v63 = vsel %vm839_vm3, %v1409_v23, %v4785_v54 }
 0x6a3   :  { %v1412_v61 = vsel %vm1113_vm4, %v1410_v62, %v4789_v59  ;;  %v1413_v2 = vsel %vm1113_vm4, %v1411_v63, %v4790_v31  ;;  %v4634_v31 = vld [vmem:[%s7299_s3] sm:$0xff] }
 0x6a4   :  { %v1415_v3 = vpack.c.bf16 %v1413_v2, %v1412_v61  ;;  %1606 = vmatpush.bf16.msrb.mxu2 %v4634_v31  ;;  %v4639_v31 = vld [vmem:[%s7300_s28 + $0x18] sm:$0xff] }
 0x6a5   :  { %1671 = vmatpush.bf16.msra.mxu1 %v4639_v31  ;;  %v4645_v31 = vld [vmem:[%s7291_s19 + $0x18] sm:$0xff] }
 0x6a6   :  { %4357 = vmatmul.msk.bf16.gmra.mxu0 %vm615_vm2, %v1415_v3 }
 0x6a8   :  { %1928 = vmatpush.bf16.msra.mxu2 %v4645_v31 }
 0x70a   :  { %v1446_v6 = vpop.f32.mrf.mxu0 }
 0x70b   :  { %v1447_v7 = vadd.f32 %v4857_v36, %v1446_v6 }
 0x70d   :  { %v1456_v8 = vadd.f32 %v1447_v7, %v6215_v39 }
 0x70f   :  { %v1462_v28 = vsel %vm615_vm2, %v1456_v8, 0.0 }
 0x710   :  { %1463 = vadd.xlane.f32.xlu0 %v1462_v28 }
 0x712   :  { %v1448_v48 = vpop.f32.mrf.mxu0 }
 0x713   :  { %v1449_v0 = vadd.f32 %v4857_v36, %v1448_v48 }
 0x715   :  { %v1457_v10 = vadd.f32 %v1449_v0, %v6219_v42  ;;  %v4956_v42 = vpop.eup %4955 }
 0x716   :  { %v1475_v22 = vmul.f32 32.0, %v4956_v42  ;;  %vm1479_vm5 = vweird.f32 %v4956_v42 }
 0x717   :  { %v1465_v12 = vsel %vm615_vm2, %v1457_v10, 0.0 }
 0x718   :  { %1466 = vadd.xlane.f32.xlu1 %v1465_v12  ;;  %v1476_v25 = vsub.f32 1.0, %v1475_v22 }
 0x71a   :  { %v1477_v32 = vmul.f32 %v4956_v42, %v1476_v25 }
 0x71c   :  { %v1478_v11 = vadd.f32 %v4956_v42, %v1477_v32 }
 0x71e   :  { %v6517_v9 = vsel %vm1479_vm5, %v4956_v42, %v1478_v11 }
 0x723   :  { %v1451_v13 = vpop.f32.mrf.mxu0 }
 0x724   :  { %v1452_v16 = vadd.f32 %v4857_v36, %v1451_v13  ;;  %v4858_v13 = vld [vmem:[#allocation9] ss:$0 sm:$0xff] }
 0x726   :  { %v1458_v57 = vadd.f32 %v1452_v16, %v6230_v50 }
 0x728   :  { %v1468_v24 = vsel %vm615_vm2, %v1458_v57, 0.0 }
 0x729   :  { %1469 = vadd.xlane.f32.xlu2 %v1468_v24 }
 0x72b   :  { %v1453_v33 = vpop.f32.mrf.mxu0 }
 0x72c   :  { %v1454_v17 = vadd.f32 %v4857_v36, %v1453_v33 }
 0x72e   :  { %v1459_v39 = vadd.f32 %v1454_v17, %v6238_v55  ;;  %v4859_v17 = vld [vmem:[#allocation10] ss:$0 sm:$0xff] }
 0x730   :  { %v1471_v18 = vsel %vm615_vm2, %v1459_v39, 0.0 }
 0x731   :  { %1472 = vadd.xlane.f32.xlu0 %v1471_v18 }
 0x783   :  { %v1464_v50 = vpop.xlane.xlu0 %1463 }
 0x784   :  { %v1481_v1 = vmul.f32 %v6517_v9, %v1464_v50 }
 0x786   :  { %v1485_v34 = vsub.f32 %v1456_v8, %v1481_v1 }
 0x788   :  { %v1489_v26 = vmul.f32 %v1485_v34, %v1485_v34 }
 0x78a   :  { %v1493_v55 = vsel %vm615_vm2, %v1489_v26, 0.0 }
 0x78b   :  { %v1467_v27 = vpop.xlane.xlu1 %1466  ;;  %1494 = vadd.xlane.f32.xlu1 %v1493_v55 }
 0x78c   :  { %v1482_v35 = vmul.f32 %v6517_v9, %v1467_v27 }
 0x78e   :  { %v1486_v44 = vsub.f32 %v1457_v10, %v1482_v35 }
 0x790   :  { %v1490_v30 = vmul.f32 %v1486_v44, %v1486_v44 }
 0x792   :  { %v1496_v4 = vsel %vm615_vm2, %v1490_v30, 0.0 }
 0x793   :  { %1497 = vadd.xlane.f32.xlu2 %v1496_v4 }
 0x79c   :  { %v1470_v40 = vpop.xlane.xlu2 %1469 }
 0x79d   :  { %v1483_v15 = vmul.f32 %v6517_v9, %v1470_v40 }
 0x79f   :  { %v6524_v29 = vsub.f32 %v1458_v57, %v1483_v15 }
 0x7a1   :  { %v1491_v21 = vmul.f32 %v6524_v29, %v6524_v29 }
 0x7a3   :  { %v1499_v14 = vsel %vm615_vm2, %v1491_v21, 0.0 }
 0x7a4   :  { %v1473_v56 = vpop.xlane.xlu0 %1472  ;;  %1500 = vadd.xlane.f32.xlu0 %v1499_v14 }
 0x7a5   :  { %v1484_v37 = vmul.f32 %v6517_v9, %v1473_v56 }
 0x7a7   :  { %v6530_v43 = vsub.f32 %v1459_v39, %v1484_v37 }
 0x7a9   :  { %v1492_v49 = vmul.f32 %v6530_v43, %v6530_v43 }
 0x7ab   :  { %v1502_v47 = vsel %vm615_vm2, %v1492_v49, 0.0 }
 0x7ac   :  { %1503 = vadd.xlane.f32.xlu1 %v1502_v47 }
 0x7fe   :  { %v1495_v53 = vpop.xlane.xlu1 %1494 }
 0x7ff   :  { %v1505_v54 = vmul.f32 %v1495_v53, %v6517_v9 }
 0x801   :  { %v1509_v58 = vadd.f32 1e-05, %v1505_v54 }
 0x803   :  { %4957 = vrsqrt.f32 %v1509_v58  ;;  %vm1519_vm7 = vweird.f32 %v1509_v58 }
 0x806   :  { %v1498_v59 = vpop.xlane.xlu2 %1497 }
 0x807   :  { %v1506_v23 = vmul.f32 %v1498_v59, %v6517_v9  ;;  %v4638_v59 = vld [vmem:[%s7300_s28 + $0x10] sm:$0xff] }
 0x808   :  { %1672 = vmatpush.bf16.msra.mxu1 %v4638_v59 }
 0x809   :  { %v4958_v60 = vpop.eup %4957  ;;  %v1510_v62 = vadd.f32 1e-05, %v1506_v23  ;;  %v4636_v23 = vld [vmem:[%s7300_s28] sm:$0xff] }
 0x80a   :  { %v1514_v63 = vmul.f32 %v4958_v60, %v1509_v58  ;;  %vm1520_vm6 = vweird.f32 %v4958_v60 }
 0x80b   :  { %4959 = vrsqrt.f32 %v1510_v62  ;;  %vm1521_vm8 = vmor %vm1519_vm7, %vm1520_vm6  ;;  %vm1529_vm10 = vweird.f32 %v1510_v62  ;;  %vm1660_vm6 = vcmask 523264  }
 0x80c   :  { %v1515_v61 = vmul.f32 %v4958_v60, %v1514_v63 }
 0x80e   :  { %v1516_v2 = vmul.f32 0.5, %v1515_v61 }
 0x810   :  { %v1517_v3 = vsub.f32 1.5, %v1516_v2 }
 0x811   :  { %v4960_v36 = vpop.eup %4959 }
 0x812   :  { %v1518_v6 = vmul.f32 %v4958_v60, %v1517_v3  ;;  %v1524_v7 = vmul.f32 %v4960_v36, %v1510_v62  ;;  %vm1530_vm9 = vweird.f32 %v4960_v36  ;;  %v4860_v62 = vld [vmem:[#allocation12] ss:$0 sm:$0xff] }
 0x813   :  { %vm1531_vm11 = vmor %vm1529_vm10, %vm1530_vm9 }
 0x814   :  { %v1525_v8 = vmul.f32 %v4960_v36, %v1524_v7  ;;  %v1522_v28 = vsel %vm1521_vm8, %v4958_v60, %v1518_v6 }
 0x815   :  { %v1553_v16 = vmul.f32 %v1522_v28, %v1485_v34 }
 0x816   :  { %v1526_v48 = vmul.f32 0.5, %v1525_v8 }
 0x817   :  { %v1501_v0 = vpop.xlane.xlu0 %1500  ;;  %v1560_v39 = vmul.f32 %v4858_v13, %v1553_v16 }
 0x818   :  { %v1527_v10 = vsub.f32 1.5, %v1526_v48  ;;  %v1507_v12 = vmul.f32 %v1501_v0, %v6517_v9 }
 0x819   :  { %v6541_v25 = vadd.f32 %v4859_v17, %v1560_v39 }
 0x81a   :  { %v1528_v57 = vmul.f32 %v4960_v36, %v1527_v10  ;;  %v1511_v24 = vadd.f32 1e-05, %v1507_v12  ;;  %v4861_v12 = vld [vmem:[#allocation13] ss:$0 sm:$0xff] }
 0x81c   :  { %v1532_v33 = vsel %vm1531_vm11, %v4960_v36, %v1528_v57  ;;  %4961 = vrsqrt.f32 %v1511_v24  ;;  %vm1539_vm13 = vweird.f32 %v1511_v24 }
 0x81d   :  { %v1554_v18 = vmul.f32 %v1532_v33, %v1486_v44 }
 0x81f   :  { %v1561_v20 = vmul.f32 %v4858_v13, %v1554_v18  ;;  %v1504_v42 = vpop.xlane.xlu1 %1503 }
 0x820   :  { %v1508_v22 = vmul.f32 %v1504_v42, %v6517_v9 }
 0x821   :  { %v6543_v32 = vadd.f32 %v4859_v17, %v1561_v20 }
 0x822   :  { %v4962_v11 = vpop.eup %4961  ;;  %v1512_v50 = vadd.f32 1e-05, %v1508_v22 }
 0x823   :  { %v1534_v1 = vmul.f32 %v4962_v11, %v1511_v24  ;;  %v1575_v34 = vpack.c.bf16 %v6543_v32, %v6541_v25  ;;  %vm1540_vm12 = vweird.f32 %v4962_v11 }
 0x824   :  { %4963 = vrsqrt.f32 %v1512_v50  ;;  %vm1541_vm14 = vmor %vm1539_vm13, %vm1540_vm12  ;;  %vm1549_vm0 = vweird.f32 %v1512_v50 }
 0x825   :  { %v1535_v26 = vmul.f32 %v4962_v11, %v1534_v1  ;;  %4366 = vmatmul.msk.bf16.vlgmr.msrb.gmra.mxu2 %vm615_vm2, %v1575_v34 }
 0x827   :  { %v1536_v55 = vmul.f32 0.5, %v1535_v26 }
 0x829   :  { %v1537_v27 = vsub.f32 1.5, %v1536_v55 }
 0x82a   :  { %v4964_v35 = vpop.eup %4963 }
 0x82b   :  { %v1538_v44 = vmul.f32 %v4962_v11, %v1537_v27  ;;  %v1544_v30 = vmul.f32 %v4964_v35, %v1512_v50  ;;  %vm1550_vm15 = vweird.f32 %v4964_v35 }
 0x82c   :  { %vm1551_vm5 = vmor %vm1549_vm0, %vm1550_vm15 }
 0x82d   :  { %v1545_v4 = vmul.f32 %v4964_v35, %v1544_v30  ;;  %v1542_v40 = vsel %vm1541_vm14, %v4962_v11, %v1538_v44 }
 0x82e   :  { %v1555_v14 = vmul.f32 %v1542_v40, %v6524_v29  ;;  %v4637_v29 = vld [vmem:[%s7300_s28 + $0x8] sm:$0xff] }
 0x82f   :  { %v1546_v15 = vmul.f32 0.5, %v1545_v4  ;;  %1673 = vmatpush.bf16.msra.mxu1 %v4637_v29 }
 0x830   :  { %v1562_v47 = vmul.f32 %v4858_v13, %v1555_v14 }
 0x831   :  { %v1547_v21 = vsub.f32 1.5, %v1546_v15 }
 0x832   :  { %v1569_v53 = vadd.f32 %v4859_v17, %v1562_v47 }
 0x833   :  { %v1548_v56 = vmul.f32 %v4964_v35, %v1547_v21  ;;  %1674 = vmatpush.bf16.msra.mxu1 %v4636_v23  ;;  %v4641_v23 = vld [vmem:[%s7293_s10 + $0x18] sm:$0xff] }
 0x834   :  { %1834 = vmatpush.bf16.msra.mxu3 %v4641_v23 }
 0x835   :  { %v1552_v37 = vsel %vm1551_vm5, %v4964_v35, %v1548_v56 }
 0x836   :  { %v1556_v49 = vmul.f32 %v1552_v37, %v6530_v43 }
 0x838   :  { %v1563_v5 = vmul.f32 %v4858_v13, %v1556_v49 }
 0x83a   :  { %v1570_v54 = vadd.f32 %v4859_v17, %v1563_v5 }
 0x83c   :  { %v1576_v58 = vpack.c.bf16 %v1570_v54, %v1569_v53 }
 0x83e   :  { %4367 = vmatmul.msk.bf16.gmra.mxu2 %vm615_vm2, %v1576_v58 }
 0x8a8   :  { %v1608_v60 = vpop.f32.mrf.mxu2 }
 0x8a9   :  { %v1609_v63 = vadd.f32 %v4860_v62, %v1608_v60  ;;  %v4643_v60 = vld [vmem:[%s7292_s9 + $0x18] sm:$0xff] }
 0x8aa   :  { %1879 = vmatpush.bf16.msra.mxu0 %v4643_v60 }
 0x8ab   :  { %v1618_v2 = vmax.f32 %v1609_v63, 0.0  ;;  %v4644_v63 = vld [vmem:[%s7291_s19 + $0x10] sm:$0xff] }
 0x8ac   :  { %1929 = vmatpush.bf16.msra.mxu2 %v4644_v63 }
 0x8b0   :  { %v1610_v61 = vpop.f32.mrf.mxu2 }
 0x8b1   :  { %v1611_v43 = vadd.f32 %v4860_v62, %v1610_v61  ;;  %v4640_v61 = vld [vmem:[%s7293_s10 + $0x10] sm:$0xff] }
 0x8b2   :  { %1835 = vmatpush.bf16.msra.mxu3 %v4640_v61 }
 0x8b3   :  { %v1619_v3 = vmax.f32 %v1611_v43, 0.0  ;;  %v4642_v43 = vld [vmem:[%s7292_s9 + $0x10] sm:$0xff] }
 0x8b4   :  { %1880 = vmatpush.bf16.msra.mxu0 %v4642_v43 }
 0x8b5   :  { %v1630_v36 = vpack.c.bf16 %v1619_v3, %v1618_v2 }
 0x8b7   :  { %4384 = vmatmul.msk.bf16.vlgmr.msra.gmra.mxu1 %vm1660_vm6, %v1630_v36 }
 0x8c1   :  { %v1613_v6 = vpop.f32.mrf.mxu2 }
 0x8c2   :  { %v1614_v7 = vadd.f32 %v4860_v62, %v1613_v6 }
 0x8c4   :  { %v1620_v48 = vmax.f32 %v1614_v7, 0.0 }
 0x8c9   :  { %v1615_v8 = vpop.f32.mrf.mxu2 }
 0x8ca   :  { %v1616_v28 = vadd.f32 %v4860_v62, %v1615_v8 }
 0x8cc   :  { %v1621_v0 = vmax.f32 %v1616_v28, 0.0 }
 0x8ce   :  { %v1631_v10 = vpack.c.bf16 %v1621_v0, %v1620_v48 }
 0x8d0   :  { %4385 = vmatmul.msk.bf16.gmra.mxu1 %vm1660_vm6, %v1631_v10 }
 0x934   :  { %v1676_v13 = vpop.f32.mrf.mxu1 }
 0x935   :  { %v1677_v16 = vadd.f32 %v4861_v12, %v1676_v13 }
 0x937   :  { %v1686_v57 = vadd.f32 %v1677_v16, %v6541_v25 }
 0x939   :  { %v1692_v24 = vsel %vm615_vm2, %v1686_v57, 0.0 }
 0x93a   :  { %1693 = vadd.xlane.f32.xlu2 %v1692_v24  ;;  %v4862_v24 = vld [vmem:[#allocation15] ss:$0 sm:$0xff] }
 0x93c   :  { %v1678_v33 = vpop.f32.mrf.mxu1 }
 0x93d   :  { %v1679_v17 = vadd.f32 %v4861_v12, %v1678_v33 }
 0x93f   :  { %v1687_v39 = vadd.f32 %v1679_v17, %v6543_v32 }
 0x941   :  { %v1695_v18 = vsel %vm615_vm2, %v1687_v39, 0.0 }
 0x942   :  { %1696 = vadd.xlane.f32.xlu0 %v1695_v18 }
 0x94d   :  { %v1681_v20 = vpop.f32.mrf.mxu1 }
 0x94e   :  { %v1682_v42 = vadd.f32 %v4861_v12, %v1681_v20 }
 0x950   :  { %v1688_v22 = vadd.f32 %v1682_v42, %v1569_v53 }
 0x952   :  { %v1698_v11 = vsel %vm615_vm2, %v1688_v22, 0.0 }
 0x953   :  { %1699 = vadd.xlane.f32.xlu1 %v1698_v11 }
 0x955   :  { %v1683_v50 = vpop.f32.mrf.mxu1 }
 0x956   :  { %v1684_v1 = vadd.f32 %v4861_v12, %v1683_v50 }
 0x958   :  { %v1689_v34 = vadd.f32 %v1684_v1, %v1570_v54 }
 0x95a   :  { %v1701_v25 = vsel %vm615_vm2, %v1689_v34, 0.0 }
 0x95b   :  { %1702 = vadd.xlane.f32.xlu2 %v1701_v25 }
 0x9ad   :  { %v1694_v26 = vpop.xlane.xlu2 %1693 }
 0x9ae   :  { %v1704_v55 = vmul.f32 %v1694_v26, %v6517_v9 }
 0x9b0   :  { %v1708_v27 = vsub.f32 %v1686_v57, %v1704_v55 }
 0x9b2   :  { %v1712_v32 = vmul.f32 %v1708_v27, %v1708_v27 }
 0x9b4   :  { %v1716_v35 = vsel %vm615_vm2, %v1712_v32, 0.0 }
 0x9b5   :  { %v1697_v44 = vpop.xlane.xlu0 %1696  ;;  %1717 = vadd.xlane.f32.xlu0 %v1716_v35 }
 0x9b6   :  { %v1705_v30 = vmul.f32 %v1697_v44, %v6517_v9 }
 0x9b8   :  { %v6566_v4 = vsub.f32 %v1687_v39, %v1705_v30 }
 0x9ba   :  { %v1713_v40 = vmul.f32 %v6566_v4, %v6566_v4 }
 0x9bc   :  { %v1719_v15 = vsel %vm615_vm2, %v1713_v40, 0.0 }
 0x9bd   :  { %1720 = vadd.xlane.f32.xlu1 %v1719_v15 }
 0x9c6   :  { %v1700_v21 = vpop.xlane.xlu1 %1699 }
 0x9c7   :  { %v1706_v14 = vmul.f32 %v1700_v21, %v6517_v9 }
 0x9c9   :  { %v6572_v56 = vsub.f32 %v1688_v22, %v1706_v14  ;;  %v4863_v22 = vld [vmem:[#allocation16] ss:$0 sm:$0xff] }
 0x9cb   :  { %v1714_v37 = vmul.f32 %v6572_v56, %v6572_v56 }
 0x9cd   :  { %v1722_v49 = vsel %vm615_vm2, %v1714_v37, 0.0 }
 0x9ce   :  { %1723 = vadd.xlane.f32.xlu2 %v1722_v49  ;;  %v1703_v47 = vpop.xlane.xlu2 %1702 }
 0x9cf   :  { %v1707_v5 = vmul.f32 %v1703_v47, %v6517_v9 }
 0x9d1   :  { %v6578_v53 = vsub.f32 %v1689_v34, %v1707_v5 }
 0x9d3   :  { %v1715_v54 = vmul.f32 %v6578_v53, %v6578_v53 }
 0x9d5   :  { %v1725_v58 = vsel %vm615_vm2, %v1715_v54, 0.0 }
 0x9d6   :  { %1726 = vadd.xlane.f32.xlu0 %v1725_v58 }
 0xa28   :  { %v1718_v59 = vpop.xlane.xlu0 %1717 }
 0xa29   :  { %v1728_v29 = vmul.f32 %v1718_v59, %v6517_v9 }
 0xa2b   :  { %v1732_v62 = vadd.f32 1e-05, %v1728_v29 }
 0xa2d   :  { %4965 = vrsqrt.f32 %v1732_v62  ;;  %vm1742_vm8 = vweird.f32 %v1732_v62 }
 0xa30   :  { %v1721_v2 = vpop.xlane.xlu1 %1720 }
 0xa31   :  { %v1729_v3 = vmul.f32 %v1721_v2, %v6517_v9 }
 0xa33   :  { %v4966_v36 = vpop.eup %4965  ;;  %v1733_v6 = vadd.f32 1e-05, %v1729_v3 }
 0xa34   :  { %v1737_v7 = vmul.f32 %v4966_v36, %v1732_v62  ;;  %vm1743_vm7 = vweird.f32 %v4966_v36 }
 0xa35   :  { %4967 = vrsqrt.f32 %v1733_v6  ;;  %vm1744_vm9 = vmor %vm1742_vm8, %vm1743_vm7  ;;  %vm1752_vm11 = vweird.f32 %v1733_v6  ;;  %vm2930_vm8 = vcmask 1040384  }
 0xa36   :  { %v1738_v8 = vmul.f32 %v4966_v36, %v1737_v7 }
 0xa38   :  { %v1739_v28 = vmul.f32 0.5, %v1738_v8  ;;  %v4864_v8 = vld [vmem:[%s7294_s11 + $0x1] ss:$0 sm:$0xff] }
 0xa3a   :  { %v1740_v48 = vsub.f32 1.5, %v1739_v28 }
 0xa3b   :  { %v4968_v0 = vpop.eup %4967 }
 0xa3c   :  { %v1741_v10 = vmul.f32 %v4966_v36, %v1740_v48  ;;  %v1747_v12 = vmul.f32 %v4968_v0, %v1733_v6  ;;  %vm1753_vm10 = vweird.f32 %v4968_v0 }
 0xa3d   :  { %vm1754_vm12 = vmor %vm1752_vm11, %vm1753_vm10  ;;  %vm3203_vm10 = vcmask 58369  }
 0xa3e   :  { %v1745_v13 = vsel %vm1744_vm9, %v4966_v36, %v1741_v10  ;;  %v1748_v16 = vmul.f32 %v4968_v0, %v1747_v12  ;;  %v6624_v10 = vld [vmem:[%s7295_s4 + $0x1] ss:$0 sm:$0xff]  ;;  %vm3050_vm9 = vcmask 57344  }
 0xa3f   :  { %v1776_v33 = vmul.f32 %v1745_v13, %v1708_v27  ;;  %v4866_v12 = vld [vmem:[%s7296_s15 + $0x1] ss:$0 sm:$0xff] }
 0xa40   :  { %v1749_v57 = vmul.f32 0.5, %v1748_v16 }
 0xa41   :  { %v1724_v17 = vpop.xlane.xlu2 %1723  ;;  %v1783_v11 = vmul.f32 %v4862_v24, %v1776_v33 }
 0xa42   :  { %v1750_v39 = vsub.f32 1.5, %v1749_v57  ;;  %v1730_v18 = vmul.f32 %v1724_v17, %v6517_v9 }
 0xa43   :  { %v6593_v34 = vadd.f32 %v4863_v22, %v1783_v11 }
 0xa44   :  { %v1751_v20 = vmul.f32 %v4968_v0, %v1750_v39  ;;  %v1734_v42 = vadd.f32 1e-05, %v1730_v18 }
 0xa45   :  { %v1794_v40 = vadd.f32 %v6593_v34, %v6213_v38 }
 0xa46   :  { %v1755_v50 = vsel %vm1754_vm12, %v4968_v0, %v1751_v20  ;;  %4969 = vrsqrt.f32 %v1734_v42  ;;  %vm1762_vm14 = vweird.f32 %v1734_v42 }
 0xa47   :  { %v1777_v1 = vmul.f32 %v1755_v50, %v6566_v4 }
 0xa49   :  { %v1784_v25 = vmul.f32 %v4862_v24, %v1777_v1  ;;  %v1727_v26 = vpop.xlane.xlu0 %1726 }
 0xa4a   :  { %v1731_v55 = vmul.f32 %v1727_v26, %v6517_v9 }
 0xa4b   :  { %v6596_v27 = vadd.f32 %v4863_v22, %v1784_v25 }
 0xa4c   :  { %v4970_v32 = vpop.eup %4969  ;;  %v1735_v35 = vadd.f32 1e-05, %v1731_v55 }
 0xa4d   :  { %v1757_v44 = vmul.f32 %v4970_v32, %v1734_v42  ;;  %v1897_v30 = vpack.c.bf16 %v6596_v27, %v6593_v34  ;;  %v1795_v4 = vadd.f32 %v6596_v27, %v6217_v41  ;;  %vm1763_vm13 = vweird.f32 %v4970_v32 }
 0xa4e   :  { %4971 = vrsqrt.f32 %v1735_v35  ;;  %vm1764_vm15 = vmor %vm1762_vm14, %vm1763_vm13  ;;  %vm1772_vm5 = vweird.f32 %v1735_v35 }
 0xa4f   :  { %v1758_v15 = vmul.f32 %v4970_v32, %v1757_v44  ;;  %4429 = vmatmul.msk.bf16.vlgmr.msra.gmra.mxu2 %vm615_vm2, %v1897_v30  ;;  %v1803_v21 = vpack.c.bf16 %v1795_v4, %v1794_v40 }
 0xa51   :  { %v1759_v14 = vmul.f32 0.5, %v1758_v15  ;;  %4399 = vmatmul.msk.bf16.vlgmr.msra.gmra.mxu3 %vm615_vm2, %v1803_v21  ;;  %4414 = vmatmul.msk.bf16.vlgmr.msra.gmra.mxu0 %vm615_vm2, %v1803_v21 }
 0xa53   :  { %v1760_v37 = vsub.f32 1.5, %v1759_v14 }
 0xa54   :  { %v4972_v49 = vpop.eup %4971 }
 0xa55   :  { %v1761_v47 = vmul.f32 %v4970_v32, %v1760_v37  ;;  %v1767_v5 = vmul.f32 %v4972_v49, %v1735_v35  ;;  %vm1773_vm0 = vweird.f32 %v4972_v49 }
 0xa56   :  { %vm1774_vm7 = vmor %vm1772_vm5, %vm1773_vm0 }
 0xa57   :  { %v1765_v54 = vsel %vm1764_vm15, %v4970_v32, %v1761_v47  ;;  %v1768_v58 = vmul.f32 %v4972_v49, %v1767_v5 }
 0xa58   :  { %v1778_v59 = vmul.f32 %v1765_v54, %v6572_v56 }
 0xa59   :  { %v1769_v31 = vmul.f32 0.5, %v1768_v58 }
 0xa5a   :  { %v1785_v60 = vmul.f32 %v4862_v24, %v1778_v59 }
 0xa5b   :  { %v1770_v29 = vsub.f32 1.5, %v1769_v31 }
 0xa5c   :  { %v6609_v43 = vadd.f32 %v4863_v22, %v1785_v60 }
 0xa5d   :  { %v1771_v23 = vmul.f32 %v4972_v49, %v1770_v29 }
 0xa5e   :  { %v1796_v3 = vadd.f32 %v6609_v43, %v6232_v51 }
 0xa5f   :  { %v1775_v62 = vsel %vm1774_vm7, %v4972_v49, %v1771_v23 }
 0xa60   :  { %v1779_v63 = vmul.f32 %v1775_v62, %v6578_v53 }
 0xa62   :  { %v1786_v61 = vmul.f32 %v4862_v24, %v1779_v63 }
 0xa64   :  { %v6611_v2 = vadd.f32 %v4863_v22, %v1786_v61 }
 0xa66   :  { %v1898_v56 = vpack.c.bf16 %v6611_v2, %v6609_v43  ;;  %v1797_v36 = vadd.f32 %v6611_v2, %v6234_v52 }
 0xa68   :  { %4430 = vmatmul.msk.bf16.gmra.mxu2 %vm615_vm2, %v1898_v56  ;;  %v1804_v6 = vpack.c.bf16 %v1797_v36, %v1796_v3 }
 0xa6a   :  { %4400 = vmatmul.msk.bf16.gmra.mxu3 %vm615_vm2, %v1804_v6  ;;  %4415 = vmatmul.msk.bf16.gmra.mxu0 %vm615_vm2, %v1804_v6 }
 0xace   :  { %v1882_v53 = vpop.f32.mrf.mxu0 }
 0xacf   :  { %v1883_v0 = vadd.f32 %v4864_v8, %v1882_v53 }
 0xad2   :  { %v1931_v7 = vpop.f32.mrf.mxu2 }
 0xad3   :  { %v1932_v24 = vadd.f32 %v6624_v10, %v1931_v7 }
 0xad4   :  { %v1837_v28 = vpop.f32.mrf.mxu3 }
 0xad5   :  { %v1838_v33 = vadd.f32 %v4866_v12, %v1837_v28 }
 0xad6   :  { %v1884_v48 = vpop.f32.mrf.mxu0 }
 0xad7   :  { %v1885_v13 = vadd.f32 %v4864_v8, %v1884_v48  ;;  %v1847_v22 = vmul.f32 0.35355338, %v1838_v33 }
 0xad9   :  { %v1949_v16 = vpack.c.bf16 %v1885_v13, %v1883_v0 }
 0xada   :  { %v1933_v57 = vpop.f32.mrf.mxu2 }
 0xadb   :  { %v1934_v17 = vadd.f32 %v6624_v10, %v1933_v57  ;;  %2015 = vrot.lane.b32.xlu1 %v1949_v16, %s5778_s17  ;;  %2083 = vrot.lane.b32.xlu0 %v1949_v16, %s5777_s22  ;;  %v1954_v39 = vsel %vm559_vm1, %v1949_v16, 0 }
 0xadc   :  { %v1839_v18 = vpop.f32.mrf.mxu3  ;;  %1963 = vmatpush.bf16.xpose.msrb.mxu1 %v1954_v39 }
 0xadd   :  { %v6632_v20 = vpack.c.bf16 %v1934_v17, %v1932_v24  ;;  %v1840_v42 = vadd.f32 %v4866_v12, %v1839_v18 }
 0xadf   :  { %v1848_v11 = vmul.f32 0.35355338, %v1840_v42  ;;  %2004 = vmatpush.bf16.msrb.mxu3 %v6632_v20 }
 0xae1   :  { %v1948_v50 = vpack.c.bf16 %v1848_v11, %v1847_v22 }
 0xae3   :  { %2150 = vrot.lane.b32.xlu1 %v1949_v16, %s5779_s29  ;;  %2012 = vrot.lane.b32.xlu2 %v1948_v50, %s5778_s17 }
 0xae4   :  { %4435 = vmatmul.msk.bf16.vlgmr.msrb.gmra.mxu1 %vm559_vm1, %v1948_v50  ;;  %2081 = vrot.lane.b32.xlu0 %v1948_v50, %s5777_s22 }
 0xae7   :  { %v1887_v1 = vpop.f32.mrf.mxu0 }
 0xae8   :  { %v1888_v55 = vadd.f32 %v4864_v8, %v1887_v1 }
 0xaeb   :  { %2148 = vrot.lane.b32.xlu2 %v1948_v50, %s5779_s29 }
 0xaed   :  { %v1842_v25 = vpop.f32.mrf.mxu3 }
 0xaee   :  { %v1843_v44 = vadd.f32 %v4866_v12, %v1842_v25 }
 0xaef   :  { %v1889_v26 = vpop.f32.mrf.mxu0 }
 0xaf0   :  { %v1890_v32 = vadd.f32 %v4864_v8, %v1889_v26  ;;  %v1849_v4 = vmul.f32 0.35355338, %v1843_v44  ;;  %v1936_v26 = vpop.f32.mrf.mxu2 }
 0xaf2   :  { %v2246_v35 = vpack.c.bf16 %v1890_v32, %v1888_v55 }
 0xaf4   :  { %2380 = vrot.lane.b32.xlu2 %v2246_v35, %s5777_s22  ;;  %2312 = vrot.lane.b32.xlu1 %v2246_v35, %s5778_s17  ;;  %v2251_v31 = vsel %vm559_vm1, %v2246_v35, 0 }
 0xaf5   :  { %v1844_v30 = vpop.f32.mrf.mxu3 }
 0xaf6   :  { %v1845_v40 = vadd.f32 %v4866_v12, %v1844_v30 }
 0xaf8   :  { %v1850_v15 = vmul.f32 0.35355338, %v1845_v40 }
 0xafa   :  { %v2245_v21 = vpack.c.bf16 %v1850_v15, %v1849_v4 }
 0xafc   :  { %2447 = vrot.lane.b32.xlu1 %v2246_v35, %s5779_s29  ;;  %2445 = vrot.lane.b32.xlu2 %v2245_v21, %s5779_s29 }
 0xafd   :  { %2309 = vrot.lane.b32.xlu0 %v2245_v21, %s5778_s17 }
 0xb04   :  { %2061 = vrot.lane.b32.xlu2 %v6632_v20, %s5778_s17 }
 0xb05   :  { %2378 = vrot.lane.b32.xlu0 %v2245_v21, %s5777_s22 }
 0xb0d   :  { %2195 = vrot.lane.b32.xlu0 %v6632_v20, %s5779_s29 }
 0xb3d   :  { %v2013_v14 = vpop.permute.xlu2 %2012 }
 0xb45   :  { %v2149_v37 = vpop.permute.xlu2 %2148 }
 0xb4d   :  { %v2016_v49 = vpop.permute.xlu1 %2015  ;;  %v2084_v47 = vpop.permute.xlu0 %2083 }
 0xb4e   :  { %v2021_v5 = vsel %vm559_vm1, %v2016_v49, 0  ;;  %v2089_v54 = vsel %vm559_vm1, %v2084_v47, 0  ;;  %v2381_v58 = vpop.permute.xlu2 %2380 }
 0xb4f   :  { %2030 = vmatpush.bf16.xpose.msra.mxu1 %v2021_v5  ;;  %2098 = vmatpush.bf16.xpose.msrb.mxu0 %v2089_v54  ;;  %v2386_v62 = vsel %vm559_vm1, %v2381_v58, 0 }
 0xb55   :  { %v2151_v59 = vpop.permute.xlu1 %2150 }
 0xb56   :  { %v2156_v29 = vsel %vm559_vm1, %v2151_v59, 0  ;;  %v2082_v23 = vpop.permute.xlu0 %2081  ;;  %4437 = vmatmul.msk.bf16.vlgmr.msra.gmra.mxu1 %vm559_vm1, %v2013_v14  ;;  %v2446_v60 = vpop.permute.xlu2 %2445  ;;  %v1937_v59 = vadd.f32 %v6624_v10, %v1936_v26 }
 0xb57   :  { %2260 = vmatpush.bf16.xpose.msra.mxu0 %v2251_v31  ;;  %2165 = vmatpush.bf16.xpose.msrb.mxu1 %v2156_v29 }
 0xb58   :  { %4439 = vmatmul.msk.bf16.vlgmr.msrb.gmra.mxu0 %vm559_vm1, %v2082_v23 }
 0xb5e   :  { %v2062_v63 = vpop.permute.xlu2 %2061 }
 0xb5f   :  { %2395 = vmatpush.bf16.xpose.msrb.mxu0 %v2386_v62  ;;  %2074 = vmatpush.bf16.msra.mxu3 %v2062_v63 }
 0xb61   :  { %v1965_v61 = vpop.f32.mrf.mxu1 }
 0xb62   :  { %v1966_v56 = vadd.f32 %v1965_v61, %v6284_v46 }
 0xb64   :  { %v1970_v3 = vsel %vm839_vm3, %v1966_v56, -inf }
 0xb65   :  { %1971 = vmax.xlane.f32.xlu1 %v1970_v3 }
 0xb66   :  { %v2313_v36 = vpop.permute.xlu1 %2312  ;;  %4441 = vmatmul.msk.bf16.vlgmr.msrb.gmra.mxu1 %vm559_vm1, %v2149_v37  ;;  %v1938_v37 = vpop.f32.mrf.mxu2 }
 0xb67   :  { %v2318_v6 = vsel %vm559_vm1, %v2313_v36, 0  ;;  %v1939_v54 = vadd.f32 %v6624_v10, %v1938_v37 }
 0xb68   :  { %4443 = vmatmul.msk.bf16.vlgmr.msra.gmra.mxu0 %vm559_vm1, %v2245_v21  ;;  %2327 = vmatpush.bf16.xpose.msra.mxu1 %v2318_v6 }
 0xb69   :  { %v1967_v53 = vpop.f32.mrf.mxu1  ;;  %v6712_v23 = vpack.c.bf16 %v1939_v54, %v1937_v59 }
 0xb6a   :  { %v1968_v7 = vadd.f32 %v1967_v53, %v6284_v46 }
 0xb6c   :  { %v1973_v8 = vsel %vm839_vm3, %v1968_v7, -inf }
 0xb6d   :  { %1974 = vmax.xlane.f32.xlu0 %v1973_v8 }
 0xb6e   :  { %v2448_v28 = vpop.permute.xlu1 %2447 }
 0xb6f   :  { %v2453_v48 = vsel %vm559_vm1, %v2448_v28, 0  ;;  %v2310_v0 = vpop.permute.xlu0 %2309 }
 0xb70   :  { %2462 = vmatpush.bf16.xpose.msrb.mxu1 %v2453_v48 }
 0xb76   :  { %4445 = vmatmul.msk.bf16.vlgmr.msra.gmra.mxu1 %vm559_vm1, %v2310_v0 }
 0xb77   :  { %v2379_v12 = vpop.permute.xlu0 %2378 }
 0xb78   :  { %4447 = vmatmul.msk.bf16.vlgmr.msrb.gmra.mxu0 %vm559_vm1, %v2379_v12 }
 0xb7e   :  { %2128 = vrot.lane.b32.xlu1 %v6632_v20, %s5777_s22 }
 0xb7f   :  { %v6680_v39 = vpop.permute.xlu0 %2195 }
 0xb86   :  { %4449 = vmatmul.msk.bf16.vlgmr.msrb.gmra.mxu1 %vm559_vm1, %v2446_v60 }
 0xbd3   :  { %v2032_v13 = vpop.f32.mrf.mxu1 }
 0xbd4   :  { %v6671_v16 = vadd.f32 %v2032_v13, %v6284_v46 }
 0xbd5   :  { %v2100_v57 = vpop.f32.mrf.mxu0 }
 0xbd6   :  { %v6674_v24 = vadd.f32 %v2100_v57, %v6284_v46  ;;  %v2037_v33 = vsel %vm839_vm3, %v6671_v16, -inf }
 0xbd7   :  { %2038 = vmax.xlane.f32.xlu2 %v2037_v33 }
 0xbd8   :  { %v2105_v17 = vsel %vm839_vm3, %v6674_v24, -inf  ;;  %v1972_v18 = vpop.xlane.xlu1 %1971 }
 0xbd9   :  { %2106 = vmax.xlane.f32.xlu0 %v2105_v17  ;;  %v1976_v20 = vsub.f32 %v1966_v56, %v1972_v18 }
 0xbdb   :  { %v1978_v42 = vmul.f32 1.442695, %v1976_v20  ;;  %v2034_v22 = vpop.f32.mrf.mxu1 }
 0xbdc   :  { %v6683_v11 = vadd.f32 %v2034_v22, %v6284_v46 }
 0xbdd   :  { %v2102_v50 = vpop.f32.mrf.mxu0  ;;  %4973 = vpow2.f32 %v1978_v42 }
 0xbde   :  { %v6686_v1 = vadd.f32 %v2102_v50, %v6284_v46  ;;  %v2040_v25 = vsel %vm839_vm3, %v6683_v11, -inf }
 0xbdf   :  { %2041 = vmax.xlane.f32.xlu1 %v2040_v25 }
 0xbe0   :  { %v2108_v55 = vsel %vm839_vm3, %v6686_v1, -inf  ;;  %v1975_v32 = vpop.xlane.xlu0 %1974 }
 0xbe1   :  { %2109 = vmax.xlane.f32.xlu2 %v2108_v55  ;;  %v1977_v35 = vsub.f32 %v1968_v7, %v1975_v32 }
 0xbe3   :  { %v6692_v44 = vpop.eup %4973  ;;  %v1980_v30 = vmul.f32 1.442695, %v1977_v35  ;;  %v2167_v40 = vpop.f32.mrf.mxu1 }
 0xbe4   :  { %v1982_v21 = vsel %vm839_vm3, %v6692_v44, 0.0  ;;  %v6702_v49 = vadd.f32 %v2167_v40, %v6284_v46 }
 0xbe5   :  { %v2262_v4 = vpop.f32.mrf.mxu0  ;;  %4975 = vpow2.f32 %v1980_v30 }
 0xbe6   :  { %v6695_v15 = vadd.f32 %v2262_v4, %v6318_v19  ;;  %v2172_v29 = vsel %vm839_vm3, %v6702_v49, -inf }
 0xbe7   :  { %1983 = vadd.xlane.f32.xlu1 %v1982_v21 }
 0xbe8   :  { %v2267_v14 = vsel %vm839_vm3, %v6695_v15, -inf }
 0xbe9   :  { %2268 = vmax.xlane.f32.xlu2 %v2267_v14 }
 0xbeb   :  { %v6704_v47 = vpop.eup %4975  ;;  %v2169_v5 = vpop.f32.mrf.mxu1 }
 0xbec   :  { %v1985_v31 = vsel %vm839_vm3, %v6704_v47, 0.0  ;;  %v6715_v60 = vadd.f32 %v2169_v5, %v6284_v46 }
 0xbed   :  { %v2264_v58 = vpop.f32.mrf.mxu0  ;;  %1986 = vadd.xlane.f32.xlu0 %v1985_v31 }
 0xbee   :  { %v6718_v63 = vadd.f32 %v2264_v58, %v6318_v19  ;;  %v2175_v10 = vsel %vm839_vm3, %v6715_v60, -inf }
 0xbef   :  { %2173 = vmax.xlane.f32.xlu1 %v2172_v29 }
 0xbf0   :  { %v2129_v62 = vpop.permute.xlu1 %2128  ;;  %v2270_v46 = vsel %vm839_vm3, %v6718_v63, -inf }
 0xbf1   :  { %2141 = vmatpush.bf16.msrb.mxu2 %v2129_v62 }
 0xbf3   :  { %v2329_v61 = vpop.f32.mrf.mxu1 }
 0xbf4   :  { %v6729_v36 = vadd.f32 %v2329_v61, %v6318_v19 }
 0xbf5   :  { %2301 = vmatpush.bf16.msra.mxu2 %v6712_v23  ;;  %2176 = vmax.xlane.f32.xlu0 %v2175_v10  ;;  %v2397_v56 = vpop.f32.mrf.mxu0 }
 0xbf6   :  { %v6724_v3 = vadd.f32 %v2397_v56, %v6318_v19  ;;  %v2334_v8 = vsel %vm839_vm3, %v6729_v36, -inf }
 0xbf7   :  { %2271 = vmax.xlane.f32.xlu1 %v2270_v46 }
 0xbf8   :  { %v2402_v6 = vsel %vm839_vm3, %v6724_v3, -inf }
 0xbf9   :  { %2403 = vmax.xlane.f32.xlu2 %v2402_v6 }
 0xbfb   :  { %v2331_v53 = vpop.f32.mrf.mxu1 }
 0xbfc   :  { %v6734_v7 = vadd.f32 %v2331_v53, %v6318_v19 }
 0xbfd   :  { %2335 = vmax.xlane.f32.xlu0 %v2334_v8  ;;  %v2399_v28 = vpop.f32.mrf.mxu0 }
 0xbfe   :  { %v6739_v48 = vadd.f32 %v2399_v28, %v6318_v19  ;;  %v2337_v0 = vsel %vm839_vm3, %v6734_v7, -inf }
 0xc00   :  { %v2405_v12 = vsel %vm839_vm3, %v6739_v48, -inf }
 0xc01   :  { %2406 = vmax.xlane.f32.xlu1 %v2405_v12  ;;  %2338 = vmax.xlane.f32.xlu2 %v2337_v0 }
 0xc03   :  { %v2464_v13 = vpop.f32.mrf.mxu1 }
 0xc04   :  { %v6746_v57 = vadd.f32 %v2464_v13, %v6318_v19 }
 0xc06   :  { %v2469_v33 = vsel %vm839_vm3, %v6746_v57, -inf }
 0xc07   :  { %2470 = vmax.xlane.f32.xlu0 %v2469_v33 }
 0xc0b   :  { %v2466_v17 = vpop.f32.mrf.mxu1 }
 0xc0c   :  { %v6751_v18 = vadd.f32 %v2466_v17, %v6318_v19 }
 0xc0e   :  { %v2472_v20 = vsel %vm839_vm3, %v6751_v18, -inf }
 0xc0f   :  { %2473 = vmax.xlane.f32.xlu2 %v2472_v20 }
 0xc4a   :  { %v2039_v42 = vpop.xlane.xlu2 %2038 }
 0xc4b   :  { %v2043_v50 = vsub.f32 %v6671_v16, %v2039_v42 }
 0xc4c   :  { %v2107_v22 = vpop.xlane.xlu0 %2106 }
 0xc4d   :  { %v2111_v25 = vsub.f32 %v6674_v24, %v2107_v22  ;;  %v2045_v26 = vmul.f32 1.442695, %v2043_v50 }
 0xc4f   :  { %4977 = vpow2.f32 %v2045_v26  ;;  %v2113_v55 = vmul.f32 1.442695, %v2111_v25 }
 0xc51   :  { %4979 = vpow2.f32 %v2113_v55 }
 0xc52   :  { %v2042_v32 = vpop.xlane.xlu1 %2041 }
 0xc53   :  { %v2044_v35 = vsub.f32 %v6683_v11, %v2042_v32 }
 0xc54   :  { %v2110_v30 = vpop.xlane.xlu2 %2109 }
 0xc55   :  { %v6758_v40 = vpop.eup %4977  ;;  %v2047_v19 = vmul.f32 1.442695, %v2044_v35  ;;  %v2112_v4 = vsub.f32 %v6686_v1, %v2110_v30 }
 0xc56   :  { %v2049_v21 = vsel %vm839_vm3, %v6758_v40, 0.0 }
 0xc57   :  { %4981 = vpow2.f32 %v2047_v19  ;;  %2050 = vadd.xlane.f32.xlu1 %v2049_v21  ;;  %v2115_v16 = vmul.f32 1.442695, %v2112_v4  ;;  %v6763_v14 = vpop.eup %4979 }
 0xc58   :  { %v2117_v1 = vsel %vm839_vm3, %v6763_v14, 0.0 }
 0xc59   :  { %4983 = vpow2.f32 %v2115_v16 }
 0xc5a   :  { %v1984_v24 = vpop.xlane.xlu1 %1983 }
 0xc5b   :  { %4985 = vrcp.f32 %v1984_v24 }
 0xc5c   :  { %v2269_v37 = vpop.xlane.xlu2 %2268 }
 0xc5d   :  { %v2273_v5 = vsub.f32 %v6695_v15, %v2269_v37  ;;  %v6766_v11 = vpop.eup %4981 }
 0xc5e   :  { %v2052_v58 = vsel %vm839_vm3, %v6766_v11, 0.0 }
 0xc5f   :  { %v2275_v54 = vmul.f32 1.442695, %v2273_v5  ;;  %2053 = vadd.xlane.f32.xlu0 %v2052_v58  ;;  %2118 = vadd.xlane.f32.xlu1 %v2117_v1  ;;  %v6772_v29 = vpop.eup %4983 }
 0xc60   :  { %v1987_v31 = vpop.xlane.xlu0 %1986  ;;  %v2120_v56 = vsel %vm839_vm3, %v6772_v29, 0.0 }
 0xc61   :  { %4987 = vpow2.f32 %v2275_v54  ;;  %v4986_v62 = vpop.eup %4985 }
 0xc62   :  { %4989 = vrcp.f32 %v1987_v31  ;;  %v2174_v59 = vpop.xlane.xlu1 %2173  ;;  %v1990_v53 = vmul.f32 %v4986_v62, %v6692_v44 }
 0xc63   :  { %v2178_v15 = vsub.f32 %v6702_v49, %v2174_v59 }
 0xc65   :  { %v2180_v61 = vmul.f32 1.442695, %v2178_v15 }
 0xc67   :  { %v6775_v10 = vpop.eup %4987  ;;  %4991 = vpow2.f32 %v2180_v61  ;;  %2121 = vadd.xlane.f32.xlu0 %v2120_v56 }
 0xc68   :  { %v4990_v46 = vpop.eup %4989  ;;  %v2279_v6 = vsel %vm839_vm3, %v6775_v10, 0.0  ;;  %v2177_v28 = vpop.xlane.xlu0 %2176 }
 0xc69   :  { %v1991_v8 = vmul.f32 %v4990_v46, %v6704_v47  ;;  %2280 = vadd.xlane.f32.xlu2 %v2279_v6  ;;  %v2179_v49 = vsub.f32 %v6715_v60, %v2177_v28 }
 0xc6a   :  { %v2272_v12 = vpop.xlane.xlu1 %2271 }
 0xc6b   :  { %v1992_v0 = vpack.c.bf16 %v1991_v8, %v1990_v53  ;;  %v2182_v13 = vmul.f32 1.442695, %v2179_v49  ;;  %v2274_v33 = vsub.f32 %v6718_v63, %v2272_v12 }
 0xc6c   :  { %v2404_v17 = vpop.xlane.xlu2 %2403 }
 0xc6d   :  { %4436 = vmatmul.msk.bf16.vlgmr.msrb.gmra.mxu3 %vm839_vm3, %v1992_v0  ;;  %v6786_v20 = vpop.eup %4991  ;;  %4993 = vpow2.f32 %v2182_v13  ;;  %v2277_v47 = vmul.f32 1.442695, %v2274_v33  ;;  %v2408_v60 = vsub.f32 %v6724_v3, %v2404_v17 }
 0xc6e   :  { %2208 = vmatpush.bf16.msrb.mxu3 %v6680_v39  ;;  %v2184_v44 = vsel %vm839_vm3, %v6786_v20, 0.0 }
 0xc6f   :  { %2185 = vadd.xlane.f32.xlu1 %v2184_v44  ;;  %4995 = vpow2.f32 %v2277_v47  ;;  %v2410_v39 = vmul.f32 1.442695, %v2408_v60 }
 0xc70   :  { %v2336_v42 = vpop.xlane.xlu0 %2335 }
 0xc71   :  { %v2340_v22 = vsub.f32 %v6729_v36, %v2336_v42 }
 0xc73   :  { %v6793_v50 = vpop.eup %4993  ;;  %v2342_v63 = vmul.f32 1.442695, %v2340_v22 }
 0xc74   :  { %v2407_v25 = vpop.xlane.xlu1 %2406  ;;  %v2339_v26 = vpop.xlane.xlu2 %2338  ;;  %v2187_v55 = vsel %vm839_vm3, %v6793_v50, 0.0 }
 0xc75   :  { %4997 = vpow2.f32 %v2342_v63  ;;  %v2409_v32 = vsub.f32 %v6739_v48, %v2407_v25  ;;  %v2341_v35 = vsub.f32 %v6734_v7, %v2339_v26  ;;  %2188 = vadd.xlane.f32.xlu0 %v2187_v55  ;;  %v6799_v19 = vpop.eup %4995 }
 0xc76   :  { %4999 = vpow2.f32 %v2410_v39  ;;  %v2282_v48 = vsel %vm839_vm3, %v6799_v19, 0.0 }
 0xc77   :  { %v2412_v30 = vmul.f32 1.442695, %v2409_v32  ;;  %v2344_v3 = vmul.f32 1.442695, %v2341_v35 }
 0xc79   :  { %5001 = vpow2.f32 %v2344_v3 }
 0xc7a   :  { %v2471_v36 = vpop.xlane.xlu0 %2470  ;;  %5003 = vpow2.f32 %v2412_v30 }
 0xc7b   :  { %v6801_v4 = vpop.eup %4997  ;;  %v2475_v21 = vsub.f32 %v6746_v57, %v2471_v36 }
 0xc7c   :  { %v2346_v16 = vsel %vm839_vm3, %v6801_v4, 0.0  ;;  %v6808_v7 = vpop.eup %4999 }
 0xc7d   :  { %2347 = vadd.xlane.f32.xlu1 %v2346_v16  ;;  %2283 = vadd.xlane.f32.xlu0 %v2282_v48  ;;  %v2477_v24 = vmul.f32 1.442695, %v2475_v21  ;;  %v2414_v58 = vsel %vm839_vm3, %v6808_v7, 0.0 }
 0xc7f   :  { %v6810_v37 = vpop.eup %5001  ;;  %5005 = vpow2.f32 %v2477_v24 }
 0xc80   :  { %v6812_v5 = vpop.eup %5003  ;;  %v2349_v54 = vsel %vm839_vm3, %v6810_v37, 0.0 }
 0xc81   :  { %2350 = vadd.xlane.f32.xlu2 %v2349_v54  ;;  %v2417_v57 = vsel %vm839_vm3, %v6812_v5, 0.0 }
 0xc82   :  { %v2474_v59 = vpop.xlane.xlu2 %2473 }
 0xc83   :  { %v2476_v15 = vsub.f32 %v6751_v18, %v2474_v59 }
 0xc85   :  { %2418 = vadd.xlane.f32.xlu1 %v2417_v57  ;;  %2415 = vadd.xlane.f32.xlu0 %v2414_v58  ;;  %v6820_v1 = vpop.eup %5005  ;;  %v2479_v62 = vmul.f32 1.442695, %v2476_v15 }
 0xc86   :  { %v2481_v31 = vsel %vm839_vm3, %v6820_v1, 0.0 }
 0xc87   :  { %5007 = vpow2.f32 %v2479_v62 }
 0xc8d   :  { %2482 = vadd.xlane.f32.xlu0 %v2481_v31  ;;  %v6831_v61 = vpop.eup %5007 }
 0xc8e   :  { %v2484_v56 = vsel %vm839_vm3, %v6831_v61, 0.0 }
 0xc99   :  { %2358 = vrot.lane.b32.xlu2 %v6712_v23, %s5778_s17 }
 0xc9e   :  { %2425 = vrot.lane.b32.xlu1 %v6712_v23, %s5777_s22 }
 0xca1   :  { %2492 = vrot.lane.b32.xlu0 %v6712_v23, %s5779_s29 }
 0xcc2   :  { %2485 = vadd.xlane.f32.xlu2 %v2484_v56 }
 0xcca   :  { %v2051_v46 = vpop.xlane.xlu1 %2050 }
 0xccb   :  { %5009 = vrcp.f32 %v2051_v46 }
 0xcd1   :  { %v5010_v8 = vpop.eup %5009 }
 0xcd2   :  { %v2054_v6 = vpop.xlane.xlu0 %2053  ;;  %v2119_v53 = vpop.xlane.xlu1 %2118  ;;  %v2057_v23 = vmul.f32 %v5010_v8, %v6758_v40 }
 0xcd3   :  { %5011 = vrcp.f32 %v2054_v6 }
 0xcd4   :  { %5013 = vrcp.f32 %v2119_v53 }
 0xcd9   :  { %v5012_v28 = vpop.eup %5011 }
 0xcda   :  { %v2058_v18 = vmul.f32 %v5012_v28, %v6766_v11  ;;  %v2122_v49 = vpop.xlane.xlu0 %2121  ;;  %v5014_v12 = vpop.eup %5013 }
 0xcdb   :  { %5015 = vrcp.f32 %v2122_v49  ;;  %v2125_v33 = vmul.f32 %v5014_v12, %v6763_v14 }
 0xcdc   :  { %v2059_v0 = vpack.c.bf16 %v2058_v18, %v2057_v23  ;;  %v2281_v11 = vpop.xlane.xlu2 %2280 }
 0xcde   :  { %4438 = vmatmul.msk.bf16.vlgmr.msra.gmra.mxu3 %vm839_vm3, %v2059_v0 }
 0xce1   :  { %v5016_v13 = vpop.eup %5015 }
 0xce2   :  { %v2126_v17 = vmul.f32 %v5016_v13, %v6772_v29  ;;  %v2186_v47 = vpop.xlane.xlu1 %2185 }
 0xce3   :  { %5017 = vrcp.f32 %v2186_v47 }
 0xce4   :  { %v2127_v44 = vpack.c.bf16 %v2126_v17, %v2125_v33 }
 0xce6   :  { %4440 = vmatmul.msk.bf16.vlgmr.msrb.gmra.mxu2 %vm839_vm3, %v2127_v44 }
 0xce8   :  { %v2189_v42 = vpop.xlane.xlu0 %2188 }
 0xce9   :  { %5019 = vrcp.f32 %v2189_v42  ;;  %v5018_v40 = vpop.eup %5017 }
 0xcea   :  { %5021 = vrcp.f32 %v2281_v11  ;;  %v2192_v22 = vmul.f32 %v5018_v40, %v6786_v20 }
 0xcef   :  { %v5020_v60 = vpop.eup %5019 }
 0xcf0   :  { %v2193_v63 = vmul.f32 %v5020_v60, %v6793_v50  ;;  %v2284_v25 = vpop.xlane.xlu0 %2283  ;;  %v2348_v14 = vpop.xlane.xlu1 %2347  ;;  %v4647_v60 = vld [vmem:[%s7298_s18 + $0x18] sm:$0xff] }
 0xcf1   :  { %5023 = vrcp.f32 %v2284_v25  ;;  %v5022_v55 = vpop.eup %5021  ;;  %2571 = vmatpush.bf16.msra.mxu0 %v4647_v60  ;;  %v4646_v25 = vld [vmem:[%s7298_s18 + $0x10] sm:$0xff] }
 0xcf2   :  { %v2194_v26 = vpack.c.bf16 %v2193_v63, %v2192_v22  ;;  %v2287_v32 = vmul.f32 %v5022_v55, %v6775_v10 }
 0xcf4   :  { %4442 = vmatmul.msk.bf16.vlgmr.msrb.gmra.mxu3 %vm839_vm3, %v2194_v26  ;;  %v2351_v29 = vpop.xlane.xlu2 %2350 }
 0xcf5   :  { %5025 = vrcp.f32 %v2351_v29  ;;  %2572 = vmatpush.bf16.msra.mxu0 %v4646_v25 }
 0xcf6   :  { %5027 = vrcp.f32 %v2348_v14 }
 0xcf7   :  { %v5024_v39 = vpop.eup %5023 }
 0xcf8   :  { %v2288_v35 = vmul.f32 %v5024_v39, %v6799_v19  ;;  %v2419_v16 = vpop.xlane.xlu1 %2418  ;;  %v2416_v48 = vpop.xlane.xlu0 %2415 }
 0xcf9   :  { %5029 = vrcp.f32 %v2419_v16 }
 0xcfa   :  { %v2289_v30 = vpack.c.bf16 %v2288_v35, %v2287_v32  ;;  %5031 = vrcp.f32 %v2416_v48 }
 0xcfb   :  { %v5026_v3 = vpop.eup %5025 }
 0xcfc   :  { %v5028_v20 = vpop.eup %5027  ;;  %4444 = vmatmul.msk.bf16.vlgmr.msra.gmra.mxu2 %vm839_vm3, %v2289_v30  ;;  %v2359_v50 = vpop.permute.xlu2 %2358  ;;  %v2355_v36 = vmul.f32 %v5026_v3, %v6810_v37 }
 0xcfd   :  { %2371 = vmatpush.bf16.msra.mxu3 %v2359_v50  ;;  %v2354_v21 = vmul.f32 %v5028_v20, %v6801_v4 }
 0xcff   :  { %v2356_v24 = vpack.c.bf16 %v2355_v36, %v2354_v21  ;;  %v5030_v10 = vpop.eup %5029 }
 0xd00   :  { %v5032_v19 = vpop.eup %5031  ;;  %v2483_v54 = vpop.xlane.xlu0 %2482  ;;  %v2423_v57 = vmul.f32 %v5030_v10, %v6812_v5 }
 0xd01   :  { %v2422_v58 = vmul.f32 %v5032_v19, %v6808_v7  ;;  %5033 = vrcp.f32 %v2483_v54  ;;  %v2006_v7 = vpop.f32.mrf.mxu3 }
 0xd03   :  { %v2424_v37 = vpack.c.bf16 %v2423_v57, %v2422_v58 }
 0xd04   :  { %4446 = vmatmul.msk.bf16.vlgmr.msra.gmra.mxu3 %vm839_vm3, %v2356_v24 }
 0xd07   :  { %v5034_v15 = vpop.eup %5033 }
 0xd08   :  { %v2489_v56 = vmul.f32 %v5034_v15, %v6820_v1 }
 0xd09   :  { %v2008_v5 = vpop.f32.mrf.mxu3 }
 0xd10   :  { %v2426_v31 = vpop.permute.xlu1 %2425 }
 0xd11   :  { %2438 = vmatpush.bf16.msrb.mxu2 %v2426_v31 }
 0xd13   :  { %v2493_v59 = vpop.permute.xlu0 %2492 }
 0xd14   :  { %4448 = vmatmul.msk.bf16.vlgmr.msrb.gmra.mxu2 %vm839_vm3, %v2424_v37  ;;  %2505 = vmatpush.bf16.msrb.mxu3 %v2493_v59 }
 0xd35   :  { %v2486_v4 = vpop.xlane.xlu2 %2485 }
 0xd36   :  { %5035 = vrcp.f32 %v2486_v4 }
 0xd3c   :  { %v5036_v62 = vpop.eup %5035 }
 0xd3d   :  { %v2490_v46 = vmul.f32 %v5036_v62, %v6831_v61 }
 0xd3f   :  { %v2491_v6 = vpack.c.bf16 %v2490_v46, %v2489_v56 }
 0xd41   :  { %4450 = vmatmul.msk.bf16.vlgmr.msrb.gmra.mxu3 %vm839_vm3, %v2491_v6 }
 0xd61   :  { %v2076_v53 = vpop.f32.mrf.mxu3 }
 0xd69   :  { %v2078_v8 = vpop.f32.mrf.mxu3  ;;  %v2143_v28 = vpop.f32.mrf.mxu2 }
 0xd6a   :  { %v4791_v23 = vpack.i.bf16 %v2078_v8, %v2076_v53  ;;  %v4655_v53 = vld [vmem:[%s7301_s14 + $0x8] sm:$0xff]  ;;  %v2926_v8 = vld [vmem:[#allocation36] sm:$0x1] }
 0xd6b   :  { %2963 = vmatpush.bf16.msra.mxu3 %v4655_v53 }
 0xd6c   :  { %4792 = vrot.lane.b32.xlu0 %v4791_v23, %s5780_s23  ;;  %v4654_v23 = vld [vmem:[%s7301_s14] sm:$0xff] }
 0xd6f   :  { %2964 = vmatpush.bf16.msra.mxu3 %v4654_v23 }
 0xd71   :  { %v2145_v18 = vpop.f32.mrf.mxu2 }
 0xd72   :  { %v4796_v49 = vpack.i.bf16 %v2145_v18, %v2143_v28  ;;  %v4868_v28 = vld [vmem:[#allocation36] ss:$0 sm:$0xff] }
 0xd73   :  { %v6881_v18 = vsel %vm2930_vm8, %v2926_v8, %v4868_v28 }
 0xd74   :  { %4797 = vrot.lane.b32.xlu1 %v4796_v49, %s5752_s25  ;;  %v4657_v49 = vld [vmem:[%s7302_s20 + $0x8] sm:$0xff] }
 0xd75   :  { %2997 = vmatpush.bf16.msrb.mxu3 %v4657_v49  ;;  %v4649_v49 = vld [vmem:[%s7299_s3 + $0x18] sm:$0xff] }
 0xd76   :  { %2730 = vmatpush.bf16.msra.mxu2 %v4649_v49 }
 0xd77   :  { %v2210_v0 = vpop.f32.mrf.mxu3 }
 0xd7f   :  { %v2212_v1 = vpop.f32.mrf.mxu3  ;;  %v2303_v61 = vpop.f32.mrf.mxu2 }
 0xd80   :  { %v4801_v12 = vpack.i.bf16 %v2212_v1, %v2210_v0  ;;  %v2937_v0 = vpack.c.bf16 %v6881_v18, %v6881_v18  ;;  %v4656_v1 = vld [vmem:[%s7302_s20] sm:$0xff] }
 0xd81   :  { %2998 = vmatpush.bf16.msrb.mxu3 %v4656_v1 }
 0xd82   :  { %4802 = vrot.lane.b32.xlu0 %v4801_v12, %s5781_s6  ;;  %4509 = vmatmul.msk.bf16.vlgmr.msra.gmra.mxu3 %vm615_vm2, %v2937_v0  ;;  %v4867_v12 = vld [vmem:[#allocation7 + $0x1] ss:$0 sm:$0xff] }
 0xd87   :  { %v2373_v13 = vpop.f32.mrf.mxu3  ;;  %v2305_v33 = vpop.f32.mrf.mxu2 }
 0xd8f   :  { %v2375_v17 = vpop.f32.mrf.mxu3 }
 0xd90   :  { %v4806_v44 = vpack.i.bf16 %v2375_v17, %v2373_v13 }
 0xd92   :  { %4807 = vrot.lane.b32.xlu1 %v4806_v44, %s5780_s23  ;;  %4518 = vmatmul.msk.bf16.vlgmr.msrb.gmra.mxu3 %vm615_vm2, %v2937_v0 }
 0xd97   :  { %v2440_v47 = vpop.f32.mrf.mxu2 }
 0xd9f   :  { %v2442_v42 = vpop.f32.mrf.mxu2 }
 0xda0   :  { %v4811_v40 = vpack.i.bf16 %v2442_v42, %v2440_v47 }
 0xda2   :  { %4812 = vrot.lane.b32.xlu0 %v4811_v40, %s5752_s25 }
 0xdc4   :  { %v2507_v11 = vpop.f32.mrf.mxu3 }
 0xdcc   :  { %v2509_v22 = vpop.f32.mrf.mxu3 }
 0xdcd   :  { %v4816_v63 = vpack.i.bf16 %v2509_v22, %v2507_v11 }
 0xdcf   :  { %4817 = vrot.lane.b32.xlu2 %v4816_v63, %s5781_s6 }
 0xdde   :  { %v4793_v26 = vpop.permute.xlu0 %4792 }
 0xddf   :  { %v4795_v29 = vunpack.i.h.bf16 %v4793_v26  ;;  %v4794_v55 = vunpack.i.l.bf16 %v4793_v26 }
 0xde1   :  { %v2240_v30 = vsel %vm559_vm1, %v2008_v5, %v4795_v29  ;;  %v2239_v3 = vsel %vm559_vm1, %v2006_v7, %v4794_v55 }
 0xde6   :  { %v4798_v14 = vpop.permute.xlu1 %4797 }
 0xde7   :  { %v4800_v39 = vunpack.i.h.bf16 %v4798_v14  ;;  %v4799_v32 = vunpack.i.l.bf16 %v4798_v14 }
 0xde9   :  { %v2241_v36 = vsel %vm839_vm3, %v2239_v3, %v4799_v32  ;;  %v2242_v21 = vsel %vm839_vm3, %v2240_v30, %v4800_v39 }
 0xdf4   :  { %v4803_v35 = vpop.permute.xlu0 %4802 }
 0xdf5   :  { %v4805_v20 = vunpack.i.h.bf16 %v4803_v35  ;;  %v4804_v50 = vunpack.i.l.bf16 %v4803_v35 }
 0xdf7   :  { %v2243_v16 = vsel %vm1113_vm4, %v2241_v36, %v4804_v50  ;;  %v2244_v48 = vsel %vm1113_vm4, %v2242_v21, %v4805_v20  ;;  %v4869_v36 = vld [vmem:[#allocation18] ss:$0 sm:$0xff] }
 0xdf8   :  { %v2542_v24 = vpack.c.bf16 %v2244_v48, %v2243_v16 }
 0xdfa   :  { %4459 = vmatmul.msk.bf16.vlgmr.msra.gmra.mxu0 %vm615_vm2, %v2542_v24  ;;  %v4870_v24 = vld [vmem:[#allocation19] ss:$0 sm:$0xff] }
 0xe04   :  { %v4808_v10 = vpop.permute.xlu1 %4807 }
 0xe05   :  { %v4810_v54 = vunpack.i.h.bf16 %v4808_v10  ;;  %v4809_v57 = vunpack.i.l.bf16 %v4808_v10  ;;  %v2966_v55 = vpop.f32.mrf.mxu3 }
 0xe06   :  { %v2967_v21 = vadd.f32 %v4869_v36, %v2966_v55 }
 0xe07   :  { %v2537_v59 = vsel %vm559_vm1, %v2305_v33, %v4810_v54  ;;  %v2536_v4 = vsel %vm559_vm1, %v2303_v61, %v4809_v57 }
 0xe08   :  { %v2970_v16 = vmul.f32 0.35355338, %v2967_v21 }
 0xe0a   :  { %v3045_v48 = vpack.c.bf16 %v2970_v16, %v2970_v16 }
 0xe0c   :  { %v3047_v54 = vunpack.c.l.bf16 %v3045_v48 }
 0xe0d   :  { %v2968_v3 = vpop.f32.mrf.mxu3 }
 0xe0e   :  { %v4872_v3 = vld [vmem:[#allocation10 + $0x1] ss:$0 sm:$0xff] }
 0xe14   :  { %v4813_v19 = vpop.permute.xlu0 %4812 }
 0xe15   :  { %v4815_v58 = vunpack.i.h.bf16 %v4813_v19  ;;  %v4814_v31 = vunpack.i.l.bf16 %v4813_v19  ;;  %v3000_v10 = vpop.f32.mrf.mxu3 }
 0xe16   :  { %v3001_v19 = vadd.f32 %v4870_v24, %v3000_v10 }
 0xe17   :  { %v2538_v56 = vsel %vm839_vm3, %v2536_v4, %v4814_v31  ;;  %v2539_v46 = vsel %vm839_vm3, %v2537_v59, %v4815_v58  ;;  %v4659_v59 = vld [vmem:[%s7303_s1 + $0x8] sm:$0xff]  ;;  %v4658_v4 = vld [vmem:[%s7303_s1] sm:$0xff] }
 0xe18   :  { %v3046_v57 = vpack.c.bf16 %v3001_v19, %v3001_v19  ;;  %3033 = vmatpush.bf16.msrb.mxu0 %v4659_v59 }
 0xe1a   :  { %v3048_v58 = vunpack.c.l.bf16 %v3046_v57 }
 0xe1c   :  { %v6909_v31 = vmul.f32 %v3048_v58, %v3047_v54  ;;  %3034 = vmatpush.bf16.msrb.mxu0 %v4658_v4 }
 0xe29   :  { %v4818_v37 = vpop.permute.xlu2 %4817 }
 0xe2a   :  { %v4820_v15 = vunpack.i.h.bf16 %v4818_v37  ;;  %v4819_v62 = vunpack.i.l.bf16 %v4818_v37  ;;  %v3002_v37 = vpop.f32.mrf.mxu3 }
 0xe2c   :  { %v2541_v6 = vsel %vm1113_vm4, %v2539_v46, %v4820_v15  ;;  %v2540_v7 = vsel %vm1113_vm4, %v2538_v56, %v4819_v62 }
 0xe2d   :  { %v2543_v5 = vpack.c.bf16 %v2541_v6, %v2540_v7  ;;  %v5783_v6 = vmov 0  }
 0xe2f   :  { %4460 = vmatmul.msk.bf16.gmra.mxu0 %vm615_vm2, %v2543_v5 }
 0xe3f   :  { %3035 = vmatmul.bf16.vlgmr.msrb.gmra.mxu0 %v5783_v6 }
 0xe77   :  { %v2574_v61 = vpop.f32.mrf.mxu0 }
 0xe78   :  { %v2575_v13 = vadd.f32 %v4867_v12, %v2574_v61  ;;  %v4648_v61 = vld [vmem:[%s7299_s3 + $0x10] sm:$0xff] }
 0xe79   :  { %2731 = vmatpush.bf16.msra.mxu2 %v4648_v61 }
 0xe7a   :  { %v2584_v33 = vadd.f32 %v2575_v13, %v6593_v34 }
 0xe7c   :  { %v2592_v17 = vsel %vm615_vm2, %v2584_v33, 0.0 }
 0xe7d   :  { %2593 = vadd.xlane.f32.xlu1 %v2592_v17 }
 0xe7f   :  { %v2576_v44 = vpop.f32.mrf.mxu0 }
 0xe80   :  { %v2577_v47 = vadd.f32 %v4867_v12, %v2576_v44 }
 0xe82   :  { %v2585_v42 = vadd.f32 %v2577_v47, %v6596_v27 }
 0xe84   :  { %v2595_v40 = vsel %vm615_vm2, %v2585_v42, 0.0 }
 0xe85   :  { %2596 = vadd.xlane.f32.xlu0 %v2595_v40 }
 0xeac   :  { %v2579_v11 = vpop.f32.mrf.mxu0 }
 0xead   :  { %v2580_v60 = vadd.f32 %v4867_v12, %v2579_v11 }
 0xeaf   :  { %v2586_v22 = vadd.f32 %v2580_v60, %v6609_v43 }
 0xeb1   :  { %v2598_v63 = vsel %vm615_vm2, %v2586_v22, 0.0 }
 0xeb2   :  { %2599 = vadd.xlane.f32.xlu2 %v2598_v63 }
 0xeb4   :  { %v2581_v34 = vpop.f32.mrf.mxu0 }
 0xeb5   :  { %v2582_v25 = vadd.f32 %v4867_v12, %v2581_v34 }
 0xeb7   :  { %v2587_v26 = vadd.f32 %v2582_v25, %v6611_v2 }
 0xeb9   :  { %v2601_v14 = vsel %vm615_vm2, %v2587_v26, 0.0 }
 0xeba   :  { %2602 = vadd.xlane.f32.xlu1 %v2601_v14 }
 0xebc   :  { %v3036_v19 = vpop.f32.mrf.mxu0 }
 0xec4   :  { %v3038_v4 = vpop.f32.mrf.mxu0 }
 0xeca   :  { %3120 = vrot.lane.b32.xlu2 %v6909_v31, %s5777_s22 }
 0xef0   :  { %v2594_v29 = vpop.xlane.xlu1 %2593 }
 0xef1   :  { %v2604_v27 = vmul.f32 %v2594_v29, %v6517_v9 }
 0xef3   :  { %v6898_v39 = vsub.f32 %v2584_v33, %v2604_v27 }
 0xef5   :  { %v2612_v32 = vmul.f32 %v6898_v39, %v6898_v39 }
 0xef7   :  { %v2616_v43 = vsel %vm615_vm2, %v2612_v32, 0.0  ;;  %v4871_v32 = vld [vmem:[#allocation9 + $0x1] ss:$0 sm:$0xff] }
 0xef8   :  { %v2597_v35 = vpop.xlane.xlu0 %2596  ;;  %2617 = vadd.xlane.f32.xlu0 %v2616_v43 }
 0xef9   :  { %v2605_v30 = vmul.f32 %v2597_v35, %v6517_v9 }
 0xefb   :  { %v6904_v2 = vsub.f32 %v2585_v42, %v2605_v30 }
 0xefd   :  { %v2613_v20 = vmul.f32 %v6904_v2, %v6904_v2 }
 0xeff   :  { %v2619_v50 = vsel %vm615_vm2, %v2613_v20, 0.0 }
 0xf00   :  { %2620 = vadd.xlane.f32.xlu1 %v2619_v50 }
 0xf25   :  { %v2600_v15 = vpop.xlane.xlu2 %2599 }
 0xf26   :  { %v2606_v62 = vmul.f32 %v2600_v15, %v6517_v9 }
 0xf28   :  { %v6916_v56 = vsub.f32 %v2586_v22, %v2606_v62 }
 0xf2a   :  { %v2614_v46 = vmul.f32 %v6916_v56, %v6916_v56 }
 0xf2c   :  { %v2622_v7 = vsel %vm615_vm2, %v2614_v46, 0.0 }
 0xf2d   :  { %v2603_v5 = vpop.xlane.xlu1 %2602  ;;  %2623 = vadd.xlane.f32.xlu0 %v2622_v7  ;;  %v3121_v17 = vpop.permute.xlu2 %3120 }
 0xf2e   :  { %v2607_v53 = vmul.f32 %v2603_v5, %v6517_v9  ;;  %v3123_v42 = vsel %vm3050_vm9, %v3121_v17, 0.0  ;;  %v3272_v22 = vsel %vm3203_vm10, %v3121_v17, 0.0 }
 0xf30   :  { %v6923_v8 = vsub.f32 %v2587_v26, %v2607_v53 }
 0xf32   :  { %v2615_v28 = vmul.f32 %v6923_v8, %v6923_v8 }
 0xf34   :  { %v2625_v23 = vsel %vm615_vm2, %v2615_v28, 0.0 }
 0xf35   :  { %2626 = vadd.xlane.f32.xlu1 %v2625_v23 }
 0xf41   :  { %3085 = vrot.lane.b32.xlu0 %v6909_v31, %s5778_s17 }
 0xf4e   :  { %3154 = vrot.lane.b32.xlu1 %v6909_v31, %s5779_s29 }
 0xf6b   :  { %v2618_v0 = vpop.xlane.xlu0 %2617  ;;  %3124 = vadd.xlane.f32.xlu0 %v3123_v42 }
 0xf6c   :  { %v2628_v1 = vmul.f32 %v2618_v0, %v6517_v9 }
 0xf6e   :  { %v2632_v12 = vadd.f32 1e-05, %v2628_v1 }
 0xf70   :  { %5037 = vrsqrt.f32 %v2632_v12  ;;  %vm2642_vm12 = vweird.f32 %v2632_v12 }
 0xf73   :  { %v2621_v13 = vpop.xlane.xlu1 %2620  ;;  %3273 = vadd.xlane.f32.xlu0 %v3272_v22 }
 0xf74   :  { %v2629_v33 = vmul.f32 %v2621_v13, %v6517_v9 }
 0xf76   :  { %v5038_v44 = vpop.eup %5037  ;;  %v2633_v47 = vadd.f32 1e-05, %v2629_v33 }
 0xf77   :  { %v2637_v40 = vmul.f32 %v5038_v44, %v2632_v12  ;;  %vm2643_vm11 = vweird.f32 %v5038_v44 }
 0xf78   :  { %5039 = vrsqrt.f32 %v2633_v47  ;;  %vm2644_vm13 = vmor %vm2642_vm12, %vm2643_vm11  ;;  %vm2652_vm15 = vweird.f32 %v2633_v47 }
 0xf79   :  { %v2638_v11 = vmul.f32 %v5038_v44, %v2637_v40 }
 0xf7b   :  { %v2639_v60 = vmul.f32 0.5, %v2638_v11 }
 0xf7d   :  { %v2640_v63 = vsub.f32 1.5, %v2639_v60 }
 0xf7e   :  { %v5040_v34 = vpop.eup %5039 }
 0xf7f   :  { %v2641_v25 = vmul.f32 %v5038_v44, %v2640_v63  ;;  %v2647_v26 = vmul.f32 %v5040_v34, %v2633_v47  ;;  %vm2653_vm14 = vweird.f32 %v5040_v34 }
 0xf80   :  { %vm2654_vm0 = vmor %vm2652_vm15, %vm2653_vm14 }
 0xf81   :  { %v2648_v14 = vmul.f32 %v5040_v34, %v2647_v26  ;;  %v2645_v29 = vsel %vm2644_vm13, %v5038_v44, %v2641_v25  ;;  %v4873_v44 = vld [vmem:[#allocation21] ss:$0 sm:$0xff] }
 0xf82   :  { %v2676_v43 = vmul.f32 %v2645_v29, %v6898_v39 }
 0xf83   :  { %v2649_v27 = vmul.f32 0.5, %v2648_v14 }
 0xf84   :  { %v2683_v20 = vmul.f32 %v4871_v32, %v2676_v43  ;;  %v4650_v43 = vld [vmem:[%s7300_s28 + $0x20] sm:$0xff] }
 0xf85   :  { %v2650_v55 = vsub.f32 1.5, %v2649_v27  ;;  %v4652_v27 = vld [vmem:[%s7300_s28 + $0x30] sm:$0xff] }
 0xf86   :  { %v6940_v21 = vadd.f32 %v4872_v3, %v2683_v20 }
 0xf87   :  { %v2651_v35 = vmul.f32 %v5040_v34, %v2650_v55  ;;  %v4651_v55 = vld [vmem:[%s7300_s28 + $0x28] sm:$0xff] }
 0xf89   :  { %v2655_v30 = vsel %vm2654_vm0, %v5040_v34, %v2651_v35  ;;  %v6963_v34 = vsel %vm2930_vm8, 65535, %v5783_v6  ;;  %v4653_v6 = vld [vmem:[%s7300_s28 + $0x38] sm:$0xff]  ;;  %v3204_v35 = vsel %vm3203_vm10, %v6909_v31, 0.0 }
 0xf8a   :  { %v2677_v50 = vmul.f32 %v2655_v30, %v6904_v2  ;;  %2797 = vmatpush.bf16.msra.mxu1 %v4653_v6 }
 0xf8c   :  { %v2684_v36 = vmul.f32 %v4871_v32, %v2677_v50  ;;  %v4874_v50 = vld [vmem:[#allocation12 + $0x1] ss:$0 sm:$0xff] }
 0xf8e   :  { %v6942_v16 = vadd.f32 %v4872_v3, %v2684_v36  ;;  %2798 = vmatpush.bf16.msra.mxu1 %v4652_v27 }
 0xf90   :  { %v2699_v48 = vpack.c.bf16 %v6942_v16, %v6940_v21 }
 0xf92   :  { %4473 = vmatmul.msk.bf16.vlgmr.msra.gmra.mxu2 %vm615_vm2, %v2699_v48  ;;  %2799 = vmatpush.bf16.msra.mxu1 %v4651_v55 }
 0xf96   :  { %2800 = vmatpush.bf16.msra.mxu1 %v4650_v43 }
 0xfa0   :  { %v2624_v24 = vpop.xlane.xlu0 %2623 }
 0xfa1   :  { %v2630_v39 = vmul.f32 %v2624_v24, %v6517_v9 }
 0xfa3   :  { %v2634_v10 = vadd.f32 1e-05, %v2630_v39 }
 0xfa5   :  { %5041 = vrsqrt.f32 %v2634_v10  ;;  %vm2662_vm7 = vweird.f32 %v2634_v10 }
 0xfa8   :  { %v2627_v54 = vpop.xlane.xlu1 %2626 }
 0xfa9   :  { %v2631_v57 = vmul.f32 %v2627_v54, %v6517_v9 }
 0xfab   :  { %v5042_v2 = vpop.eup %5041  ;;  %v2635_v58 = vadd.f32 1e-05, %v2631_v57 }
 0xfac   :  { %v2657_v37 = vmul.f32 %v5042_v2, %v2634_v10  ;;  %vm2663_vm5 = vweird.f32 %v5042_v2 }
 0xfad   :  { %5043 = vrsqrt.f32 %v2635_v58  ;;  %vm2664_vm11 = vmor %vm2662_vm7, %vm2663_vm5  ;;  %vm2672_vm13 = vweird.f32 %v2635_v58 }
 0xfae   :  { %v2658_v59 = vmul.f32 %v5042_v2, %v2657_v37 }
 0xfb0   :  { %v2659_v15 = vmul.f32 0.5, %v2658_v59 }
 0xfb2   :  { %v2660_v62 = vsub.f32 1.5, %v2659_v15 }
 0xfb3   :  { %v5044_v46 = vpop.eup %5043  ;;  %v3086_v7 = vpop.permute.xlu0 %3085 }
 0xfb4   :  { %v2661_v5 = vmul.f32 %v5042_v2, %v2660_v62  ;;  %v2667_v53 = vmul.f32 %v5044_v46, %v2635_v58  ;;  %v3088_v28 = vsel %vm3050_vm9, %v3086_v7, 0.0  ;;  %vm2673_vm12 = vweird.f32 %v5044_v46 }
 0xfb5   :  { %3089 = vadd.xlane.f32.xlu2 %v3088_v28  ;;  %vm2674_vm14 = vmor %vm2672_vm13, %vm2673_vm12  ;;  %v3238_v25 = vsel %vm3203_vm10, %v3086_v7, 0.0 }
 0xfb6   :  { %v2668_v23 = vmul.f32 %v5044_v46, %v2667_v53  ;;  %v2665_v49 = vsel %vm2664_vm11, %v5042_v2, %v2661_v5 }
 0xfb7   :  { %v2678_v12 = vmul.f32 %v2665_v49, %v6916_v56  ;;  %v3037_v56 = vadd.f32 %v4873_v44, %v3036_v19 }
 0xfb8   :  { %v2669_v0 = vmul.f32 0.5, %v2668_v23 }
 0xfb9   :  { %v2685_v17 = vmul.f32 %v4871_v32, %v2678_v12 }
 0xfba   :  { %v2670_v1 = vsub.f32 1.5, %v2669_v0 }
 0xfbb   :  { %v6954_v60 = vadd.f32 %v4872_v3, %v2685_v17 }
 0xfbc   :  { %v2671_v61 = vmul.f32 %v5044_v46, %v2670_v1 }
 0xfbe   :  { %v2675_v13 = vsel %vm2674_vm14, %v5044_v46, %v2671_v61 }
 0xfbf   :  { %v2679_v33 = vmul.f32 %v2675_v13, %v6923_v8  ;;  %v3061_v8 = vpack.c.bf16 %v3037_v56, %v3037_v56 }
 0xfc0   :  { %v3155_v47 = vpop.permute.xlu1 %3154 }
 0xfc1   :  { %v3157_v42 = vsel %vm3050_vm9, %v3155_v47, 0.0  ;;  %v3306_v40 = vsel %vm3203_vm10, %v3155_v47, 0.0  ;;  %v2686_v11 = vmul.f32 %v4871_v32, %v2679_v33  ;;  %v3217_v26 = vshrl.u32 %v3061_v8, 16 }
 0xfc2   :  { %3158 = vadd.xlane.f32.xlu1 %v3157_v42  ;;  %3307 = vadd.xlane.f32.xlu0 %v3306_v40  ;;  %v3069_v14 = vand.u32 %v6963_v34, %v3061_v8  ;;  %v3051_v32 = vsel %vm3050_vm9, %v6909_v31, 0.0  ;;  %vm3062_vm9 = vcmask 7168   ;;  %vm3394_vm10 = vcmask 254976  }
 0xfc3   :  { %v6956_v22 = vadd.f32 %v4872_v3, %v2686_v11  ;;  %v3223_v29 = vand.u32 %v3217_v26, %v6963_v34 }
 0xfc4   :  { %3078 = vmatpush.bf16.msrb.mxu2 %v3069_v14 }
 0xfc5   :  { %v2700_v63 = vpack.c.bf16 %v6956_v22, %v6954_v60 }
 0xfc7   :  { %4474 = vmatmul.msk.bf16.gmra.mxu2 %vm615_vm2, %v2700_v63 }
 0xfc8   :  { %3232 = vmatpush.bf16.msra.mxu2 %v3223_v29 }
 0xfca   :  { %3239 = vadd.xlane.f32.xlu1 %v3238_v25 }
 0xfcd   :  { %3133 = vrot.lane.b32.xlu2 %v3061_v8, %s5777_s22 }
 0xfd5   :  { %3285 = vrot.lane.b32.xlu2 %v3217_v26, %s5777_s22 }
 0xfd6   :  { %3167 = vrot.lane.b32.xlu0 %v3061_v8, %s5779_s29 }
 0xfde   :  { %3251 = vrot.lane.b32.xlu0 %v3217_v26, %s5778_s17  ;;  %v3125_v3 = vpop.xlane.xlu0 %3124 }
 0xfdf   :  { %v3126_v20 = vsub.f32 %v3125_v3, %v3125_v3 }
 0xfe1   :  { %v3127_v36 = vmul.f32 1.442695, %v3126_v20 }
 0xfe3   :  { %3099 = vrot.lane.b32.xlu1 %v3061_v8, %s5778_s17  ;;  %5045 = vpow2.f32 %v3127_v36 }
 0xfe6   :  { %v3274_v10 = vpop.xlane.xlu0 %3273 }
 0xfe7   :  { %v3275_v2 = vsub.f32 %v3274_v10, %v3274_v10 }
 0xfe9   :  { %v5046_v58 = vpop.eup %5045  ;;  %v3276_v37 = vmul.f32 1.442695, %v3275_v2 }
 0xfea   :  { %5047 = vrcp.f32 %v5046_v58 }
 0xfeb   :  { %3319 = vrot.lane.b32.xlu1 %v3217_v26, %s5779_s29  ;;  %5049 = vpow2.f32 %v3276_v37 }
 0xff0   :  { %v5048_v59 = vpop.eup %5047 }
 0xff1   :  { %v5050_v4 = vpop.eup %5049  ;;  %v3131_v15 = vmul.f32 %v5048_v59, %v5046_v58 }
 0xff2   :  { %5051 = vrcp.f32 %v5050_v4 }
 0xff3   :  { %v3132_v7 = vpack.c.bf16 %v3131_v15, %v3131_v15 }
 0xff8   :  { %v5052_v49 = vpop.eup %5051 }
 0xff9   :  { %v3280_v1 = vmul.f32 %v5052_v49, %v5050_v4 }
 0xffb   :  { %v3281_v33 = vpack.c.bf16 %v3280_v1, %v3280_v1 }
 0xffd   :  { %v3283_v44 = vshrl.u32 %v3281_v33, 16 }
 0xffe   :  { %3052 = vadd.xlane.f32.xlu2 %v3051_v32 }
0x1008   :  { %3205 = vadd.xlane.f32.xlu0 %v3204_v35 }
0x1015   :  { %v2733_v30 = vpop.f32.mrf.mxu2 }
0x1016   :  { %v2734_v48 = vadd.f32 %v4874_v50, %v2733_v30 }
0x1018   :  { %v2743_v19 = vmax.f32 %v2734_v48, 0.0 }
0x101d   :  { %v2735_v24 = vpop.f32.mrf.mxu2 }
0x101e   :  { %v2736_v39 = vadd.f32 %v4874_v50, %v2735_v24 }
0x1020   :  { %v2744_v54 = vmax.f32 %v2736_v39, 0.0 }
0x1022   :  { %v2756_v57 = vpack.c.bf16 %v2744_v54, %v2743_v19 }
0x1024   :  { %4499 = vmatmul.msk.bf16.vlgmr.msra.gmra.mxu1 %vm1660_vm6, %v2756_v57 }
0x1028   :  { %v3090_v31 = vpop.xlane.xlu2 %3089 }
0x1029   :  { %v3091_v11 = vsub.f32 %v3090_v31, %v3090_v31 }
0x102b   :  { %v3092_v26 = vmul.f32 1.442695, %v3091_v11 }
0x1030   :  { %v3134_v62 = vpop.permute.xlu2 %3133 }
0x1031   :  { %v3139_v46 = vand.u32 %v3134_v62, %v6963_v34 }
0x1033   :  { %3148 = vmatpush.bf16.msra.mxu3 %v3139_v46 }
0x1035   :  { %v3159_v5 = vpop.xlane.xlu1 %3158  ;;  %v3308_v12 = vpop.xlane.xlu0 %3307 }
0x1036   :  { %v3160_v53 = vsub.f32 %v3159_v5, %v3159_v5  ;;  %4529 = vmatmul.msk.bf16.vlgmr.msra.gmra.mxu3 %vm3062_vm9, %v3132_v7  ;;  %v3309_v61 = vsub.f32 %v3308_v12, %v3308_v12 }
0x1038   :  { %v3161_v28 = vmul.f32 1.442695, %v3160_v53  ;;  %v3286_v23 = vpop.permute.xlu2 %3285  ;;  %v3310_v17 = vmul.f32 1.442695, %v3309_v61 }
0x1039   :  { %v3291_v0 = vand.u32 %v3286_v23, %v6963_v34 }
0x103a   :  { %5053 = vpow2.f32 %v3161_v28 }
0x103b   :  { %3300 = vmatpush.bf16.msrb.mxu3 %v3291_v0 }
0x103d   :  { %v3240_v14 = vpop.xlane.xlu1 %3239 }
0x103e   :  { %v3241_v32 = vsub.f32 %v3240_v14, %v3240_v14 }
0x1040   :  { %v5054_v13 = vpop.eup %5053  ;;  %v3242_v10 = vmul.f32 1.442695, %v3241_v32 }
0x1041   :  { %5055 = vrcp.f32 %v5054_v13 }
0x1042   :  { %5057 = vpow2.f32 %v3310_v17 }
0x1046   :  { %4533 = vmatmul.msk.bf16.vlgmr.msrb.gmra.mxu3 %vm3062_vm9, %v3283_v44  ;;  %v4875_v44 = vld [vmem:[#allocation13 + $0x1] ss:$0 sm:$0xff] }
0x1047   :  { %v5056_v47 = vpop.eup %5055 }
0x1048   :  { %v3165_v42 = vmul.f32 %v5056_v47, %v5054_v13  ;;  %v3168_v40 = vpop.permute.xlu0 %3167  ;;  %v5058_v25 = vpop.eup %5057 }
0x1049   :  { %v3173_v56 = vand.u32 %v3168_v40, %v6963_v34  ;;  %5059 = vrcp.f32 %v5058_v25 }
0x104a   :  { %v2738_v63 = vpop.f32.mrf.mxu2  ;;  %v3166_v8 = vpack.c.bf16 %v3165_v42, %v3165_v42  ;;  %5061 = vpow2.f32 %v3092_v26 }
0x104b   :  { %3182 = vmatpush.bf16.msra.mxu0 %v3173_v56  ;;  %v2739_v29 = vadd.f32 %v4874_v50, %v2738_v63 }
0x104d   :  { %v2745_v43 = vmax.f32 %v2739_v29, 0.0 }
0x104e   :  { %4530 = vmatmul.msk.bf16.vlgmr.msra.gmra.mxu0 %vm3062_vm9, %v3166_v8 }
0x104f   :  { %v5060_v3 = vpop.eup %5059 }
0x1050   :  { %v3252_v55 = vpop.permute.xlu0 %3251  ;;  %v5062_v48 = vpop.eup %5061  ;;  %v3314_v39 = vmul.f32 %v5060_v3, %v5058_v25 }
0x1051   :  { %v3257_v36 = vand.u32 %v3252_v55, %v6963_v34  ;;  %5063 = vrcp.f32 %v5062_v48 }
0x1052   :  { %v2740_v6 = vpop.f32.mrf.mxu2  ;;  %5065 = vpow2.f32 %v3242_v10 }
0x1053   :  { %v2741_v27 = vadd.f32 %v4874_v50, %v2740_v6  ;;  %v3315_v50 = vpack.c.bf16 %v3314_v39, %v3314_v39 }
0x1055   :  { %v2746_v35 = vmax.f32 %v2741_v27, 0.0  ;;  %v3100_v30 = vpop.permute.xlu1 %3099  ;;  %v3317_v2 = vshrl.u32 %v3315_v50, 16 }
0x1056   :  { %v3105_v20 = vand.u32 %v3100_v30, %v6963_v34 }
0x1057   :  { %v2757_v24 = vpack.c.bf16 %v2746_v35, %v2745_v43  ;;  %v5064_v57 = vpop.eup %5063 }
0x1058   :  { %3114 = vmatpush.bf16.msrb.mxu1 %v3105_v20  ;;  %v5066_v58 = vpop.eup %5065  ;;  %v3096_v37 = vmul.f32 %v5064_v57, %v5062_v48 }
0x1059   :  { %4500 = vmatmul.msk.bf16.gmra.mxu1 %vm1660_vm6, %v2757_v24  ;;  %5067 = vrcp.f32 %v5066_v58 }
0x105a   :  { %v3097_v31 = vpack.c.bf16 %v3096_v37, %v3096_v37  ;;  %v4661_v37 = vld [vmem:[#allocation22 + $0x8] sm:$0xff] }
0x105c   :  { %3266 = vmatpush.bf16.msra.mxu1 %v3257_v36 }
0x105d   :  { %v3320_v19 = vpop.permute.xlu1 %3319 }
0x105e   :  { %v3325_v54 = vand.u32 %v3320_v19, %v6963_v34 }
0x105f   :  { %v5068_v59 = vpop.eup %5067 }
0x1060   :  { %3334 = vmatpush.bf16.msrb.mxu0 %v3325_v54  ;;  %v3246_v4 = vmul.f32 %v5068_v59, %v5066_v58 }
0x1062   :  { %v3247_v46 = vpack.c.bf16 %v3246_v4, %v3246_v4 }
0x1063   :  { %4534 = vmatmul.msk.bf16.vlgmr.msrb.gmra.mxu0 %vm3062_vm9, %v3317_v2 }
0x1064   :  { %v3249_v5 = vshrl.u32 %v3247_v46, 16 }
0x1069   :  { %4528 = vmatmul.msk.bf16.vlgmr.msrb.gmra.mxu1 %vm3062_vm9, %v3097_v31  ;;  %v4660_v31 = vld [vmem:[#allocation22] sm:$0xff] }
0x1071   :  { %v3053_v15 = vpop.xlane.xlu2 %3052 }
0x1072   :  { %v3054_v62 = vsub.f32 %v3053_v15, %v3053_v15 }
0x1074   :  { %v3055_v7 = vmul.f32 1.442695, %v3054_v62 }
0x1076   :  { %5069 = vpow2.f32 %v3055_v7 }
0x1079   :  { %4532 = vmatmul.msk.bf16.vlgmr.msra.gmra.mxu1 %vm3062_vm9, %v3249_v5 }
0x107b   :  { %v3206_v34 = vpop.xlane.xlu0 %3205 }
0x107c   :  { %v5070_v53 = vpop.eup %5069  ;;  %v3207_v28 = vsub.f32 %v3206_v34, %v3206_v34 }
0x107d   :  { %5071 = vrcp.f32 %v5070_v53 }
0x107e   :  { %v3208_v23 = vmul.f32 1.442695, %v3207_v28 }
0x1080   :  { %5073 = vpow2.f32 %v3208_v23 }
0x1083   :  { %v5072_v49 = vpop.eup %5071 }
0x1084   :  { %v3059_v0 = vmul.f32 %v5072_v49, %v5070_v53 }
0x1086   :  { %v5074_v1 = vpop.eup %5073  ;;  %v3060_v12 = vpack.c.bf16 %v3059_v0, %v3059_v0 }
0x1087   :  { %5075 = vrcp.f32 %v5074_v1 }
0x1088   :  { %4527 = vmatmul.msk.bf16.vlgmr.msrb.gmra.mxu2 %vm3062_vm9, %v3060_v12 }
0x1089   :  { %3384 = vmatpush.bf16.msrb.mxu2 %v4661_v37  ;;  %v4666_v37 = vld [vmem:[#allocation28] sm:$0xff] }
0x108d   :  { %v5076_v61 = vpop.eup %5075  ;;  %3385 = vmatpush.bf16.msrb.mxu2 %v4660_v31 }
0x108e   :  { %v3212_v13 = vmul.f32 %v5076_v61, %v5074_v1 }
0x1090   :  { %v3213_v33 = vpack.c.bf16 %v3212_v13, %v3212_v13 }
0x1092   :  { %v3215_v17 = vshrl.u32 %v3213_v33, 16 }
0x1098   :  { %4531 = vmatmul.msk.bf16.vlgmr.msra.gmra.mxu2 %vm3062_vm9, %v3215_v17 }
0x10a1   :  { %v2802_v47 = vpop.f32.mrf.mxu1 }
0x10a2   :  { %v2803_v42 = vadd.f32 %v4875_v44, %v2802_v47 }
0x10a4   :  { %v2812_v2 = vadd.f32 %v2803_v42, %v6940_v21 }
0x10a6   :  { %v2820_v58 = vsel %vm615_vm2, %v2812_v2, 0.0 }
0x10a9   :  { %v2804_v40 = vpop.f32.mrf.mxu1 }
0x10aa   :  { %v2805_v11 = vadd.f32 %v4875_v44, %v2804_v40  ;;  %v4876_v40 = vld [vmem:[#allocation24] ss:$0 sm:$0xff] }
0x10ac   :  { %v6999_v56 = vadd.f32 %v2805_v11, %v6942_v16 }
0x10ae   :  { %v2823_v63 = vsel %vm615_vm2, %v6999_v56, 0.0 }
0x10af   :  { %2824 = vadd.xlane.f32.xlu2 %v2823_v63 }
0x10b9   :  { %v3150_v8 = vpop.f32.mrf.mxu3 }
0x10c1   :  { %v3152_v25 = vpop.f32.mrf.mxu3 }
0x10c9   :  { %v3302_v26 = vpop.f32.mrf.mxu3 }
0x10ca   :  { %v4821_v14 = vpack.i.bf16 %v3150_v8, %v3302_v26 }
0x10cb   :  { %v3184_v29 = vpop.f32.mrf.mxu0 }
0x10cc   :  { %4822 = vrot.lane.b32.xlu1 %v4821_v14, %s5752_s25 }
0x10d1   :  { %v3304_v6 = vpop.f32.mrf.mxu3 }
0x10d3   :  { %v3186_v27 = vpop.f32.mrf.mxu0 }
0x10d6   :  { %v2807_v55 = vpop.f32.mrf.mxu1 }
0x10d7   :  { %v2808_v32 = vadd.f32 %v4875_v44, %v2807_v55 }
0x10d9   :  { %v7005_v43 = vadd.f32 %v2808_v32, %v6954_v60 }
0x10db   :  { %v2826_v16 = vsel %vm615_vm2, %v7005_v43, 0.0 }
0x10dc   :  { %2827 = vadd.xlane.f32.xlu0 %v2826_v16 }
0x10de   :  { %v2809_v35 = vpop.f32.mrf.mxu1 }
0x10df   :  { %v2810_v30 = vadd.f32 %v4875_v44, %v2809_v35 }
0x10e0   :  { %v3336_v3 = vpop.f32.mrf.mxu0 }
0x10e1   :  { %v4831_v50 = vpack.i.bf16 %v3184_v29, %v3336_v3  ;;  %v2815_v14 = vadd.f32 %v2810_v30, %v6956_v22 }
0x10e3   :  { %v2829_v27 = vsel %vm615_vm2, %v2815_v14, 0.0 }
0x10e6   :  { %v3116_v20 = vpop.f32.mrf.mxu1 }
0x10e8   :  { %v3338_v36 = vpop.f32.mrf.mxu0 }
0x10ee   :  { %v3118_v48 = vpop.f32.mrf.mxu1 }
0x10f6   :  { %v3268_v24 = vpop.f32.mrf.mxu1 }
0x10f7   :  { %v4826_v39 = vpack.i.bf16 %v3116_v20, %v3268_v24 }
0x10f9   :  { %4827 = vrot.lane.b32.xlu1 %v4826_v39, %s5780_s23 }
0x10fe   :  { %v3270_v10 = vpop.f32.mrf.mxu1 }
0x1101   :  { %4832 = vrot.lane.b32.xlu1 %v4831_v50, %s5781_s6 }
0x110b   :  { %v3080_v60 = vpop.f32.mrf.mxu2 }
0x1113   :  { %v3082_v19 = vpop.f32.mrf.mxu2 }
0x111b   :  { %v3234_v54 = vpop.f32.mrf.mxu2 }
0x1122   :  { %v2825_v25 = vpop.xlane.xlu2 %2824 }
0x1123   :  { %v3236_v57 = vpop.f32.mrf.mxu2  ;;  %v2833_v26 = vmul.f32 %v2825_v25, %v6517_v9 }
0x1124   :  { %v4665_v57 = vld [vmem:[#allocation27 + $0x8] sm:$0xff] }
0x1125   :  { %v7031_v6 = vsub.f32 %v6999_v56, %v2833_v26  ;;  %3498 = vmatpush.bf16.msra.mxu3 %v4665_v57 }
0x1127   :  { %v2841_v16 = vmul.f32 %v7031_v6, %v7031_v6 }
0x1129   :  { %v2847_v3 = vsel %vm615_vm2, %v2841_v16, 0.0 }
0x112b   :  { %2821 = vadd.xlane.f32.xlu1 %v2820_v58 }
0x113e   :  { %v4823_v59 = vpop.permute.xlu1 %4822 }
0x113f   :  { %v4824_v7 = vunpack.i.l.bf16 %v4823_v59  ;;  %v4825_v21 = vunpack.i.h.bf16 %v4823_v59  ;;  %v4664_v59 = vld [vmem:[#allocation27] sm:$0xff] }
0x1140   :  { %3499 = vmatpush.bf16.msra.mxu3 %v4664_v59 }
0x114f   :  { %v2828_v55 = vpop.xlane.xlu0 %2827 }
0x1150   :  { %v2834_v32 = vmul.f32 %v2828_v55, %v6517_v9  ;;  %v4662_v55 = vld [vmem:[#allocation25] sm:$0xff] }
0x1152   :  { %v7038_v35 = vsub.f32 %v7005_v43, %v2834_v32 }
0x1154   :  { %v2842_v22 = vmul.f32 %v7038_v35, %v7038_v35 }
0x1156   :  { %v2850_v56 = vsel %vm615_vm2, %v2842_v22, 0.0 }
0x116b   :  { %v4828_v4 = vpop.permute.xlu1 %4827 }
0x116c   :  { %v4829_v15 = vunpack.i.l.bf16 %v4828_v4  ;;  %v4830_v62 = vunpack.i.h.bf16 %v4828_v4 }
0x116e   :  { %v3352_v46 = vsel %vm559_vm1, %v3234_v54, %v4829_v15  ;;  %v3200_v34 = vsel %vm559_vm1, %v3080_v60, %v4830_v62  ;;  %v4667_v60 = vld [vmem:[#allocation28 + $0x8] sm:$0xff] }
0x116f   :  { %v3353_v23 = vsel %vm839_vm3, %v3352_v46, %v4824_v7  ;;  %v3201_v0 = vsel %vm839_vm3, %v3200_v34, %v4825_v21  ;;  %3545 = vmatpush.bf16.msra.mxu0 %v4667_v60 }
0x1173   :  { %v4833_v5 = vpop.permute.xlu1 %4832  ;;  %3546 = vmatpush.bf16.msra.mxu0 %v4666_v37  ;;  %v4879_v37 = vld [vmem:[%s7304_s27] ss:$0 sm:$0xff] }
0x1174   :  { %v4835_v53 = vunpack.i.h.bf16 %v4833_v5  ;;  %v4834_v28 = vunpack.i.l.bf16 %v4833_v5 }
0x1176   :  { %v3354_v49 = vsel %vm1113_vm4, %v3353_v23, %v4834_v28  ;;  %v3202_v12 = vsel %vm1113_vm4, %v3201_v0, %v4835_v53 }
0x1177   :  { %v3356_v1 = vrot.slane %v3354_v49, 7 }
0x1179   :  { %v3358_v61 = vsel %vm2930_vm8, %v3202_v12, %v3356_v1  ;;  %v7058_v1 = vld [vmem:[#allocation15 + $0x1] ss:$0 sm:$0xff] }
0x117a   :  { %v3359_v13 = vpack.c.bf16 %v3358_v61, %v3358_v61 }
0x117c   :  { %4543 = vmatmul.msk.bf16.vlgmr.msrb.gmra.mxu2 %vm615_vm2, %v3359_v13 }
0x119e   :  { %v2822_v33 = vpop.xlane.xlu1 %2821 }
0x119f   :  { %v2832_v17 = vmul.f32 %v2822_v33, %v6517_v9  ;;  %v7061_v33 = vld [vmem:[#allocation16 + $0x1] ss:$0 sm:$0xff] }
0x11a1   :  { %v7022_v44 = vsub.f32 %v2812_v2, %v2832_v17 }
0x11a3   :  { %v2840_v47 = vmul.f32 %v7022_v44, %v7022_v44 }
0x11a5   :  { %v2844_v42 = vsel %vm615_vm2, %v2840_v47, 0.0 }
0x11a6   :  { %2845 = vadd.xlane.f32.xlu0 %v2844_v42 }
0x11ff   :  { %v3387_v11 = vpop.f32.mrf.mxu2 }
0x1200   :  { %v3388_v63 = vadd.f32 %v4876_v40, %v3387_v11 }
0x1202   :  { %v3395_v8 = vsel %vm3394_vm10, %v3388_v63, 0.0 }
0x1203   :  { %3396 = vadd.xlane.f32.xlu2 %v3395_v8 }
0x1207   :  { %v3389_v29 = vpop.f32.mrf.mxu2 }
0x120b   :  { %2830 = vadd.xlane.f32.xlu2 %v2829_v27  ;;  %v4663_v27 = vld [vmem:[#allocation25 + $0x8] sm:$0xff] }
0x120c   :  { %3456 = vmatpush.bf16.msrb.mxu1 %v4663_v27 }
0x1210   :  { %3457 = vmatpush.bf16.msrb.mxu1 %v4662_v55 }
0x1213   :  { %2848 = vadd.xlane.f32.xlu2 %v2847_v3 }
0x1219   :  { %v2846_v30 = vpop.xlane.xlu0 %2845 }
0x121a   :  { %v2856_v20 = vmul.f32 %v2846_v30, %v6517_v9 }
0x121b   :  { %2851 = vadd.xlane.f32.xlu2 %v2850_v56 }
0x121c   :  { %v2860_v36 = vadd.f32 1e-05, %v2856_v20 }
0x121e   :  { %5077 = vrsqrt.f32 %v2860_v36  ;;  %vm2870_vm0 = vweird.f32 %v2860_v36 }
0x1224   :  { %v5078_v10 = vpop.eup %5077 }
0x1225   :  { %v2865_v2 = vmul.f32 %v5078_v10, %v2860_v36  ;;  %vm2871_vm15 = vweird.f32 %v5078_v10 }
0x1226   :  { %vm2872_vm5 = vmor %vm2870_vm0, %vm2871_vm15 }
0x1227   :  { %v2866_v4 = vmul.f32 %v5078_v10, %v2865_v2 }
0x1229   :  { %v2867_v7 = vmul.f32 0.5, %v2866_v4 }
0x122b   :  { %v2868_v34 = vsub.f32 1.5, %v2867_v7 }
0x122d   :  { %v2869_v53 = vmul.f32 %v5078_v10, %v2868_v34 }
0x122f   :  { %v2873_v23 = vsel %vm2872_vm5, %v5078_v10, %v2869_v53 }
0x1230   :  { %v2904_v12 = vmul.f32 %v2873_v23, %v7022_v44 }
0x1232   :  { %v2911_v17 = vmul.f32 %v7058_v1, %v2904_v12 }
0x1234   :  { %v2918_v40 = vadd.f32 %v7061_v33, %v2911_v17 }
0x1236   :  { %v2922_v44 = vadd.f32 %v2918_v40, %v6213_v38 }
0x1276   :  { %v3397_v48 = vpop.xlane.xlu2 %3396 }
0x1277   :  { %v3398_v24 = vmul.f32 %v3397_v48, %v6517_v9 }
0x1279   :  { %v7046_v39 = vsub.f32 %v3388_v63, %v3398_v24 }
0x127b   :  { %v3400_v43 = vmul.f32 %v7046_v39, %v7046_v39 }
0x127d   :  { %v3401_v50 = vsel %vm3394_vm10, %v3400_v43, 0.0 }
0x127e   :  { %3402 = vadd.xlane.f32.xlu0 %v3401_v50  ;;  %v2831_v19 = vpop.xlane.xlu2 %2830 }
0x127f   :  { %v2835_v54 = vmul.f32 %v2831_v19, %v6517_v9 }
0x1281   :  { %v7052_v58 = vsub.f32 %v2815_v14, %v2835_v54 }
0x1283   :  { %v2843_v31 = vmul.f32 %v7052_v58, %v7052_v58 }
0x1285   :  { %v2853_v15 = vsel %vm615_vm2, %v2843_v31, 0.0 }
0x1286   :  { %2854 = vadd.xlane.f32.xlu0 %v2853_v15  ;;  %v2849_v62 = vpop.xlane.xlu2 %2848  ;;  %v4880_v15 = vld [vmem:[%s7305_s8] ss:$0 sm:$0xff] }
0x1287   :  { %v2857_v46 = vmul.f32 %v2849_v62, %v6517_v9 }
0x1289   :  { %v2861_v5 = vadd.f32 1e-05, %v2857_v46 }
0x128b   :  { %5079 = vrsqrt.f32 %v2861_v5  ;;  %vm2880_vm11 = vweird.f32 %v2861_v5 }
0x128e   :  { %v2852_v14 = vpop.xlane.xlu2 %2851 }
0x128f   :  { %v2858_v29 = vmul.f32 %v2852_v14, %v6517_v9  ;;  %v4883_v14 = vld [vmem:[%s7308_s30] ss:$0 sm:$0xff] }
0x1291   :  { %v5080_v28 = vpop.eup %5079 }
0x1292   :  { %v2875_v21 = vmul.f32 %v5080_v28, %v2861_v5  ;;  %vm2881_vm7 = vweird.f32 %v5080_v28 }
0x1293   :  { %vm2882_vm12 = vmor %vm2880_vm11, %vm2881_vm7 }
0x1294   :  { %v2876_v49 = vmul.f32 %v5080_v28, %v2875_v21 }
0x1296   :  { %v2877_v0 = vmul.f32 0.5, %v2876_v49 }
0x1298   :  { %v2878_v61 = vsub.f32 1.5, %v2877_v0 }
0x129a   :  { %v2879_v13 = vmul.f32 %v5080_v28, %v2878_v61 }
0x129c   :  { %v2883_v47 = vsel %vm2882_vm12, %v5080_v28, %v2879_v13 }
0x129d   :  { %v2905_v42 = vmul.f32 %v2883_v47, %v7031_v6  ;;  %v2862_v6 = vadd.f32 1e-05, %v2858_v29 }
0x129f   :  { %v2912_v11 = vmul.f32 %v7058_v1, %v2905_v42  ;;  %5081 = vrsqrt.f32 %v2862_v6  ;;  %vm2890_vm9 = vweird.f32 %v2862_v6  ;;  %v7094_v42 = vld [vmem:[%s7306_s2] ss:$0 sm:$0xff] }
0x12a1   :  { %v2919_v63 = vadd.f32 %v7061_v33, %v2912_v11 }
0x12a3   :  { %v2923_v8 = vadd.f32 %v2919_v63, %v6217_v41  ;;  %v3515_v25 = vpack.c.bf16 %v2919_v63, %v2918_v40 }
0x12a5   :  { %4571 = vmatmul.msk.bf16.vlgmr.msra.gmra.mxu0 %vm615_vm2, %v3515_v25  ;;  %v3468_v26 = vpack.c.bf16 %v2923_v8, %v2922_v44  ;;  %v5082_v32 = vpop.eup %5081 }
0x12a6   :  { %v2885_v41 = vmul.f32 %v5082_v32, %v2862_v6  ;;  %vm2891_vm13 = vweird.f32 %v5082_v32 }
0x12a7   :  { %4561 = vmatmul.msk.bf16.vlgmr.msra.gmra.mxu3 %vm615_vm2, %v3468_v26  ;;  %vm2892_vm15 = vmor %vm2890_vm9, %vm2891_vm13  ;;  %vm3584_vm13 = vcmask 122880  }
0x12a8   :  { %v2886_v22 = vmul.f32 %v5082_v32, %v2885_v41 }
0x12aa   :  { %v2887_v20 = vmul.f32 0.5, %v2886_v22 }
0x12ac   :  { %v2888_v43 = vsub.f32 1.5, %v2887_v20 }
0x12ae   :  { %v2889_v60 = vmul.f32 %v5082_v32, %v2888_v43 }
0x12b0   :  { %v2893_v31 = vsel %vm2892_vm15, %v5082_v32, %v2889_v60 }
0x12b1   :  { %v2906_v7 = vmul.f32 %v2893_v31, %v7038_v35 }
0x12b3   :  { %v2913_v23 = vmul.f32 %v7058_v1, %v2906_v7 }
0x12b5   :  { %v2920_v12 = vadd.f32 %v7061_v33, %v2913_v23 }
0x12f1   :  { %v3403_v16 = vpop.xlane.xlu0 %3402 }
0x12f2   :  { %v3404_v38 = vmul.f32 %v3403_v16, %v6517_v9 }
0x12f4   :  { %v3405_v3 = vadd.f32 1e-05, %v3404_v38 }
0x12f6   :  { %5083 = vrsqrt.f32 %v3405_v3  ;;  %vm3412_vm0 = vweird.f32 %v3405_v3 }
0x12f9   :  { %v2855_v56 = vpop.xlane.xlu0 %2854 }
0x12fa   :  { %v2859_v30 = vmul.f32 %v2855_v56, %v6517_v9 }
0x12fc   :  { %v5084_v36 = vpop.eup %5083  ;;  %v2863_v48 = vadd.f32 1e-05, %v2859_v30 }
0x12fd   :  { %v3407_v24 = vmul.f32 %v5084_v36, %v3405_v3  ;;  %vm3413_vm14 = vweird.f32 %v5084_v36 }
0x12fe   :  { %5085 = vrsqrt.f32 %v2863_v48  ;;  %vm3414_vm5 = vmor %vm3412_vm0, %vm3413_vm14  ;;  %vm2900_vm11 = vweird.f32 %v2863_v48 }
0x12ff   :  { %v3408_v10 = vmul.f32 %v5084_v36, %v3407_v24 }
0x1301   :  { %v3409_v50 = vmul.f32 0.5, %v3408_v10 }
0x1303   :  { %v3410_v19 = vsub.f32 1.5, %v3409_v50 }
0x1304   :  { %v5086_v54 = vpop.eup %5085 }
0x1305   :  { %v3411_v57 = vmul.f32 %v5084_v36, %v3410_v19  ;;  %v2895_v2 = vmul.f32 %v5086_v54, %v2863_v48  ;;  %vm2901_vm7 = vweird.f32 %v5086_v54 }
0x1306   :  { %vm2902_vm12 = vmor %vm2900_vm11, %vm2901_vm7 }
0x1307   :  { %v3415_v59 = vsel %vm3414_vm5, %v5084_v36, %v3411_v57  ;;  %v2896_v4 = vmul.f32 %v5086_v54, %v2895_v2 }
0x1308   :  { %v3416_v62 = vmul.f32 %v3415_v59, %v7046_v39 }
0x1309   :  { %v2897_v46 = vmul.f32 0.5, %v2896_v4 }
0x130a   :  { %v3420_v5 = vmul.f32 %v4879_v37, %v3416_v62 }
0x130b   :  { %v2898_v34 = vsub.f32 1.5, %v2897_v46 }
0x130c   :  { %v7079_v53 = vadd.f32 %v4880_v15, %v3420_v5 }
0x130d   :  { %v2899_v28 = vmul.f32 %v5086_v54, %v2898_v34 }
0x130e   :  { %v3425_v21 = vadd.f32 %v7079_v53, %v6881_v18  ;;  %v2924_v18 = vadd.f32 %v2920_v12, %v6232_v51  ;;  %v4882_v51 = vld [vmem:[%s7307_s26] ss:$0 sm:$0xff] }
0x130f   :  { %v2903_v49 = vsel %vm2902_vm12, %v5086_v54, %v2899_v28 }
0x1310   :  { %v3430_v0 = vpack.c.bf16 %v3425_v21, %v3425_v21  ;;  %v2907_v39 = vmul.f32 %v2903_v49, %v7052_v58 }
0x1312   :  { %4552 = vmatmul.msk.bf16.vlgmr.msrb.gmra.mxu1 %vm615_vm2, %v3430_v0  ;;  %v2914_v35 = vmul.f32 %v7058_v1, %v2907_v39 }
0x1314   :  { %v2921_v61 = vadd.f32 %v7061_v33, %v2914_v35 }
0x1316   :  { %v3516_v13 = vpack.c.bf16 %v2921_v61, %v2920_v12  ;;  %v2925_v17 = vadd.f32 %v2921_v61, %v6234_v52 }
0x1318   :  { %4572 = vmatmul.msk.bf16.gmra.mxu0 %vm615_vm2, %v3516_v13  ;;  %v3469_v47 = vpack.c.bf16 %v2925_v17, %v2924_v18 }
0x131a   :  { %4562 = vmatmul.msk.bf16.gmra.mxu3 %vm615_vm2, %v3469_v47 }
0x1322   :  { %v3548_v58 = vpop.f32.mrf.mxu0 }
0x1323   :  { %v3549_v11 = vadd.f32 %v7094_v42, %v3548_v58  ;;  %v3798_v58 = vrot.slane %v6281_v45, 1 }
0x132a   :  { %v3501_v40 = vpop.f32.mrf.mxu3  ;;  %v3550_v1 = vpop.f32.mrf.mxu0 }
0x132b   :  { %v3551_v33 = vadd.f32 %v7094_v42, %v3550_v1  ;;  %v3502_v44 = vadd.f32 %v4882_v51, %v3501_v40 }
0x132d   :  { %v7098_v63 = vpack.c.bf16 %v3551_v33, %v3549_v11 }
0x132f   :  { %3608 = vmatpush.bf16.msra.mxu1 %v7098_v63 }
0x1332   :  { %v3503_v52 = vpop.f32.mrf.mxu3 }
0x1333   :  { %v3504_v8 = vadd.f32 %v4882_v51, %v3503_v52 }
0x1335   :  { %v3564_v25 = vpack.c.bf16 %v3504_v8, %v3502_v44 }
0x1337   :  { %3673 = vrot.lane.b32.xlu0 %v3564_v25, %s5777_s22  ;;  %3618 = vrot.lane.b32.xlu1 %v3564_v25, %s5778_s17  ;;  %v3569_v26 = vsel %vm559_vm1, %v3564_v25, 0 }
0x1338   :  { %3578 = vmatpush.bf16.xpose.msra.mxu2 %v3569_v26 }
0x133f   :  { %3727 = vrot.lane.b32.xlu0 %v3564_v25, %s5779_s29 }
0x138f   :  { %v3459_v29 = vpop.f32.mrf.mxu1 }
0x1390   :  { %v3460_v6 = vadd.f32 %v4883_v14, %v3459_v29 }
0x1392   :  { %v3463_v27 = vmul.f32 0.35355338, %v3460_v6 }
0x1394   :  { %v3563_v55 = vpack.c.bf16 %v3463_v27, %v3463_v27 }
0x1396   :  { %3615 = vrot.lane.b32.xlu2 %v3563_v55, %s5778_s17  ;;  %3671 = vrot.lane.b32.xlu1 %v3563_v55, %s5777_s22  ;;  %v3795_v16 = vshrl.u32 %v3563_v55, 16 }
0x1397   :  { %4573 = vmatmul.msk.bf16.vlgmr.msra.gmra.mxu2 %vm559_vm1, %v3563_v55  ;;  %v3461_v32 = vpop.f32.mrf.mxu1 }
0x139d   :  { %v3506_v38 = vpop.f32.mrf.mxu3 }
0x139e   :  { %3725 = vrot.lane.b32.xlu2 %v3563_v55, %s5779_s29  ;;  %3848 = vrot.lane.b32.xlu1 %v3795_v16, %s5778_s17  ;;  %v3507_v3 = vadd.f32 %v4882_v51, %v3506_v38 }
0x13a5   :  { %v3508_v41 = vpop.f32.mrf.mxu3 }
0x13a6   :  { %v3509_v22 = vadd.f32 %v4882_v51, %v3508_v41  ;;  %3904 = vrot.lane.b32.xlu1 %v3795_v16, %s5777_s22 }
0x13a8   :  { %v3794_v56 = vpack.c.bf16 %v3509_v22, %v3507_v3 }
0x13a9   :  { %v3674_v30 = vpop.permute.xlu0 %3673  ;;  %v3619_v20 = vpop.permute.xlu1 %3618 }
0x13aa   :  { %v3679_v36 = vsel %vm559_vm1, %v3674_v30, 0  ;;  %v3624_v48 = vsel %vm559_vm1, %v3619_v20, 0  ;;  %3906 = vrot.lane.b32.xlu2 %v3794_v56, %s5777_s22  ;;  %3851 = vrot.lane.b32.xlu0 %v3794_v56, %s5778_s17  ;;  %v3804_v24 = vsel %vm559_vm1, %v3794_v56, 0 }
0x13ab   :  { %3633 = vmatpush.bf16.xpose.msrb.mxu2 %v3624_v48  ;;  %3688 = vmatpush.bf16.xpose.msrb.mxu3 %v3679_v36 }
0x13b1   :  { %v3728_v43 = vpop.permute.xlu0 %3727 }
0x13b2   :  { %v3733_v10 = vsel %vm559_vm1, %v3728_v43, 0  ;;  %3958 = vrot.lane.b32.xlu2 %v3795_v16, %s5779_s29  ;;  %3960 = vrot.lane.b32.xlu0 %v3794_v56, %s5779_s29 }
0x13b3   :  { %3813 = vmatpush.bf16.xpose.msra.mxu3 %v3804_v24  ;;  %3742 = vmatpush.bf16.xpose.msra.mxu2 %v3733_v10 }
0x13f0   :  { %v3616_v50 = vpop.permute.xlu2 %3615 }
0x13f1   :  { %4575 = vmatmul.msk.bf16.vlgmr.msrb.gmra.mxu2 %vm559_vm1, %v3616_v50 }
0x13f8   :  { %v3726_v60 = vpop.permute.xlu2 %3725 }
0x1401   :  { %4579 = vmatmul.msk.bf16.vlgmr.msra.gmra.mxu2 %vm559_vm1, %v3726_v60 }
0x1404   :  { %v3907_v19 = vpop.permute.xlu2 %3906 }
0x1405   :  { %v3912_v57 = vsel %vm559_vm1, %v3907_v19, 0 }
0x1408   :  { %v3672_v54 = vpop.permute.xlu1 %3671 }
0x1409   :  { %4577 = vmatmul.msk.bf16.vlgmr.msrb.gmra.mxu3 %vm559_vm1, %v3672_v54 }
0x140a   :  { %3921 = vmatpush.bf16.xpose.msrb.mxu3 %v3912_v57 }
0x140c   :  { %v3959_v34 = vpop.permute.xlu2 %3958 }
0x1410   :  { %v3849_v15 = vpop.permute.xlu1 %3848 }
0x1418   :  { %v3905_v5 = vpop.permute.xlu1 %3904 }
0x1419   :  { %4581 = vmatmul.msk.bf16.vlgmr.msra.gmra.mxu3 %vm559_vm1, %v3795_v16 }
0x141a   :  { %v3580_v2 = vpop.f32.mrf.mxu2 }
0x141b   :  { %v3581_v37 = vadd.f32 %v3580_v2, %v6281_v45 }
0x141c   :  { %v3852_v31 = vpop.permute.xlu0 %3851 }
0x141d   :  { %v3857_v59 = vsel %vm559_vm1, %v3852_v31, 0  ;;  %v3585_v4 = vsel %vm3584_vm13, %v3581_v37, -inf }
0x141e   :  { %3586 = vmax.xlane.f32.xlu0 %v3585_v4  ;;  %3866 = vmatpush.bf16.xpose.msrb.mxu2 %v3857_v59 }
0x1422   :  { %v3582_v62 = vpop.f32.mrf.mxu2 }
0x1424   :  { %v3961_v46 = vpop.permute.xlu0 %3960 }
0x1425   :  { %v3966_v7 = vsel %vm559_vm1, %v3961_v46, 0  ;;  %4583 = vmatmul.msk.bf16.vlgmr.msrb.gmra.mxu2 %vm559_vm1, %v3849_v15 }
0x1426   :  { %3975 = vmatpush.bf16.xpose.msra.mxu2 %v3966_v7 }
0x1429   :  { %4585 = vmatmul.msk.bf16.vlgmr.msrb.gmra.mxu3 %vm559_vm1, %v3905_v5 }
0x1435   :  { %4587 = vmatmul.msk.bf16.vlgmr.msra.gmra.mxu2 %vm559_vm1, %v3959_v34 }
0x1474   :  { %v3635_v28 = vpop.f32.mrf.mxu2 }
0x1475   :  { %v3636_v21 = vadd.f32 %v3635_v28, %v6281_v45  ;;  %v3553_v28 = vpop.f32.mrf.mxu0 }
0x1477   :  { %v3639_v23 = vsel %vm3584_vm13, %v3636_v21, -inf }
0x1478   :  { %3640 = vmax.xlane.f32.xlu1 %v3639_v23 }
0x147c   :  { %v3637_v49 = vpop.f32.mrf.mxu2 }
0x1484   :  { %v3744_v0 = vpop.f32.mrf.mxu2 }
0x1485   :  { %v3745_v52 = vadd.f32 %v3744_v0, %v6281_v45  ;;  %v3555_v0 = vpop.f32.mrf.mxu0 }
0x1487   :  { %v3748_v8 = vsel %vm3584_vm13, %v3745_v52, -inf }
0x148c   :  { %v3690_v39 = vpop.f32.mrf.mxu3  ;;  %v3746_v35 = vpop.f32.mrf.mxu2 }
0x148d   :  { %v3691_v12 = vadd.f32 %v3690_v39, %v6281_v45 }
0x148f   :  { %v3694_v61 = vsel %vm3584_vm13, %v3691_v12, -inf }
0x1490   :  { %3695 = vmax.xlane.f32.xlu2 %v3694_v61 }
0x1491   :  { %v3587_v13 = vpop.xlane.xlu0 %3586 }
0x1492   :  { %v3588_v18 = vsub.f32 %v3581_v37, %v3587_v13  ;;  %v3554_v13 = vadd.f32 %v7094_v42, %v3553_v28 }
0x1494   :  { %v3589_v17 = vmul.f32 1.442695, %v3588_v18  ;;  %v3692_v47 = vpop.f32.mrf.mxu3 }
0x1496   :  { %5087 = vpow2.f32 %v3589_v17 }
0x149c   :  { %v5088_v40 = vpop.eup %5087  ;;  %v3815_v1 = vpop.f32.mrf.mxu3 }
0x149d   :  { %v3816_v11 = vadd.f32 %v3815_v1, %v3798_v58  ;;  %v3591_v33 = vsel %vm3584_vm13, %v5088_v40, 0.0 }
0x149e   :  { %3592 = vadd.xlane.f32.xlu0 %v3591_v33 }
0x149f   :  { %v3819_v51 = vsel %vm3584_vm13, %v3816_v11, -inf }
0x14a0   :  { %3820 = vmax.xlane.f32.xlu1 %v3819_v51 }
0x14a4   :  { %v3817_v44 = vpop.f32.mrf.mxu3 }
0x14a6   :  { %3749 = vmax.xlane.f32.xlu0 %v3748_v8 }
0x14a8   :  { %v3868_v25 = vpop.f32.mrf.mxu2 }
0x14a9   :  { %v3869_v26 = vadd.f32 %v3868_v25, %v3798_v58 }
0x14ab   :  { %v3872_v14 = vsel %vm3584_vm13, %v3869_v26, -inf }
0x14ac   :  { %3873 = vmax.xlane.f32.xlu2 %v3872_v14  ;;  %v3923_v29 = vpop.f32.mrf.mxu3 }
0x14ad   :  { %v7143_v6 = vadd.f32 %v3923_v29, %v3798_v58 }
0x14af   :  { %v3927_v27 = vsel %vm3584_vm13, %v7143_v6, -inf }
0x14b0   :  { %v3870_v55 = vpop.f32.mrf.mxu2  ;;  %3928 = vmax.xlane.f32.xlu1 %v3927_v27 }
0x14b4   :  { %v3925_v32 = vpop.f32.mrf.mxu3 }
0x14b8   :  { %v3977_v16 = vpop.f32.mrf.mxu2 }
0x14b9   :  { %v3978_v45 = vadd.f32 %v3977_v16, %v3798_v58 }
0x14ba   :  { %3760 = vrot.lane.b32.xlu0 %v7098_v63, %s5779_s29 }
0x14bb   :  { %v3981_v38 = vsel %vm3584_vm13, %v3978_v45, -inf }
0x14bc   :  { %3982 = vmax.xlane.f32.xlu2 %v3981_v38 }
0x14c0   :  { %v3979_v41 = vpop.f32.mrf.mxu2 }
0x14c9   :  { %3652 = vrot.lane.b32.xlu1 %v7098_v63, %s5778_s17 }
0x14d4   :  { %3706 = vrot.lane.b32.xlu2 %v7098_v63, %s5777_s22 }
0x14eb   :  { %v3641_v3 = vpop.xlane.xlu1 %3640 }
0x14ec   :  { %v3642_v22 = vsub.f32 %v3636_v21, %v3641_v3 }
0x14ee   :  { %v3643_v56 = vmul.f32 1.442695, %v3642_v22 }
0x14f0   :  { %5089 = vpow2.f32 %v3643_v56 }
0x14f6   :  { %v7154_v30 = vpop.eup %5089 }
0x14f7   :  { %v3645_v20 = vsel %vm3584_vm13, %v7154_v30, 0.0 }
0x14f8   :  { %3646 = vadd.xlane.f32.xlu0 %v3645_v20 }
0x1503   :  { %v3696_v36 = vpop.xlane.xlu2 %3695 }
0x1504   :  { %v3697_v48 = vsub.f32 %v3691_v12, %v3696_v36  ;;  %v3556_v12 = vadd.f32 %v7094_v42, %v3555_v0 }
0x1506   :  { %v3698_v24 = vmul.f32 1.442695, %v3697_v48  ;;  %v3831_v18 = vpack.c.bf16 %v3556_v12, %v3554_v13  ;;  %v4668_v13 = vld [vmem:[#allocation30] sm:$0xff] }
0x1508   :  { %5091 = vpow2.f32 %v3698_v24 }
0x150e   :  { %v7158_v43 = vpop.eup %5091 }
0x150f   :  { %v3700_v10 = vsel %vm3584_vm13, %v7158_v43, 0.0 }
0x1510   :  { %3701 = vadd.xlane.f32.xlu2 %v3700_v10 }
0x1511   :  { %v3593_v63 = vpop.xlane.xlu0 %3592 }
0x1512   :  { %5093 = vrcp.f32 %v3593_v63 }
0x1513   :  { %v3821_v50 = vpop.xlane.xlu1 %3820 }
0x1514   :  { %v3822_v60 = vsub.f32 %v3816_v11, %v3821_v50 }
0x1516   :  { %v3823_v19 = vmul.f32 1.442695, %v3822_v60 }
0x1518   :  { %v5094_v54 = vpop.eup %5093  ;;  %5095 = vpow2.f32 %v3823_v19 }
0x1519   :  { %v3595_v57 = vmul.f32 %v5094_v54, %v5088_v40  ;;  %v3750_v2 = vpop.xlane.xlu0 %3749 }
0x151a   :  { %v3751_v37 = vsub.f32 %v3745_v52, %v3750_v2 }
0x151b   :  { %v3596_v31 = vpack.c.bf16 %v3595_v57, %v3595_v57 }
0x151c   :  { %v3752_v59 = vmul.f32 1.442695, %v3751_v37 }
0x151d   :  { %4574 = vmatmul.msk.bf16.vlgmr.msra.gmra.mxu1 %vm839_vm3, %v3596_v31 }
0x151e   :  { %v5096_v4 = vpop.eup %5095  ;;  %5097 = vpow2.f32 %v3752_v59 }
0x151f   :  { %v3874_v15 = vpop.xlane.xlu2 %3873  ;;  %v3825_v62 = vsel %vm3584_vm13, %v5096_v4, 0.0 }
0x1520   :  { %v3875_v46 = vsub.f32 %v3869_v26, %v3874_v15  ;;  %3826 = vadd.xlane.f32.xlu1 %v3825_v62 }
0x1522   :  { %v3876_v7 = vmul.f32 1.442695, %v3875_v46 }
0x1523   :  { %v3929_v61 = vpop.xlane.xlu1 %3928 }
0x1524   :  { %v5098_v5 = vpop.eup %5097  ;;  %5099 = vpow2.f32 %v3876_v7  ;;  %v3930_v11 = vsub.f32 %v7143_v6, %v3929_v61  ;;  %v4669_v61 = vld [vmem:[#allocation30 + $0x8] sm:$0xff] }
0x1525   :  { %v3754_v34 = vsel %vm3584_vm13, %v5098_v5, 0.0  ;;  %4056 = vmatpush.bf16.msra.mxu3 %v4669_v61 }
0x1526   :  { %3755 = vadd.xlane.f32.xlu0 %v3754_v34  ;;  %v3931_v42 = vmul.f32 1.442695, %v3930_v11 }
0x1529   :  { %4057 = vmatpush.bf16.msra.mxu3 %v4668_v13 }
0x152a   :  { %v7165_v21 = vpop.eup %5099 }
0x152b   :  { %v3878_v23 = vsel %vm3584_vm13, %v7165_v21, 0.0 }
0x152c   :  { %3879 = vadd.xlane.f32.xlu2 %v3878_v23  ;;  %v3761_v1 = vpop.permute.xlu0 %3760 }
0x152f   :  { %v3983_v49 = vpop.xlane.xlu2 %3982 }
0x1530   :  { %v3984_v39 = vsub.f32 %v3978_v45, %v3983_v49 }
0x1532   :  { %v3985_v35 = vmul.f32 1.442695, %v3984_v39 }
0x1534   :  { %5101 = vpow2.f32 %v3985_v35 }
0x1535   :  { %5103 = vpow2.f32 %v3931_v42 }
0x1537   :  { %v3707_v17 = vpop.permute.xlu2 %3706 }
0x1538   :  { %3719 = vmatpush.bf16.msrb.mxu0 %v3707_v17 }
0x153a   :  { %v5102_v47 = vpop.eup %5101  ;;  %3885 = vrot.lane.b32.xlu0 %v3831_v18, %s5778_s17 }
0x153b   :  { %v3653_v58 = vpop.permute.xlu1 %3652  ;;  %v3987_v40 = vsel %vm3584_vm13, %v5102_v47, 0.0  ;;  %v5104_v33 = vpop.eup %5103 }
0x153c   :  { %3842 = vmatpush.bf16.msra.mxu0 %v3831_v18  ;;  %3665 = vmatpush.bf16.msrb.mxu1 %v3653_v58  ;;  %v3933_v51 = vsel %vm3584_vm13, %v5104_v33, 0.0 }
0x153d   :  { %3988 = vadd.xlane.f32.xlu1 %v3987_v40 }
0x1540   :  { %3773 = vmatpush.bf16.msra.mxu1 %v3761_v1 }
0x1544   :  { %3939 = vrot.lane.b32.xlu2 %v3831_v18, %s5777_s22 }
0x1556   :  { %3993 = vrot.lane.b32.xlu1 %v3831_v18, %s5779_s29 }
0x1564   :  { %3934 = vadd.xlane.f32.xlu0 %v3933_v51 }
0x156b   :  { %v3647_v52 = vpop.xlane.xlu0 %3646 }
0x156c   :  { %5105 = vrcp.f32 %v3647_v52 }
0x1572   :  { %v5106_v44 = vpop.eup %5105 }
0x1573   :  { %v3649_v8 = vmul.f32 %v5106_v44, %v7154_v30 }
0x1575   :  { %v3650_v25 = vpack.c.bf16 %v3649_v8, %v3649_v8 }
0x1577   :  { %4576 = vmatmul.msk.bf16.vlgmr.msrb.gmra.mxu1 %vm839_vm3, %v3650_v25 }
0x1583   :  { %v3702_v26 = vpop.xlane.xlu2 %3701 }
0x1584   :  { %5107 = vrcp.f32 %v3702_v26 }
0x158a   :  { %v5108_v14 = vpop.eup %5107 }
0x158b   :  { %v3704_v29 = vmul.f32 %v5108_v14, %v7158_v43 }
0x158d   :  { %v3705_v6 = vpack.c.bf16 %v3704_v29, %v3704_v29 }
0x158f   :  { %4578 = vmatmul.msk.bf16.vlgmr.msrb.gmra.mxu0 %vm839_vm3, %v3705_v6 }
0x1593   :  { %v3827_v27 = vpop.xlane.xlu1 %3826 }
0x1594   :  { %5109 = vrcp.f32 %v3827_v27  ;;  %v4884_v27 = vld [vmem:[%s7309_s7] ss:$0 sm:$0xff] }
0x1599   :  { %v3756_v55 = vpop.xlane.xlu0 %3755 }
0x159a   :  { %v5110_v32 = vpop.eup %5109  ;;  %5111 = vrcp.f32 %v3756_v55  ;;  %v7181_v16 = vpop.f32.mrf.mxu1 }
0x159b   :  { %v3829_v45 = vmul.f32 %v5110_v32, %v5096_v4 }
0x159d   :  { %v3830_v38 = vpack.c.bf16 %v3829_v45, %v3829_v45 }
0x159f   :  { %4582 = vmatmul.msk.bf16.vlgmr.msra.gmra.mxu0 %vm839_vm3, %v3830_v38  ;;  %v3880_v41 = vpop.xlane.xlu2 %3879 }
0x15a0   :  { %v5112_v3 = vpop.eup %5111  ;;  %5113 = vrcp.f32 %v3880_v41 }
0x15a1   :  { %v3758_v22 = vmul.f32 %v5112_v3, %v5098_v5 }
0x15a2   :  { %v3612_v56 = vpop.f32.mrf.mxu1 }
0x15a3   :  { %v3759_v30 = vpack.c.bf16 %v3758_v22, %v3758_v22 }
0x15a5   :  { %4580 = vmatmul.msk.bf16.vlgmr.msra.gmra.mxu1 %vm839_vm3, %v3759_v30 }
0x15a6   :  { %v5114_v36 = vpop.eup %5113 }
0x15a7   :  { %v3940_v20 = vpop.permute.xlu2 %3939  ;;  %v3882_v24 = vmul.f32 %v5114_v36, %v7165_v21  ;;  %v4670_v36 = vld [vmem:[#allocation33] sm:$0xff] }
0x15a8   :  { %3952 = vmatpush.bf16.msrb.mxu0 %v3940_v20  ;;  %v4671_v20 = vld [vmem:[#allocation33 + $0x8] sm:$0xff] }
0x15a9   :  { %v3883_v43 = vpack.c.bf16 %v3882_v24, %v3882_v24 }
0x15ac   :  { %v3886_v48 = vpop.permute.xlu0 %3885  ;;  %4126 = vmatpush.bf16.msra.mxu0 %v4671_v20 }
0x15ad   :  { %3898 = vmatpush.bf16.msrb.mxu1 %v3886_v48 }
0x15b0   :  { %v3989_v10 = vpop.xlane.xlu1 %3988  ;;  %4127 = vmatpush.bf16.msra.mxu0 %v4670_v36 }
0x15b1   :  { %5115 = vrcp.f32 %v3989_v10 }
0x15b5   :  { %4584 = vmatmul.msk.bf16.vlgmr.msrb.gmra.mxu1 %vm839_vm3, %v3883_v43 }
0x15b7   :  { %v5116_v63 = vpop.eup %5115 }
0x15b8   :  { %v3991_v50 = vmul.f32 %v5116_v63, %v5102_v47 }
0x15ba   :  { %v3992_v19 = vpack.c.bf16 %v3991_v50, %v3991_v50 }
0x15c8   :  { %v3994_v60 = vpop.permute.xlu1 %3993 }
0x15c9   :  { %4006 = vmatpush.bf16.msra.mxu1 %v3994_v60 }
0x15cc   :  { %4588 = vmatmul.msk.bf16.vlgmr.msra.gmra.mxu1 %vm839_vm3, %v3992_v19 }
0x15d7   :  { %v3935_v54 = vpop.xlane.xlu0 %3934 }
0x15d8   :  { %5117 = vrcp.f32 %v3935_v54 }
0x15de   :  { %v5118_v57 = vpop.eup %5117 }
0x15df   :  { %v3937_v2 = vmul.f32 %v5118_v57, %v5104_v33 }
0x15e1   :  { %v3938_v37 = vpack.c.bf16 %v3937_v2, %v3937_v2  ;;  %v4885_v2 = vld [vmem:[#allocation31] ss:$0 sm:$0xff] }
0x15e3   :  { %4586 = vmatmul.msk.bf16.vlgmr.msrb.gmra.mxu0 %vm839_vm3, %v3938_v37 }
0x15f4   :  { %v3667_v31 = vpop.f32.mrf.mxu1 }
0x15fc   :  { %v3669_v59 = vpop.f32.mrf.mxu1 }
0x160c   :  { %v3721_v4 = vpop.f32.mrf.mxu0 }
0x1614   :  { %v3723_v15 = vpop.f32.mrf.mxu0 }
0x161c   :  { %v3844_v62 = vpop.f32.mrf.mxu0 }
0x1622   :  { %v3775_v46 = vpop.f32.mrf.mxu1 }
0x1624   :  { %v3846_v7 = vpop.f32.mrf.mxu0 }
0x162a   :  { %v3777_v5 = vpop.f32.mrf.mxu1 }
0x162b   :  { %v4887_v5 = vld [vmem:[%s7312_s24] ss:$0 sm:$0xff] }
0x1632   :  { %v3900_v34 = vpop.f32.mrf.mxu1 }
0x1633   :  { %v4836_v28 = vpack.i.bf16 %v3667_v31, %v3900_v34  ;;  %v4886_v31 = vld [vmem:[%s7311_s12] ss:$0 sm:$0xff] }
0x1635   :  { %4837 = vrot.lane.b32.xlu0 %v4836_v28, %s5780_s23 }
0x163a   :  { %v3902_v21 = vpop.f32.mrf.mxu1 }
0x1649   :  { %v4008_v23 = vpop.f32.mrf.mxu1 }
0x164a   :  { %v4846_v49 = vpack.i.bf16 %v3775_v46, %v4008_v23 }
0x164c   :  { %4847 = vrot.lane.b32.xlu1 %v4846_v49, %s5781_s6 }
0x1651   :  { %v4010_v0 = vpop.f32.mrf.mxu1 }
0x1652   :  { %v4888_v0 = vld [vmem:[%s7313_s16] ss:$0 sm:$0xff] }
0x1660   :  { %v3954_v39 = vpop.f32.mrf.mxu0 }
0x1661   :  { %v4841_v35 = vpack.i.bf16 %v3721_v4, %v3954_v39 }
0x1663   :  { %4842 = vrot.lane.b32.xlu2 %v4841_v35, %s5752_s25  ;;  %s7310_s25 = sld [smem:[#allocation81_spill]] }
0x1668   :  { %v3956_v12 = vpop.f32.mrf.mxu0 }
0x1669   :  { %v4675_v48 = vld [vmem:[%s7310_s25 + $0x18] sm:$0xff]  ;;  %v4674_v43 = vld [vmem:[%s7310_s25 + $0x10] sm:$0xff]  ;;  %v4673_v46 = vld [vmem:[%s7310_s25 + $0x8] sm:$0xff] }
0x166a   :  { %4178 = vmatpush.bf16.msrb.mxu2 %v4675_v48  ;;  %v4672_v7 = vld [vmem:[%s7310_s25] sm:$0xff] }
0x166e   :  { %4179 = vmatpush.bf16.msrb.mxu2 %v4674_v43 }
0x1672   :  { %4180 = vmatpush.bf16.msrb.mxu2 %v4673_v46 }
0x1676   :  { %4181 = vmatpush.bf16.msrb.mxu2 %v4672_v7 }
0x16a7   :  { %v4838_v18 = vpop.permute.xlu0 %4837 }
0x16a8   :  { %v4840_v17 = vunpack.i.h.bf16 %v4838_v18  ;;  %v4839_v47 = vunpack.i.l.bf16 %v4838_v18 }
0x16aa   :  { %v3791_v33 = vsel %vm559_vm1, %v7181_v16, %v4840_v17  ;;  %v4024_v51 = vsel %vm559_vm1, %v3844_v62, %v4839_v47 }
0x16bd   :  { %v4843_v58 = vpop.permute.xlu2 %4842 }
0x16be   :  { %v4848_v40 = vpop.permute.xlu1 %4847  ;;  %v4845_v1 = vunpack.i.h.bf16 %v4843_v58  ;;  %v4844_v11 = vunpack.i.l.bf16 %v4843_v58 }
0x16bf   :  { %v4849_v42 = vunpack.i.l.bf16 %v4848_v40  ;;  %v4850_v52 = vunpack.i.h.bf16 %v4848_v40 }
0x16c0   :  { %v3792_v44 = vsel %vm839_vm3, %v3791_v33, %v4845_v1  ;;  %v4025_v8 = vsel %vm839_vm3, %v4024_v51, %v4844_v11 }
0x16c1   :  { %v4026_v25 = vsel %vm1113_vm4, %v4025_v8, %v4849_v42  ;;  %v3793_v14 = vsel %vm1113_vm4, %v3792_v44, %v4850_v52 }
0x16c2   :  { %v4028_v26 = vrot.slane %v4026_v25, 7 }
0x16c4   :  { %v4030_v29 = vsel %vm2930_vm8, %v3793_v14, %v4028_v26  ;;  %v4889_v26 = vld [vmem:[#allocation34] ss:$0 sm:$0xff] }
0x16c5   :  { %v4031_v6 = vpack.c.bf16 %v4030_v29, %v4030_v29  ;;  %v4890_v29 = vld [vmem:[%s6037_s5] ss:$0 sm:$0xff] }
0x16c7   :  { %4597 = vmatmul.msk.bf16.vlgmr.msra.gmra.mxu3 %vm615_vm2, %v4031_v6 }
0x174a   :  { %v4059_v55 = vpop.f32.mrf.mxu3 }
0x174b   :  { %v4060_v32 = vadd.f32 %v4884_v27, %v4059_v55 }
0x174d   :  { %v4063_v16 = vadd.f32 %v4060_v32, %v7079_v53 }
0x174f   :  { %v4066_v45 = vsel %vm3394_vm10, %v4063_v16, 0.0 }
0x1750   :  { %4067 = vadd.xlane.f32.xlu2 %v4066_v45 }
0x1752   :  { %v4061_v38 = vpop.f32.mrf.mxu3 }
0x17c3   :  { %v4068_v41 = vpop.xlane.xlu2 %4067 }
0x17c4   :  { %v4069_v3 = vmul.f32 %v4068_v41, %v6517_v9 }
0x17c6   :  { %v4070_v22 = vsub.f32 %v4063_v16, %v4069_v3 }
0x17c8   :  { %v4071_v56 = vmul.f32 %v4070_v22, %v4070_v22 }
0x17ca   :  { %v4072_v30 = vsel %vm3394_vm10, %v4071_v56, 0.0 }
0x17cb   :  { %4073 = vadd.xlane.f32.xlu0 %v4072_v30 }
0x183e   :  { %v4074_v24 = vpop.xlane.xlu0 %4073 }
0x183f   :  { %v4075_v53 = vmul.f32 %v4074_v24, %v6517_v9 }
0x1841   :  { %v4076_v10 = vadd.f32 1e-05, %v4075_v53 }
0x1843   :  { %5119 = vrsqrt.f32 %v4076_v10  ;;  %vm4083_vm3 = vweird.f32 %v4076_v10 }
0x1849   :  { %v5120_v63 = vpop.eup %5119 }
0x184a   :  { %v4078_v50 = vmul.f32 %v5120_v63, %v4076_v10  ;;  %vm4084_vm1 = vweird.f32 %v5120_v63 }
0x184b   :  { %vm4085_vm4 = vmor %vm4083_vm3, %vm4084_vm1 }
0x184c   :  { %v4079_v60 = vmul.f32 %v5120_v63, %v4078_v50 }
0x184e   :  { %v4080_v19 = vmul.f32 0.5, %v4079_v60 }
0x1850   :  { %v4081_v54 = vsub.f32 1.5, %v4080_v19 }
0x1852   :  { %v4082_v57 = vmul.f32 %v5120_v63, %v4081_v54 }
0x1854   :  { %v4086_v37 = vsel %vm4085_vm4, %v5120_v63, %v4082_v57 }
0x1855   :  { %v4087_v59 = vmul.f32 %v4086_v37, %v4070_v22 }
0x1857   :  { %v4091_v4 = vmul.f32 %v4885_v2, %v4087_v59 }
0x1859   :  { %v4095_v15 = vadd.f32 %v4886_v31, %v4091_v4 }
0x185b   :  { %v4100_v62 = vpack.c.bf16 %v4095_v15, %v4095_v15 }
0x185d   :  { %4606 = vmatmul.msk.bf16.vlgmr.msra.gmra.mxu0 %vm615_vm2, %v4100_v62 }
0x18da   :  { %v4129_v34 = vpop.f32.mrf.mxu0 }
0x18db   :  { %v4130_v28 = vadd.f32 %v4887_v5, %v4129_v34 }
0x18dd   :  { %v4133_v21 = vmax.f32 %v4130_v28, 0.0 }
0x18df   :  { %v4142_v23 = vpack.c.bf16 %v4133_v21, %v4133_v21 }
0x18e1   :  { %4623 = vmatmul.msk.bf16.vlgmr.msrb.gmra.mxu2 %vm1660_vm6, %v4142_v23 }
0x18e2   :  { %v4131_v49 = vpop.f32.mrf.mxu0 }
0x1964   :  { %v4183_v39 = vpop.f32.mrf.mxu2 }
0x1965   :  { %v4184_v35 = vadd.f32 %v4888_v0, %v4183_v39 }
0x1967   :  { %v4187_v12 = vadd.f32 %v4184_v35, %v4095_v15 }
0x1969   :  { %v4190_v61 = vsel %vm3394_vm10, %v4187_v12, 0.0 }
0x196a   :  { %4191 = vadd.xlane.f32.xlu1 %v4190_v61 }
0x196c   :  { %v4185_v13 = vpop.f32.mrf.mxu2 }
0x19dd   :  { %v4192_v18 = vpop.xlane.xlu1 %4191 }
0x19de   :  { %v4193_v17 = vmul.f32 %v4192_v18, %v6517_v9 }
0x19e0   :  { %v4194_v47 = vsub.f32 %v4187_v12, %v4193_v17 }
0x19e2   :  { %v4195_v58 = vmul.f32 %v4194_v47, %v4194_v47 }
0x19e4   :  { %v4196_v40 = vsel %vm3394_vm10, %v4195_v58, 0.0 }
0x19e5   :  { %4197 = vadd.xlane.f32.xlu2 %v4196_v40 }
0x1a58   :  { %v4198_v1 = vpop.xlane.xlu2 %4197 }
0x1a59   :  { %v4199_v11 = vmul.f32 %v4198_v1, %v6517_v9 }
0x1a5b   :  { %v4200_v42 = vadd.f32 1e-05, %v4199_v11 }
0x1a5d   :  { %5121 = vrsqrt.f32 %v4200_v42  ;;  %vm4207_vm6 = vweird.f32 %v4200_v42 }
0x1a63   :  { %v5122_v33 = vpop.eup %5121 }
0x1a64   :  { %v4202_v51 = vmul.f32 %v5122_v33, %v4200_v42  ;;  %vm4208_vm2 = vweird.f32 %v5122_v33 }
0x1a65   :  { %vm4209_vm8 = vmor %vm4207_vm6, %vm4208_vm2 }
0x1a66   :  { %v4203_v52 = vmul.f32 %v5122_v33, %v4202_v51 }
0x1a68   :  { %v4204_v44 = vmul.f32 0.5, %v4203_v52 }
0x1a6a   :  { %v4205_v8 = vsub.f32 1.5, %v4204_v44 }
0x1a6c   :  { %v4206_v25 = vmul.f32 %v5122_v33, %v4205_v8 }
0x1a6e   :  { %v4210_v14 = vsel %vm4209_vm8, %v5122_v33, %v4206_v25 }
0x1a6f   :  { %v4211_v6 = vmul.f32 %v4210_v14, %v4194_v47 }
0x1a71   :  { %v4215_v27 = vmul.f32 %v4889_v26, %v4211_v6 }
0x1a73   :  { %v4219_v55 = vadd.f32 %v4890_v29, %v4215_v27 }
0x1a75   :  { %4220 = vst.msk [vmem:[%s6047_s21] sm:$0x3] %vm3394_vm10, %v4219_v55 }
0x1a76   :  { %4225 = vsyncpa [#allocation3], 1 }
0x1a77   :  { %4226 = vsyncpa [#allocation5], 1 }
0x1a78   :  { %4227 = vsyncpa [#allocation8], 1 }
0x1a79   :  { %4228 = vsyncpa [#allocation11], 1 }
0x1a7a   :  { %4229 = vsyncpa [#allocation14], 1 }
0x1a7b   :  { %4230 = vsyncpa [#allocation17], 1 }
0x1a7c   :  { %4231 = vsyncpa [#allocation20], 1 }
0x1a7d   :  { %4232 = vsyncpa [#allocation23], 1 }
0x1a7e   :  { %4233 = vsyncpa [#allocation26], 1 }
0x1a7f   :  { %4234 = vsyncpa [#allocation29], 1 }
0x1a80   :  { %4235 = vsyncpa [#allocation32], 1 }
0x1a81   :  { %4236 = vsyncpa [#allocation35], 1 }

</bundles_post_ra>
